<compile_context>
chip_gen: v6e
topology: v6e:2x2x1
jax: 0.10.0
libtpu: 0.0.40
codegen_flags: <defaults>
</compile_context>

<pallas_src>
import functools

import jax
import jax.numpy as jnp
from jax.experimental import pallas as pl
from jax.experimental.pallas import tpu as pltpu

_BN_EPS = 1e-5
_SLOPE = 0.1  # LeakyReLU negative slope

H1_NCHAN = 64
H2_NCHAN = 128
H4_DIM = 1024
N_SPATIAL = 7 * 7                 # conv1 output spatial positions
FC_IN = N_SPATIAL * H2_NCHAN      # 6272


def _leaky(z):
    return jnp.maximum(z, _SLOPE * z)


def _bn_rows(z, gamma, beta):
    """Training-mode batchnorm over rows (axis 0), per column; biased variance."""
    mu = jnp.mean(z, axis=0, keepdims=True)
    var = jnp.maximum(jnp.mean(z * z, axis=0, keepdims=True) - mu * mu, 0.0)
    return (z - mu) * jax.lax.rsqrt(var + _BN_EPS) * gamma + beta


# ----------------------------------------------------------------------------
# Kernel 1: conv22 as matmul + bias + LeakyReLU
# ----------------------------------------------------------------------------
def _conv22_kernel(p_ref, w_ref, b_ref, o_ref):
    z = jnp.dot(p_ref[...], w_ref[...], preferred_element_type=jnp.float32)
    z = z + b_ref[...]
    o_ref[...] = _leaky(z).astype(o_ref.dtype)


def conv22_matmul(p22, w22, b22):
    M, K = p22.shape
    C = w22.shape[1]
    return pl.pallas_call(
        _conv22_kernel,
        out_shape=jax.ShapeDtypeStruct((M, C), jnp.bfloat16),
        grid_spec=pltpu.PrefetchScalarGridSpec(
            num_scalar_prefetch=0,
            grid=(1,),
            in_specs=[pl.BlockSpec((M, K), lambda i: (0, 0)),
                      pl.BlockSpec((K, C), lambda i: (0, 0)),
                      pl.BlockSpec((1, C), lambda i: (0, 0))],
            out_specs=pl.BlockSpec((M, C), lambda i: (0, 0)),
        ),
        compiler_params=pltpu.CompilerParams(dimension_semantics=("arbitrary",)),
    )(p22, w22, b22)


# ----------------------------------------------------------------------------
# Kernel 2: fused conv1(+BN2d+Leaky) -> fc2(+BN1d+Leaky) -> fc1(+BN1d+Leaky)
# ----------------------------------------------------------------------------
def _conv1_fc_kernel(n_batch,
                     a1_ref, wc1_ref, bc1_ref, gc1_ref, bec1_ref,
                     w2_ref, b2_ref, g2_ref, be2_ref,
                     w1_ref, b1_ref, g1_ref, be1_ref,
                     z_ref, y1_ref, acc_ref):
    """Grid axis j tiles the 1024 fc2 output features (tile width tn).

    Step 0 computes the conv1+BN+Leaky output y1 (rows ordered (spatial, batch))
    into VMEM scratch.  Every step builds its fc2 tile from 49 contiguous
    (N,128)@(128,tn) dots against the streamed W2 tile, applies BN1d+Leaky, and
    accumulates the fc1 contraction into `acc`.  The last step finalizes fc1.
    """
    j = pl.program_id(0)

    @pl.when(j == 0)
    def _():
        z1 = jnp.dot(a1_ref[...], wc1_ref[...],
                     preferred_element_type=jnp.float32)          # (49*N, 128)
        z1 = z1 + bc1_ref[...]
        y1 = _leaky(_bn_rows(z1, gc1_ref[...], bec1_ref[...]))    # BN2d over N*H*W
        y1_ref[...] = y1.astype(y1_ref.dtype)
        acc_ref[...] = jnp.zeros_like(acc_ref)

    tn = w2_ref.shape[2]
    h2 = jnp.zeros((n_batch, tn), jnp.float32)
    for s in range(N_SPATIAL):                                    # static unroll
        lhs = y1_ref[s * n_batch:(s + 1) * n_batch, :]            # (N, 128) bf16
        h2 = h2 + jnp.dot(lhs, w2_ref[s], preferred_element_type=jnp.float32)
    h2 = h2 + b2_ref[...]
    h2 = _leaky(_bn_rows(h2, g2_ref[...], be2_ref[...]))          # (N, tn) f32

    acc_ref[...] += jnp.dot(h2.astype(w1_ref.dtype), w1_ref[...],
                            preferred_element_type=jnp.float32)

    @pl.when(j == pl.num_programs(0) - 1)
    def _():
        zf = acc_ref[...] + b1_ref[...]
        z_ref[...] = _leaky(_bn_rows(zf, g1_ref[...], be1_ref[...])).astype(z_ref.dtype)


def conv1_fc_head(a1, wc1, bc1, gc1, bec1,
                  w2p, b2, g2, be2,
                  w1p, b1, g1, be1, *, tn=256):
    """a1: (49*N, 1024) bf16 conv1 im2col, rows ordered (spatial, batch)."""
    M, K1 = a1.shape
    n_batch = M // N_SPATIAL
    H = w2p.shape[2]            # 1024
    L = w1p.shape[1]            # latent_dim
    assert H % tn == 0
    kernel = functools.partial(_conv1_fc_kernel, n_batch)
    return pl.pallas_call(
        kernel,
        out_shape=jax.ShapeDtypeStruct((n_batch, L), jnp.float32),
        grid_spec=pltpu.PrefetchScalarGridSpec(
            num_scalar_prefetch=0,
            grid=(H // tn,),
            in_specs=[
                pl.BlockSpec((M, K1), lambda j: (0, 0)),                       # a1 (resident)
                pl.BlockSpec((K1, H2_NCHAN), lambda j: (0, 0)),                # Wc1
                pl.BlockSpec((1, H2_NCHAN), lambda j: (0, 0)),                 # bc1
                pl.BlockSpec((1, H2_NCHAN), lambda j: (0, 0)),                 # gamma_c1
                pl.BlockSpec((1, H2_NCHAN), lambda j: (0, 0)),                 # beta_c1
                pl.BlockSpec((N_SPATIAL, H2_NCHAN, tn), lambda j: (0, 0, j)),  # W2 tile (bf16)
                pl.BlockSpec((1, tn), lambda j: (0, j)),                       # b2
                pl.BlockSpec((1, tn), lambda j: (0, j)),                       # gamma2
                pl.BlockSpec((1, tn), lambda j: (0, j)),                       # beta2
                pl.BlockSpec((tn, L), lambda j: (j, 0)),                       # W1 row tile
                pl.BlockSpec((1, L), lambda j: (0, 0)),                        # b1
                pl.BlockSpec((1, L), lambda j: (0, 0)),                        # gamma1
                pl.BlockSpec((1, L), lambda j: (0, 0)),                        # beta1
            ],
            out_specs=pl.BlockSpec((n_batch, L), lambda j: (0, 0)),
            scratch_shapes=[pltpu.VMEM((M, H2_NCHAN), jnp.bfloat16),  # y1 (conv1 out)
                            pltpu.VMEM((n_batch, L), jnp.float32)],   # fc1 accumulator
        ),
        compiler_params=pltpu.CompilerParams(dimension_semantics=("arbitrary",)),
    )(a1, wc1, bc1, gc1, bec1, w2p, b2, g2, be2, w1p, b1, g1, be1)


# ----------------------------------------------------------------------------
# Parameters
# ----------------------------------------------------------------------------
def init_params(key, latent_dim):
    """PyTorch-layout parameters (as nn.Module would hold them)."""
    ks = jax.random.split(key, 14)
    n = lambda k, shape, s=0.05: s * jax.random.normal(k, shape, jnp.float32)
    return {
        "conv22_w": n(ks[0], (H1_NCHAN, 1, 4, 4)), "conv22_b": n(ks[1], (H1_NCHAN,)),
        "conv1_w": n(ks[2], (H2_NCHAN, H1_NCHAN, 4, 4)), "conv1_b": n(ks[3], (H2_NCHAN,)),
        "conv1_g": 1.0 + n(ks[4], (H2_NCHAN,)), "conv1_be": n(ks[5], (H2_NCHAN,)),
        "fc2_w": n(ks[6], (H4_DIM, FC_IN)), "fc2_b": n(ks[7], (H4_DIM,)),
        "fc2_g": 1.0 + n(ks[8], (H4_DIM,)), "fc2_be": n(ks[9], (H4_DIM,)),
        "fc1_w": n(ks[10], (latent_dim, H4_DIM)), "fc1_b": n(ks[11], (latent_dim,)),
        "fc1_g": 1.0 + n(ks[12], (latent_dim,)), "fc1_be": n(ks[13], (latent_dim,)),
    }


def pack_params(p):
    """One-time conversion (outside the traced forward) to kernel layouts.

    Conv weights -> (kh*kw*c_in, c_out).  fc2's 6272 input axis is re-ordered to
    (spatial, channel) so the fused kernel can contract the VMEM-resident conv1
    output without any relayout.  Big weights go to bf16.
    """
    row = lambda v: v.reshape(1, -1).astype(jnp.float32)
    w22 = jnp.transpose(p["conv22_w"], (2, 3, 1, 0)).reshape(16, H1_NCHAN).astype(jnp.bfloat16)
    wc1 = jnp.transpose(p["conv1_w"], (2, 3, 1, 0)).reshape(16 * H1_NCHAN, H2_NCHAN).astype(jnp.bfloat16)
    # PyTorch fc2 input index = c*49 + qy*7 + qx  ->  W2p[qy*7+qx, c, out]
    w2 = (p["fc2_w"].reshape(H4_DIM, H2_NCHAN, 7, 7)
          .transpose(2, 3, 1, 0).reshape(N_SPATIAL, H2_NCHAN, H4_DIM).astype(jnp.bfloat16))
    w1 = p["fc1_w"].T.astype(jnp.bfloat16)                       # (1024, latent)
    return {
        "W22": w22, "b22": row(p["conv22_b"]),
        "Wc1": wc1, "bc1": row(p["conv1_b"]), "gc1": row(p["conv1_g"]), "bec1": row(p["conv1_be"]),
        "W2": w2, "b2": row(p["fc2_b"]), "g2": row(p["fc2_g"]), "be2": row(p["fc2_be"]),
        "W1": w1, "b1": row(p["fc1_b"]), "g1": row(p["fc1_g"]), "be1": row(p["fc1_be"]),
    }


# ----------------------------------------------------------------------------
# Encoder2 forward
# ----------------------------------------------------------------------------
def encoder2_forward(x_nchw, pp):
    N = x_nchw.shape[0]
    assert x_nchw.shape[1:] == (1, 28, 28)

    # NCHW -> NHWC (C == 1: pure reshape), bf16 for all inter-kernel traffic.
    x = x_nchw.reshape(N, 28, 28, 1).astype(jnp.bfloat16)

    # ---- conv22: Conv2d(1->64, k4, s2, p1) + LeakyReLU -------------------
    # Tiny window gather (<=50 KB, fused by XLA) feeding the matmul kernel.
    xp = jnp.pad(x, ((0, 0), (1, 1), (1, 1), (0, 0)))                 # (N,30,30,1)
    p22 = jnp.stack([xp[:, ki:ki + 28:2, kj:kj + 28:2, 0]
                     for ki in range(4) for kj in range(4)], axis=-1)  # (N,14,14,16)
    a22 = p22.reshape(N * 14 * 14, 16)
    h22 = conv22_matmul(a22, pp["W22"], pp["b22"])                     # (N*196, 64) bf16

    # ---- conv1 window gather, rows ordered (spatial, batch), bf16 --------
    h22 = h22.reshape(N, 14, 14, H1_NCHAN)
    hp = jnp.pad(h22, ((0, 0), (1, 1), (1, 1), (0, 0)))                # (N,16,16,64)
    p1 = jnp.stack([hp[:, ki:ki + 14:2, kj:kj + 14:2, :]
                    for ki in range(4) for kj in range(4)], axis=3)    # (N,7,7,16,64)
    a1 = p1.transpose(1, 2, 0, 3, 4).reshape(N_SPATIAL * N, 16 * H1_NCHAN)  # (49*N, 1024)

    # ---- fused conv1+BN2d+Leaky -> fc2+BN1d+Leaky -> fc1+BN1d+Leaky ------
    # NOTE: tn=256 is safe for v5e's 16 MB scoped VMEM; use tn=512 on v7x.
    z = conv1_fc_head(a1, pp["Wc1"], pp["bc1"], pp["gc1"], pp["bec1"],
                      pp["W2"], pp["b2"], pp["g2"], pp["be2"],
                      pp["W1"], pp["b1"], pp["g1"], pp["be1"], tn=256)
    return z


# ----------------------------------------------------------------------------
if __name__ == "__main__":
    latent_dim = 32
    batch = 4
    key = jax.random.PRNGKey(0)
    k_x, k_p = jax.random.split(key)
    x = jax.random.normal(k_x, (batch, 1, 28, 28), jnp.float32)

    params = init_params(k_p, latent_dim)
    packed = jax.block_until_ready(pack_params(params))  # one-time layout conversion

    z = jax.jit(encoder2_forward)(x, packed)
    z = jax.block_until_ready(z)

    assert z.shape == (batch, latent_dim), z.shape
    assert bool(jnp.all(jnp.isfinite(z)))
    print("KERNEL_OK")
</pallas_src>

<mosaic_0001>
module attributes {stable_mosaic.version = 11 : i64} {
  func.func @_conv22_kernel(%arg0: i32, %arg1: memref<784x16xbf16, #tpu.memory_space<vmem>>, %arg2: memref<16x64xbf16, #tpu.memory_space<vmem>>, %arg3: memref<1x64xf32, #tpu.memory_space<vmem>>, %arg4: memref<784x64xbf16, #tpu.memory_space<vmem>>) attributes {dimension_semantics = [#tpu.dimension_semantics<arbitrary>], iteration_bounds = array<i64: 1>, scalar_prefetch = 0 : i64, scratch_operands = 0 : i64, tpu.core_type = #tpu.core_type<tc>, window_params = [{pipeline_mode = #tpu.pipeline_mode<synchronous>, transform_indices = @transform_0, window_bounds = array<i64: 784, 16>}, {pipeline_mode = #tpu.pipeline_mode<synchronous>, transform_indices = @transform_1, window_bounds = array<i64: 16, 64>}, {pipeline_mode = #tpu.pipeline_mode<synchronous>, transform_indices = @transform_2, window_bounds = array<i64: 1, 64>}, {pipeline_mode = #tpu.pipeline_mode<synchronous>, transform_indices = @transform_3, window_bounds = array<i64: 784, 64>}]} {
    %c0 = arith.constant 0 : index
    %c0_0 = arith.constant 0 : index
    %0 = vector.load %arg1[%c0, %c0_0] : memref<784x16xbf16, #tpu.memory_space<vmem>>, vector<784x16xbf16>
    %c0_1 = arith.constant 0 : index
    %c0_2 = arith.constant 0 : index
    %1 = vector.load %arg2[%c0_1, %c0_2] : memref<16x64xbf16, #tpu.memory_space<vmem>>, vector<16x64xbf16>
    %cst = arith.constant dense<0.000000e+00> : vector<784x64xf32>
    %2 = tpu.matmul %0, %1, %cst {dimension_numbers = #tpu.dot_dimension_numbers<[1], [0], [0], [1], [0, 0, 1, 1], [], []>} : vector<784x16xbf16>, vector<16x64xbf16>, vector<784x64xf32> -> vector<784x64xf32>
    %c0_3 = arith.constant 0 : index
    %c0_4 = arith.constant 0 : index
    %3 = vector.load %arg3[%c0_3, %c0_4] : memref<1x64xf32, #tpu.memory_space<vmem>>, vector<1x64xf32>
    %4 = vector.broadcast %3 : vector<1x64xf32> to vector<784x64xf32>
    %5 = arith.addf %2, %4 : vector<784x64xf32>
    %cst_5 = arith.constant 1.000000e-01 : f32
    %6 = vector.broadcast %cst_5 : f32 to vector<784x64xf32>
    %7 = arith.mulf %6, %5 : vector<784x64xf32>
    %8 = arith.maximumf %5, %7 : vector<784x64xf32>
    %9 = arith.truncf %8 : vector<784x64xf32> to vector<784x64xbf16>
    %c0_6 = arith.constant 0 : index
    %c0_7 = arith.constant 0 : index
    %10 = vector.load %arg4[%c0_6, %c0_7] : memref<784x64xbf16, #tpu.memory_space<vmem>>, vector<784x64xbf16>
    tpu.vector_store %arg4[%c0_6, %c0_7], %9 {strides = array<i32>} : memref<784x64xbf16, #tpu.memory_space<vmem>>, vector<784x64xbf16>,
    return
  }
  func.func @transform_0(%arg0: i32) -> (i32, i32) {
    %c0_i32 = arith.constant 0 : i32
    %c0_i32_0 = arith.constant 0 : i32
    %c0_i32_1 = arith.constant 0 : i32
    return %c0_i32, %c0_i32_0 : i32, i32
  }
  func.func @transform_1(%arg0: i32) -> (i32, i32) {
    %c0_i32 = arith.constant 0 : i32
    %c0_i32_0 = arith.constant 0 : i32
    %c0_i32_1 = arith.constant 0 : i32
    return %c0_i32, %c0_i32_0 : i32, i32
  }
  func.func @transform_2(%arg0: i32) -> (i32, i32) {
    %c0_i32 = arith.constant 0 : i32
    %c0_i32_0 = arith.constant 0 : i32
    %c0_i32_1 = arith.constant 0 : i32
    return %c0_i32, %c0_i32_0 : i32, i32
  }
  func.func @transform_3(%arg0: i32) -> (i32, i32) {
    %c0_i32 = arith.constant 0 : i32
    %c0_i32_0 = arith.constant 0 : i32
    %c0_i32_1 = arith.constant 0 : i32
    return %c0_i32, %c0_i32_0 : i32, i32
  }
}

module attributes {stable_mosaic.version = 11 : i64} {
  func.func @_conv1_fc_kernel(%arg0: i32, %arg1: memref<196x1024xbf16, #tpu.memory_space<vmem>>, %arg2: memref<1024x128xbf16, #tpu.memory_space<vmem>>, %arg3: memref<1x128xf32, #tpu.memory_space<vmem>>, %arg4: memref<1x128xf32, #tpu.memory_space<vmem>>, %arg5: memref<1x128xf32, #tpu.memory_space<vmem>>, %arg6: memref<49x128x256xbf16, #tpu.memory_space<vmem>>, %arg7: memref<1x256xf32, #tpu.memory_space<vmem>>, %arg8: memref<1x256xf32, #tpu.memory_space<vmem>>, %arg9: memref<1x256xf32, #tpu.memory_space<vmem>>, %arg10: memref<256x32xbf16, #tpu.memory_space<vmem>>, %arg11: memref<1x32xf32, #tpu.memory_space<vmem>>, %arg12: memref<1x32xf32, #tpu.memory_space<vmem>>, %arg13: memref<1x32xf32, #tpu.memory_space<vmem>>, %arg14: memref<4x32xf32, #tpu.memory_space<vmem>>, %arg15: memref<196x128xbf16, #tpu.memory_space<vmem>>, %arg16: memref<4x32xf32, #tpu.memory_space<vmem>>) attributes {dimension_semantics = [#tpu.dimension_semantics<arbitrary>], iteration_bounds = array<i64: 4>, scalar_prefetch = 0 : i64, scratch_operands = 2 : i64, tpu.core_type = #tpu.core_type<tc>, window_params = [{pipeline_mode = #tpu.pipeline_mode<synchronous>, transform_indices = @transform_0, window_bounds = array<i64: 196, 1024>}, {pipeline_mode = #tpu.pipeline_mode<synchronous>, transform_indices = @transform_1, window_bounds = array<i64: 1024, 128>}, {pipeline_mode = #tpu.pipeline_mode<synchronous>, transform_indices = @transform_2, window_bounds = array<i64: 1, 128>}, {pipeline_mode = #tpu.pipeline_mode<synchronous>, transform_indices = @transform_3, window_bounds = array<i64: 1, 128>}, {pipeline_mode = #tpu.pipeline_mode<synchronous>, transform_indices = @transform_4, window_bounds = array<i64: 1, 128>}, {transform_indices = @transform_5, window_bounds = array<i64: 49, 128, 256>}, {transform_indices = @transform_6, window_bounds = array<i64: 1, 256>}, {transform_indices = @transform_7, window_bounds = array<i64: 1, 256>}, {transform_indices = @transform_8, window_bounds = array<i64: 1, 256>}, {transform_indices = @transform_9, window_bounds = array<i64: 256, 32>}, {pipeline_mode = #tpu.pipeline_mode<synchronous>, transform_indices = @transform_10, window_bounds = array<i64: 1, 32>}, {pipeline_mode = #tpu.pipeline_mode<synchronous>, transform_indices = @transform_11, window_bounds = array<i64: 1, 32>}, {pipeline_mode = #tpu.pipeline_mode<synchronous>, transform_indices = @transform_12, window_bounds = array<i64: 1, 32>}, {pipeline_mode = #tpu.pipeline_mode<synchronous>, transform_indices = @transform_13, window_bounds = array<i64: 4, 32>}]} {
    %c0_i32 = arith.constant 0 : i32
    %0 = arith.cmpi eq, %arg0, %c0_i32 : i32
    %1 = arith.extui %0 : i1 to i32
    %c0_i32_0 = arith.constant 0 : i32
    %2 = arith.cmpi ne, %1, %c0_i32_0 : i32
    scf.if %2 {
      %c0_231 = arith.constant 0 : index
      %c0_232 = arith.constant 0 : index
      %290 = vector.load %arg1[%c0_231, %c0_232] : memref<196x1024xbf16, #tpu.memory_space<vmem>>, vector<196x1024xbf16>
      %c0_233 = arith.constant 0 : index
      %c0_234 = arith.constant 0 : index
      %291 = vector.load %arg2[%c0_233, %c0_234] : memref<1024x128xbf16, #tpu.memory_space<vmem>>, vector<1024x128xbf16>
      %cst_235 = arith.constant dense<0.000000e+00> : vector<196x128xf32>
      %292 = tpu.matmul %290, %291, %cst_235 {dimension_numbers = #tpu.dot_dimension_numbers<[1], [0], [0], [1], [0, 0, 1, 1], [], []>} : vector<196x1024xbf16>, vector<1024x128xbf16>, vector<196x128xf32> -> vector<196x128xf32>
      %c0_236 = arith.constant 0 : index
      %c0_237 = arith.constant 0 : index
      %293 = vector.load %arg3[%c0_236, %c0_237] : memref<1x128xf32, #tpu.memory_space<vmem>>, vector<1x128xf32>
      %294 = vector.broadcast %293 : vector<1x128xf32> to vector<196x128xf32>
      %295 = arith.addf %292, %294 : vector<196x128xf32>
      %c0_238 = arith.constant 0 : index
      %c0_239 = arith.constant 0 : index
      %296 = vector.load %arg4[%c0_238, %c0_239] : memref<1x128xf32, #tpu.memory_space<vmem>>, vector<1x128xf32>
      %c0_240 = arith.constant 0 : index
      %c0_241 = arith.constant 0 : index
      %297 = vector.load %arg5[%c0_240, %c0_241] : memref<1x128xf32, #tpu.memory_space<vmem>>, vector<1x128xf32>
      %cst_242 = arith.constant dense<0.000000e+00> : vector<128xf32>
      %298 = vector.multi_reduction <add>, %295, %cst_242 [0] : vector<196x128xf32> to vector<128xf32>
      %299 = vector.shape_cast %298 : vector<128xf32> to vector<1x128xf32>
      %cst_243 = arith.constant 1.960000e+02 : f32
      %300 = vector.broadcast %cst_243 : f32 to vector<1x128xf32>
      %301 = arith.divf %299, %300 : vector<1x128xf32>
      %302 = arith.mulf %295, %295 : vector<196x128xf32>
      %cst_244 = arith.constant dense<0.000000e+00> : vector<128xf32>
      %303 = vector.multi_reduction <add>, %302, %cst_244 [0] : vector<196x128xf32> to vector<128xf32>
      %304 = vector.shape_cast %303 : vector<128xf32> to vector<1x128xf32>
      %cst_245 = arith.constant 1.960000e+02 : f32
      %305 = vector.broadcast %cst_245 : f32 to vector<1x128xf32>
      %306 = arith.divf %304, %305 : vector<1x128xf32>
      %307 = arith.mulf %301, %301 : vector<1x128xf32>
      %308 = arith.subf %306, %307 : vector<1x128xf32>
      %cst_246 = arith.constant 0.000000e+00 : f32
      %309 = vector.broadcast %cst_246 : f32 to vector<1x128xf32>
      %310 = arith.maximumf %308, %309 : vector<1x128xf32>
      %311 = vector.broadcast %301 : vector<1x128xf32> to vector<196x128xf32>
      %312 = arith.subf %295, %311 : vector<196x128xf32>
      %cst_247 = arith.constant 9.99999974E-6 : f32
      %313 = vector.broadcast %cst_247 : f32 to vector<1x128xf32>
      %314 = arith.addf %310, %313 : vector<1x128xf32>
      %315 = math.rsqrt %314 : vector<1x128xf32>
      %316 = vector.broadcast %315 : vector<1x128xf32> to vector<196x128xf32>
      %317 = arith.mulf %312, %316 : vector<196x128xf32>
      %318 = vector.broadcast %296 : vector<1x128xf32> to vector<196x128xf32>
      %319 = arith.mulf %317, %318 : vector<196x128xf32>
      %320 = vector.broadcast %297 : vector<1x128xf32> to vector<196x128xf32>
      %321 = arith.addf %319, %320 : vector<196x128xf32>
      %cst_248 = arith.constant 1.000000e-01 : f32
      %322 = vector.broadcast %cst_248 : f32 to vector<196x128xf32>
      %323 = arith.mulf %322, %321 : vector<196x128xf32>
      %324 = arith.maximumf %321, %323 : vector<196x128xf32>
      %325 = arith.truncf %324 : vector<196x128xf32> to vector<196x128xbf16>
      %c0_249 = arith.constant 0 : index
      %c0_250 = arith.constant 0 : index
      %326 = vector.load %arg15[%c0_249, %c0_250] : memref<196x128xbf16, #tpu.memory_space<vmem>>, vector<196x128xbf16>
      tpu.vector_store %arg15[%c0_249, %c0_250], %325 {strides = array<i32>} : memref<196x128xbf16, #tpu.memory_space<vmem>>, vector<196x128xbf16>,
      %cst_251 = arith.constant 0.000000e+00 : f32
      %327 = vector.broadcast %cst_251 : f32 to vector<4x32xf32>
      %c0_252 = arith.constant 0 : index
      %c0_253 = arith.constant 0 : index
      %328 = vector.load %arg16[%c0_252, %c0_253] : memref<4x32xf32, #tpu.memory_space<vmem>>, vector<4x32xf32>
      tpu.vector_store %arg16[%c0_252, %c0_253], %327 {strides = array<i32>} : memref<4x32xf32, #tpu.memory_space<vmem>>, vector<4x32xf32>,
    } else {
    }
    %cst = arith.constant 0.000000e+00 : f32
    %3 = vector.broadcast %cst : f32 to vector<4x256xf32>
    %c0 = arith.constant 0 : index
    %c0_1 = arith.constant 0 : index
    %4 = vector.load %arg15[%c0, %c0_1] : memref<196x128xbf16, #tpu.memory_space<vmem>>, vector<4x128xbf16>
    %c0_2 = arith.constant 0 : index
    %c0_3 = arith.constant 0 : index
    %c0_4 = arith.constant 0 : index
    %5 = vector.load %arg6[%c0_2, %c0_3, %c0_4] : memref<49x128x256xbf16, #tpu.memory_space<vmem>>, vector<1x128x256xbf16>
    %6 = vector.shape_cast %5 : vector<1x128x256xbf16> to vector<128x256xbf16>
    %cst_5 = arith.constant dense<0.000000e+00> : vector<4x256xf32>
    %7 = tpu.matmul %4, %6, %cst_5 {dimension_numbers = #tpu.dot_dimension_numbers<[1], [0], [0], [1], [0, 0, 1, 1], [], []>} : vector<4x128xbf16>, vector<128x256xbf16>, vector<4x256xf32> -> vector<4x256xf32>
    %8 = arith.addf %3, %7 : vector<4x256xf32>
    %c4 = arith.constant 4 : index
    %c0_6 = arith.constant 0 : index
    %9 = vector.load %arg15[%c4, %c0_6] : memref<196x128xbf16, #tpu.memory_space<vmem>>, vector<4x128xbf16>
    %c1 = arith.constant 1 : index
    %c0_7 = arith.constant 0 : index
    %c0_8 = arith.constant 0 : index
    %10 = vector.load %arg6[%c1, %c0_7, %c0_8] : memref<49x128x256xbf16, #tpu.memory_space<vmem>>, vector<1x128x256xbf16>
    %11 = vector.shape_cast %10 : vector<1x128x256xbf16> to vector<128x256xbf16>
    %cst_9 = arith.constant dense<0.000000e+00> : vector<4x256xf32>
    %12 = tpu.matmul %9, %11, %cst_9 {dimension_numbers = #tpu.dot_dimension_numbers<[1], [0], [0], [1], [0, 0, 1, 1], [], []>} : vector<4x128xbf16>, vector<128x256xbf16>, vector<4x256xf32> -> vector<4x256xf32>
    %13 = arith.addf %8, %12 : vector<4x256xf32>
    %c8 = arith.constant 8 : index
    %c0_10 = arith.constant 0 : index
    %14 = vector.load %arg15[%c8, %c0_10] : memref<196x128xbf16, #tpu.memory_space<vmem>>, vector<4x128xbf16>
    %c2 = arith.constant 2 : index
    %c0_11 = arith.constant 0 : index
    %c0_12 = arith.constant 0 : index
    %15 = vector.load %arg6[%c2, %c0_11, %c0_12] : memref<49x128x256xbf16, #tpu.memory_space<vmem>>, vector<1x128x256xbf16>
    %16 = vector.shape_cast %15 : vector<1x128x256xbf16> to vector<128x256xbf16>
    %cst_13 = arith.constant dense<0.000000e+00> : vector<4x256xf32>
    %17 = tpu.matmul %14, %16, %cst_13 {dimension_numbers = #tpu.dot_dimension_numbers<[1], [0], [0], [1], [0, 0, 1, 1], [], []>} : vector<4x128xbf16>, vector<128x256xbf16>, vector<4x256xf32> -> vector<4x256xf32>
    %18 = arith.addf %13, %17 : vector<4x256xf32>
    %c12 = arith.constant 12 : index
    %c0_14 = arith.constant 0 : index
    %19 = vector.load %arg15[%c12, %c0_14] : memref<196x128xbf16, #tpu.memory_space<vmem>>, vector<4x128xbf16>
    %c3 = arith.constant 3 : index
    %c0_15 = arith.constant 0 : index
    %c0_16 = arith.constant 0 : index
    %20 = vector.load %arg6[%c3, %c0_15, %c0_16] : memref<49x128x256xbf16, #tpu.memory_space<vmem>>, vector<1x128x256xbf16>
    %21 = vector.shape_cast %20 : vector<1x128x256xbf16> to vector<128x256xbf16>
    %cst_17 = arith.constant dense<0.000000e+00> : vector<4x256xf32>
    %22 = tpu.matmul %19, %21, %cst_17 {dimension_numbers = #tpu.dot_dimension_numbers<[1], [0], [0], [1], [0, 0, 1, 1], [], []>} : vector<4x128xbf16>, vector<128x256xbf16>, vector<4x256xf32> -> vector<4x256xf32>
    %23 = arith.addf %18, %22 : vector<4x256xf32>
    %c16 = arith.constant 16 : index
    %c0_18 = arith.constant 0 : index
    %24 = vector.load %arg15[%c16, %c0_18] : memref<196x128xbf16, #tpu.memory_space<vmem>>, vector<4x128xbf16>
    %c4_19 = arith.constant 4 : index
    %c0_20 = arith.constant 0 : index
    %c0_21 = arith.constant 0 : index
    %25 = vector.load %arg6[%c4_19, %c0_20, %c0_21] : memref<49x128x256xbf16, #tpu.memory_space<vmem>>, vector<1x128x256xbf16>
    %26 = vector.shape_cast %25 : vector<1x128x256xbf16> to vector<128x256xbf16>
    %cst_22 = arith.constant dense<0.000000e+00> : vector<4x256xf32>
    %27 = tpu.matmul %24, %26, %cst_22 {dimension_numbers = #tpu.dot_dimension_numbers<[1], [0], [0], [1], [0, 0, 1, 1], [], []>} : vector<4x128xbf16>, vector<128x256xbf16>, vector<4x256xf32> -> vector<4x256xf32>
    %28 = arith.addf %23, %27 : vector<4x256xf32>
    %c20 = arith.constant 20 : index
    %c0_23 = arith.constant 0 : index
    %29 = vector.load %arg15[%c20, %c0_23] : memref<196x128xbf16, #tpu.memory_space<vmem>>, vector<4x128xbf16>
    %c5 = arith.constant 5 : index
    %c0_24 = arith.constant 0 : index
    %c0_25 = arith.constant 0 : index
    %30 = vector.load %arg6[%c5, %c0_24, %c0_25] : memref<49x128x256xbf16, #tpu.memory_space<vmem>>, vector<1x128x256xbf16>
    %31 = vector.shape_cast %30 : vector<1x128x256xbf16> to vector<128x256xbf16>
    %cst_26 = arith.constant dense<0.000000e+00> : vector<4x256xf32>
    %32 = tpu.matmul %29, %31, %cst_26 {dimension_numbers = #tpu.dot_dimension_numbers<[1], [0], [0], [1], [0, 0, 1, 1], [], []>} : vector<4x128xbf16>, vector<128x256xbf16>, vector<4x256xf32> -> vector<4x256xf32>
    %33 = arith.addf %28, %32 : vector<4x256xf32>
    %c24 = arith.constant 24 : index
    %c0_27 = arith.constant 0 : index
    %34 = vector.load %arg15[%c24, %c0_27] : memref<196x128xbf16, #tpu.memory_space<vmem>>, vector<4x128xbf16>
    %c6 = arith.constant 6 : index
    %c0_28 = arith.constant 0 : index
    %c0_29 = arith.constant 0 : index
    %35 = vector.load %arg6[%c6, %c0_28, %c0_29] : memref<49x128x256xbf16, #tpu.memory_space<vmem>>, vector<1x128x256xbf16>
    %36 = vector.shape_cast %35 : vector<1x128x256xbf16> to vector<128x256xbf16>
    %cst_30 = arith.constant dense<0.000000e+00> : vector<4x256xf32>
    %37 = tpu.matmul %34, %36, %cst_30 {dimension_numbers = #tpu.dot_dimension_numbers<[1], [0], [0], [1], [0, 0, 1, 1], [], []>} : vector<4x128xbf16>, vector<128x256xbf16>, vector<4x256xf32> -> vector<4x256xf32>
    %38 = arith.addf %33, %37 : vector<4x256xf32>
    %c28 = arith.constant 28 : index
    %c0_31 = arith.constant 0 : index
    %39 = vector.load %arg15[%c28, %c0_31] : memref<196x128xbf16, #tpu.memory_space<vmem>>, vector<4x128xbf16>
    %c7 = arith.constant 7 : index
    %c0_32 = arith.constant 0 : index
    %c0_33 = arith.constant 0 : index
    %40 = vector.load %arg6[%c7, %c0_32, %c0_33] : memref<49x128x256xbf16, #tpu.memory_space<vmem>>, vector<1x128x256xbf16>
    %41 = vector.shape_cast %40 : vector<1x128x256xbf16> to vector<128x256xbf16>
    %cst_34 = arith.constant dense<0.000000e+00> : vector<4x256xf32>
    %42 = tpu.matmul %39, %41, %cst_34 {dimension_numbers = #tpu.dot_dimension_numbers<[1], [0], [0], [1], [0, 0, 1, 1], [], []>} : vector<4x128xbf16>, vector<128x256xbf16>, vector<4x256xf32> -> vector<4x256xf32>
    %43 = arith.addf %38, %42 : vector<4x256xf32>
    %c32 = arith.constant 32 : index
    %c0_35 = arith.constant 0 : index
    %44 = vector.load %arg15[%c32, %c0_35] : memref<196x128xbf16, #tpu.memory_space<vmem>>, vector<4x128xbf16>
    %c8_36 = arith.constant 8 : index
    %c0_37 = arith.constant 0 : index
    %c0_38 = arith.constant 0 : index
    %45 = vector.load %arg6[%c8_36, %c0_37, %c0_38] : memref<49x128x256xbf16, #tpu.memory_space<vmem>>, vector<1x128x256xbf16>
    %46 = vector.shape_cast %45 : vector<1x128x256xbf16> to vector<128x256xbf16>
    %cst_39 = arith.constant dense<0.000000e+00> : vector<4x256xf32>
    %47 = tpu.matmul %44, %46, %cst_39 {dimension_numbers = #tpu.dot_dimension_numbers<[1], [0], [0], [1], [0, 0, 1, 1], [], []>} : vector<4x128xbf16>, vector<128x256xbf16>, vector<4x256xf32> -> vector<4x256xf32>
    %48 = arith.addf %43, %47 : vector<4x256xf32>
    %c36 = arith.constant 36 : index
    %c0_40 = arith.constant 0 : index
    %49 = vector.load %arg15[%c36, %c0_40] : memref<196x128xbf16, #tpu.memory_space<vmem>>, vector<4x128xbf16>
    %c9 = arith.constant 9 : index
    %c0_41 = arith.constant 0 : index
    %c0_42 = arith.constant 0 : index
    %50 = vector.load %arg6[%c9, %c0_41, %c0_42] : memref<49x128x256xbf16, #tpu.memory_space<vmem>>, vector<1x128x256xbf16>
    %51 = vector.shape_cast %50 : vector<1x128x256xbf16> to vector<128x256xbf16>
    %cst_43 = arith.constant dense<0.000000e+00> : vector<4x256xf32>
    %52 = tpu.matmul %49, %51, %cst_43 {dimension_numbers = #tpu.dot_dimension_numbers<[1], [0], [0], [1], [0, 0, 1, 1], [], []>} : vector<4x128xbf16>, vector<128x256xbf16>, vector<4x256xf32> -> vector<4x256xf32>
    %53 = arith.addf %48, %52 : vector<4x256xf32>
    %c40 = arith.constant 40 : index
    %c0_44 = arith.constant 0 : index
    %54 = vector.load %arg15[%c40, %c0_44] : memref<196x128xbf16, #tpu.memory_space<vmem>>, vector<4x128xbf16>
    %c10 = arith.constant 10 : index
    %c0_45 = arith.constant 0 : index
    %c0_46 = arith.constant 0 : index
    %55 = vector.load %arg6[%c10, %c0_45, %c0_46] : memref<49x128x256xbf16, #tpu.memory_space<vmem>>, vector<1x128x256xbf16>
    %56 = vector.shape_cast %55 : vector<1x128x256xbf16> to vector<128x256xbf16>
    %cst_47 = arith.constant dense<0.000000e+00> : vector<4x256xf32>
    %57 = tpu.matmul %54, %56, %cst_47 {dimension_numbers = #tpu.dot_dimension_numbers<[1], [0], [0], [1], [0, 0, 1, 1], [], []>} : vector<4x128xbf16>, vector<128x256xbf16>, vector<4x256xf32> -> vector<4x256xf32>
    %58 = arith.addf %53, %57 : vector<4x256xf32>
    %c44 = arith.constant 44 : index
    %c0_48 = arith.constant 0 : index
    %59 = vector.load %arg15[%c44, %c0_48] : memref<196x128xbf16, #tpu.memory_space<vmem>>, vector<4x128xbf16>
    %c11 = arith.constant 11 : index
    %c0_49 = arith.constant 0 : index
    %c0_50 = arith.constant 0 : index
    %60 = vector.load %arg6[%c11, %c0_49, %c0_50] : memref<49x128x256xbf16, #tpu.memory_space<vmem>>, vector<1x128x256xbf16>
    %61 = vector.shape_cast %60 : vector<1x128x256xbf16> to vector<128x256xbf16>
    %cst_51 = arith.constant dense<0.000000e+00> : vector<4x256xf32>
    %62 = tpu.matmul %59, %61, %cst_51 {dimension_numbers = #tpu.dot_dimension_numbers<[1], [0], [0], [1], [0, 0, 1, 1], [], []>} : vector<4x128xbf16>, vector<128x256xbf16>, vector<4x256xf32> -> vector<4x256xf32>
    %63 = arith.addf %58, %62 : vector<4x256xf32>
    %c48 = arith.constant 48 : index
    %c0_52 = arith.constant 0 : index
    %64 = vector.load %arg15[%c48, %c0_52] : memref<196x128xbf16, #tpu.memory_space<vmem>>, vector<4x128xbf16>
    %c12_53 = arith.constant 12 : index
    %c0_54 = arith.constant 0 : index
    %c0_55 = arith.constant 0 : index
    %65 = vector.load %arg6[%c12_53, %c0_54, %c0_55] : memref<49x128x256xbf16, #tpu.memory_space<vmem>>, vector<1x128x256xbf16>
    %66 = vector.shape_cast %65 : vector<1x128x256xbf16> to vector<128x256xbf16>
    %cst_56 = arith.constant dense<0.000000e+00> : vector<4x256xf32>
    %67 = tpu.matmul %64, %66, %cst_56 {dimension_numbers = #tpu.dot_dimension_numbers<[1], [0], [0], [1], [0, 0, 1, 1], [], []>} : vector<4x128xbf16>, vector<128x256xbf16>, vector<4x256xf32> -> vector<4x256xf32>
    %68 = arith.addf %63, %67 : vector<4x256xf32>
    %c52 = arith.constant 52 : index
    %c0_57 = arith.constant 0 : index
    %69 = vector.load %arg15[%c52, %c0_57] : memref<196x128xbf16, #tpu.memory_space<vmem>>, vector<4x128xbf16>
    %c13 = arith.constant 13 : index
    %c0_58 = arith.constant 0 : index
    %c0_59 = arith.constant 0 : index
    %70 = vector.load %arg6[%c13, %c0_58, %c0_59] : memref<49x128x256xbf16, #tpu.memory_space<vmem>>, vector<1x128x256xbf16>
    %71 = vector.shape_cast %70 : vector<1x128x256xbf16> to vector<128x256xbf16>
    %cst_60 = arith.constant dense<0.000000e+00> : vector<4x256xf32>
    %72 = tpu.matmul %69, %71, %cst_60 {dimension_numbers = #tpu.dot_dimension_numbers<[1], [0], [0], [1], [0, 0, 1, 1], [], []>} : vector<4x128xbf16>, vector<128x256xbf16>, vector<4x256xf32> -> vector<4x256xf32>
    %73 = arith.addf %68, %72 : vector<4x256xf32>
    %c56 = arith.constant 56 : index
    %c0_61 = arith.constant 0 : index
    %74 = vector.load %arg15[%c56, %c0_61] : memref<196x128xbf16, #tpu.memory_space<vmem>>, vector<4x128xbf16>
    %c14 = arith.constant 14 : index
    %c0_62 = arith.constant 0 : index
    %c0_63 = arith.constant 0 : index
    %75 = vector.load %arg6[%c14, %c0_62, %c0_63] : memref<49x128x256xbf16, #tpu.memory_space<vmem>>, vector<1x128x256xbf16>
    %76 = vector.shape_cast %75 : vector<1x128x256xbf16> to vector<128x256xbf16>
    %cst_64 = arith.constant dense<0.000000e+00> : vector<4x256xf32>
    %77 = tpu.matmul %74, %76, %cst_64 {dimension_numbers = #tpu.dot_dimension_numbers<[1], [0], [0], [1], [0, 0, 1, 1], [], []>} : vector<4x128xbf16>, vector<128x256xbf16>, vector<4x256xf32> -> vector<4x256xf32>
    %78 = arith.addf %73, %77 : vector<4x256xf32>
    %c60 = arith.constant 60 : index
    %c0_65 = arith.constant 0 : index
    %79 = vector.load %arg15[%c60, %c0_65] : memref<196x128xbf16, #tpu.memory_space<vmem>>, vector<4x128xbf16>
    %c15 = arith.constant 15 : index
    %c0_66 = arith.constant 0 : index
    %c0_67 = arith.constant 0 : index
    %80 = vector.load %arg6[%c15, %c0_66, %c0_67] : memref<49x128x256xbf16, #tpu.memory_space<vmem>>, vector<1x128x256xbf16>
    %81 = vector.shape_cast %80 : vector<1x128x256xbf16> to vector<128x256xbf16>
    %cst_68 = arith.constant dense<0.000000e+00> : vector<4x256xf32>
    %82 = tpu.matmul %79, %81, %cst_68 {dimension_numbers = #tpu.dot_dimension_numbers<[1], [0], [0], [1], [0, 0, 1, 1], [], []>} : vector<4x128xbf16>, vector<128x256xbf16>, vector<4x256xf32> -> vector<4x256xf32>
    %83 = arith.addf %78, %82 : vector<4x256xf32>
    %c64 = arith.constant 64 : index
    %c0_69 = arith.constant 0 : index
    %84 = vector.load %arg15[%c64, %c0_69] : memref<196x128xbf16, #tpu.memory_space<vmem>>, vector<4x128xbf16>
    %c16_70 = arith.constant 16 : index
    %c0_71 = arith.constant 0 : index
    %c0_72 = arith.constant 0 : index
    %85 = vector.load %arg6[%c16_70, %c0_71, %c0_72] : memref<49x128x256xbf16, #tpu.memory_space<vmem>>, vector<1x128x256xbf16>
    %86 = vector.shape_cast %85 : vector<1x128x256xbf16> to vector<128x256xbf16>
    %cst_73 = arith.constant dense<0.000000e+00> : vector<4x256xf32>
    %87 = tpu.matmul %84, %86, %cst_73 {dimension_numbers = #tpu.dot_dimension_numbers<[1], [0], [0], [1], [0, 0, 1, 1], [], []>} : vector<4x128xbf16>, vector<128x256xbf16>, vector<4x256xf32> -> vector<4x256xf32>
    %88 = arith.addf %83, %87 : vector<4x256xf32>
    %c68 = arith.constant 68 : index
    %c0_74 = arith.constant 0 : index
    %89 = vector.load %arg15[%c68, %c0_74] : memref<196x128xbf16, #tpu.memory_space<vmem>>, vector<4x128xbf16>
    %c17 = arith.constant 17 : index
    %c0_75 = arith.constant 0 : index
    %c0_76 = arith.constant 0 : index
    %90 = vector.load %arg6[%c17, %c0_75, %c0_76] : memref<49x128x256xbf16, #tpu.memory_space<vmem>>, vector<1x128x256xbf16>
    %91 = vector.shape_cast %90 : vector<1x128x256xbf16> to vector<128x256xbf16>
    %cst_77 = arith.constant dense<0.000000e+00> : vector<4x256xf32>
    %92 = tpu.matmul %89, %91, %cst_77 {dimension_numbers = #tpu.dot_dimension_numbers<[1], [0], [0], [1], [0, 0, 1, 1], [], []>} : vector<4x128xbf16>, vector<128x256xbf16>, vector<4x256xf32> -> vector<4x256xf32>
    %93 = arith.addf %88, %92 : vector<4x256xf32>
    %c72 = arith.constant 72 : index
    %c0_78 = arith.constant 0 : index
    %94 = vector.load %arg15[%c72, %c0_78] : memref<196x128xbf16, #tpu.memory_space<vmem>>, vector<4x128xbf16>
    %c18 = arith.constant 18 : index
    %c0_79 = arith.constant 0 : index
    %c0_80 = arith.constant 0 : index
    %95 = vector.load %arg6[%c18, %c0_79, %c0_80] : memref<49x128x256xbf16, #tpu.memory_space<vmem>>, vector<1x128x256xbf16>
    %96 = vector.shape_cast %95 : vector<1x128x256xbf16> to vector<128x256xbf16>
    %cst_81 = arith.constant dense<0.000000e+00> : vector<4x256xf32>
    %97 = tpu.matmul %94, %96, %cst_81 {dimension_numbers = #tpu.dot_dimension_numbers<[1], [0], [0], [1], [0, 0, 1, 1], [], []>} : vector<4x128xbf16>, vector<128x256xbf16>, vector<4x256xf32> -> vector<4x256xf32>
    %98 = arith.addf %93, %97 : vector<4x256xf32>
    %c76 = arith.constant 76 : index
    %c0_82 = arith.constant 0 : index
    %99 = vector.load %arg15[%c76, %c0_82] : memref<196x128xbf16, #tpu.memory_space<vmem>>, vector<4x128xbf16>
    %c19 = arith.constant 19 : index
    %c0_83 = arith.constant 0 : index
    %c0_84 = arith.constant 0 : index
    %100 = vector.load %arg6[%c19, %c0_83, %c0_84] : memref<49x128x256xbf16, #tpu.memory_space<vmem>>, vector<1x128x256xbf16>
    %101 = vector.shape_cast %100 : vector<1x128x256xbf16> to vector<128x256xbf16>
    %cst_85 = arith.constant dense<0.000000e+00> : vector<4x256xf32>
    %102 = tpu.matmul %99, %101, %cst_85 {dimension_numbers = #tpu.dot_dimension_numbers<[1], [0], [0], [1], [0, 0, 1, 1], [], []>} : vector<4x128xbf16>, vector<128x256xbf16>, vector<4x256xf32> -> vector<4x256xf32>
    %103 = arith.addf %98, %102 : vector<4x256xf32>
    %c80 = arith.constant 80 : index
    %c0_86 = arith.constant 0 : index
    %104 = vector.load %arg15[%c80, %c0_86] : memref<196x128xbf16, #tpu.memory_space<vmem>>, vector<4x128xbf16>
    %c20_87 = arith.constant 20 : index
    %c0_88 = arith.constant 0 : index
    %c0_89 = arith.constant 0 : index
    %105 = vector.load %arg6[%c20_87, %c0_88, %c0_89] : memref<49x128x256xbf16, #tpu.memory_space<vmem>>, vector<1x128x256xbf16>
    %106 = vector.shape_cast %105 : vector<1x128x256xbf16> to vector<128x256xbf16>
    %cst_90 = arith.constant dense<0.000000e+00> : vector<4x256xf32>
    %107 = tpu.matmul %104, %106, %cst_90 {dimension_numbers = #tpu.dot_dimension_numbers<[1], [0], [0], [1], [0, 0, 1, 1], [], []>} : vector<4x128xbf16>, vector<128x256xbf16>, vector<4x256xf32> -> vector<4x256xf32>
    %108 = arith.addf %103, %107 : vector<4x256xf32>
    %c84 = arith.constant 84 : index
    %c0_91 = arith.constant 0 : index
    %109 = vector.load %arg15[%c84, %c0_91] : memref<196x128xbf16, #tpu.memory_space<vmem>>, vector<4x128xbf16>
    %c21 = arith.constant 21 : index
    %c0_92 = arith.constant 0 : index
    %c0_93 = arith.constant 0 : index
    %110 = vector.load %arg6[%c21, %c0_92, %c0_93] : memref<49x128x256xbf16, #tpu.memory_space<vmem>>, vector<1x128x256xbf16>
    %111 = vector.shape_cast %110 : vector<1x128x256xbf16> to vector<128x256xbf16>
    %cst_94 = arith.constant dense<0.000000e+00> : vector<4x256xf32>
    %112 = tpu.matmul %109, %111, %cst_94 {dimension_numbers = #tpu.dot_dimension_numbers<[1], [0], [0], [1], [0, 0, 1, 1], [], []>} : vector<4x128xbf16>, vector<128x256xbf16>, vector<4x256xf32> -> vector<4x256xf32>
    %113 = arith.addf %108, %112 : vector<4x256xf32>
    %c88 = arith.constant 88 : index
    %c0_95 = arith.constant 0 : index
    %114 = vector.load %arg15[%c88, %c0_95] : memref<196x128xbf16, #tpu.memory_space<vmem>>, vector<4x128xbf16>
    %c22 = arith.constant 22 : index
    %c0_96 = arith.constant 0 : index
    %c0_97 = arith.constant 0 : index
    %115 = vector.load %arg6[%c22, %c0_96, %c0_97] : memref<49x128x256xbf16, #tpu.memory_space<vmem>>, vector<1x128x256xbf16>
    %116 = vector.shape_cast %115 : vector<1x128x256xbf16> to vector<128x256xbf16>
    %cst_98 = arith.constant dense<0.000000e+00> : vector<4x256xf32>
    %117 = tpu.matmul %114, %116, %cst_98 {dimension_numbers = #tpu.dot_dimension_numbers<[1], [0], [0], [1], [0, 0, 1, 1], [], []>} : vector<4x128xbf16>, vector<128x256xbf16>, vector<4x256xf32> -> vector<4x256xf32>
    %118 = arith.addf %113, %117 : vector<4x256xf32>
    %c92 = arith.constant 92 : index
    %c0_99 = arith.constant 0 : index
    %119 = vector.load %arg15[%c92, %c0_99] : memref<196x128xbf16, #tpu.memory_space<vmem>>, vector<4x128xbf16>
    %c23 = arith.constant 23 : index
    %c0_100 = arith.constant 0 : index
    %c0_101 = arith.constant 0 : index
    %120 = vector.load %arg6[%c23, %c0_100, %c0_101] : memref<49x128x256xbf16, #tpu.memory_space<vmem>>, vector<1x128x256xbf16>
    %121 = vector.shape_cast %120 : vector<1x128x256xbf16> to vector<128x256xbf16>
    %cst_102 = arith.constant dense<0.000000e+00> : vector<4x256xf32>
    %122 = tpu.matmul %119, %121, %cst_102 {dimension_numbers = #tpu.dot_dimension_numbers<[1], [0], [0], [1], [0, 0, 1, 1], [], []>} : vector<4x128xbf16>, vector<128x256xbf16>, vector<4x256xf32> -> vector<4x256xf32>
    %123 = arith.addf %118, %122 : vector<4x256xf32>
    %c96 = arith.constant 96 : index
    %c0_103 = arith.constant 0 : index
    %124 = vector.load %arg15[%c96, %c0_103] : memref<196x128xbf16, #tpu.memory_space<vmem>>, vector<4x128xbf16>
    %c24_104 = arith.constant 24 : index
    %c0_105 = arith.constant 0 : index
    %c0_106 = arith.constant 0 : index
    %125 = vector.load %arg6[%c24_104, %c0_105, %c0_106] : memref<49x128x256xbf16, #tpu.memory_space<vmem>>, vector<1x128x256xbf16>
    %126 = vector.shape_cast %125 : vector<1x128x256xbf16> to vector<128x256xbf16>
    %cst_107 = arith.constant dense<0.000000e+00> : vector<4x256xf32>
    %127 = tpu.matmul %124, %126, %cst_107 {dimension_numbers = #tpu.dot_dimension_numbers<[1], [0], [0], [1], [0, 0, 1, 1], [], []>} : vector<4x128xbf16>, vector<128x256xbf16>, vector<4x256xf32> -> vector<4x256xf32>
    %128 = arith.addf %123, %127 : vector<4x256xf32>
    %c100 = arith.constant 100 : index
    %c0_108 = arith.constant 0 : index
    %129 = vector.load %arg15[%c100, %c0_108] : memref<196x128xbf16, #tpu.memory_space<vmem>>, vector<4x128xbf16>
    %c25 = arith.constant 25 : index
    %c0_109 = arith.constant 0 : index
    %c0_110 = arith.constant 0 : index
    %130 = vector.load %arg6[%c25, %c0_109, %c0_110] : memref<49x128x256xbf16, #tpu.memory_space<vmem>>, vector<1x128x256xbf16>
    %131 = vector.shape_cast %130 : vector<1x128x256xbf16> to vector<128x256xbf16>
    %cst_111 = arith.constant dense<0.000000e+00> : vector<4x256xf32>
    %132 = tpu.matmul %129, %131, %cst_111 {dimension_numbers = #tpu.dot_dimension_numbers<[1], [0], [0], [1], [0, 0, 1, 1], [], []>} : vector<4x128xbf16>, vector<128x256xbf16>, vector<4x256xf32> -> vector<4x256xf32>
    %133 = arith.addf %128, %132 : vector<4x256xf32>
    %c104 = arith.constant 104 : index
    %c0_112 = arith.constant 0 : index
    %134 = vector.load %arg15[%c104, %c0_112] : memref<196x128xbf16, #tpu.memory_space<vmem>>, vector<4x128xbf16>
    %c26 = arith.constant 26 : index
    %c0_113 = arith.constant 0 : index
    %c0_114 = arith.constant 0 : index
    %135 = vector.load %arg6[%c26, %c0_113, %c0_114] : memref<49x128x256xbf16, #tpu.memory_space<vmem>>, vector<1x128x256xbf16>
    %136 = vector.shape_cast %135 : vector<1x128x256xbf16> to vector<128x256xbf16>
    %cst_115 = arith.constant dense<0.000000e+00> : vector<4x256xf32>
    %137 = tpu.matmul %134, %136, %cst_115 {dimension_numbers = #tpu.dot_dimension_numbers<[1], [0], [0], [1], [0, 0, 1, 1], [], []>} : vector<4x128xbf16>, vector<128x256xbf16>, vector<4x256xf32> -> vector<4x256xf32>
    %138 = arith.addf %133, %137 : vector<4x256xf32>
    %c108 = arith.constant 108 : index
    %c0_116 = arith.constant 0 : index
    %139 = vector.load %arg15[%c108, %c0_116] : memref<196x128xbf16, #tpu.memory_space<vmem>>, vector<4x128xbf16>
    %c27 = arith.constant 27 : index
    %c0_117 = arith.constant 0 : index
    %c0_118 = arith.constant 0 : index
    %140 = vector.load %arg6[%c27, %c0_117, %c0_118] : memref<49x128x256xbf16, #tpu.memory_space<vmem>>, vector<1x128x256xbf16>
    %141 = vector.shape_cast %140 : vector<1x128x256xbf16> to vector<128x256xbf16>
    %cst_119 = arith.constant dense<0.000000e+00> : vector<4x256xf32>
    %142 = tpu.matmul %139, %141, %cst_119 {dimension_numbers = #tpu.dot_dimension_numbers<[1], [0], [0], [1], [0, 0, 1, 1], [], []>} : vector<4x128xbf16>, vector<128x256xbf16>, vector<4x256xf32> -> vector<4x256xf32>
    %143 = arith.addf %138, %142 : vector<4x256xf32>
    %c112 = arith.constant 112 : index
    %c0_120 = arith.constant 0 : index
    %144 = vector.load %arg15[%c112, %c0_120] : memref<196x128xbf16, #tpu.memory_space<vmem>>, vector<4x128xbf16>
    %c28_121 = arith.constant 28 : index
    %c0_122 = arith.constant 0 : index
    %c0_123 = arith.constant 0 : index
    %145 = vector.load %arg6[%c28_121, %c0_122, %c0_123] : memref<49x128x256xbf16, #tpu.memory_space<vmem>>, vector<1x128x256xbf16>
    %146 = vector.shape_cast %145 : vector<1x128x256xbf16> to vector<128x256xbf16>
    %cst_124 = arith.constant dense<0.000000e+00> : vector<4x256xf32>
    %147 = tpu.matmul %144, %146, %cst_124 {dimension_numbers = #tpu.dot_dimension_numbers<[1], [0], [0], [1], [0, 0, 1, 1], [], []>} : vector<4x128xbf16>, vector<128x256xbf16>, vector<4x256xf32> -> vector<4x256xf32>
    %148 = arith.addf %143, %147 : vector<4x256xf32>
    %c116 = arith.constant 116 : index
    %c0_125 = arith.constant 0 : index
    %149 = vector.load %arg15[%c116, %c0_125] : memref<196x128xbf16, #tpu.memory_space<vmem>>, vector<4x128xbf16>
    %c29 = arith.constant 29 : index
    %c0_126 = arith.constant 0 : index
    %c0_127 = arith.constant 0 : index
    %150 = vector.load %arg6[%c29, %c0_126, %c0_127] : memref<49x128x256xbf16, #tpu.memory_space<vmem>>, vector<1x128x256xbf16>
    %151 = vector.shape_cast %150 : vector<1x128x256xbf16> to vector<128x256xbf16>
    %cst_128 = arith.constant dense<0.000000e+00> : vector<4x256xf32>
    %152 = tpu.matmul %149, %151, %cst_128 {dimension_numbers = #tpu.dot_dimension_numbers<[1], [0], [0], [1], [0, 0, 1, 1], [], []>} : vector<4x128xbf16>, vector<128x256xbf16>, vector<4x256xf32> -> vector<4x256xf32>
    %153 = arith.addf %148, %152 : vector<4x256xf32>
    %c120 = arith.constant 120 : index
    %c0_129 = arith.constant 0 : index
    %154 = vector.load %arg15[%c120, %c0_129] : memref<196x128xbf16, #tpu.memory_space<vmem>>, vector<4x128xbf16>
    %c30 = arith.constant 30 : index
    %c0_130 = arith.constant 0 : index
    %c0_131 = arith.constant 0 : index
    %155 = vector.load %arg6[%c30, %c0_130, %c0_131] : memref<49x128x256xbf16, #tpu.memory_space<vmem>>, vector<1x128x256xbf16>
    %156 = vector.shape_cast %155 : vector<1x128x256xbf16> to vector<128x256xbf16>
    %cst_132 = arith.constant dense<0.000000e+00> : vector<4x256xf32>
    %157 = tpu.matmul %154, %156, %cst_132 {dimension_numbers = #tpu.dot_dimension_numbers<[1], [0], [0], [1], [0, 0, 1, 1], [], []>} : vector<4x128xbf16>, vector<128x256xbf16>, vector<4x256xf32> -> vector<4x256xf32>
    %158 = arith.addf %153, %157 : vector<4x256xf32>
    %c124 = arith.constant 124 : index
    %c0_133 = arith.constant 0 : index
    %159 = vector.load %arg15[%c124, %c0_133] : memref<196x128xbf16, #tpu.memory_space<vmem>>, vector<4x128xbf16>
    %c31 = arith.constant 31 : index
    %c0_134 = arith.constant 0 : index
    %c0_135 = arith.constant 0 : index
    %160 = vector.load %arg6[%c31, %c0_134, %c0_135] : memref<49x128x256xbf16, #tpu.memory_space<vmem>>, vector<1x128x256xbf16>
    %161 = vector.shape_cast %160 : vector<1x128x256xbf16> to vector<128x256xbf16>
    %cst_136 = arith.constant dense<0.000000e+00> : vector<4x256xf32>
    %162 = tpu.matmul %159, %161, %cst_136 {dimension_numbers = #tpu.dot_dimension_numbers<[1], [0], [0], [1], [0, 0, 1, 1], [], []>} : vector<4x128xbf16>, vector<128x256xbf16>, vector<4x256xf32> -> vector<4x256xf32>
    %163 = arith.addf %158, %162 : vector<4x256xf32>
    %c128 = arith.constant 128 : index
    %c0_137 = arith.constant 0 : index
    %164 = vector.load %arg15[%c128, %c0_137] : memref<196x128xbf16, #tpu.memory_space<vmem>>, vector<4x128xbf16>
    %c32_138 = arith.constant 32 : index
    %c0_139 = arith.constant 0 : index
    %c0_140 = arith.constant 0 : index
    %165 = vector.load %arg6[%c32_138, %c0_139, %c0_140] : memref<49x128x256xbf16, #tpu.memory_space<vmem>>, vector<1x128x256xbf16>
    %166 = vector.shape_cast %165 : vector<1x128x256xbf16> to vector<128x256xbf16>
    %cst_141 = arith.constant dense<0.000000e+00> : vector<4x256xf32>
    %167 = tpu.matmul %164, %166, %cst_141 {dimension_numbers = #tpu.dot_dimension_numbers<[1], [0], [0], [1], [0, 0, 1, 1], [], []>} : vector<4x128xbf16>, vector<128x256xbf16>, vector<4x256xf32> -> vector<4x256xf32>
    %168 = arith.addf %163, %167 : vector<4x256xf32>
    %c132 = arith.constant 132 : index
    %c0_142 = arith.constant 0 : index
    %169 = vector.load %arg15[%c132, %c0_142] : memref<196x128xbf16, #tpu.memory_space<vmem>>, vector<4x128xbf16>
    %c33 = arith.constant 33 : index
    %c0_143 = arith.constant 0 : index
    %c0_144 = arith.constant 0 : index
    %170 = vector.load %arg6[%c33, %c0_143, %c0_144] : memref<49x128x256xbf16, #tpu.memory_space<vmem>>, vector<1x128x256xbf16>
    %171 = vector.shape_cast %170 : vector<1x128x256xbf16> to vector<128x256xbf16>
    %cst_145 = arith.constant dense<0.000000e+00> : vector<4x256xf32>
    %172 = tpu.matmul %169, %171, %cst_145 {dimension_numbers = #tpu.dot_dimension_numbers<[1], [0], [0], [1], [0, 0, 1, 1], [], []>} : vector<4x128xbf16>, vector<128x256xbf16>, vector<4x256xf32> -> vector<4x256xf32>
    %173 = arith.addf %168, %172 : vector<4x256xf32>
    %c136 = arith.constant 136 : index
    %c0_146 = arith.constant 0 : index
    %174 = vector.load %arg15[%c136, %c0_146] : memref<196x128xbf16, #tpu.memory_space<vmem>>, vector<4x128xbf16>
    %c34 = arith.constant 34 : index
    %c0_147 = arith.constant 0 : index
    %c0_148 = arith.constant 0 : index
    %175 = vector.load %arg6[%c34, %c0_147, %c0_148] : memref<49x128x256xbf16, #tpu.memory_space<vmem>>, vector<1x128x256xbf16>
    %176 = vector.shape_cast %175 : vector<1x128x256xbf16> to vector<128x256xbf16>
    %cst_149 = arith.constant dense<0.000000e+00> : vector<4x256xf32>
    %177 = tpu.matmul %174, %176, %cst_149 {dimension_numbers = #tpu.dot_dimension_numbers<[1], [0], [0], [1], [0, 0, 1, 1], [], []>} : vector<4x128xbf16>, vector<128x256xbf16>, vector<4x256xf32> -> vector<4x256xf32>
    %178 = arith.addf %173, %177 : vector<4x256xf32>
    %c140 = arith.constant 140 : index
    %c0_150 = arith.constant 0 : index
    %179 = vector.load %arg15[%c140, %c0_150] : memref<196x128xbf16, #tpu.memory_space<vmem>>, vector<4x128xbf16>
    %c35 = arith.constant 35 : index
    %c0_151 = arith.constant 0 : index
    %c0_152 = arith.constant 0 : index
    %180 = vector.load %arg6[%c35, %c0_151, %c0_152] : memref<49x128x256xbf16, #tpu.memory_space<vmem>>, vector<1x128x256xbf16>
    %181 = vector.shape_cast %180 : vector<1x128x256xbf16> to vector<128x256xbf16>
    %cst_153 = arith.constant dense<0.000000e+00> : vector<4x256xf32>
    %182 = tpu.matmul %179, %181, %cst_153 {dimension_numbers = #tpu.dot_dimension_numbers<[1], [0], [0], [1], [0, 0, 1, 1], [], []>} : vector<4x128xbf16>, vector<128x256xbf16>, vector<4x256xf32> -> vector<4x256xf32>
    %183 = arith.addf %178, %182 : vector<4x256xf32>
    %c144 = arith.constant 144 : index
    %c0_154 = arith.constant 0 : index
    %184 = vector.load %arg15[%c144, %c0_154] : memref<196x128xbf16, #tpu.memory_space<vmem>>, vector<4x128xbf16>
    %c36_155 = arith.constant 36 : index
    %c0_156 = arith.constant 0 : index
    %c0_157 = arith.constant 0 : index
    %185 = vector.load %arg6[%c36_155, %c0_156, %c0_157] : memref<49x128x256xbf16, #tpu.memory_space<vmem>>, vector<1x128x256xbf16>
    %186 = vector.shape_cast %185 : vector<1x128x256xbf16> to vector<128x256xbf16>
    %cst_158 = arith.constant dense<0.000000e+00> : vector<4x256xf32>
    %187 = tpu.matmul %184, %186, %cst_158 {dimension_numbers = #tpu.dot_dimension_numbers<[1], [0], [0], [1], [0, 0, 1, 1], [], []>} : vector<4x128xbf16>, vector<128x256xbf16>, vector<4x256xf32> -> vector<4x256xf32>
    %188 = arith.addf %183, %187 : vector<4x256xf32>
    %c148 = arith.constant 148 : index
    %c0_159 = arith.constant 0 : index
    %189 = vector.load %arg15[%c148, %c0_159] : memref<196x128xbf16, #tpu.memory_space<vmem>>, vector<4x128xbf16>
    %c37 = arith.constant 37 : index
    %c0_160 = arith.constant 0 : index
    %c0_161 = arith.constant 0 : index
    %190 = vector.load %arg6[%c37, %c0_160, %c0_161] : memref<49x128x256xbf16, #tpu.memory_space<vmem>>, vector<1x128x256xbf16>
    %191 = vector.shape_cast %190 : vector<1x128x256xbf16> to vector<128x256xbf16>
    %cst_162 = arith.constant dense<0.000000e+00> : vector<4x256xf32>
    %192 = tpu.matmul %189, %191, %cst_162 {dimension_numbers = #tpu.dot_dimension_numbers<[1], [0], [0], [1], [0, 0, 1, 1], [], []>} : vector<4x128xbf16>, vector<128x256xbf16>, vector<4x256xf32> -> vector<4x256xf32>
    %193 = arith.addf %188, %192 : vector<4x256xf32>
    %c152 = arith.constant 152 : index
    %c0_163 = arith.constant 0 : index
    %194 = vector.load %arg15[%c152, %c0_163] : memref<196x128xbf16, #tpu.memory_space<vmem>>, vector<4x128xbf16>
    %c38 = arith.constant 38 : index
    %c0_164 = arith.constant 0 : index
    %c0_165 = arith.constant 0 : index
    %195 = vector.load %arg6[%c38, %c0_164, %c0_165] : memref<49x128x256xbf16, #tpu.memory_space<vmem>>, vector<1x128x256xbf16>
    %196 = vector.shape_cast %195 : vector<1x128x256xbf16> to vector<128x256xbf16>
    %cst_166 = arith.constant dense<0.000000e+00> : vector<4x256xf32>
    %197 = tpu.matmul %194, %196, %cst_166 {dimension_numbers = #tpu.dot_dimension_numbers<[1], [0], [0], [1], [0, 0, 1, 1], [], []>} : vector<4x128xbf16>, vector<128x256xbf16>, vector<4x256xf32> -> vector<4x256xf32>
    %198 = arith.addf %193, %197 : vector<4x256xf32>
    %c156 = arith.constant 156 : index
    %c0_167 = arith.constant 0 : index
    %199 = vector.load %arg15[%c156, %c0_167] : memref<196x128xbf16, #tpu.memory_space<vmem>>, vector<4x128xbf16>
    %c39 = arith.constant 39 : index
    %c0_168 = arith.constant 0 : index
    %c0_169 = arith.constant 0 : index
    %200 = vector.load %arg6[%c39, %c0_168, %c0_169] : memref<49x128x256xbf16, #tpu.memory_space<vmem>>, vector<1x128x256xbf16>
    %201 = vector.shape_cast %200 : vector<1x128x256xbf16> to vector<128x256xbf16>
    %cst_170 = arith.constant dense<0.000000e+00> : vector<4x256xf32>
    %202 = tpu.matmul %199, %201, %cst_170 {dimension_numbers = #tpu.dot_dimension_numbers<[1], [0], [0], [1], [0, 0, 1, 1], [], []>} : vector<4x128xbf16>, vector<128x256xbf16>, vector<4x256xf32> -> vector<4x256xf32>
    %203 = arith.addf %198, %202 : vector<4x256xf32>
    %c160 = arith.constant 160 : index
    %c0_171 = arith.constant 0 : index
    %204 = vector.load %arg15[%c160, %c0_171] : memref<196x128xbf16, #tpu.memory_space<vmem>>, vector<4x128xbf16>
    %c40_172 = arith.constant 40 : index
    %c0_173 = arith.constant 0 : index
    %c0_174 = arith.constant 0 : index
    %205 = vector.load %arg6[%c40_172, %c0_173, %c0_174] : memref<49x128x256xbf16, #tpu.memory_space<vmem>>, vector<1x128x256xbf16>
    %206 = vector.shape_cast %205 : vector<1x128x256xbf16> to vector<128x256xbf16>
    %cst_175 = arith.constant dense<0.000000e+00> : vector<4x256xf32>
    %207 = tpu.matmul %204, %206, %cst_175 {dimension_numbers = #tpu.dot_dimension_numbers<[1], [0], [0], [1], [0, 0, 1, 1], [], []>} : vector<4x128xbf16>, vector<128x256xbf16>, vector<4x256xf32> -> vector<4x256xf32>
    %208 = arith.addf %203, %207 : vector<4x256xf32>
    %c164 = arith.constant 164 : index
    %c0_176 = arith.constant 0 : index
    %209 = vector.load %arg15[%c164, %c0_176] : memref<196x128xbf16, #tpu.memory_space<vmem>>, vector<4x128xbf16>
    %c41 = arith.constant 41 : index
    %c0_177 = arith.constant 0 : index
    %c0_178 = arith.constant 0 : index
    %210 = vector.load %arg6[%c41, %c0_177, %c0_178] : memref<49x128x256xbf16, #tpu.memory_space<vmem>>, vector<1x128x256xbf16>
    %211 = vector.shape_cast %210 : vector<1x128x256xbf16> to vector<128x256xbf16>
    %cst_179 = arith.constant dense<0.000000e+00> : vector<4x256xf32>
    %212 = tpu.matmul %209, %211, %cst_179 {dimension_numbers = #tpu.dot_dimension_numbers<[1], [0], [0], [1], [0, 0, 1, 1], [], []>} : vector<4x128xbf16>, vector<128x256xbf16>, vector<4x256xf32> -> vector<4x256xf32>
    %213 = arith.addf %208, %212 : vector<4x256xf32>
    %c168 = arith.constant 168 : index
    %c0_180 = arith.constant 0 : index
    %214 = vector.load %arg15[%c168, %c0_180] : memref<196x128xbf16, #tpu.memory_space<vmem>>, vector<4x128xbf16>
    %c42 = arith.constant 42 : index
    %c0_181 = arith.constant 0 : index
    %c0_182 = arith.constant 0 : index
    %215 = vector.load %arg6[%c42, %c0_181, %c0_182] : memref<49x128x256xbf16, #tpu.memory_space<vmem>>, vector<1x128x256xbf16>
    %216 = vector.shape_cast %215 : vector<1x128x256xbf16> to vector<128x256xbf16>
    %cst_183 = arith.constant dense<0.000000e+00> : vector<4x256xf32>
    %217 = tpu.matmul %214, %216, %cst_183 {dimension_numbers = #tpu.dot_dimension_numbers<[1], [0], [0], [1], [0, 0, 1, 1], [], []>} : vector<4x128xbf16>, vector<128x256xbf16>, vector<4x256xf32> -> vector<4x256xf32>
    %218 = arith.addf %213, %217 : vector<4x256xf32>
    %c172 = arith.constant 172 : index
    %c0_184 = arith.constant 0 : index
    %219 = vector.load %arg15[%c172, %c0_184] : memref<196x128xbf16, #tpu.memory_space<vmem>>, vector<4x128xbf16>
    %c43 = arith.constant 43 : index
    %c0_185 = arith.constant 0 : index
    %c0_186 = arith.constant 0 : index
    %220 = vector.load %arg6[%c43, %c0_185, %c0_186] : memref<49x128x256xbf16, #tpu.memory_space<vmem>>, vector<1x128x256xbf16>
    %221 = vector.shape_cast %220 : vector<1x128x256xbf16> to vector<128x256xbf16>
    %cst_187 = arith.constant dense<0.000000e+00> : vector<4x256xf32>
    %222 = tpu.matmul %219, %221, %cst_187 {dimension_numbers = #tpu.dot_dimension_numbers<[1], [0], [0], [1], [0, 0, 1, 1], [], []>} : vector<4x128xbf16>, vector<128x256xbf16>, vector<4x256xf32> -> vector<4x256xf32>
    %223 = arith.addf %218, %222 : vector<4x256xf32>
    %c176 = arith.constant 176 : index
    %c0_188 = arith.constant 0 : index
    %224 = vector.load %arg15[%c176, %c0_188] : memref<196x128xbf16, #tpu.memory_space<vmem>>, vector<4x128xbf16>
    %c44_189 = arith.constant 44 : index
    %c0_190 = arith.constant 0 : index
    %c0_191 = arith.constant 0 : index
    %225 = vector.load %arg6[%c44_189, %c0_190, %c0_191] : memref<49x128x256xbf16, #tpu.memory_space<vmem>>, vector<1x128x256xbf16>
    %226 = vector.shape_cast %225 : vector<1x128x256xbf16> to vector<128x256xbf16>
    %cst_192 = arith.constant dense<0.000000e+00> : vector<4x256xf32>
    %227 = tpu.matmul %224, %226, %cst_192 {dimension_numbers = #tpu.dot_dimension_numbers<[1], [0], [0], [1], [0, 0, 1, 1], [], []>} : vector<4x128xbf16>, vector<128x256xbf16>, vector<4x256xf32> -> vector<4x256xf32>
    %228 = arith.addf %223, %227 : vector<4x256xf32>
    %c180 = arith.constant 180 : index
    %c0_193 = arith.constant 0 : index
    %229 = vector.load %arg15[%c180, %c0_193] : memref<196x128xbf16, #tpu.memory_space<vmem>>, vector<4x128xbf16>
    %c45 = arith.constant 45 : index
    %c0_194 = arith.constant 0 : index
    %c0_195 = arith.constant 0 : index
    %230 = vector.load %arg6[%c45, %c0_194, %c0_195] : memref<49x128x256xbf16, #tpu.memory_space<vmem>>, vector<1x128x256xbf16>
    %231 = vector.shape_cast %230 : vector<1x128x256xbf16> to vector<128x256xbf16>
    %cst_196 = arith.constant dense<0.000000e+00> : vector<4x256xf32>
    %232 = tpu.matmul %229, %231, %cst_196 {dimension_numbers = #tpu.dot_dimension_numbers<[1], [0], [0], [1], [0, 0, 1, 1], [], []>} : vector<4x128xbf16>, vector<128x256xbf16>, vector<4x256xf32> -> vector<4x256xf32>
    %233 = arith.addf %228, %232 : vector<4x256xf32>
    %c184 = arith.constant 184 : index
    %c0_197 = arith.constant 0 : index
    %234 = vector.load %arg15[%c184, %c0_197] : memref<196x128xbf16, #tpu.memory_space<vmem>>, vector<4x128xbf16>
    %c46 = arith.constant 46 : index
    %c0_198 = arith.constant 0 : index
    %c0_199 = arith.constant 0 : index
    %235 = vector.load %arg6[%c46, %c0_198, %c0_199] : memref<49x128x256xbf16, #tpu.memory_space<vmem>>, vector<1x128x256xbf16>
    %236 = vector.shape_cast %235 : vector<1x128x256xbf16> to vector<128x256xbf16>
    %cst_200 = arith.constant dense<0.000000e+00> : vector<4x256xf32>
    %237 = tpu.matmul %234, %236, %cst_200 {dimension_numbers = #tpu.dot_dimension_numbers<[1], [0], [0], [1], [0, 0, 1, 1], [], []>} : vector<4x128xbf16>, vector<128x256xbf16>, vector<4x256xf32> -> vector<4x256xf32>
    %238 = arith.addf %233, %237 : vector<4x256xf32>
    %c188 = arith.constant 188 : index
    %c0_201 = arith.constant 0 : index
    %239 = vector.load %arg15[%c188, %c0_201] : memref<196x128xbf16, #tpu.memory_space<vmem>>, vector<4x128xbf16>
    %c47 = arith.constant 47 : index
    %c0_202 = arith.constant 0 : index
    %c0_203 = arith.constant 0 : index
    %240 = vector.load %arg6[%c47, %c0_202, %c0_203] : memref<49x128x256xbf16, #tpu.memory_space<vmem>>, vector<1x128x256xbf16>
    %241 = vector.shape_cast %240 : vector<1x128x256xbf16> to vector<128x256xbf16>
    %cst_204 = arith.constant dense<0.000000e+00> : vector<4x256xf32>
    %242 = tpu.matmul %239, %241, %cst_204 {dimension_numbers = #tpu.dot_dimension_numbers<[1], [0], [0], [1], [0, 0, 1, 1], [], []>} : vector<4x128xbf16>, vector<128x256xbf16>, vector<4x256xf32> -> vector<4x256xf32>
    %243 = arith.addf %238, %242 : vector<4x256xf32>
    %c192 = arith.constant 192 : index
    %c0_205 = arith.constant 0 : index
    %244 = vector.load %arg15[%c192, %c0_205] : memref<196x128xbf16, #tpu.memory_space<vmem>>, vector<4x128xbf16>
    %c48_206 = arith.constant 48 : index
    %c0_207 = arith.constant 0 : index
    %c0_208 = arith.constant 0 : index
    %245 = vector.load %arg6[%c48_206, %c0_207, %c0_208] : memref<49x128x256xbf16, #tpu.memory_space<vmem>>, vector<1x128x256xbf16>
    %246 = vector.shape_cast %245 : vector<1x128x256xbf16> to vector<128x256xbf16>
    %cst_209 = arith.constant dense<0.000000e+00> : vector<4x256xf32>
    %247 = tpu.matmul %244, %246, %cst_209 {dimension_numbers = #tpu.dot_dimension_numbers<[1], [0], [0], [1], [0, 0, 1, 1], [], []>} : vector<4x128xbf16>, vector<128x256xbf16>, vector<4x256xf32> -> vector<4x256xf32>
    %248 = arith.addf %243, %247 : vector<4x256xf32>
    %c0_210 = arith.constant 0 : index
    %c0_211 = arith.constant 0 : index
    %249 = vector.load %arg7[%c0_210, %c0_211] : memref<1x256xf32, #tpu.memory_space<vmem>>, vector<1x256xf32>
    %250 = vector.broadcast %249 : vector<1x256xf32> to vector<4x256xf32>
    %251 = arith.addf %248, %250 : vector<4x256xf32>
    %c0_212 = arith.constant 0 : index
    %c0_213 = arith.constant 0 : index
    %252 = vector.load %arg8[%c0_212, %c0_213] : memref<1x256xf32, #tpu.memory_space<vmem>>, vector<1x256xf32>
    %c0_214 = arith.constant 0 : index
    %c0_215 = arith.constant 0 : index
    %253 = vector.load %arg9[%c0_214, %c0_215] : memref<1x256xf32, #tpu.memory_space<vmem>>, vector<1x256xf32>
    %cst_216 = arith.constant dense<0.000000e+00> : vector<256xf32>
    %254 = vector.multi_reduction <add>, %251, %cst_216 [0] : vector<4x256xf32> to vector<256xf32>
    %255 = vector.shape_cast %254 : vector<256xf32> to vector<1x256xf32>
    %cst_217 = arith.constant 4.000000e+00 : f32
    %256 = vector.broadcast %cst_217 : f32 to vector<1x256xf32>
    %257 = arith.divf %255, %256 : vector<1x256xf32>
    %258 = arith.mulf %251, %251 : vector<4x256xf32>
    %cst_218 = arith.constant dense<0.000000e+00> : vector<256xf32>
    %259 = vector.multi_reduction <add>, %258, %cst_218 [0] : vector<4x256xf32> to vector<256xf32>
    %260 = vector.shape_cast %259 : vector<256xf32> to vector<1x256xf32>
    %cst_219 = arith.constant 4.000000e+00 : f32
    %261 = vector.broadcast %cst_219 : f32 to vector<1x256xf32>
    %262 = arith.divf %260, %261 : vector<1x256xf32>
    %263 = arith.mulf %257, %257 : vector<1x256xf32>
    %264 = arith.subf %262, %263 : vector<1x256xf32>
    %cst_220 = arith.constant 0.000000e+00 : f32
    %265 = vector.broadcast %cst_220 : f32 to vector<1x256xf32>
    %266 = arith.maximumf %264, %265 : vector<1x256xf32>
    %267 = vector.broadcast %257 : vector<1x256xf32> to vector<4x256xf32>
    %268 = arith.subf %251, %267 : vector<4x256xf32>
    %cst_221 = arith.constant 9.99999974E-6 : f32
    %269 = vector.broadcast %cst_221 : f32 to vector<1x256xf32>
    %270 = arith.addf %266, %269 : vector<1x256xf32>
    %271 = math.rsqrt %270 : vector<1x256xf32>
    %272 = vector.broadcast %271 : vector<1x256xf32> to vector<4x256xf32>
    %273 = arith.mulf %268, %272 : vector<4x256xf32>
    %274 = vector.broadcast %252 : vector<1x256xf32> to vector<4x256xf32>
    %275 = arith.mulf %273, %274 : vector<4x256xf32>
    %276 = vector.broadcast %253 : vector<1x256xf32> to vector<4x256xf32>
    %277 = arith.addf %275, %276 : vector<4x256xf32>
    %cst_222 = arith.constant 1.000000e-01 : f32
    %278 = vector.broadcast %cst_222 : f32 to vector<4x256xf32>
    %279 = arith.mulf %278, %277 : vector<4x256xf32>
    %280 = arith.maximumf %277, %279 : vector<4x256xf32>
    %c0_223 = arith.constant 0 : index
    %c0_224 = arith.constant 0 : index
    %281 = vector.load %arg16[%c0_223, %c0_224] : memref<4x32xf32, #tpu.memory_space<vmem>>, vector<4x32xf32>
    %282 = arith.truncf %280 : vector<4x256xf32> to vector<4x256xbf16>
    %c0_225 = arith.constant 0 : index
    %c0_226 = arith.constant 0 : index
    %283 = vector.load %arg10[%c0_225, %c0_226] : memref<256x32xbf16, #tpu.memory_space<vmem>>, vector<256x32xbf16>
    %cst_227 = arith.constant dense<0.000000e+00> : vector<4x32xf32>
    %284 = tpu.matmul %282, %283, %cst_227 {dimension_numbers = #tpu.dot_dimension_numbers<[1], [0], [0], [1], [0, 0, 1, 1], [], []>} : vector<4x256xbf16>, vector<256x32xbf16>, vector<4x32xf32> -> vector<4x32xf32>
    %285 = arith.addf %281, %284 : vector<4x32xf32>
    %c0_228 = arith.constant 0 : index
    %c0_229 = arith.constant 0 : index
    %286 = vector.load %arg16[%c0_228, %c0_229] : memref<4x32xf32, #tpu.memory_space<vmem>>, vector<4x32xf32>
    tpu.vector_store %arg16[%c0_228, %c0_229], %285 {strides = array<i32>} : memref<4x32xf32, #tpu.memory_space<vmem>>, vector<4x32xf32>,
    %c3_i32 = arith.constant 3 : i32
    %287 = arith.cmpi eq, %arg0, %c3_i32 : i32
    %288 = arith.extui %287 : i1 to i32
    %c0_i32_230 = arith.constant 0 : i32
    %289 = arith.cmpi ne, %288, %c0_i32_230 : i32
    scf.if %289 {
      %c0_231 = arith.constant 0 : index
      %c0_232 = arith.constant 0 : index
      %290 = vector.load %arg16[%c0_231, %c0_232] : memref<4x32xf32, #tpu.memory_space<vmem>>, vector<4x32xf32>
      %c0_233 = arith.constant 0 : index
      %c0_234 = arith.constant 0 : index
      %291 = vector.load %arg11[%c0_233, %c0_234] : memref<1x32xf32, #tpu.memory_space<vmem>>, vector<1x32xf32>
      %292 = vector.broadcast %291 : vector<1x32xf32> to vector<4x32xf32>
      %293 = arith.addf %290, %292 : vector<4x32xf32>
      %c0_235 = arith.constant 0 : index
      %c0_236 = arith.constant 0 : index
      %294 = vector.load %arg12[%c0_235, %c0_236] : memref<1x32xf32, #tpu.memory_space<vmem>>, vector<1x32xf32>
      %c0_237 = arith.constant 0 : index
      %c0_238 = arith.constant 0 : index
      %295 = vector.load %arg13[%c0_237, %c0_238] : memref<1x32xf32, #tpu.memory_space<vmem>>, vector<1x32xf32>
      %cst_239 = arith.constant dense<0.000000e+00> : vector<32xf32>
      %296 = vector.multi_reduction <add>, %293, %cst_239 [0] : vector<4x32xf32> to vector<32xf32>
      %297 = vector.shape_cast %296 : vector<32xf32> to vector<1x32xf32>
      %cst_240 = arith.constant 4.000000e+00 : f32
      %298 = vector.broadcast %cst_240 : f32 to vector<1x32xf32>
      %299 = arith.divf %297, %298 : vector<1x32xf32>
      %300 = arith.mulf %293, %293 : vector<4x32xf32>
      %cst_241 = arith.constant dense<0.000000e+00> : vector<32xf32>
      %301 = vector.multi_reduction <add>, %300, %cst_241 [0] : vector<4x32xf32> to vector<32xf32>
      %302 = vector.shape_cast %301 : vector<32xf32> to vector<1x32xf32>
      %cst_242 = arith.constant 4.000000e+00 : f32
      %303 = vector.broadcast %cst_242 : f32 to vector<1x32xf32>
      %304 = arith.divf %302, %303 : vector<1x32xf32>
      %305 = arith.mulf %299, %299 : vector<1x32xf32>
      %306 = arith.subf %304, %305 : vector<1x32xf32>
      %cst_243 = arith.constant 0.000000e+00 : f32
      %307 = vector.broadcast %cst_243 : f32 to vector<1x32xf32>
      %308 = arith.maximumf %306, %307 : vector<1x32xf32>
      %309 = vector.broadcast %299 : vector<1x32xf32> to vector<4x32xf32>
      %310 = arith.subf %293, %309 : vector<4x32xf32>
      %cst_244 = arith.constant 9.99999974E-6 : f32
      %311 = vector.broadcast %cst_244 : f32 to vector<1x32xf32>
      %312 = arith.addf %308, %311 : vector<1x32xf32>
      %313 = math.rsqrt %312 : vector<1x32xf32>
      %314 = vector.broadcast %313 : vector<1x32xf32> to vector<4x32xf32>
      %315 = arith.mulf %310, %314 : vector<4x32xf32>
      %316 = vector.broadcast %294 : vector<1x32xf32> to vector<4x32xf32>
      %317 = arith.mulf %315, %316 : vector<4x32xf32>
      %318 = vector.broadcast %295 : vector<1x32xf32> to vector<4x32xf32>
      %319 = arith.addf %317, %318 : vector<4x32xf32>
      %cst_245 = arith.constant 1.000000e-01 : f32
      %320 = vector.broadcast %cst_245 : f32 to vector<4x32xf32>
      %321 = arith.mulf %320, %319 : vector<4x32xf32>
      %322 = arith.maximumf %319, %321 : vector<4x32xf32>
      %c0_246 = arith.constant 0 : index
      %c0_247 = arith.constant 0 : index
      %323 = vector.load %arg14[%c0_246, %c0_247] : memref<4x32xf32, #tpu.memory_space<vmem>>, vector<4x32xf32>
      tpu.vector_store %arg14[%c0_246, %c0_247], %322 {strides = array<i32>} : memref<4x32xf32, #tpu.memory_space<vmem>>, vector<4x32xf32>,
    } else {
    }
    return
  }
  func.func @transform_0(%arg0: i32) -> (i32, i32) {
    %c0_i32 = arith.constant 0 : i32
    %c0_i32_0 = arith.constant 0 : i32
    %c0_i32_1 = arith.constant 0 : i32
    return %c0_i32, %c0_i32_0 : i32, i32
  }
  func.func @transform_1(%arg0: i32) -> (i32, i32) {
    %c0_i32 = arith.constant 0 : i32
    %c0_i32_0 = arith.constant 0 : i32
    %c0_i32_1 = arith.constant 0 : i32
    return %c0_i32, %c0_i32_0 : i32, i32
  }
  func.func @transform_2(%arg0: i32) -> (i32, i32) {
    %c0_i32 = arith.constant 0 : i32
    %c0_i32_0 = arith.constant 0 : i32
    %c0_i32_1 = arith.constant 0 : i32
    return %c0_i32, %c0_i32_0 : i32, i32
  }
  func.func @transform_3(%arg0: i32) -> (i32, i32) {
    %c0_i32 = arith.constant 0 : i32
    %c0_i32_0 = arith.constant 0 : i32
    %c0_i32_1 = arith.constant 0 : i32
    return %c0_i32, %c0_i32_0 : i32, i32
  }
  func.func @transform_4(%arg0: i32) -> (i32, i32) {
    %c0_i32 = arith.constant 0 : i32
    %c0_i32_0 = arith.constant 0 : i32
    %c0_i32_1 = arith.constant 0 : i32
    return %c0_i32, %c0_i32_0 : i32, i32
  }
  func.func @transform_5(%arg0: i32) -> (i32, i32, i32) {
    %c0_i32 = arith.constant 0 : i32
    %c0_i32_0 = arith.constant 0 : i32
    %c0_i32_1 = arith.constant 0 : i32
    return %c0_i32, %c0_i32_0, %arg0 : i32, i32, i32
  }
  func.func @transform_6(%arg0: i32) -> (i32, i32) {
    %c0_i32 = arith.constant 0 : i32
    %c0_i32_0 = arith.constant 0 : i32
    return %c0_i32, %arg0 : i32, i32
  }
  func.func @transform_7(%arg0: i32) -> (i32, i32) {
    %c0_i32 = arith.constant 0 : i32
    %c0_i32_0 = arith.constant 0 : i32
    return %c0_i32, %arg0 : i32, i32
  }
  func.func @transform_8(%arg0: i32) -> (i32, i32) {
    %c0_i32 = arith.constant 0 : i32
    %c0_i32_0 = arith.constant 0 : i32
    return %c0_i32, %arg0 : i32, i32
  }
  func.func @transform_9(%arg0: i32) -> (i32, i32) {
    %c0_i32 = arith.constant 0 : i32
    %c0_i32_0 = arith.constant 0 : i32
    return %arg0, %c0_i32 : i32, i32
  }
  func.func @transform_10(%arg0: i32) -> (i32, i32) {
    %c0_i32 = arith.constant 0 : i32
    %c0_i32_0 = arith.constant 0 : i32
    %c0_i32_1 = arith.constant 0 : i32
    return %c0_i32, %c0_i32_0 : i32, i32
  }
  func.func @transform_11(%arg0: i32) -> (i32, i32) {
    %c0_i32 = arith.constant 0 : i32
    %c0_i32_0 = arith.constant 0 : i32
    %c0_i32_1 = arith.constant 0 : i32
    return %c0_i32, %c0_i32_0 : i32, i32
  }
  func.func @transform_12(%arg0: i32) -> (i32, i32) {
    %c0_i32 = arith.constant 0 : i32
    %c0_i32_0 = arith.constant 0 : i32
    %c0_i32_1 = arith.constant 0 : i32
    return %c0_i32, %c0_i32_0 : i32, i32
  }
  func.func @transform_13(%arg0: i32) -> (i32, i32) {
    %c0_i32 = arith.constant 0 : i32
    %c0_i32_0 = arith.constant 0 : i32
    %c0_i32_1 = arith.constant 0 : i32
    return %c0_i32, %c0_i32_0 : i32, i32
  }
}

</mosaic_0001>

<bundles_post_ra>
// kernel: encoder2_forward.2
= control target key start
LH: loop header
LB: loop body
LE: loop exit
PB: predicated region body
PF: predicated region fallthrough
CT: control target
= control target key end

     0   :  { %8 = vsyncpa [#allocation3], 0  ;;  %s3134_s0 = inlined_call_operand.vmem [shape: bf16[784,16], index: 0, kind: input, shape index: {}]   ;;  %s3135_s1 = inlined_call_operand.hbm [shape: bf16[16,64], index: 1, kind: input, shape index: {}]   ;;  %s3136_s2 = inlined_call_operand.hbm [shape: f32[1,64], index: 2, kind: input, shape index: {}]   ;;  %s3137_s3 = inlined_call_operand.vmem [shape: bf16[784,64], index: 3, kind: output, shape index: {}]  }
   0x1   :  { %9 = vsyncpa [#allocation5], 0  ;;  %s2312_s12 = smov [#allocation2]  }
   0x2   :  { %s17_s13 = sshll.u32 %s2312_s12, 4  ;;  %s18_s13 = int_to_ptr.vmem [resolvable:$true] %s17_s13 }
   0x3   :  { %s2276_s14 = scalar_lea.vmem %s18_s13, 128  ;;  %p2281_p1 = scmp.lt.s32.totalorder %s18_s13, %s18_s13 }
   0x4   :  { %p2277_p0 = scmp.ne.s32.totalorder %s18_s13, %s2276_s14  ;;  %p2282_p2 = scmp.lt.s32.totalorder %s2276_s14, %s2276_s14 }
   0x6   :  { %p2283_p3 = por %p2282_p2, %p2281_p1 }
   0x8   :  { %p2284_p4 = pnand %p2283_p3, %p2277_p0 }
   0xa   :  { %2287 = shalt.err (!%p2284_p4)
}
   0xb   :  { %s2313_s15 = smov 64   ;;  %s2314_s16 = smov 4  }
   0xc   :  { %23 = dma.hbm_to_vmem [thread:$0]  %s3135_s1, 128, %s18_s13, [#allocation3], %s2313_s15, %s2313_s15, %s2314_s16  }
   0xd   :  { %s2315_s19 = smov [#allocation4]  }
   0xe   :  { %s30_s20 = sshll.u32 %s2315_s19, 4  ;;  %s31_s20 = int_to_ptr.vmem [resolvable:$true] %s30_s20 }
   0xf   :  { %s2296_s21 = scalar_lea.vmem %s31_s20, 16  ;;  %s2300_s22 = scalar_lea.vmem %s31_s20, 32 }
  0x10   :  { %p2297_p5 = scmp.ne.s32.totalorder %s31_s20, %s2296_s21  ;;  %p2301_p6 = scmp.lt.s32.totalorder %s31_s20, %s31_s20 }
  0x11   :  { %p2302_p7 = scmp.lt.s32.totalorder %s2300_s22, %s2296_s21 }
  0x13   :  { %p2303_p8 = por %p2302_p7, %p2301_p6 }
  0x15   :  { %p2304_p9 = pnand %p2303_p8, %p2297_p5 }
  0x17   :  { %2307 = shalt.err (!%p2304_p9)
}
  0x18   :  { %33 = dma.hbm_to_vmem [thread:$0]  %s3136_s2, 16, %s31_s20, [#allocation5]  }
  0x19   :  { %2308 = dma.done.wait [#allocation3], 128  }
  0x1a   :  { %2309 = vsyncadd [#allocation3], 4294967168 }
  0x1b   :  { %2310 = dma.done.wait [#allocation5], 16  }
  0x1c   :  { %2311 = vsyncadd [#allocation5], 4294967280  ;;  %v2316_v0 = vmov 0.0   ;;  %vm2317_vm0 = vmmov 0   ;;  %v2217_v1 = vld [vmem:[#allocation2] sm:$0xff]   ;;  %vm399_vm1 = vcmask 130048  }
  0x1d   :  { %2011 = vmatprep.subr.bf16.mxu0 %v2316_v0  ;;  %2209 = vmatprep.subr.bf16.mxu1 %v2316_v0  ;;  %v2218_v2 = vld [vmem:[%s3134_s0] sm:$0xff]   ;;  %v2219_v3 = vld [vmem:[%s3134_s0 + $0xc8] sm:$0xff]   ;;  %v2221_v5 = vld [vmem:[%s3134_s0 + $0xd0] sm:$0xff]   ;;  %vm1560_vm2 = vcmask 519168  }
  0x1e   :  { %2013 = vmatprep.mubr.msk.bf16.mxu0 %vm2317_vm0, %v2316_v0  ;;  %2113 = vmatprep.mubr.msk.bf16.mxu1 %vm2317_vm0, %v2316_v0  ;;  %v2220_v4 = vld [vmem:[%s3134_s0 + $0x8] sm:$0xff]   ;;  %v2222_v6 = vld [vmem:[%s3134_s0 + $0x10] sm:$0xff]   ;;  %v2223_v7 = vld [vmem:[%s3134_s0 + $0xd8] sm:$0xff]  }
  0x1f   :  { %2012 = vmatpush3.bf16.msra.mxu0 %v2217_v1  ;;  %2210 = vmatpush3.bf16.msra.mxu1 %v2217_v1  ;;  %v2224_v8 = vld [vmem:[%s3134_s0 + $0x18] sm:$0xff]   ;;  %v2225_v9 = vld [vmem:[%s3134_s0 + $0xe0] sm:$0xff]   ;;  %v2227_v11 = vld [vmem:[%s3134_s0 + $0xe8] sm:$0xff]  }
  0x20   :  { %v2226_v10 = vld [vmem:[%s3134_s0 + $0x20] sm:$0xff]   ;;  %v2228_v12 = vld [vmem:[%s3134_s0 + $0x28] sm:$0xff]   ;;  %v2229_v13 = vld [vmem:[%s3134_s0 + $0xf0] sm:$0xff]  }
  0x21   :  { %v2230_v14 = vld [vmem:[%s3134_s0 + $0x30] sm:$0xff]   ;;  %v2231_v15 = vld [vmem:[%s3134_s0 + $0xf8] sm:$0xff]   ;;  %v2233_v17 = vld [vmem:[%s3134_s0 + $0x100] sm:$0xff]  }
  0x22   :  { %2014 = vmatmul.mubr.msk.bf16.vlgmr.msra.gmra.mxu0 %vm399_vm1, %v2218_v2  ;;  %2114 = vmatmul.mubr.msk.bf16.vlgmr.msra.gmra.mxu1 %vm399_vm1, %v2219_v3  ;;  %v2232_v16 = vld [vmem:[%s3134_s0 + $0x38] sm:$0xff]   ;;  %v2234_v18 = vld [vmem:[%s3134_s0 + $0x40] sm:$0xff]   ;;  %v2235_v19 = vld [vmem:[%s3134_s0 + $0x108] sm:$0xff]  }
  0x23   :  { %2017 = vmatprep.mubr.msk.bf16.mxu0 %vm2317_vm0, %v2316_v0  ;;  %2117 = vmatprep.mubr.msk.bf16.mxu1 %vm2317_vm0, %v2316_v0  ;;  %v2236_v20 = vld [vmem:[%s3134_s0 + $0x48] sm:$0xff]   ;;  %v2237_v21 = vld [vmem:[%s3134_s0 + $0x110] sm:$0xff]   ;;  %v2239_v23 = vld [vmem:[%s3134_s0 + $0x118] sm:$0xff]  }
  0x24   :  { %v2238_v22 = vld [vmem:[%s3134_s0 + $0x50] sm:$0xff]   ;;  %v2240_v24 = vld [vmem:[%s3134_s0 + $0x58] sm:$0xff]   ;;  %v2241_v25 = vld [vmem:[%s3134_s0 + $0x120] sm:$0xff]  }
  0x25   :  { %v2242_v26 = vld [vmem:[%s3134_s0 + $0x60] sm:$0xff]   ;;  %v2243_v27 = vld [vmem:[%s3134_s0 + $0x128] sm:$0xff]   ;;  %v2245_v29 = vld [vmem:[%s3134_s0 + $0x130] sm:$0xff]  }
  0x26   :  { %v2244_v28 = vld [vmem:[%s3134_s0 + $0x68] sm:$0xff]   ;;  %v2246_v30 = vld [vmem:[%s3134_s0 + $0x70] sm:$0xff]   ;;  %v2247_v31 = vld [vmem:[%s3134_s0 + $0x138] sm:$0xff]  }
  0x27   :  { %v2248_v32 = vld [vmem:[%s3134_s0 + $0x78] sm:$0xff]   ;;  %v2249_v33 = vld [vmem:[%s3134_s0 + $0x140] sm:$0xff]   ;;  %v2251_v35 = vld [vmem:[%s3134_s0 + $0x148] sm:$0xff]  }
  0x28   :  { %v2250_v34 = vld [vmem:[%s3134_s0 + $0x80] sm:$0xff]   ;;  %v2252_v36 = vld [vmem:[%s3134_s0 + $0x88] sm:$0xff]   ;;  %v2253_v37 = vld [vmem:[%s3134_s0 + $0x150] sm:$0xff]  }
  0x29   :  { %v2254_v38 = vld [vmem:[%s3134_s0 + $0x90] sm:$0xff]   ;;  %v2255_v39 = vld [vmem:[%s3134_s0 + $0x158] sm:$0xff]   ;;  %v2257_v41 = vld [vmem:[%s3134_s0 + $0x160] sm:$0xff]  }
  0x2a   :  { %2018 = vmatmul.mubr.msk.bf16.gmra.mxu0 %vm399_vm1, %v2220_v4  ;;  %2118 = vmatmul.mubr.msk.bf16.gmra.mxu1 %vm399_vm1, %v2221_v5  ;;  %v2256_v40 = vld [vmem:[%s3134_s0 + $0x98] sm:$0xff]   ;;  %v2258_v42 = vld [vmem:[%s3134_s0 + $0xa0] sm:$0xff]   ;;  %v2259_v43 = vld [vmem:[%s3134_s0 + $0x168] sm:$0xff]  }
  0x2b   :  { %2021 = vmatprep.mubr.msk.bf16.mxu0 %vm2317_vm0, %v2316_v0  ;;  %2121 = vmatprep.mubr.msk.bf16.mxu1 %vm2317_vm0, %v2316_v0  ;;  %v2260_v44 = vld [vmem:[%s3134_s0 + $0xa8] sm:$0xff]   ;;  %v2261_v45 = vld [vmem:[%s3134_s0 + $0x170] sm:$0xff]   ;;  %v2263_v47 = vld [vmem:[%s3134_s0 + $0x178] sm:$0xff]  }
  0x2c   :  { %v2262_v46 = vld [vmem:[%s3134_s0 + $0xb0] sm:$0xff]   ;;  %v2264_v48 = vld [vmem:[%s3134_s0 + $0xb8] sm:$0xff]   ;;  %v2265_v49 = vld [vmem:[%s3134_s0 + $0x180] sm:$0xff]  }
  0x2d   :  { %v2266_v50 = vld [vmem:[%s3134_s0 + $0xc0] sm:$0xff]   ;;  %v2639_v51 = vld [vmem:[#allocation4] ss:$0 sm:$0xff] }
  0x32   :  { %2022 = vmatmul.mubr.msk.bf16.gmra.mxu0 %vm399_vm1, %v2222_v6  ;;  %2122 = vmatmul.mubr.msk.bf16.gmra.mxu1 %vm399_vm1, %v2223_v7 }
  0x33   :  { %2025 = vmatprep.mubr.msk.bf16.mxu0 %vm2317_vm0, %v2316_v0  ;;  %2125 = vmatprep.mubr.msk.bf16.mxu1 %vm2317_vm0, %v2316_v0 }
  0x3a   :  { %2026 = vmatmul.mubr.msk.bf16.gmra.mxu0 %vm399_vm1, %v2224_v8  ;;  %2126 = vmatmul.mubr.msk.bf16.gmra.mxu1 %vm399_vm1, %v2225_v9 }
  0x3b   :  { %2029 = vmatprep.mubr.msk.bf16.mxu0 %vm2317_vm0, %v2316_v0  ;;  %2129 = vmatprep.mubr.msk.bf16.mxu1 %vm2317_vm0, %v2316_v0 }
  0x42   :  { %2030 = vmatmul.mubr.msk.bf16.gmra.mxu0 %vm399_vm1, %v2226_v10  ;;  %2130 = vmatmul.mubr.msk.bf16.gmra.mxu1 %vm399_vm1, %v2227_v11 }
  0x43   :  { %2033 = vmatprep.mubr.msk.bf16.mxu0 %vm2317_vm0, %v2316_v0  ;;  %2133 = vmatprep.mubr.msk.bf16.mxu1 %vm2317_vm0, %v2316_v0 }
  0x4a   :  { %2034 = vmatmul.mubr.msk.bf16.gmra.mxu0 %vm399_vm1, %v2228_v12  ;;  %2134 = vmatmul.mubr.msk.bf16.gmra.mxu1 %vm399_vm1, %v2229_v13 }
  0x4b   :  { %2037 = vmatprep.mubr.msk.bf16.mxu0 %vm2317_vm0, %v2316_v0  ;;  %2137 = vmatprep.mubr.msk.bf16.mxu1 %vm2317_vm0, %v2316_v0 }
  0x52   :  { %2038 = vmatmul.mubr.msk.bf16.gmra.mxu0 %vm399_vm1, %v2230_v14  ;;  %2138 = vmatmul.mubr.msk.bf16.gmra.mxu1 %vm399_vm1, %v2231_v15 }
  0x53   :  { %2041 = vmatprep.mubr.msk.bf16.mxu0 %vm2317_vm0, %v2316_v0  ;;  %2141 = vmatprep.mubr.msk.bf16.mxu1 %vm2317_vm0, %v2316_v0 }
  0x5a   :  { %2042 = vmatmul.mubr.msk.bf16.gmra.mxu0 %vm399_vm1, %v2232_v16  ;;  %2142 = vmatmul.mubr.msk.bf16.gmra.mxu1 %vm399_vm1, %v2233_v17 }
  0x5b   :  { %2045 = vmatprep.mubr.msk.bf16.mxu0 %vm2317_vm0, %v2316_v0  ;;  %2145 = vmatprep.mubr.msk.bf16.mxu1 %vm2317_vm0, %v2316_v0 }
  0x62   :  { %2046 = vmatmul.mubr.msk.bf16.gmra.mxu0 %vm399_vm1, %v2234_v18  ;;  %2146 = vmatmul.mubr.msk.bf16.gmra.mxu1 %vm399_vm1, %v2235_v19 }
  0x63   :  { %2049 = vmatprep.mubr.msk.bf16.mxu0 %vm2317_vm0, %v2316_v0  ;;  %2149 = vmatprep.mubr.msk.bf16.mxu1 %vm2317_vm0, %v2316_v0 }
  0x6a   :  { %2050 = vmatmul.mubr.msk.bf16.gmra.mxu0 %vm399_vm1, %v2236_v20  ;;  %2150 = vmatmul.mubr.msk.bf16.gmra.mxu1 %vm399_vm1, %v2237_v21 }
  0x6b   :  { %2053 = vmatprep.mubr.msk.bf16.mxu0 %vm2317_vm0, %v2316_v0  ;;  %2153 = vmatprep.mubr.msk.bf16.mxu1 %vm2317_vm0, %v2316_v0 }
  0x72   :  { %2054 = vmatmul.mubr.msk.bf16.gmra.mxu0 %vm399_vm1, %v2238_v22  ;;  %2154 = vmatmul.mubr.msk.bf16.gmra.mxu1 %vm399_vm1, %v2239_v23 }
  0x73   :  { %2057 = vmatprep.mubr.msk.bf16.mxu0 %vm2317_vm0, %v2316_v0  ;;  %2157 = vmatprep.mubr.msk.bf16.mxu1 %vm2317_vm0, %v2316_v0 }
  0x7a   :  { %2058 = vmatmul.mubr.msk.bf16.gmra.mxu0 %vm399_vm1, %v2240_v24  ;;  %2158 = vmatmul.mubr.msk.bf16.gmra.mxu1 %vm399_vm1, %v2241_v25 }
  0x7b   :  { %2061 = vmatprep.mubr.msk.bf16.mxu0 %vm2317_vm0, %v2316_v0  ;;  %2161 = vmatprep.mubr.msk.bf16.mxu1 %vm2317_vm0, %v2316_v0 }
  0x82   :  { %2062 = vmatmul.mubr.msk.bf16.gmra.mxu0 %vm399_vm1, %v2242_v26  ;;  %2162 = vmatmul.mubr.msk.bf16.gmra.mxu1 %vm399_vm1, %v2243_v27 }
  0x83   :  { %2065 = vmatprep.mubr.msk.bf16.mxu0 %vm2317_vm0, %v2316_v0  ;;  %2165 = vmatprep.mubr.msk.bf16.mxu1 %vm2317_vm0, %v2316_v0 }
  0x8a   :  { %2066 = vmatmul.mubr.msk.bf16.gmra.mxu0 %vm399_vm1, %v2244_v28  ;;  %2166 = vmatmul.mubr.msk.bf16.gmra.mxu1 %vm399_vm1, %v2245_v29 }
  0x8b   :  { %2069 = vmatprep.mubr.msk.bf16.mxu0 %vm2317_vm0, %v2316_v0  ;;  %2169 = vmatprep.mubr.msk.bf16.mxu1 %vm2317_vm0, %v2316_v0 }
  0x92   :  { %2070 = vmatmul.mubr.msk.bf16.gmra.mxu0 %vm399_vm1, %v2246_v30  ;;  %2170 = vmatmul.mubr.msk.bf16.gmra.mxu1 %vm399_vm1, %v2247_v31 }
  0x93   :  { %2073 = vmatprep.mubr.msk.bf16.mxu0 %vm2317_vm0, %v2316_v0  ;;  %2173 = vmatprep.mubr.msk.bf16.mxu1 %vm2317_vm0, %v2316_v0 }
  0x9a   :  { %2074 = vmatmul.mubr.msk.bf16.gmra.mxu0 %vm399_vm1, %v2248_v32  ;;  %2174 = vmatmul.mubr.msk.bf16.gmra.mxu1 %vm399_vm1, %v2249_v33 }
  0x9b   :  { %2077 = vmatprep.mubr.msk.bf16.mxu0 %vm2317_vm0, %v2316_v0  ;;  %2177 = vmatprep.mubr.msk.bf16.mxu1 %vm2317_vm0, %v2316_v0 }
  0xa2   :  { %2078 = vmatmul.mubr.msk.bf16.gmra.mxu0 %vm399_vm1, %v2250_v34  ;;  %2178 = vmatmul.mubr.msk.bf16.gmra.mxu1 %vm399_vm1, %v2251_v35 }
  0xa3   :  { %2081 = vmatprep.mubr.msk.bf16.mxu0 %vm2317_vm0, %v2316_v0  ;;  %2181 = vmatprep.mubr.msk.bf16.mxu1 %vm2317_vm0, %v2316_v0 }
  0xaa   :  { %2082 = vmatmul.mubr.msk.bf16.gmra.mxu0 %vm399_vm1, %v2252_v36  ;;  %2182 = vmatmul.mubr.msk.bf16.gmra.mxu1 %vm399_vm1, %v2253_v37 }
  0xab   :  { %2085 = vmatprep.mubr.msk.bf16.mxu0 %vm2317_vm0, %v2316_v0  ;;  %2185 = vmatprep.mubr.msk.bf16.mxu1 %vm2317_vm0, %v2316_v0 }
  0xb2   :  { %2086 = vmatmul.mubr.msk.bf16.gmra.mxu0 %vm399_vm1, %v2254_v38  ;;  %2186 = vmatmul.mubr.msk.bf16.gmra.mxu1 %vm399_vm1, %v2255_v39 }
  0xb3   :  { %2089 = vmatprep.mubr.msk.bf16.mxu0 %vm2317_vm0, %v2316_v0  ;;  %2189 = vmatprep.mubr.msk.bf16.mxu1 %vm2317_vm0, %v2316_v0 }
  0xba   :  { %2090 = vmatmul.mubr.msk.bf16.gmra.mxu0 %vm399_vm1, %v2256_v40  ;;  %2190 = vmatmul.mubr.msk.bf16.gmra.mxu1 %vm399_vm1, %v2257_v41 }
  0xbb   :  { %2093 = vmatprep.mubr.msk.bf16.mxu0 %vm2317_vm0, %v2316_v0  ;;  %2193 = vmatprep.mubr.msk.bf16.mxu1 %vm2317_vm0, %v2316_v0 }
  0xc2   :  { %2094 = vmatmul.mubr.msk.bf16.gmra.mxu0 %vm399_vm1, %v2258_v42  ;;  %2194 = vmatmul.mubr.msk.bf16.gmra.mxu1 %vm399_vm1, %v2259_v43 }
  0xc3   :  { %2097 = vmatprep.mubr.msk.bf16.mxu0 %vm2317_vm0, %v2316_v0  ;;  %2197 = vmatprep.mubr.msk.bf16.mxu1 %vm2317_vm0, %v2316_v0 }
  0xca   :  { %2098 = vmatmul.mubr.msk.bf16.gmra.mxu0 %vm399_vm1, %v2260_v44  ;;  %2198 = vmatmul.mubr.msk.bf16.gmra.mxu1 %vm399_vm1, %v2261_v45 }
  0xcb   :  { %2101 = vmatprep.mubr.msk.bf16.mxu0 %vm2317_vm0, %v2316_v0  ;;  %2201 = vmatprep.mubr.msk.bf16.mxu1 %vm2317_vm0, %v2316_v0 }
  0xd2   :  { %2102 = vmatmul.mubr.msk.bf16.gmra.mxu0 %vm399_vm1, %v2262_v46  ;;  %2202 = vmatmul.mubr.msk.bf16.gmra.mxu1 %vm399_vm1, %v2263_v47 }
  0xd3   :  { %2105 = vmatprep.mubr.msk.bf16.mxu0 %vm2317_vm0, %v2316_v0  ;;  %2205 = vmatprep.mubr.msk.bf16.mxu1 %vm2317_vm0, %v2316_v0 }
  0xda   :  { %2106 = vmatmul.mubr.msk.bf16.gmra.mxu0 %vm399_vm1, %v2264_v48  ;;  %2206 = vmatmul.mubr.msk.bf16.gmra.mxu1 %vm399_vm1, %v2265_v49 }
  0xdb   :  { %2109 = vmatprep.mubr.msk.bf16.mxu0 %vm2317_vm0, %v2316_v0 }
  0xe2   :  { %v581_v52 = vpop.f32.mrf.mxu0  ;;  %2110 = vmatmul.mubr.msk.bf16.gmra.mxu0 %vm399_vm1, %v2266_v50  ;;  %v781_v53 = vpop.f32.mrf.mxu1 }
  0xe3   :  { %v582_v54 = vadd.f32 %v2639_v51, %v581_v52  ;;  %v782_v55 = vadd.f32 %v2639_v51, %v781_v53 }
  0xe4   :  { %v2015_v56 = vpop.f32.mrf.mxu0  ;;  %v2115_v57 = vpop.f32.mrf.mxu1 }
  0xe5   :  { %v972_v58 = vmul.f32 0.1, %v582_v54  ;;  %v1022_v59 = vmul.f32 0.1, %v782_v55 }
  0xe6   :  { %v584_v60 = vpop.f32.mrf.mxu0  ;;  %v784_v61 = vpop.f32.mrf.mxu1 }
  0xe7   :  { %v1070_v62 = vmax.f32 %v582_v54, %v972_v58  ;;  %v1120_v63 = vmax.f32 %v782_v55, %v1022_v59  ;;  %v585_v0 = vadd.f32 %v2639_v51, %v584_v60  ;;  %v785_v1 = vadd.f32 %v2639_v51, %v784_v61 }
  0xe8   :  { %v2016_v2 = vpop.f32.mrf.mxu0  ;;  %v2116_v3 = vpop.f32.mrf.mxu1 }
  0xe9   :  { %v1863_v4 = vpack.c.bf16 %v1070_v62, %v1070_v62  ;;  %v1913_v5 = vpack.c.bf16 %v1120_v63, %v1120_v63  ;;  %v973_v6 = vmul.f32 0.1, %v585_v0  ;;  %v1023_v7 = vmul.f32 0.1, %v785_v1 }
  0xea   :  { %v589_v8 = vpop.f32.mrf.mxu0  ;;  %v789_v9 = vpop.f32.mrf.mxu1 }
  0xeb   :  { %1561 = vst.msk [vmem:[%s3137_s3] sm:$0xf] %vm1560_vm2, %v1863_v4  ;;  %1611 = vst.msk [vmem:[%s3137_s3 + $0xc8] sm:$0xf] %vm1560_vm2, %v1913_v5  ;;  %v1071_v10 = vmax.f32 %v585_v0, %v973_v6  ;;  %v1121_v11 = vmax.f32 %v785_v1, %v1023_v7  ;;  %v590_v12 = vadd.f32 %v2639_v51, %v589_v8 }
  0xec   :  { %v790_v13 = vadd.f32 %v2639_v51, %v789_v9  ;;  %v2019_v14 = vpop.f32.mrf.mxu0  ;;  %v2119_v15 = vpop.f32.mrf.mxu1 }
  0xed   :  { %v1864_v16 = vpack.c.bf16 %v1071_v10, %v1071_v10  ;;  %v1914_v17 = vpack.c.bf16 %v1121_v11, %v1121_v11  ;;  %v974_v18 = vmul.f32 0.1, %v590_v12 }
  0xee   :  { %v1024_v19 = vmul.f32 0.1, %v790_v13  ;;  %v592_v20 = vpop.f32.mrf.mxu0  ;;  %v792_v21 = vpop.f32.mrf.mxu1 }
  0xef   :  { %1562 = vst.msk [vmem:[%s3137_s3 + $0x4] sm:$0xf] %vm1560_vm2, %v1864_v16  ;;  %1612 = vst.msk [vmem:[%s3137_s3 + $0xcc] sm:$0xf] %vm1560_vm2, %v1914_v17  ;;  %v1072_v22 = vmax.f32 %v590_v12, %v974_v18  ;;  %v593_v24 = vadd.f32 %v2639_v51, %v592_v20  ;;  %v793_v25 = vadd.f32 %v2639_v51, %v792_v21 }
  0xf0   :  { %v1122_v23 = vmax.f32 %v790_v13, %v1024_v19  ;;  %v2020_v26 = vpop.f32.mrf.mxu0  ;;  %v2120_v27 = vpop.f32.mrf.mxu1 }
  0xf1   :  { %v1865_v28 = vpack.c.bf16 %v1072_v22, %v1072_v22  ;;  %v975_v30 = vmul.f32 0.1, %v593_v24  ;;  %v1025_v31 = vmul.f32 0.1, %v793_v25 }
  0xf2   :  { %v1915_v29 = vpack.c.bf16 %v1122_v23, %v1122_v23  ;;  %v597_v32 = vpop.f32.mrf.mxu0  ;;  %v797_v33 = vpop.f32.mrf.mxu1 }
  0xf3   :  { %1563 = vst.msk [vmem:[%s3137_s3 + $0x8] sm:$0xf] %vm1560_vm2, %v1865_v28  ;;  %v1073_v34 = vmax.f32 %v593_v24, %v975_v30  ;;  %v1123_v35 = vmax.f32 %v793_v25, %v1025_v31  ;;  %v598_v36 = vadd.f32 %v2639_v51, %v597_v32  ;;  %v798_v37 = vadd.f32 %v2639_v51, %v797_v33 }
  0xf4   :  { %1613 = vst.msk [vmem:[%s3137_s3 + $0xd0] sm:$0xf] %vm1560_vm2, %v1915_v29  ;;  %v2023_v38 = vpop.f32.mrf.mxu0  ;;  %v2123_v39 = vpop.f32.mrf.mxu1 }
  0xf5   :  { %v1866_v40 = vpack.c.bf16 %v1073_v34, %v1073_v34  ;;  %v1916_v41 = vpack.c.bf16 %v1123_v35, %v1123_v35  ;;  %v976_v42 = vmul.f32 0.1, %v598_v36  ;;  %v1026_v43 = vmul.f32 0.1, %v798_v37 }
  0xf6   :  { %v600_v44 = vpop.f32.mrf.mxu0  ;;  %v800_v45 = vpop.f32.mrf.mxu1 }
  0xf7   :  { %1564 = vst.msk [vmem:[%s3137_s3 + $0xc] sm:$0xf] %vm1560_vm2, %v1866_v40  ;;  %1614 = vst.msk [vmem:[%s3137_s3 + $0xd4] sm:$0xf] %vm1560_vm2, %v1916_v41  ;;  %v1074_v46 = vmax.f32 %v598_v36, %v976_v42  ;;  %v1124_v47 = vmax.f32 %v798_v37, %v1026_v43  ;;  %v601_v48 = vadd.f32 %v2639_v51, %v600_v44 }
  0xf8   :  { %v801_v49 = vadd.f32 %v2639_v51, %v800_v45  ;;  %v2024_v50 = vpop.f32.mrf.mxu0  ;;  %v2124_v52 = vpop.f32.mrf.mxu1 }
  0xf9   :  { %v1867_v53 = vpack.c.bf16 %v1074_v46, %v1074_v46  ;;  %v1917_v54 = vpack.c.bf16 %v1124_v47, %v1124_v47  ;;  %v977_v55 = vmul.f32 0.1, %v601_v48 }
  0xfa   :  { %v1027_v56 = vmul.f32 0.1, %v801_v49  ;;  %v605_v57 = vpop.f32.mrf.mxu0  ;;  %v805_v58 = vpop.f32.mrf.mxu1 }
  0xfb   :  { %1565 = vst.msk [vmem:[%s3137_s3 + $0x10] sm:$0xf] %vm1560_vm2, %v1867_v53  ;;  %1615 = vst.msk [vmem:[%s3137_s3 + $0xd8] sm:$0xf] %vm1560_vm2, %v1917_v54  ;;  %v1075_v59 = vmax.f32 %v601_v48, %v977_v55  ;;  %v606_v61 = vadd.f32 %v2639_v51, %v605_v57  ;;  %v806_v62 = vadd.f32 %v2639_v51, %v805_v58 }
  0xfc   :  { %v1125_v60 = vmax.f32 %v801_v49, %v1027_v56  ;;  %v2027_v63 = vpop.f32.mrf.mxu0  ;;  %v2127_v0 = vpop.f32.mrf.mxu1 }
  0xfd   :  { %v1868_v1 = vpack.c.bf16 %v1075_v59, %v1075_v59  ;;  %v978_v3 = vmul.f32 0.1, %v606_v61  ;;  %v1028_v4 = vmul.f32 0.1, %v806_v62 }
  0xfe   :  { %v1918_v2 = vpack.c.bf16 %v1125_v60, %v1125_v60  ;;  %v608_v5 = vpop.f32.mrf.mxu0  ;;  %v808_v6 = vpop.f32.mrf.mxu1 }
  0xff   :  { %1566 = vst.msk [vmem:[%s3137_s3 + $0x14] sm:$0xf] %vm1560_vm2, %v1868_v1  ;;  %v1076_v7 = vmax.f32 %v606_v61, %v978_v3  ;;  %v1126_v8 = vmax.f32 %v806_v62, %v1028_v4  ;;  %v609_v9 = vadd.f32 %v2639_v51, %v608_v5  ;;  %v809_v10 = vadd.f32 %v2639_v51, %v808_v6 }
 0x100   :  { %1616 = vst.msk [vmem:[%s3137_s3 + $0xdc] sm:$0xf] %vm1560_vm2, %v1918_v2  ;;  %v2028_v11 = vpop.f32.mrf.mxu0  ;;  %v2128_v12 = vpop.f32.mrf.mxu1 }
 0x101   :  { %v1869_v13 = vpack.c.bf16 %v1076_v7, %v1076_v7  ;;  %v1919_v14 = vpack.c.bf16 %v1126_v8, %v1126_v8  ;;  %v979_v15 = vmul.f32 0.1, %v609_v9  ;;  %v1029_v16 = vmul.f32 0.1, %v809_v10 }
 0x102   :  { %v613_v17 = vpop.f32.mrf.mxu0  ;;  %v813_v18 = vpop.f32.mrf.mxu1 }
 0x103   :  { %1567 = vst.msk [vmem:[%s3137_s3 + $0x18] sm:$0xf] %vm1560_vm2, %v1869_v13  ;;  %1617 = vst.msk [vmem:[%s3137_s3 + $0xe0] sm:$0xf] %vm1560_vm2, %v1919_v14  ;;  %v1077_v19 = vmax.f32 %v609_v9, %v979_v15  ;;  %v1127_v20 = vmax.f32 %v809_v10, %v1029_v16  ;;  %v614_v21 = vadd.f32 %v2639_v51, %v613_v17 }
 0x104   :  { %v814_v22 = vadd.f32 %v2639_v51, %v813_v18  ;;  %v2031_v23 = vpop.f32.mrf.mxu0  ;;  %v2131_v24 = vpop.f32.mrf.mxu1 }
 0x105   :  { %v1870_v25 = vpack.c.bf16 %v1077_v19, %v1077_v19  ;;  %v1920_v26 = vpack.c.bf16 %v1127_v20, %v1127_v20  ;;  %v980_v27 = vmul.f32 0.1, %v614_v21 }
 0x106   :  { %v1030_v28 = vmul.f32 0.1, %v814_v22  ;;  %v616_v29 = vpop.f32.mrf.mxu0  ;;  %v816_v30 = vpop.f32.mrf.mxu1 }
 0x107   :  { %1568 = vst.msk [vmem:[%s3137_s3 + $0x1c] sm:$0xf] %vm1560_vm2, %v1870_v25  ;;  %1618 = vst.msk [vmem:[%s3137_s3 + $0xe4] sm:$0xf] %vm1560_vm2, %v1920_v26  ;;  %v1078_v31 = vmax.f32 %v614_v21, %v980_v27  ;;  %v617_v33 = vadd.f32 %v2639_v51, %v616_v29  ;;  %v817_v34 = vadd.f32 %v2639_v51, %v816_v30 }
 0x108   :  { %v1128_v32 = vmax.f32 %v814_v22, %v1030_v28  ;;  %v2032_v35 = vpop.f32.mrf.mxu0  ;;  %v2132_v36 = vpop.f32.mrf.mxu1 }
 0x109   :  { %v1871_v37 = vpack.c.bf16 %v1078_v31, %v1078_v31  ;;  %v981_v39 = vmul.f32 0.1, %v617_v33  ;;  %v1031_v40 = vmul.f32 0.1, %v817_v34 }
 0x10a   :  { %v1921_v38 = vpack.c.bf16 %v1128_v32, %v1128_v32  ;;  %v621_v41 = vpop.f32.mrf.mxu0  ;;  %v821_v42 = vpop.f32.mrf.mxu1 }
 0x10b   :  { %1569 = vst.msk [vmem:[%s3137_s3 + $0x20] sm:$0xf] %vm1560_vm2, %v1871_v37  ;;  %v1079_v43 = vmax.f32 %v617_v33, %v981_v39  ;;  %v1129_v44 = vmax.f32 %v817_v34, %v1031_v40  ;;  %v622_v45 = vadd.f32 %v2639_v51, %v621_v41  ;;  %v822_v46 = vadd.f32 %v2639_v51, %v821_v42 }
 0x10c   :  { %1619 = vst.msk [vmem:[%s3137_s3 + $0xe8] sm:$0xf] %vm1560_vm2, %v1921_v38  ;;  %v2035_v47 = vpop.f32.mrf.mxu0  ;;  %v2135_v48 = vpop.f32.mrf.mxu1 }
 0x10d   :  { %v1872_v49 = vpack.c.bf16 %v1079_v43, %v1079_v43  ;;  %v1922_v50 = vpack.c.bf16 %v1129_v44, %v1129_v44  ;;  %v982_v52 = vmul.f32 0.1, %v622_v45  ;;  %v1032_v53 = vmul.f32 0.1, %v822_v46 }
 0x10e   :  { %v624_v54 = vpop.f32.mrf.mxu0  ;;  %v824_v55 = vpop.f32.mrf.mxu1 }
 0x10f   :  { %1570 = vst.msk [vmem:[%s3137_s3 + $0x24] sm:$0xf] %vm1560_vm2, %v1872_v49  ;;  %1620 = vst.msk [vmem:[%s3137_s3 + $0xec] sm:$0xf] %vm1560_vm2, %v1922_v50  ;;  %v1080_v56 = vmax.f32 %v622_v45, %v982_v52  ;;  %v1130_v57 = vmax.f32 %v822_v46, %v1032_v53  ;;  %v625_v58 = vadd.f32 %v2639_v51, %v624_v54 }
 0x110   :  { %v825_v59 = vadd.f32 %v2639_v51, %v824_v55  ;;  %v2036_v60 = vpop.f32.mrf.mxu0  ;;  %v2136_v61 = vpop.f32.mrf.mxu1 }
 0x111   :  { %v1873_v62 = vpack.c.bf16 %v1080_v56, %v1080_v56  ;;  %v1923_v63 = vpack.c.bf16 %v1130_v57, %v1130_v57  ;;  %v983_v0 = vmul.f32 0.1, %v625_v58 }
 0x112   :  { %v1033_v1 = vmul.f32 0.1, %v825_v59  ;;  %v629_v2 = vpop.f32.mrf.mxu0  ;;  %v829_v3 = vpop.f32.mrf.mxu1 }
 0x113   :  { %1571 = vst.msk [vmem:[%s3137_s3 + $0x28] sm:$0xf] %vm1560_vm2, %v1873_v62  ;;  %1621 = vst.msk [vmem:[%s3137_s3 + $0xf0] sm:$0xf] %vm1560_vm2, %v1923_v63  ;;  %v1081_v4 = vmax.f32 %v625_v58, %v983_v0  ;;  %v630_v6 = vadd.f32 %v2639_v51, %v629_v2  ;;  %v830_v7 = vadd.f32 %v2639_v51, %v829_v3 }
 0x114   :  { %v1131_v5 = vmax.f32 %v825_v59, %v1033_v1  ;;  %v2039_v8 = vpop.f32.mrf.mxu0  ;;  %v2139_v9 = vpop.f32.mrf.mxu1 }
 0x115   :  { %v1874_v10 = vpack.c.bf16 %v1081_v4, %v1081_v4  ;;  %v984_v12 = vmul.f32 0.1, %v630_v6  ;;  %v1034_v13 = vmul.f32 0.1, %v830_v7 }
 0x116   :  { %v1924_v11 = vpack.c.bf16 %v1131_v5, %v1131_v5  ;;  %v632_v14 = vpop.f32.mrf.mxu0  ;;  %v832_v15 = vpop.f32.mrf.mxu1 }
 0x117   :  { %1572 = vst.msk [vmem:[%s3137_s3 + $0x2c] sm:$0xf] %vm1560_vm2, %v1874_v10  ;;  %v1082_v16 = vmax.f32 %v630_v6, %v984_v12  ;;  %v1132_v17 = vmax.f32 %v830_v7, %v1034_v13  ;;  %v633_v18 = vadd.f32 %v2639_v51, %v632_v14  ;;  %v833_v19 = vadd.f32 %v2639_v51, %v832_v15 }
 0x118   :  { %1622 = vst.msk [vmem:[%s3137_s3 + $0xf4] sm:$0xf] %vm1560_vm2, %v1924_v11  ;;  %v2040_v20 = vpop.f32.mrf.mxu0  ;;  %v2140_v21 = vpop.f32.mrf.mxu1 }
 0x119   :  { %v1875_v22 = vpack.c.bf16 %v1082_v16, %v1082_v16  ;;  %v1925_v23 = vpack.c.bf16 %v1132_v17, %v1132_v17  ;;  %v985_v24 = vmul.f32 0.1, %v633_v18  ;;  %v1035_v25 = vmul.f32 0.1, %v833_v19 }
 0x11a   :  { %v637_v26 = vpop.f32.mrf.mxu0  ;;  %v837_v27 = vpop.f32.mrf.mxu1 }
 0x11b   :  { %1573 = vst.msk [vmem:[%s3137_s3 + $0x30] sm:$0xf] %vm1560_vm2, %v1875_v22  ;;  %1623 = vst.msk [vmem:[%s3137_s3 + $0xf8] sm:$0xf] %vm1560_vm2, %v1925_v23  ;;  %v1083_v28 = vmax.f32 %v633_v18, %v985_v24  ;;  %v1133_v29 = vmax.f32 %v833_v19, %v1035_v25  ;;  %v638_v30 = vadd.f32 %v2639_v51, %v637_v26 }
 0x11c   :  { %v838_v31 = vadd.f32 %v2639_v51, %v837_v27  ;;  %v2043_v32 = vpop.f32.mrf.mxu0  ;;  %v2143_v33 = vpop.f32.mrf.mxu1 }
 0x11d   :  { %v1876_v34 = vpack.c.bf16 %v1083_v28, %v1083_v28  ;;  %v1926_v35 = vpack.c.bf16 %v1133_v29, %v1133_v29  ;;  %v986_v36 = vmul.f32 0.1, %v638_v30 }
 0x11e   :  { %v1036_v37 = vmul.f32 0.1, %v838_v31  ;;  %v640_v38 = vpop.f32.mrf.mxu0  ;;  %v840_v39 = vpop.f32.mrf.mxu1 }
 0x11f   :  { %1574 = vst.msk [vmem:[%s3137_s3 + $0x34] sm:$0xf] %vm1560_vm2, %v1876_v34  ;;  %1624 = vst.msk [vmem:[%s3137_s3 + $0xfc] sm:$0xf] %vm1560_vm2, %v1926_v35  ;;  %v1084_v40 = vmax.f32 %v638_v30, %v986_v36  ;;  %v641_v42 = vadd.f32 %v2639_v51, %v640_v38  ;;  %v841_v43 = vadd.f32 %v2639_v51, %v840_v39 }
 0x120   :  { %v1134_v41 = vmax.f32 %v838_v31, %v1036_v37  ;;  %v2044_v44 = vpop.f32.mrf.mxu0  ;;  %v2144_v45 = vpop.f32.mrf.mxu1 }
 0x121   :  { %v1877_v46 = vpack.c.bf16 %v1084_v40, %v1084_v40  ;;  %v987_v48 = vmul.f32 0.1, %v641_v42  ;;  %v1037_v49 = vmul.f32 0.1, %v841_v43 }
 0x122   :  { %v1927_v47 = vpack.c.bf16 %v1134_v41, %v1134_v41  ;;  %v645_v50 = vpop.f32.mrf.mxu0  ;;  %v845_v52 = vpop.f32.mrf.mxu1 }
 0x123   :  { %1575 = vst.msk [vmem:[%s3137_s3 + $0x38] sm:$0xf] %vm1560_vm2, %v1877_v46  ;;  %v1085_v53 = vmax.f32 %v641_v42, %v987_v48  ;;  %v1135_v54 = vmax.f32 %v841_v43, %v1037_v49  ;;  %v646_v55 = vadd.f32 %v2639_v51, %v645_v50  ;;  %v846_v56 = vadd.f32 %v2639_v51, %v845_v52 }
 0x124   :  { %1625 = vst.msk [vmem:[%s3137_s3 + $0x100] sm:$0xf] %vm1560_vm2, %v1927_v47  ;;  %v2047_v57 = vpop.f32.mrf.mxu0  ;;  %v2147_v58 = vpop.f32.mrf.mxu1 }
 0x125   :  { %v1878_v59 = vpack.c.bf16 %v1085_v53, %v1085_v53  ;;  %v1928_v60 = vpack.c.bf16 %v1135_v54, %v1135_v54  ;;  %v988_v61 = vmul.f32 0.1, %v646_v55  ;;  %v1038_v62 = vmul.f32 0.1, %v846_v56 }
 0x126   :  { %v648_v63 = vpop.f32.mrf.mxu0  ;;  %v848_v0 = vpop.f32.mrf.mxu1 }
 0x127   :  { %1576 = vst.msk [vmem:[%s3137_s3 + $0x3c] sm:$0xf] %vm1560_vm2, %v1878_v59  ;;  %1626 = vst.msk [vmem:[%s3137_s3 + $0x104] sm:$0xf] %vm1560_vm2, %v1928_v60  ;;  %v1086_v1 = vmax.f32 %v646_v55, %v988_v61  ;;  %v1136_v2 = vmax.f32 %v846_v56, %v1038_v62  ;;  %v649_v3 = vadd.f32 %v2639_v51, %v648_v63 }
 0x128   :  { %v849_v4 = vadd.f32 %v2639_v51, %v848_v0  ;;  %v2048_v5 = vpop.f32.mrf.mxu0  ;;  %v2148_v6 = vpop.f32.mrf.mxu1 }
 0x129   :  { %v1879_v7 = vpack.c.bf16 %v1086_v1, %v1086_v1  ;;  %v1929_v8 = vpack.c.bf16 %v1136_v2, %v1136_v2  ;;  %v989_v9 = vmul.f32 0.1, %v649_v3 }
 0x12a   :  { %v1039_v10 = vmul.f32 0.1, %v849_v4  ;;  %v653_v11 = vpop.f32.mrf.mxu0  ;;  %v853_v12 = vpop.f32.mrf.mxu1 }
 0x12b   :  { %1577 = vst.msk [vmem:[%s3137_s3 + $0x40] sm:$0xf] %vm1560_vm2, %v1879_v7  ;;  %1627 = vst.msk [vmem:[%s3137_s3 + $0x108] sm:$0xf] %vm1560_vm2, %v1929_v8  ;;  %v1087_v13 = vmax.f32 %v649_v3, %v989_v9  ;;  %v654_v15 = vadd.f32 %v2639_v51, %v653_v11  ;;  %v854_v16 = vadd.f32 %v2639_v51, %v853_v12 }
 0x12c   :  { %v1137_v14 = vmax.f32 %v849_v4, %v1039_v10  ;;  %v2051_v17 = vpop.f32.mrf.mxu0  ;;  %v2151_v18 = vpop.f32.mrf.mxu1 }
 0x12d   :  { %v1880_v19 = vpack.c.bf16 %v1087_v13, %v1087_v13  ;;  %v990_v21 = vmul.f32 0.1, %v654_v15  ;;  %v1040_v22 = vmul.f32 0.1, %v854_v16 }
 0x12e   :  { %v1930_v20 = vpack.c.bf16 %v1137_v14, %v1137_v14  ;;  %v656_v23 = vpop.f32.mrf.mxu0  ;;  %v856_v24 = vpop.f32.mrf.mxu1 }
 0x12f   :  { %1578 = vst.msk [vmem:[%s3137_s3 + $0x44] sm:$0xf] %vm1560_vm2, %v1880_v19  ;;  %v1088_v25 = vmax.f32 %v654_v15, %v990_v21  ;;  %v1138_v26 = vmax.f32 %v854_v16, %v1040_v22  ;;  %v657_v27 = vadd.f32 %v2639_v51, %v656_v23  ;;  %v857_v28 = vadd.f32 %v2639_v51, %v856_v24 }
 0x130   :  { %1628 = vst.msk [vmem:[%s3137_s3 + $0x10c] sm:$0xf] %vm1560_vm2, %v1930_v20  ;;  %v2052_v29 = vpop.f32.mrf.mxu0  ;;  %v2152_v30 = vpop.f32.mrf.mxu1 }
 0x131   :  { %v1881_v31 = vpack.c.bf16 %v1088_v25, %v1088_v25  ;;  %v1931_v32 = vpack.c.bf16 %v1138_v26, %v1138_v26  ;;  %v991_v33 = vmul.f32 0.1, %v657_v27  ;;  %v1041_v34 = vmul.f32 0.1, %v857_v28 }
 0x132   :  { %v661_v35 = vpop.f32.mrf.mxu0  ;;  %v861_v36 = vpop.f32.mrf.mxu1 }
 0x133   :  { %1579 = vst.msk [vmem:[%s3137_s3 + $0x48] sm:$0xf] %vm1560_vm2, %v1881_v31  ;;  %1629 = vst.msk [vmem:[%s3137_s3 + $0x110] sm:$0xf] %vm1560_vm2, %v1931_v32  ;;  %v1089_v37 = vmax.f32 %v657_v27, %v991_v33  ;;  %v1139_v38 = vmax.f32 %v857_v28, %v1041_v34  ;;  %v662_v39 = vadd.f32 %v2639_v51, %v661_v35 }
 0x134   :  { %v862_v40 = vadd.f32 %v2639_v51, %v861_v36  ;;  %v2055_v41 = vpop.f32.mrf.mxu0  ;;  %v2155_v42 = vpop.f32.mrf.mxu1 }
 0x135   :  { %v1882_v43 = vpack.c.bf16 %v1089_v37, %v1089_v37  ;;  %v1932_v44 = vpack.c.bf16 %v1139_v38, %v1139_v38  ;;  %v992_v45 = vmul.f32 0.1, %v662_v39 }
 0x136   :  { %v1042_v46 = vmul.f32 0.1, %v862_v40  ;;  %v664_v47 = vpop.f32.mrf.mxu0  ;;  %v864_v48 = vpop.f32.mrf.mxu1 }
 0x137   :  { %1580 = vst.msk [vmem:[%s3137_s3 + $0x4c] sm:$0xf] %vm1560_vm2, %v1882_v43  ;;  %1630 = vst.msk [vmem:[%s3137_s3 + $0x114] sm:$0xf] %vm1560_vm2, %v1932_v44  ;;  %v1090_v49 = vmax.f32 %v662_v39, %v992_v45  ;;  %v665_v52 = vadd.f32 %v2639_v51, %v664_v47  ;;  %v865_v53 = vadd.f32 %v2639_v51, %v864_v48 }
 0x138   :  { %v1140_v50 = vmax.f32 %v862_v40, %v1042_v46  ;;  %v2056_v54 = vpop.f32.mrf.mxu0  ;;  %v2156_v55 = vpop.f32.mrf.mxu1 }
 0x139   :  { %v1883_v56 = vpack.c.bf16 %v1090_v49, %v1090_v49  ;;  %v993_v58 = vmul.f32 0.1, %v665_v52  ;;  %v1043_v59 = vmul.f32 0.1, %v865_v53 }
 0x13a   :  { %v1933_v57 = vpack.c.bf16 %v1140_v50, %v1140_v50  ;;  %v669_v60 = vpop.f32.mrf.mxu0  ;;  %v869_v61 = vpop.f32.mrf.mxu1 }
 0x13b   :  { %1581 = vst.msk [vmem:[%s3137_s3 + $0x50] sm:$0xf] %vm1560_vm2, %v1883_v56  ;;  %v1091_v62 = vmax.f32 %v665_v52, %v993_v58  ;;  %v1141_v63 = vmax.f32 %v865_v53, %v1043_v59  ;;  %v670_v0 = vadd.f32 %v2639_v51, %v669_v60  ;;  %v870_v1 = vadd.f32 %v2639_v51, %v869_v61 }
 0x13c   :  { %1631 = vst.msk [vmem:[%s3137_s3 + $0x118] sm:$0xf] %vm1560_vm2, %v1933_v57  ;;  %v2059_v2 = vpop.f32.mrf.mxu0  ;;  %v2159_v3 = vpop.f32.mrf.mxu1 }
 0x13d   :  { %v1884_v4 = vpack.c.bf16 %v1091_v62, %v1091_v62  ;;  %v1934_v5 = vpack.c.bf16 %v1141_v63, %v1141_v63  ;;  %v994_v6 = vmul.f32 0.1, %v670_v0  ;;  %v1044_v7 = vmul.f32 0.1, %v870_v1 }
 0x13e   :  { %v672_v8 = vpop.f32.mrf.mxu0  ;;  %v872_v9 = vpop.f32.mrf.mxu1 }
 0x13f   :  { %1582 = vst.msk [vmem:[%s3137_s3 + $0x54] sm:$0xf] %vm1560_vm2, %v1884_v4  ;;  %1632 = vst.msk [vmem:[%s3137_s3 + $0x11c] sm:$0xf] %vm1560_vm2, %v1934_v5  ;;  %v1092_v10 = vmax.f32 %v670_v0, %v994_v6  ;;  %v1142_v11 = vmax.f32 %v870_v1, %v1044_v7  ;;  %v673_v12 = vadd.f32 %v2639_v51, %v672_v8 }
 0x140   :  { %v873_v13 = vadd.f32 %v2639_v51, %v872_v9  ;;  %v2060_v14 = vpop.f32.mrf.mxu0  ;;  %v2160_v15 = vpop.f32.mrf.mxu1 }
 0x141   :  { %v1885_v16 = vpack.c.bf16 %v1092_v10, %v1092_v10  ;;  %v1935_v17 = vpack.c.bf16 %v1142_v11, %v1142_v11  ;;  %v995_v18 = vmul.f32 0.1, %v673_v12 }
 0x142   :  { %v1045_v19 = vmul.f32 0.1, %v873_v13  ;;  %v677_v20 = vpop.f32.mrf.mxu0  ;;  %v877_v21 = vpop.f32.mrf.mxu1 }
 0x143   :  { %1583 = vst.msk [vmem:[%s3137_s3 + $0x58] sm:$0xf] %vm1560_vm2, %v1885_v16  ;;  %1633 = vst.msk [vmem:[%s3137_s3 + $0x120] sm:$0xf] %vm1560_vm2, %v1935_v17  ;;  %v1093_v22 = vmax.f32 %v673_v12, %v995_v18  ;;  %v678_v24 = vadd.f32 %v2639_v51, %v677_v20  ;;  %v878_v25 = vadd.f32 %v2639_v51, %v877_v21 }
 0x144   :  { %v1143_v23 = vmax.f32 %v873_v13, %v1045_v19  ;;  %v2063_v26 = vpop.f32.mrf.mxu0  ;;  %v2163_v27 = vpop.f32.mrf.mxu1 }
 0x145   :  { %v1886_v28 = vpack.c.bf16 %v1093_v22, %v1093_v22  ;;  %v996_v30 = vmul.f32 0.1, %v678_v24  ;;  %v1046_v31 = vmul.f32 0.1, %v878_v25 }
 0x146   :  { %v1936_v29 = vpack.c.bf16 %v1143_v23, %v1143_v23  ;;  %v680_v32 = vpop.f32.mrf.mxu0  ;;  %v880_v33 = vpop.f32.mrf.mxu1 }
 0x147   :  { %1584 = vst.msk [vmem:[%s3137_s3 + $0x5c] sm:$0xf] %vm1560_vm2, %v1886_v28  ;;  %v1094_v34 = vmax.f32 %v678_v24, %v996_v30  ;;  %v1144_v35 = vmax.f32 %v878_v25, %v1046_v31  ;;  %v681_v36 = vadd.f32 %v2639_v51, %v680_v32  ;;  %v881_v37 = vadd.f32 %v2639_v51, %v880_v33 }
 0x148   :  { %1634 = vst.msk [vmem:[%s3137_s3 + $0x124] sm:$0xf] %vm1560_vm2, %v1936_v29  ;;  %v2064_v38 = vpop.f32.mrf.mxu0  ;;  %v2164_v39 = vpop.f32.mrf.mxu1 }
 0x149   :  { %v1887_v40 = vpack.c.bf16 %v1094_v34, %v1094_v34  ;;  %v1937_v41 = vpack.c.bf16 %v1144_v35, %v1144_v35  ;;  %v997_v42 = vmul.f32 0.1, %v681_v36  ;;  %v1047_v43 = vmul.f32 0.1, %v881_v37 }
 0x14a   :  { %v685_v44 = vpop.f32.mrf.mxu0  ;;  %v885_v45 = vpop.f32.mrf.mxu1 }
 0x14b   :  { %1585 = vst.msk [vmem:[%s3137_s3 + $0x60] sm:$0xf] %vm1560_vm2, %v1887_v40  ;;  %1635 = vst.msk [vmem:[%s3137_s3 + $0x128] sm:$0xf] %vm1560_vm2, %v1937_v41  ;;  %v1095_v46 = vmax.f32 %v681_v36, %v997_v42  ;;  %v1145_v47 = vmax.f32 %v881_v37, %v1047_v43  ;;  %v686_v48 = vadd.f32 %v2639_v51, %v685_v44 }
 0x14c   :  { %v886_v49 = vadd.f32 %v2639_v51, %v885_v45  ;;  %v2067_v50 = vpop.f32.mrf.mxu0  ;;  %v2167_v52 = vpop.f32.mrf.mxu1 }
 0x14d   :  { %v1888_v53 = vpack.c.bf16 %v1095_v46, %v1095_v46  ;;  %v1938_v54 = vpack.c.bf16 %v1145_v47, %v1145_v47  ;;  %v998_v55 = vmul.f32 0.1, %v686_v48 }
 0x14e   :  { %v1048_v56 = vmul.f32 0.1, %v886_v49  ;;  %v688_v57 = vpop.f32.mrf.mxu0  ;;  %v888_v58 = vpop.f32.mrf.mxu1 }
 0x14f   :  { %1586 = vst.msk [vmem:[%s3137_s3 + $0x64] sm:$0xf] %vm1560_vm2, %v1888_v53  ;;  %1636 = vst.msk [vmem:[%s3137_s3 + $0x12c] sm:$0xf] %vm1560_vm2, %v1938_v54  ;;  %v1096_v59 = vmax.f32 %v686_v48, %v998_v55  ;;  %v689_v61 = vadd.f32 %v2639_v51, %v688_v57  ;;  %v889_v62 = vadd.f32 %v2639_v51, %v888_v58 }
 0x150   :  { %v1146_v60 = vmax.f32 %v886_v49, %v1048_v56  ;;  %v2068_v63 = vpop.f32.mrf.mxu0  ;;  %v2168_v0 = vpop.f32.mrf.mxu1 }
 0x151   :  { %v1889_v1 = vpack.c.bf16 %v1096_v59, %v1096_v59  ;;  %v999_v3 = vmul.f32 0.1, %v689_v61  ;;  %v1049_v4 = vmul.f32 0.1, %v889_v62 }
 0x152   :  { %v1939_v2 = vpack.c.bf16 %v1146_v60, %v1146_v60  ;;  %v693_v5 = vpop.f32.mrf.mxu0  ;;  %v893_v6 = vpop.f32.mrf.mxu1 }
 0x153   :  { %1587 = vst.msk [vmem:[%s3137_s3 + $0x68] sm:$0xf] %vm1560_vm2, %v1889_v1  ;;  %v1097_v7 = vmax.f32 %v689_v61, %v999_v3  ;;  %v1147_v8 = vmax.f32 %v889_v62, %v1049_v4  ;;  %v694_v9 = vadd.f32 %v2639_v51, %v693_v5  ;;  %v894_v10 = vadd.f32 %v2639_v51, %v893_v6 }
 0x154   :  { %1637 = vst.msk [vmem:[%s3137_s3 + $0x130] sm:$0xf] %vm1560_vm2, %v1939_v2  ;;  %v2071_v11 = vpop.f32.mrf.mxu0  ;;  %v2171_v12 = vpop.f32.mrf.mxu1 }
 0x155   :  { %v1890_v13 = vpack.c.bf16 %v1097_v7, %v1097_v7  ;;  %v1940_v14 = vpack.c.bf16 %v1147_v8, %v1147_v8  ;;  %v1000_v15 = vmul.f32 0.1, %v694_v9  ;;  %v1050_v16 = vmul.f32 0.1, %v894_v10 }
 0x156   :  { %v696_v17 = vpop.f32.mrf.mxu0  ;;  %v896_v18 = vpop.f32.mrf.mxu1 }
 0x157   :  { %1588 = vst.msk [vmem:[%s3137_s3 + $0x6c] sm:$0xf] %vm1560_vm2, %v1890_v13  ;;  %1638 = vst.msk [vmem:[%s3137_s3 + $0x134] sm:$0xf] %vm1560_vm2, %v1940_v14  ;;  %v1098_v19 = vmax.f32 %v694_v9, %v1000_v15  ;;  %v1148_v20 = vmax.f32 %v894_v10, %v1050_v16  ;;  %v697_v21 = vadd.f32 %v2639_v51, %v696_v17 }
 0x158   :  { %v897_v22 = vadd.f32 %v2639_v51, %v896_v18  ;;  %v2072_v23 = vpop.f32.mrf.mxu0  ;;  %v2172_v24 = vpop.f32.mrf.mxu1 }
 0x159   :  { %v1891_v25 = vpack.c.bf16 %v1098_v19, %v1098_v19  ;;  %v1941_v26 = vpack.c.bf16 %v1148_v20, %v1148_v20  ;;  %v1001_v27 = vmul.f32 0.1, %v697_v21 }
 0x15a   :  { %v1051_v28 = vmul.f32 0.1, %v897_v22  ;;  %v701_v29 = vpop.f32.mrf.mxu0  ;;  %v901_v30 = vpop.f32.mrf.mxu1 }
 0x15b   :  { %1589 = vst.msk [vmem:[%s3137_s3 + $0x70] sm:$0xf] %vm1560_vm2, %v1891_v25  ;;  %1639 = vst.msk [vmem:[%s3137_s3 + $0x138] sm:$0xf] %vm1560_vm2, %v1941_v26  ;;  %v1099_v31 = vmax.f32 %v697_v21, %v1001_v27  ;;  %v702_v33 = vadd.f32 %v2639_v51, %v701_v29  ;;  %v902_v34 = vadd.f32 %v2639_v51, %v901_v30 }
 0x15c   :  { %v1149_v32 = vmax.f32 %v897_v22, %v1051_v28  ;;  %v2075_v35 = vpop.f32.mrf.mxu0  ;;  %v2175_v36 = vpop.f32.mrf.mxu1 }
 0x15d   :  { %v1892_v37 = vpack.c.bf16 %v1099_v31, %v1099_v31  ;;  %v1002_v39 = vmul.f32 0.1, %v702_v33  ;;  %v1052_v40 = vmul.f32 0.1, %v902_v34 }
 0x15e   :  { %v1942_v38 = vpack.c.bf16 %v1149_v32, %v1149_v32  ;;  %v704_v41 = vpop.f32.mrf.mxu0  ;;  %v904_v42 = vpop.f32.mrf.mxu1 }
 0x15f   :  { %1590 = vst.msk [vmem:[%s3137_s3 + $0x74] sm:$0xf] %vm1560_vm2, %v1892_v37  ;;  %v1100_v43 = vmax.f32 %v702_v33, %v1002_v39  ;;  %v1150_v44 = vmax.f32 %v902_v34, %v1052_v40  ;;  %v705_v45 = vadd.f32 %v2639_v51, %v704_v41  ;;  %v905_v46 = vadd.f32 %v2639_v51, %v904_v42 }
 0x160   :  { %1640 = vst.msk [vmem:[%s3137_s3 + $0x13c] sm:$0xf] %vm1560_vm2, %v1942_v38  ;;  %v2076_v47 = vpop.f32.mrf.mxu0  ;;  %v2176_v48 = vpop.f32.mrf.mxu1 }
 0x161   :  { %v1893_v49 = vpack.c.bf16 %v1100_v43, %v1100_v43  ;;  %v1943_v50 = vpack.c.bf16 %v1150_v44, %v1150_v44  ;;  %v1003_v52 = vmul.f32 0.1, %v705_v45  ;;  %v1053_v53 = vmul.f32 0.1, %v905_v46 }
 0x162   :  { %v709_v54 = vpop.f32.mrf.mxu0  ;;  %v909_v55 = vpop.f32.mrf.mxu1 }
 0x163   :  { %1591 = vst.msk [vmem:[%s3137_s3 + $0x78] sm:$0xf] %vm1560_vm2, %v1893_v49  ;;  %1641 = vst.msk [vmem:[%s3137_s3 + $0x140] sm:$0xf] %vm1560_vm2, %v1943_v50  ;;  %v1101_v56 = vmax.f32 %v705_v45, %v1003_v52  ;;  %v1151_v57 = vmax.f32 %v905_v46, %v1053_v53  ;;  %v710_v58 = vadd.f32 %v2639_v51, %v709_v54  ;;  %v3004_v54 = vld [vmem:[#allocation4] ss:$0 sm:$0xff] }
 0x164   :  { %v910_v59 = vadd.f32 %v2639_v51, %v909_v55  ;;  %v2079_v60 = vpop.f32.mrf.mxu0  ;;  %v2179_v61 = vpop.f32.mrf.mxu1 }
 0x165   :  { %v1894_v62 = vpack.c.bf16 %v1101_v56, %v1101_v56  ;;  %v1944_v63 = vpack.c.bf16 %v1151_v57, %v1151_v57  ;;  %v1004_v0 = vmul.f32 0.1, %v710_v58 }
 0x166   :  { %v1054_v1 = vmul.f32 0.1, %v910_v59  ;;  %v712_v2 = vpop.f32.mrf.mxu0  ;;  %v912_v3 = vpop.f32.mrf.mxu1 }
 0x167   :  { %1592 = vst.msk [vmem:[%s3137_s3 + $0x7c] sm:$0xf] %vm1560_vm2, %v1894_v62  ;;  %1642 = vst.msk [vmem:[%s3137_s3 + $0x144] sm:$0xf] %vm1560_vm2, %v1944_v63  ;;  %v1102_v4 = vmax.f32 %v710_v58, %v1004_v0  ;;  %v713_v6 = vadd.f32 %v2639_v51, %v712_v2  ;;  %v913_v7 = vadd.f32 %v2639_v51, %v912_v3 }
 0x168   :  { %v1152_v5 = vmax.f32 %v910_v59, %v1054_v1  ;;  %v2080_v8 = vpop.f32.mrf.mxu0  ;;  %v2180_v9 = vpop.f32.mrf.mxu1 }
 0x169   :  { %v1895_v10 = vpack.c.bf16 %v1102_v4, %v1102_v4  ;;  %v1005_v12 = vmul.f32 0.1, %v713_v6  ;;  %v1055_v13 = vmul.f32 0.1, %v913_v7 }
 0x16a   :  { %v1945_v11 = vpack.c.bf16 %v1152_v5, %v1152_v5  ;;  %v717_v14 = vpop.f32.mrf.mxu0  ;;  %v917_v15 = vpop.f32.mrf.mxu1 }
 0x16b   :  { %1593 = vst.msk [vmem:[%s3137_s3 + $0x80] sm:$0xf] %vm1560_vm2, %v1895_v10  ;;  %v1103_v16 = vmax.f32 %v713_v6, %v1005_v12  ;;  %v1153_v17 = vmax.f32 %v913_v7, %v1055_v13  ;;  %v718_v18 = vadd.f32 %v2639_v51, %v717_v14  ;;  %v918_v19 = vadd.f32 %v2639_v51, %v917_v15 }
 0x16c   :  { %1643 = vst.msk [vmem:[%s3137_s3 + $0x148] sm:$0xf] %vm1560_vm2, %v1945_v11  ;;  %v2083_v20 = vpop.f32.mrf.mxu0  ;;  %v2183_v21 = vpop.f32.mrf.mxu1 }
 0x16d   :  { %v1896_v22 = vpack.c.bf16 %v1103_v16, %v1103_v16  ;;  %v1946_v23 = vpack.c.bf16 %v1153_v17, %v1153_v17  ;;  %v1006_v24 = vmul.f32 0.1, %v718_v18  ;;  %v1056_v25 = vmul.f32 0.1, %v918_v19 }
 0x16e   :  { %v720_v26 = vpop.f32.mrf.mxu0  ;;  %v920_v27 = vpop.f32.mrf.mxu1 }
 0x16f   :  { %1594 = vst.msk [vmem:[%s3137_s3 + $0x84] sm:$0xf] %vm1560_vm2, %v1896_v22  ;;  %1644 = vst.msk [vmem:[%s3137_s3 + $0x14c] sm:$0xf] %vm1560_vm2, %v1946_v23  ;;  %v1104_v28 = vmax.f32 %v718_v18, %v1006_v24  ;;  %v1154_v29 = vmax.f32 %v918_v19, %v1056_v25  ;;  %v721_v30 = vadd.f32 %v2639_v51, %v720_v26 }
 0x170   :  { %v921_v31 = vadd.f32 %v2639_v51, %v920_v27  ;;  %v2084_v32 = vpop.f32.mrf.mxu0  ;;  %v2184_v33 = vpop.f32.mrf.mxu1 }
 0x171   :  { %v1897_v34 = vpack.c.bf16 %v1104_v28, %v1104_v28  ;;  %v1947_v35 = vpack.c.bf16 %v1154_v29, %v1154_v29  ;;  %v1007_v36 = vmul.f32 0.1, %v721_v30 }
 0x172   :  { %v1057_v37 = vmul.f32 0.1, %v921_v31  ;;  %v725_v38 = vpop.f32.mrf.mxu0  ;;  %v925_v39 = vpop.f32.mrf.mxu1 }
 0x173   :  { %1595 = vst.msk [vmem:[%s3137_s3 + $0x88] sm:$0xf] %vm1560_vm2, %v1897_v34  ;;  %1645 = vst.msk [vmem:[%s3137_s3 + $0x150] sm:$0xf] %vm1560_vm2, %v1947_v35  ;;  %v1105_v40 = vmax.f32 %v721_v30, %v1007_v36  ;;  %v726_v42 = vadd.f32 %v2639_v51, %v725_v38  ;;  %v926_v43 = vadd.f32 %v2639_v51, %v925_v39 }
 0x174   :  { %v1155_v41 = vmax.f32 %v921_v31, %v1057_v37  ;;  %v2087_v44 = vpop.f32.mrf.mxu0  ;;  %v2187_v45 = vpop.f32.mrf.mxu1 }
 0x175   :  { %v1898_v46 = vpack.c.bf16 %v1105_v40, %v1105_v40  ;;  %v1008_v48 = vmul.f32 0.1, %v726_v42  ;;  %v1058_v49 = vmul.f32 0.1, %v926_v43 }
 0x176   :  { %v1948_v47 = vpack.c.bf16 %v1155_v41, %v1155_v41  ;;  %v728_v50 = vpop.f32.mrf.mxu0  ;;  %v928_v52 = vpop.f32.mrf.mxu1 }
 0x177   :  { %1596 = vst.msk [vmem:[%s3137_s3 + $0x8c] sm:$0xf] %vm1560_vm2, %v1898_v46  ;;  %v1106_v53 = vmax.f32 %v726_v42, %v1008_v48  ;;  %v1156_v51 = vmax.f32 %v926_v43, %v1058_v49  ;;  %v729_v55 = vadd.f32 %v3004_v54, %v728_v50  ;;  %v929_v56 = vadd.f32 %v3004_v54, %v928_v52 }
 0x178   :  { %1646 = vst.msk [vmem:[%s3137_s3 + $0x154] sm:$0xf] %vm1560_vm2, %v1948_v47  ;;  %v2088_v57 = vpop.f32.mrf.mxu0  ;;  %v2188_v58 = vpop.f32.mrf.mxu1 }
 0x179   :  { %v1899_v59 = vpack.c.bf16 %v1106_v53, %v1106_v53  ;;  %v1949_v60 = vpack.c.bf16 %v1156_v51, %v1156_v51  ;;  %v1009_v61 = vmul.f32 0.1, %v729_v55  ;;  %v1059_v62 = vmul.f32 0.1, %v929_v56 }
 0x17a   :  { %v733_v63 = vpop.f32.mrf.mxu0  ;;  %v933_v0 = vpop.f32.mrf.mxu1 }
 0x17b   :  { %1597 = vst.msk [vmem:[%s3137_s3 + $0x90] sm:$0xf] %vm1560_vm2, %v1899_v59  ;;  %1647 = vst.msk [vmem:[%s3137_s3 + $0x158] sm:$0xf] %vm1560_vm2, %v1949_v60  ;;  %v1107_v1 = vmax.f32 %v729_v55, %v1009_v61  ;;  %v1157_v2 = vmax.f32 %v929_v56, %v1059_v62  ;;  %v734_v3 = vadd.f32 %v3004_v54, %v733_v63 }
 0x17c   :  { %v934_v4 = vadd.f32 %v3004_v54, %v933_v0  ;;  %v2091_v5 = vpop.f32.mrf.mxu0  ;;  %v2191_v6 = vpop.f32.mrf.mxu1 }
 0x17d   :  { %v1900_v7 = vpack.c.bf16 %v1107_v1, %v1107_v1  ;;  %v1950_v8 = vpack.c.bf16 %v1157_v2, %v1157_v2  ;;  %v1010_v9 = vmul.f32 0.1, %v734_v3 }
 0x17e   :  { %v1060_v10 = vmul.f32 0.1, %v934_v4  ;;  %v736_v11 = vpop.f32.mrf.mxu0  ;;  %v936_v12 = vpop.f32.mrf.mxu1 }
 0x17f   :  { %1598 = vst.msk [vmem:[%s3137_s3 + $0x94] sm:$0xf] %vm1560_vm2, %v1900_v7  ;;  %1648 = vst.msk [vmem:[%s3137_s3 + $0x15c] sm:$0xf] %vm1560_vm2, %v1950_v8  ;;  %v1108_v13 = vmax.f32 %v734_v3, %v1010_v9  ;;  %v737_v15 = vadd.f32 %v3004_v54, %v736_v11  ;;  %v937_v16 = vadd.f32 %v3004_v54, %v936_v12 }
 0x180   :  { %v1158_v14 = vmax.f32 %v934_v4, %v1060_v10  ;;  %v2092_v17 = vpop.f32.mrf.mxu0  ;;  %v2192_v18 = vpop.f32.mrf.mxu1 }
 0x181   :  { %v1901_v19 = vpack.c.bf16 %v1108_v13, %v1108_v13  ;;  %v1011_v21 = vmul.f32 0.1, %v737_v15  ;;  %v1061_v22 = vmul.f32 0.1, %v937_v16 }
 0x182   :  { %v1951_v20 = vpack.c.bf16 %v1158_v14, %v1158_v14  ;;  %v741_v23 = vpop.f32.mrf.mxu0  ;;  %v941_v24 = vpop.f32.mrf.mxu1 }
 0x183   :  { %1599 = vst.msk [vmem:[%s3137_s3 + $0x98] sm:$0xf] %vm1560_vm2, %v1901_v19  ;;  %v1109_v25 = vmax.f32 %v737_v15, %v1011_v21  ;;  %v1159_v26 = vmax.f32 %v937_v16, %v1061_v22  ;;  %v742_v27 = vadd.f32 %v3004_v54, %v741_v23  ;;  %v942_v28 = vadd.f32 %v3004_v54, %v941_v24 }
 0x184   :  { %1649 = vst.msk [vmem:[%s3137_s3 + $0x160] sm:$0xf] %vm1560_vm2, %v1951_v20  ;;  %v2095_v29 = vpop.f32.mrf.mxu0  ;;  %v2195_v30 = vpop.f32.mrf.mxu1 }
 0x185   :  { %v1902_v31 = vpack.c.bf16 %v1109_v25, %v1109_v25  ;;  %v1952_v32 = vpack.c.bf16 %v1159_v26, %v1159_v26  ;;  %v1012_v33 = vmul.f32 0.1, %v742_v27  ;;  %v1062_v34 = vmul.f32 0.1, %v942_v28 }
 0x186   :  { %v744_v35 = vpop.f32.mrf.mxu0  ;;  %v944_v36 = vpop.f32.mrf.mxu1 }
 0x187   :  { %1600 = vst.msk [vmem:[%s3137_s3 + $0x9c] sm:$0xf] %vm1560_vm2, %v1902_v31  ;;  %1650 = vst.msk [vmem:[%s3137_s3 + $0x164] sm:$0xf] %vm1560_vm2, %v1952_v32  ;;  %v1110_v37 = vmax.f32 %v742_v27, %v1012_v33  ;;  %v1160_v38 = vmax.f32 %v942_v28, %v1062_v34  ;;  %v745_v39 = vadd.f32 %v3004_v54, %v744_v35 }
 0x188   :  { %v945_v40 = vadd.f32 %v3004_v54, %v944_v36  ;;  %v2096_v41 = vpop.f32.mrf.mxu0  ;;  %v2196_v42 = vpop.f32.mrf.mxu1 }
 0x189   :  { %v1903_v43 = vpack.c.bf16 %v1110_v37, %v1110_v37  ;;  %v1953_v44 = vpack.c.bf16 %v1160_v38, %v1160_v38  ;;  %v1013_v45 = vmul.f32 0.1, %v745_v39 }
 0x18a   :  { %v1063_v46 = vmul.f32 0.1, %v945_v40  ;;  %v749_v47 = vpop.f32.mrf.mxu0  ;;  %v949_v48 = vpop.f32.mrf.mxu1 }
 0x18b   :  { %1601 = vst.msk [vmem:[%s3137_s3 + $0xa0] sm:$0xf] %vm1560_vm2, %v1903_v43  ;;  %1651 = vst.msk [vmem:[%s3137_s3 + $0x168] sm:$0xf] %vm1560_vm2, %v1953_v44  ;;  %v1111_v49 = vmax.f32 %v745_v39, %v1013_v45  ;;  %v750_v52 = vadd.f32 %v3004_v54, %v749_v47  ;;  %v950_v53 = vadd.f32 %v3004_v54, %v949_v48 }
 0x18c   :  { %v1161_v50 = vmax.f32 %v945_v40, %v1063_v46  ;;  %v2099_v51 = vpop.f32.mrf.mxu0  ;;  %v2199_v55 = vpop.f32.mrf.mxu1 }
 0x18d   :  { %v1904_v56 = vpack.c.bf16 %v1111_v49, %v1111_v49  ;;  %v1014_v58 = vmul.f32 0.1, %v750_v52  ;;  %v1064_v59 = vmul.f32 0.1, %v950_v53 }
 0x18e   :  { %v1954_v57 = vpack.c.bf16 %v1161_v50, %v1161_v50  ;;  %v752_v60 = vpop.f32.mrf.mxu0  ;;  %v952_v61 = vpop.f32.mrf.mxu1 }
 0x18f   :  { %1602 = vst.msk [vmem:[%s3137_s3 + $0xa4] sm:$0xf] %vm1560_vm2, %v1904_v56  ;;  %v1112_v62 = vmax.f32 %v750_v52, %v1014_v58  ;;  %v1162_v63 = vmax.f32 %v950_v53, %v1064_v59  ;;  %v753_v0 = vadd.f32 %v3004_v54, %v752_v60  ;;  %v953_v1 = vadd.f32 %v3004_v54, %v952_v61 }
 0x190   :  { %1652 = vst.msk [vmem:[%s3137_s3 + $0x16c] sm:$0xf] %vm1560_vm2, %v1954_v57  ;;  %v2100_v2 = vpop.f32.mrf.mxu0  ;;  %v2200_v3 = vpop.f32.mrf.mxu1 }
 0x191   :  { %v1905_v4 = vpack.c.bf16 %v1112_v62, %v1112_v62  ;;  %v1955_v5 = vpack.c.bf16 %v1162_v63, %v1162_v63  ;;  %v1015_v6 = vmul.f32 0.1, %v753_v0  ;;  %v1065_v7 = vmul.f32 0.1, %v953_v1 }
 0x192   :  { %v757_v8 = vpop.f32.mrf.mxu0  ;;  %v957_v9 = vpop.f32.mrf.mxu1 }
 0x193   :  { %1603 = vst.msk [vmem:[%s3137_s3 + $0xa8] sm:$0xf] %vm1560_vm2, %v1905_v4  ;;  %1653 = vst.msk [vmem:[%s3137_s3 + $0x170] sm:$0xf] %vm1560_vm2, %v1955_v5  ;;  %v1113_v10 = vmax.f32 %v753_v0, %v1015_v6  ;;  %v1163_v11 = vmax.f32 %v953_v1, %v1065_v7  ;;  %v758_v12 = vadd.f32 %v3004_v54, %v757_v8 }
 0x194   :  { %v958_v13 = vadd.f32 %v3004_v54, %v957_v9  ;;  %v2103_v14 = vpop.f32.mrf.mxu0  ;;  %v2203_v15 = vpop.f32.mrf.mxu1 }
 0x195   :  { %v1906_v16 = vpack.c.bf16 %v1113_v10, %v1113_v10  ;;  %v1956_v17 = vpack.c.bf16 %v1163_v11, %v1163_v11  ;;  %v1016_v18 = vmul.f32 0.1, %v758_v12 }
 0x196   :  { %v1066_v19 = vmul.f32 0.1, %v958_v13  ;;  %v760_v20 = vpop.f32.mrf.mxu0  ;;  %v960_v21 = vpop.f32.mrf.mxu1 }
 0x197   :  { %1604 = vst.msk [vmem:[%s3137_s3 + $0xac] sm:$0xf] %vm1560_vm2, %v1906_v16  ;;  %1654 = vst.msk [vmem:[%s3137_s3 + $0x174] sm:$0xf] %vm1560_vm2, %v1956_v17  ;;  %v1114_v22 = vmax.f32 %v758_v12, %v1016_v18  ;;  %v761_v24 = vadd.f32 %v3004_v54, %v760_v20  ;;  %v961_v25 = vadd.f32 %v3004_v54, %v960_v21 }
 0x198   :  { %v1164_v23 = vmax.f32 %v958_v13, %v1066_v19  ;;  %v2104_v26 = vpop.f32.mrf.mxu0  ;;  %v2204_v27 = vpop.f32.mrf.mxu1 }
 0x199   :  { %v1907_v28 = vpack.c.bf16 %v1114_v22, %v1114_v22  ;;  %v1017_v30 = vmul.f32 0.1, %v761_v24  ;;  %v1067_v31 = vmul.f32 0.1, %v961_v25 }
 0x19a   :  { %v1957_v29 = vpack.c.bf16 %v1164_v23, %v1164_v23  ;;  %v765_v32 = vpop.f32.mrf.mxu0  ;;  %v965_v33 = vpop.f32.mrf.mxu1 }
 0x19b   :  { %1605 = vst.msk [vmem:[%s3137_s3 + $0xb0] sm:$0xf] %vm1560_vm2, %v1907_v28  ;;  %v1115_v34 = vmax.f32 %v761_v24, %v1017_v30  ;;  %v1165_v35 = vmax.f32 %v961_v25, %v1067_v31  ;;  %v766_v36 = vadd.f32 %v3004_v54, %v765_v32  ;;  %v966_v37 = vadd.f32 %v3004_v54, %v965_v33 }
 0x19c   :  { %1655 = vst.msk [vmem:[%s3137_s3 + $0x178] sm:$0xf] %vm1560_vm2, %v1957_v29  ;;  %v2107_v38 = vpop.f32.mrf.mxu0  ;;  %v2207_v39 = vpop.f32.mrf.mxu1 }
 0x19d   :  { %v1908_v40 = vpack.c.bf16 %v1115_v34, %v1115_v34  ;;  %v1958_v41 = vpack.c.bf16 %v1165_v35, %v1165_v35  ;;  %v1018_v42 = vmul.f32 0.1, %v766_v36  ;;  %v1068_v43 = vmul.f32 0.1, %v966_v37 }
 0x19e   :  { %v768_v44 = vpop.f32.mrf.mxu0  ;;  %v968_v45 = vpop.f32.mrf.mxu1 }
 0x19f   :  { %1606 = vst.msk [vmem:[%s3137_s3 + $0xb4] sm:$0xf] %vm1560_vm2, %v1908_v40  ;;  %1656 = vst.msk [vmem:[%s3137_s3 + $0x17c] sm:$0xf] %vm1560_vm2, %v1958_v41  ;;  %v1116_v46 = vmax.f32 %v766_v36, %v1018_v42  ;;  %v1166_v47 = vmax.f32 %v966_v37, %v1068_v43  ;;  %v769_v48 = vadd.f32 %v3004_v54, %v768_v44 }
 0x1a0   :  { %v969_v49 = vadd.f32 %v3004_v54, %v968_v45  ;;  %v2108_v50 = vpop.f32.mrf.mxu0  ;;  %v2208_v52 = vpop.f32.mrf.mxu1 }
 0x1a1   :  { %v1909_v53 = vpack.c.bf16 %v1116_v46, %v1116_v46  ;;  %v1959_v51 = vpack.c.bf16 %v1166_v47, %v1166_v47  ;;  %v1019_v55 = vmul.f32 0.1, %v769_v48 }
 0x1a2   :  { %v1069_v56 = vmul.f32 0.1, %v969_v49  ;;  %v773_v57 = vpop.f32.mrf.mxu0 }
 0x1a3   :  { %1607 = vst.msk [vmem:[%s3137_s3 + $0xb8] sm:$0xf] %vm1560_vm2, %v1909_v53  ;;  %1657 = vst.msk [vmem:[%s3137_s3 + $0x180] sm:$0xf] %vm1560_vm2, %v1959_v51  ;;  %v1117_v58 = vmax.f32 %v769_v48, %v1019_v55  ;;  %v774_v60 = vadd.f32 %v3004_v54, %v773_v57 }
 0x1a4   :  { %v1167_v59 = vmax.f32 %v969_v49, %v1069_v56  ;;  %v2111_v61 = vpop.f32.mrf.mxu0 }
 0x1a5   :  { %v1910_v62 = vpack.c.bf16 %v1117_v58, %v1117_v58  ;;  %v1020_v0 = vmul.f32 0.1, %v774_v60 }
 0x1a6   :  { %v1960_v63 = vpack.c.bf16 %v1167_v59, %v1167_v59  ;;  %v776_v1 = vpop.f32.mrf.mxu0 }
 0x1a7   :  { %1608 = vst.msk [vmem:[%s3137_s3 + $0xbc] sm:$0xf] %vm1560_vm2, %v1910_v62  ;;  %v1118_v2 = vmax.f32 %v774_v60, %v1020_v0  ;;  %v777_v3 = vadd.f32 %v3004_v54, %v776_v1 }
 0x1a8   :  { %1658 = vst.msk [vmem:[%s3137_s3 + $0x184] sm:$0xf] %vm1560_vm2, %v1960_v63  ;;  %v2112_v4 = vpop.f32.mrf.mxu0 }
 0x1a9   :  { %v1911_v5 = vpack.c.bf16 %v1118_v2, %v1118_v2  ;;  %v1021_v6 = vmul.f32 0.1, %v777_v3 }
 0x1ab   :  { %1609 = vst.msk [vmem:[%s3137_s3 + $0xc0] sm:$0xf] %vm1560_vm2, %v1911_v5  ;;  %v1119_v7 = vmax.f32 %v777_v3, %v1021_v6 }
 0x1ad   :  { %v1912_v8 = vpack.c.bf16 %v1119_v7, %v1119_v7 }
 0x1af   :  { %1610 = vst.msk [vmem:[%s3137_s3 + $0xc4] sm:$0xf] %vm1560_vm2, %v1912_v8 }
 0x1b0   :  { %1663 = vsyncpa [#allocation3], 1 }
 0x1b1   :  { %1664 = vsyncpa [#allocation5], 1 }

// kernel: encoder2_forward.3
= control target key start
LH: loop header
LB: loop body
LE: loop exit
PB: predicated region body
PF: predicated region fallthrough
CT: control target
= control target key end

     0   :  { %s16434_s0 = inlined_call_operand.vmem [shape: bf16[196,1024], index: 0, kind: input, shape index: {}]   ;;  %s16435_s1 = inlined_call_operand.hbm [shape: bf16[1024,128], index: 1, kind: input, shape index: {}]   ;;  %s16436_s2 = inlined_call_operand.hbm [shape: f32[1,128], index: 2, kind: input, shape index: {}]   ;;  %s16437_s3 = inlined_call_operand.hbm [shape: f32[1,128], index: 3, kind: input, shape index: {}]   ;;  %s16438_s4 = inlined_call_operand.hbm [shape: f32[1,128], index: 4, kind: input, shape index: {}]   ;;  %s16439_s5 = inlined_call_operand.hbm [shape: bf16[49,128,1024], index: 5, kind: input, shape index: {}]   ;;  %s16440_s6 = inlined_call_operand.hbm [shape: f32[1,1024], index: 6, kind: input, shape index: {}]   ;;  %s16441_s7 = inlined_call_operand.hbm [shape: f32[1,1024], index: 7, kind: input, shape index: {}]   ;;  %s16442_s8 = inlined_call_operand.hbm [shape: f32[1,1024], index: 8, kind: input, shape index: {}]   ;;  %s16443_s9 = inlined_call_operand.vmem [shape: bf16[1024,32], index: 9, kind: input, shape index: {}]   ;;  %s16444_s10 = inlined_call_operand.hbm [shape: f32[1,32], index: 10, kind: input, shape index: {}]   ;;  %s16445_s11 = inlined_call_operand.hbm [shape: f32[1,32], index: 11, kind: input, shape index: {}]   ;;  %s16446_s12 = inlined_call_operand.hbm [shape: f32[1,32], index: 12, kind: input, shape index: {}]   ;;  %s16447_s13 = inlined_call_operand.hbm [shape: f32[4,32], index: 13, kind: output, shape index: {}]  }
   0x1   :  { %16468 = sst [smem:[#allocation32_spill]] %s16434_s0 }
   0x2   :  { %16469 = sst [smem:[#allocation33_spill]] %s16435_s1 }
   0x3   :  { %16470 = sst [smem:[#allocation34_spill]] %s16436_s2 }
   0x4   :  { %16471 = sst [smem:[#allocation35_spill]] %s16437_s3 }
   0x5   :  { %16472 = sst [smem:[#allocation36_spill]] %s16439_s5 }
   0x6   :  { %16473 = sst [smem:[#allocation37_spill]] %s16443_s9 }
   0x7   :  { %16474 = sst [smem:[#allocation38_spill]] %s16447_s13 }
   0x8   :  { %18 = vsyncpa [#allocation5], 0 }
   0x9   :  { %19 = vsyncpa [#allocation8], 0 }
   0xa   :  { %20 = vsyncpa [#allocation11], 0 }
   0xb   :  { %21 = vsyncpa [#allocation19], 0 }
   0xc   :  { %22 = vsyncpa [#allocation6], 0  ;;  %s14511_s25 = smov 0   ;;  %s14513_s26 = smov 0  }
   0xd   :  { %s14515_s27 = smov 0   ;;  %s14517_s28 = smov 0  }
   0xe LB: > { %s14422_s29 = smov [#allocation4]   ;;  %s14532_s14 = sadd.s32 4294967295, %s14420_s28   ;;  %s14420_s28 = sphi %s14517_s28, %s16517_s28   ;;  %s14416_s27 = sphi %s14515_s27, %s16521_s27   ;;  %s14412_s26 = sphi %s14513_s26, %s16520_s26   ;;  %s14408_s25 = sphi %s14511_s25, %s16519_s25  }
   0xf   : > { %s367_s30 = sshll.u32 %s14422_s29, 4  ;;  %p10275_p0 = scmp.ge.s32.totalorder %s14420_s28, 1  ;;  %s368_s30 = int_to_ptr.vmem [resolvable:$true] %s367_s30 }
  0x10   : > { %p16450_p1 = scmp.eq.s32.totalorder %s14532_s14, 0  ;;  %p352_p2 = scmp.lt.s32.totalorder %s14420_s28, 5 }
  0x11   : > { %s14551_s17 = sadd.s32 1, %s14420_s28   ;;  %s14051_s19 = scalar_lea.vmem %s368_s30, 8192 }
  0x12   : > { %p14538_p4 = pnand %p10275_p0, %p352_p2  ;;  %16477 = sst [smem:[#allocation29_spill]] %s14551_s17 }
  0x13   : > { %p14052_p8 = scmp.ne.s32.totalorder %s368_s30, %s14051_s19  ;;  %p14059_p11 = scmp.lt.s32.totalorder %s368_s30, %s368_s30 }
  0x14   : > { %s16475_s15 = scalar_select %p14538_p4, 1, 0 }
  0x15   : > { %p12645_p5 = pneg %p14538_p4  ;;  %p14060_p12 = scmp.lt.s32.totalorder %s14051_s19, %s14051_s19 }
  0x17   : > { %p14546_p6 = pnand %p12645_p5, %p16450_p1  ;;  %p14061_p13 = por %p14060_p12, %p14059_p11 }
  0x19   : > { %s16476_s16 = scalar_select %p14546_p6, 1, 0 }
  0x1a   : > { %p14555_p7 = pneg %p14546_p6 }
  0x1c   : > { %s16478_s18 = scalar_select %p14555_p7, 1, 0 }
  0x1d   : > { %p14054_p9 = pnand %p14052_p8, %p14555_p7 }
  0x1f   : > { %p14055_p10 = pneg %p14054_p9 }
  0x21   : > { %p14062_p0 = pnand %p14061_p13, %p14055_p10 }
  0x23   : > { %14065 = shalt.err (!%p14062_p0)
}
  0x24   : > { %s14423_s20 = smov 64   ;;  %s14424_s21 = smov 4  }
  0x25   : > { %s16479_s1 = sld [smem:[#allocation33_spill]]  ;;  %s137_s24 = ssub.s32 %s14420_s28, %s14551_s17 }
  0x26   : > { %s140_s29 = sadd.s32 1, %s14416_s27  ;;  %p138_p2 = scmp.eq.s32.totalorder %s137_s24, 0 }
  0x27   : > { %p147_p5 = scmp.ne.s32.totalorder %s14416_s27, %s14412_s26  ;;  %p148_p8 = scmp.eq.s32.totalorder %s14420_s28, 0 }
  0x28   : > { %p153_p9 = scmp.ne.s32.totalorder %s14412_s26, %s14408_s25  ;;  %p12687_p12 = scmp.lt.s32.totalorder %s14420_s28, 4 }
  0x29   : > { %s14575_s19 = scalar_select %p138_p2, %s14416_s27, %s140_s29  }
  0x2a   : > { %p149_p10 = por %p148_p8, %p147_p5  ;;  %p14579_p11 = por %p16450_p1, %p153_p9 }
  0x2b   : > { %12648 = dma.hbm_to_vmem [thread:$0]  (!%p14546_p6), %s16479_s1, 8192, %s368_s30, [#allocation5], %s14423_s20, %s14423_s20, %s14424_s21  }
  0x2c   : > { %16480 = sst [smem:[#allocation30_spill]] %s14575_s19  ;;  %s447_s0 = sand.u32 1, %s14420_s28  }
  0x2d   : > { %s16481_s13 = scalar_select %p14579_p11, 1, 0 }
  0x2e   : > { %s16449_s9 = sand.u32 1, %s14416_s27   ;;  %s12105_s30 = sshll.u32 %s14420_s28, 7 }
  0x2f   : > { %16482 = sst [smem:[#allocation31_spill]] %s16481_s13  ;;  %s12603_s22 = smul.u32 6272, %s16449_s9 }
  0x30   : > { %s16483_s5 = sld [smem:[#allocation36_spill]]  ;;  %p14594_p13 = pnand %p12687_p12, %p149_p10 }
  0x31   : > { %s451_s24 = scalar_lea.vmem [#allocation12], %s12603_s22  ;;  %s14600_s1 = scalar_lea.sflag [#allocation5], %s447_s0 }
  0x32   : > { %s16484_s25 = scalar_select %p14594_p13, 1, 0 }
  0x33   : > { %s458_s29 = sshll.u32 %s451_s24, 4  ;;  %p14606_p2 = pneg %p14594_p13  ;;  %s14598_s29 = int_to_ptr.vmem [resolvable:$true] %s458_s29 }
  0x36   : > { %s14592_s23 = scalar_lea.hbm %s16483_s5, %s12105_s30  ;;  %s14071_s22 = scalar_lea.hbm %s16483_s5, 401408 }
  0x37   : > { %s14066_s9 = scalar_lea.hbm %s14592_s23, 100352  ;;  %p14072_p9 = scmp.lt.s32.totalorder %s14592_s23, %s16483_s5 }
  0x38   : > { %p14067_p0 = scmp.ne.s32.totalorder %s14592_s23, %s14066_s9  ;;  %p14073_p10 = scmp.lt.s32.totalorder %s14071_s22, %s14066_s9 }
  0x39   : > { %s16485_s30 = scalar_select %p14606_p2, 1, 0 }
  0x3a   : > { %p14069_p5 = pnand %p14606_p2, %p14067_p0  ;;  %p14074_p12 = por %p14073_p10, %p14072_p9 }
  0x3c   : > { %p14070_p8 = pneg %p14069_p5 }
  0x3e   : > { %p14075_p3 = pnand %p14074_p12, %p14070_p8 }
  0x40   : > { %14078 = shalt.err (!%p14075_p3)
}
  0x41   : > { %s14079_s0 = scalar_lea.vmem %s14598_s29, 100352  ;;  %s14425_s17 = smov [#allocation12]  }
  0x42   : > { %p14080_p1 = scmp.ne.s32.totalorder %s14598_s29, %s14079_s0  ;;  %s14084_s20 = sshll.u32 %s14425_s17, 4  ;;  %s14085_s20 = int_to_ptr.vmem [resolvable:$false] %s14084_s20 }
  0x43   : > { %s14086_s21 = scalar_lea.vmem %s14085_s20, 200704  ;;  %p14087_p11 = scmp.lt.s32.totalorder %s14598_s29, %s14085_s20 }
  0x44   : > { %p14082_p0 = pnand %p14080_p1, %p14606_p2  ;;  %p14088_p4 = scmp.lt.s32.totalorder %s14086_s21, %s14079_s0 }
  0x46   : > { %p14083_p5 = pneg %p14082_p0  ;;  %p14089_p6 = por %p14088_p4, %p14087_p11 }
  0x48   : > { %p14090_p7 = pnand %p14089_p6, %p14083_p5 }
  0x4a   : > { %14093 = shalt.err (!%p14090_p7)
}
  0x4b   : > { %s14426_s9 = smov 512   ;;  %s14427_s19 = smov 128  }
  0x4c   : > { %s14428_s22 = smov 8   ;;  %s14429_s24 = smov [#allocation7]  }
  0x4d   : > { %12670 = dma.hbm_to_vmem [thread:$0]  (!%p14594_p13), %s14592_s23, 100352, %s14598_s29, %s14600_s1, %s14426_s9, %s14427_s19, %s14428_s22  }
  0x4e   : > { %s381_s17 = sshll.u32 %s14429_s24, 4  ;;  %s16486_s5 = sand.u32 1, %s14416_s27   ;;  %s382_s17 = int_to_ptr.vmem [resolvable:$true] %s381_s17 }
  0x4f   : > { %s14631_s13 = sshll.u32 %s16486_s5, 1  ;;  %s14105_s0 = scalar_lea.vmem %s382_s17, 16 }
  0x50   : > { %p14106_p1 = scmp.ne.s32.totalorder %s382_s17, %s14105_s0  ;;  %p16487_p3 = scmp.ne.s32.totalorder %s16478_s18, 0 }
  0x51   : > { %s14112_s20 = scalar_lea.vmem %s382_s17, 32  ;;  %p14113_p7 = scmp.lt.s32.totalorder %s382_s17, %s382_s17 }
  0x52   : > { %p14108_p4 = pnand %p14106_p1, %p16487_p3  ;;  %p14114_p11 = scmp.lt.s32.totalorder %s14112_s20, %s14105_s0 }
  0x54   : > { %p14109_p6 = pneg %p14108_p4  ;;  %p14115_p8 = por %p14114_p11, %p14113_p7 }
  0x56   : > { %p14116_p9 = pnand %p14115_p8, %p14109_p6 }
  0x58   : > { %14119 = shalt.err (!%p14116_p9)
}
  0x59   : > { %p16488_p10 = scmp.ne.s32.totalorder %s16476_s16, 0  ;;  %s16489_s2 = sld [smem:[#allocation34_spill]] }
  0x5a   : > { %s14641_s5 = sshll.u32 %s14420_s28, 5  ;;  %s472_s21 = scalar_lea.vmem [#allocation13], %s14631_s13 }
  0x5b   : > { %s480_s9 = sshll.u32 %s472_s21, 4  ;;  %s478_s24 = scalar_lea.hbm %s16440_s6, %s14641_s5  ;;  %s481_s9 = int_to_ptr.vmem [resolvable:$true] %s480_s9 }
  0x5c   : > { %s14120_s0 = scalar_lea.hbm %s478_s24, 32  ;;  %s14125_s29 = scalar_lea.hbm %s16440_s6, 128 }
  0x5d   : > { %p14121_p12 = scmp.ne.s32.totalorder %s478_s24, %s14120_s0  ;;  %p14126_p1 = scmp.lt.s32.totalorder %s478_s24, %s16440_s6 }
  0x5e   : > { %p14127_p4 = scmp.lt.s32.totalorder %s14125_s29, %s14120_s0 }
  0x5f   : > { %12651 = dma.hbm_to_vmem [thread:$0]  (!%p16488_p10), %s16489_s2, 16, %s382_s17, [#allocation8]  }
  0x60   : > { %p14123_p0 = pnand %p14121_p12, %p14606_p2  ;;  %p14128_p6 = por %p14127_p4, %p14126_p1 }
  0x62   : > { %p14124_p5 = pneg %p14123_p0 }
  0x64   : > { %p14129_p7 = pnand %p14128_p6, %p14124_p5 }
  0x66   : > { %14132 = shalt.err (!%p14129_p7)
}
  0x67   : > { %s14133_s21 = scalar_lea.vmem %s481_s9, 32  ;;  %s14430_s19 = smov [#allocation13]  }
  0x68   : > { %p14134_p11 = scmp.ne.s32.totalorder %s481_s9, %s14133_s21  ;;  %s14138_s22 = sshll.u32 %s14430_s19, 4  ;;  %s14139_s22 = int_to_ptr.vmem [resolvable:$false] %s14138_s22 }
  0x69   : > { %s14140_s2 = scalar_lea.vmem %s14139_s22, 64  ;;  %p14141_p12 = scmp.lt.s32.totalorder %s481_s9, %s14139_s22 }
  0x6a   : > { %p14136_p8 = pnand %p14134_p11, %p14606_p2  ;;  %p14142_p0 = scmp.lt.s32.totalorder %s14140_s2, %s14133_s21 }
  0x6c   : > { %p14137_p9 = pneg %p14136_p8  ;;  %p14143_p10 = por %p14142_p0, %p14141_p12 }
  0x6e   : > { %p14144_p3 = pnand %p14143_p10, %p14137_p9 }
  0x70   : > { %14147 = shalt.err (!%p14144_p3)
}
  0x71   : > { %12673 = dma.hbm_to_vmem [thread:$0]  (!%p14594_p13), %s478_s24, 32, %s481_s9, %s14600_s1  }
  0x72   : > { %s14431_s0 = smov [#allocation9]   ;;  %s14432_s23 = smov [#allocation10]  }
  0x73   : > { %s392_s20 = sshll.u32 %s14431_s0, 4  ;;  %s403_s29 = sshll.u32 %s14432_s23, 4  ;;  %s393_s20 = int_to_ptr.vmem [resolvable:$true] %s392_s20  ;;  %s404_s29 = int_to_ptr.vmem [resolvable:$true] %s403_s29 }
  0x74   : > { %s14159_s17 = scalar_lea.vmem %s393_s20, 16  ;;  %p16490_p1 = scmp.ne.s32.totalorder %s16478_s18, 0 }
  0x75   : > { %p14160_p5 = scmp.ne.s32.totalorder %s393_s20, %s14159_s17  ;;  %s14166_s2 = scalar_lea.vmem %s393_s20, 32 }
  0x76   : > { %p14167_p7 = scmp.lt.s32.totalorder %s393_s20, %s393_s20  ;;  %p14168_p10 = scmp.lt.s32.totalorder %s14166_s2, %s14159_s17 }
  0x77   : > { %p14162_p4 = pnand %p14160_p5, %p16490_p1 }
  0x78   : > { %p14169_p3 = por %p14168_p10, %p14167_p7 }
  0x79   : > { %p14163_p6 = pneg %p14162_p4 }
  0x7b   : > { %p14170_p11 = pnand %p14169_p3, %p14163_p6 }
  0x7d   : > { %14173 = shalt.err (!%p14170_p11)
}
  0x7e   : > { %p16491_p8 = scmp.ne.s32.totalorder %s16476_s16, 0  ;;  %s16492_s3 = sld [smem:[#allocation35_spill]] }
  0x7f   : > { %s14185_s28 = scalar_lea.vmem %s404_s29, 16  ;;  %s14192_s21 = scalar_lea.vmem %s404_s29, 32 }
  0x80   : > { %p14186_p9 = scmp.ne.s32.totalorder %s404_s29, %s14185_s28  ;;  %p14193_p5 = scmp.lt.s32.totalorder %s404_s29, %s404_s29 }
  0x81   : > { %p14194_p4 = scmp.lt.s32.totalorder %s14192_s21, %s14185_s28 }
  0x82   : > { %p14188_p12 = pnand %p14186_p9, %p16490_p1 }
  0x83   : > { %p14195_p13 = por %p14194_p4, %p14193_p5 }
  0x84   : > { %12654 = dma.hbm_to_vmem [thread:$0]  (!%p16491_p8), %s16492_s3, 16, %s393_s20, [#allocation8]  }
  0x85   : > { %p14189_p0 = pneg %p14188_p12 }
  0x87   : > { %p14196_p2 = pnand %p14195_p13, %p14189_p0 }
  0x89   : > { %14199 = shalt.err (!%p14196_p2)
}
  0x8a   : > { %12657 = dma.hbm_to_vmem [thread:$0]  (!%p16491_p8), %s16438_s4, 16, %s404_s29, [#allocation11]  }
  0x8b   : > { %s14679_s23 = scalar_lea.hbm %s16441_s7, %s14641_s5  ;;  %s491_s17 = scalar_lea.vmem [#allocation14], %s14631_s13 }
  0x8c   : > { %s499_s2 = sshll.u32 %s491_s17, 4  ;;  %s14433_s9 = smov [#allocation16]   ;;  %s500_s2 = int_to_ptr.vmem [resolvable:$true] %s499_s2 }
  0x8d   : > { %s414_s24 = sshll.u32 %s14433_s9, 4  ;;  %s14200_s28 = scalar_lea.hbm %s14679_s23, 32  ;;  %s415_s24 = int_to_ptr.vmem [resolvable:$true] %s414_s24 }
  0x8e   : > { %p14201_p13 = scmp.ne.s32.totalorder %s14679_s23, %s14200_s28  ;;  %p16493_p2 = scmp.ne.s32.totalorder %s16485_s30, 0 }
  0x8f   : > { %s14205_s19 = scalar_lea.hbm %s16441_s7, 128  ;;  %p14206_p10 = scmp.lt.s32.totalorder %s14679_s23, %s16441_s7 }
  0x90   : > { %p14203_p6 = pnand %p14201_p13, %p16493_p2  ;;  %p14207_p3 = scmp.lt.s32.totalorder %s14205_s19, %s14200_s28 }
  0x92   : > { %p14204_p7 = pneg %p14203_p6  ;;  %p14208_p11 = por %p14207_p3, %p14206_p10 }
  0x94   : > { %p14209_p9 = pnand %p14208_p11, %p14204_p7 }
  0x96   : > { %14212 = shalt.err (!%p14209_p9)
}
  0x97   : > { %s14213_s20 = scalar_lea.vmem %s500_s2, 32  ;;  %s14434_s17 = smov [#allocation14]  }
  0x98   : > { %p14214_p12 = scmp.ne.s32.totalorder %s500_s2, %s14213_s20  ;;  %s14218_s9 = sshll.u32 %s14434_s17, 4  ;;  %s14219_s9 = int_to_ptr.vmem [resolvable:$false] %s14218_s9 }
  0x99   : > { %s14220_s3 = scalar_lea.vmem %s14219_s9, 64  ;;  %p14221_p4 = scmp.lt.s32.totalorder %s500_s2, %s14219_s9 }
  0x9a   : > { %p14216_p0 = pnand %p14214_p12, %p16493_p2  ;;  %p14222_p13 = scmp.lt.s32.totalorder %s14220_s3, %s14213_s20 }
  0x9c   : > { %p14217_p5 = pneg %p14216_p0  ;;  %p14223_p6 = por %p14222_p13, %p14221_p4 }
  0x9e   : > { %p14224_p8 = pnand %p14223_p6, %p14217_p5 }
  0xa0   : > { %14227 = shalt.err (!%p14224_p8)
}
  0xa1   : > { %p16494_p1 = scmp.ne.s32.totalorder %s16484_s25, 0  ;;  %s14239_s28 = scalar_lea.vmem %s415_s24, 16 }
  0xa2   : > { %p14240_p7 = scmp.ne.s32.totalorder %s415_s24, %s14239_s28  ;;  %p16495_p10 = scmp.ne.s32.totalorder %s16478_s18, 0 }
  0xa3   : > { %12676 = dma.hbm_to_vmem [thread:$0]  (!%p16494_p1), %s14679_s23, 32, %s500_s2, %s14600_s1  }
  0xa4   : > { %p14242_p3 = pnand %p14240_p7, %p16495_p10  ;;  %s14246_s21 = scalar_lea.vmem %s415_s24, 32 }
  0xa5   : > { %p14247_p9 = scmp.lt.s32.totalorder %s415_s24, %s415_s24  ;;  %p14248_p12 = scmp.lt.s32.totalorder %s14246_s21, %s14239_s28 }
  0xa6   : > { %p14243_p11 = pneg %p14242_p3 }
  0xa7   : > { %p14249_p0 = por %p14248_p12, %p14247_p9 }
  0xa9   : > { %p14250_p2 = pnand %p14249_p0, %p14243_p11 }
  0xab   : > { %14253 = shalt.err (!%p14250_p2)
}
  0xac   : > { %p16496_p8 = scmp.ne.s32.totalorder %s16476_s16, 0  ;;  %s14435_s23 = smov [#allocation17]  }
  0xad   : > { %s425_s2 = sshll.u32 %s14435_s23, 4  ;;  %s14436_s19 = smov [#allocation18]   ;;  %s426_s2 = int_to_ptr.vmem [resolvable:$true] %s425_s2 }
  0xae   : > { %12660 = dma.hbm_to_vmem [thread:$0]  (!%p16496_p8), %s16444_s10, 16, %s415_s24, [#allocation8]  }
  0xaf   : > { %s436_s22 = sshll.u32 %s14436_s19, 4  ;;  %s14265_s0 = scalar_lea.vmem %s426_s2, 16  ;;  %s437_s22 = int_to_ptr.vmem [resolvable:$true] %s436_s22 }
  0xb0   : > { %p14266_p5 = scmp.ne.s32.totalorder %s426_s2, %s14265_s0  ;;  %s14272_s20 = scalar_lea.vmem %s426_s2, 32 }
  0xb1   : > { %p14273_p6 = scmp.lt.s32.totalorder %s426_s2, %s426_s2  ;;  %p14274_p2 = scmp.lt.s32.totalorder %s14272_s20, %s14265_s0 }
  0xb2   : > { %p14268_p4 = pnand %p14266_p5, %p16495_p10 }
  0xb3   : > { %p14275_p7 = por %p14274_p2, %p14273_p6 }
  0xb4   : > { %p14269_p13 = pneg %p14268_p4 }
  0xb6   : > { %p14276_p3 = pnand %p14275_p7, %p14269_p13 }
  0xb8   : > { %14279 = shalt.err (!%p14276_p3)
}
  0xb9   : > { %12663 = dma.hbm_to_vmem [thread:$0]  (!%p16496_p8), %s16445_s11, 16, %s426_s2, [#allocation11]  }
  0xba   : > { %s14291_s9 = scalar_lea.vmem %s437_s22, 16  ;;  %s14298_s28 = scalar_lea.vmem %s437_s22, 32 }
  0xbb   : > { %p14292_p11 = scmp.ne.s32.totalorder %s437_s22, %s14291_s9  ;;  %p14299_p0 = scmp.lt.s32.totalorder %s437_s22, %s437_s22 }
  0xbc   : > { %p14300_p5 = scmp.lt.s32.totalorder %s14298_s28, %s14291_s9 }
  0xbd   : > { %p14294_p9 = pnand %p14292_p11, %p16495_p10 }
  0xbe   : > { %p14301_p4 = por %p14300_p5, %p14299_p0 }
  0xbf   : > { %p14295_p12 = pneg %p14294_p9 }
  0xc1   : > { %p14302_p6 = pnand %p14301_p4, %p14295_p12 }
  0xc3   : > { %14305 = shalt.err (!%p14302_p6)
}
  0xc4   : > { %12666 = dma.hbm_to_vmem [thread:$0]  (!%p16496_p8), %s16446_s12, 16, %s437_s22, [#allocation19]  }
  0xc5   : > { %s516_s18 = scalar_lea.hbm %s16442_s8, %s14641_s5  ;;  %s510_s2 = scalar_lea.vmem [#allocation15], %s14631_s13 }
  0xc6   : > { %s518_s19 = sshll.u32 %s510_s2, 4  ;;  %s14306_s0 = scalar_lea.hbm %s516_s18, 32  ;;  %s519_s19 = int_to_ptr.vmem [resolvable:$true] %s518_s19 }
  0xc7   : > { %p14307_p10 = scmp.ne.s32.totalorder %s516_s18, %s14306_s0  ;;  %p16497_p13 = scmp.ne.s32.totalorder %s16485_s30, 0 }
  0xc8   : > { %s14311_s17 = scalar_lea.hbm %s16442_s8, 128  ;;  %p14312_p8 = scmp.lt.s32.totalorder %s516_s18, %s16442_s8 }
  0xc9   : > { %p14309_p2 = pnand %p14307_p10, %p16497_p13  ;;  %p14313_p3 = scmp.lt.s32.totalorder %s14311_s17, %s14306_s0 }
  0xcb   : > { %p14310_p7 = pneg %p14309_p2  ;;  %p14314_p11 = por %p14313_p3, %p14312_p8 }
  0xcd   : > { %p14315_p9 = pnand %p14314_p11, %p14310_p7 }
  0xcf   : > { %14318 = shalt.err (!%p14315_p9)
}
  0xd0   : > { %s14319_s13 = scalar_lea.vmem %s519_s19, 32  ;;  %s14437_s5 = smov [#allocation15]  }
  0xd1   : > { %p14320_p12 = scmp.ne.s32.totalorder %s519_s19, %s14319_s13  ;;  %s14324_s22 = sshll.u32 %s14437_s5, 4  ;;  %s14325_s22 = int_to_ptr.vmem [resolvable:$false] %s14324_s22 }
  0xd2   : > { %s14326_s28 = scalar_lea.vmem %s14325_s22, 64  ;;  %p14327_p4 = scmp.lt.s32.totalorder %s519_s19, %s14325_s22 }
  0xd3   : > { %p14322_p0 = pnand %p14320_p12, %p16497_p13  ;;  %p14328_p6 = scmp.lt.s32.totalorder %s14326_s28, %s14319_s13 }
  0xd5   : > { %p14323_p5 = pneg %p14322_p0  ;;  %p14329_p10 = por %p14328_p6, %p14327_p4 }
  0xd7   : > { %p14330_p2 = pnand %p14329_p10, %p14323_p5 }
  0xd9   : > { %14333 = shalt.err (!%p14330_p2)
}
  0xda   : > { %12679 = dma.hbm_to_vmem [thread:$0]  (!%p16494_p1), %s516_s18, 32, %s519_s19, %s14600_s1  }
  0xdb   : > { %p16498_p7 = scmp.ne.s32.totalorder %s16475_s15, 0 }
  0xdc   : > { %p16499_p8 = scmp.eq.s32.totalorder (!%p16498_p7), %s14532_s14, 0 }
  0xdd   : > { %536 = sbr.rel (%p16498_p7) target bundleno = 2103 (0x837), region = 72 }
  0xe2   : > { %14375 = dma.done.wait (%p16499_p8), [#allocation5], 8192   ;;  %p16500_p13 = pmov %p16499_p8 }
  0xe3   : > { %p16501_p3 = pmov %p16499_p8 }
  0xe4   : > { %14377 = vsyncadd (%p16500_p13), [#allocation5], 4294959104 }
  0xe5   : > { %14379 = dma.done.wait (%p16501_p3), [#allocation8], 32   ;;  %p16502_p11 = pmov %p16501_p3 }
  0xe6   : > { %p16503_p9 = pmov %p16501_p3 }
  0xe7   : > { %14381 = vsyncadd (%p16502_p11), [#allocation8], 4294967264 }
  0xe8   : > { %14383 = dma.done.wait (%p16503_p9), [#allocation11], 16   ;;  %p16504_p1 = pmov %p16501_p3 }
  0xe9   : > { %s16505_s1 = sld [smem:[#allocation31_spill]]  ;;  %s554_s15 = sand.u32 1, %s14532_s14  }
  0xea   : > { %14385 = vsyncadd (%p16504_p1), [#allocation11], 4294967280  ;;  %s556_s25 = sand.u32 1, %s14412_s26   ;;  %s555_s21 = scalar_lea.sflag [#allocation5], %s554_s15 }
  0xeb   : > { %s12604_s30 = smul.u32 6272, %s556_s25 }
  0xed   : > { %s14754_s3 = scalar_lea.vmem [#allocation12], %s12604_s30 }
  0xef   : > { %p16506_p12 = scmp.ne.s32.totalorder %s16505_s1, 0 }
  0xf1   : > { %14387 = dma.done.wait (%p16506_p12), %s555_s21, 100448  }
  0xf2   : > { %14389 = vsyncadd (%p16506_p12), %s555_s21, 4294866848  ;;  %s14760_s29 = sshll.u32 %s556_s25, 1  ;;  %p16507_p0 = pmov %p16504_p1 }
  0xf3   : > { %s567_s23 = scalar_lea.vmem [#allocation13], %s14760_s29  ;;  %s576_s18 = scalar_lea.vmem [#allocation14], %s14760_s29 }
  0xf4   : > { %s585_s2 = scalar_lea.vmem [#allocation15], %s14760_s29 }
  0xf5   : > { %14391 = dma.done.wait (%p16507_p0), [#allocation8], 16   ;;  %p16508_p5 = pmov %p16507_p0 }
  0xf6   : > { %p16509_p4 = pmov %p16507_p0 }
  0xf7   : > { %14393 = vsyncadd (%p16508_p5), [#allocation8], 4294967280 }
  0xf8   : > { %14395 = dma.done.wait (%p16509_p4), [#allocation11], 16   ;;  %p16510_p6 = pmov %p16507_p0 }
  0xf9   : > { %p16511_p10 = pmov %p16507_p0 }
  0xfa   : > { %14397 = vsyncadd (%p16510_p6), [#allocation11], 4294967280 }
  0xfb   : > { %14399 = dma.done.wait (%p16511_p10), [#allocation19], 16   ;;  %p16512_p2 = pmov %p16507_p0 }
  0xfc   : > { %s10306_s19 = sshll.u32 %s14532_s14, 5  ;;  %s16513_s17 = sld [smem:[#allocation37_spill]] }
  0xfd   : > { %14401 = vsyncadd (%p16512_p2), [#allocation19], 4294967280  ;;  %p660_p7 = scmp.lt.s32.totalorder %s10306_s19, 127  ;;  %p16514_p8 = scmp.ne.s32.totalorder %s14532_s14, 0 }
  0xfe   : > { %s16515_s5 = sld [smem:[#allocation32_spill]] (!%p16514_p8) }
  0xff   : > { %s16523_s19 = smov (!%p660_p7, %s10306_s19), 127  ;;  %669 = sbr.rel (%p16514_p8) target bundleno = 774 (0x306), region = 120 }
 0x100   : > { %s10307_s0 = sshll.u32 %s16523_s19, 2 }
 0x102   : > { %s14781_s24 = scalar_lea.vmem %s16513_s17, %s10307_s0 }
 0x104   : > { %v12744_v0 = vld [vmem:[#allocation4 + $0x78] sm:$0xff]   ;;  %v12748_v4 = vld [vmem:[#allocation4 + $0x70] sm:$0xff]   ;;  %v12752_v8 = vld [vmem:[#allocation4 + $0x68] sm:$0xff]   ;;  %vm2727_vm0 = vcmask 257024   ;;  %vm2366_vm1 = vcmask 1043456  }
 0x105   : > { %v12745_v1 = vld [vmem:[#allocation4 + $0xf8] sm:$0xff]   ;;  %12205 = vmatprep.subr.bf16.mxu0 %v12744_v0  ;;  %v12749_v5 = vld [vmem:[#allocation4 + $0xf0] sm:$0xff]   ;;  %v12753_v9 = vld [vmem:[#allocation4 + $0xe8] sm:$0xff]  }
 0x106   : > { %v12746_v2 = vld [vmem:[#allocation4 + $0x38] sm:$0xff]   ;;  %12299 = vmatprep.subr.bf16.mxu1 %v12745_v1  ;;  %v12750_v6 = vld [vmem:[#allocation4 + $0x30] sm:$0xff]   ;;  %v12754_v10 = vld [vmem:[#allocation4 + $0x28] sm:$0xff]  }
 0x107   : > { %v12747_v3 = vld [vmem:[#allocation4 + $0xb8] sm:$0xff]   ;;  %12206 = vmatpush3.bf16.msra.mxu0 %v12746_v2  ;;  %v12751_v7 = vld [vmem:[#allocation4 + $0xb0] sm:$0xff]   ;;  %v12755_v11 = vld [vmem:[#allocation4 + $0xa8] sm:$0xff]  }
 0x108   : > { %12300 = vmatpush3.bf16.msra.mxu1 %v12747_v3  ;;  %12207 = vmatprep.subr.bf16.mxu0 %v12748_v4  ;;  %v12756_v12 = vld [vmem:[#allocation4 + $0x60] sm:$0xff]   ;;  %v12760_v16 = vld [vmem:[#allocation4 + $0x58] sm:$0xff]   ;;  %v12764_v20 = vld [vmem:[#allocation4 + $0x50] sm:$0xff]  }
 0x109   : > { %12301 = vmatprep.subr.bf16.mxu1 %v12749_v5  ;;  %v12757_v13 = vld [vmem:[#allocation4 + $0xe0] sm:$0xff]   ;;  %v12761_v17 = vld [vmem:[#allocation4 + $0xd8] sm:$0xff]   ;;  %v12765_v21 = vld [vmem:[#allocation4 + $0xd0] sm:$0xff]  }
 0x10a   : > { %v12758_v14 = vld [vmem:[#allocation4 + $0x20] sm:$0xff]   ;;  %v12762_v18 = vld [vmem:[#allocation4 + $0x18] sm:$0xff]   ;;  %v12766_v22 = vld [vmem:[#allocation4 + $0x10] sm:$0xff]  }
 0x10b   : > { %12208 = vmatpush3.bf16.msra.mxu0 %v12750_v6  ;;  %v12759_v15 = vld [vmem:[#allocation4 + $0xa0] sm:$0xff]   ;;  %v12763_v19 = vld [vmem:[#allocation4 + $0x98] sm:$0xff]   ;;  %v12767_v23 = vld [vmem:[#allocation4 + $0x90] sm:$0xff]  }
 0x10c   : > { %12302 = vmatpush3.bf16.msra.mxu1 %v12751_v7  ;;  %12209 = vmatprep.subr.bf16.mxu0 %v12752_v8  ;;  %v12768_v24 = vld [vmem:[#allocation4 + $0x48] sm:$0xff]   ;;  %v12772_v28 = vld [vmem:[#allocation4 + $0x40] sm:$0xff]   ;;  %v670_v32 = vld [vmem:[%s16515_s5] sm:$0xff] }
 0x10d   : > { %12303 = vmatprep.subr.bf16.mxu1 %v12753_v9  ;;  %v12769_v25 = vld [vmem:[#allocation4 + $0xc8] sm:$0xff]   ;;  %v12773_v29 = vld [vmem:[#allocation4 + $0xc0] sm:$0xff]   ;;  %v674_v33 = vld [vmem:[%s16515_s5 + $0x20] sm:$0xff] }
 0x10e   : > { %v12770_v26 = vld [vmem:[#allocation4 + $0x8] sm:$0xff]   ;;  %v12774_v30 = vld [vmem:[#allocation4] sm:$0xff]   ;;  %v10310_v35 = vcombine.low %v670_v32, %v674_v33  ;;  %v10311_v36 = vcombine.high %v670_v32, %v674_v33  ;;  %v12776_v40 = vld [vmem:[#allocation4 + $0x178] sm:$0xff]  }
 0x10f   : > { %12210 = vmatpush3.bf16.msra.mxu0 %v12754_v10  ;;  %v12771_v27 = vld [vmem:[#allocation4 + $0x88] sm:$0xff]   ;;  %v12775_v31 = vld [vmem:[#allocation4 + $0x80] sm:$0xff]   ;;  %v12777_v41 = vld [vmem:[#allocation4 + $0x138] sm:$0xff]  }
 0x110   : > { %12304 = vmatpush3.bf16.msra.mxu1 %v12755_v11  ;;  %12211 = vmatprep.subr.bf16.mxu0 %v12756_v12  ;;  %v671_v34 = vld [vmem:[%s16515_s5 + $0x8] sm:$0xff]  ;;  %v12778_v42 = vld [vmem:[#allocation4 + $0x1f8] sm:$0xff]   ;;  %v12780_v50 = vld [vmem:[#allocation4 + $0x170] sm:$0xff]  }
 0x111   : > { %12305 = vmatprep.subr.bf16.mxu1 %v12757_v13  ;;  %v675_v37 = vld [vmem:[%s16515_s5 + $0x28] sm:$0xff]  ;;  %1829 = vmatprep.mubr.bf16.mxu0 %v10311_v36  ;;  %v12779_v43 = vld [vmem:[#allocation4 + $0x1b8] sm:$0xff]   ;;  %v12781_v52 = vld [vmem:[#allocation4 + $0x130] sm:$0xff]  }
 0x112   : > { %v10312_v38 = vcombine.low %v671_v34, %v675_v37  ;;  %v10313_v39 = vcombine.high %v671_v34, %v675_v37  ;;  %v678_v44 = vld [vmem:[%s16515_s5 + $0x40] sm:$0xff]  ;;  %v679_v47 = vld [vmem:[%s16515_s5 + $0x48] sm:$0xff]  ;;  %v12782_v60 = vld [vmem:[#allocation4 + $0x1f0] sm:$0xff]  }
 0x113   : > { %12212 = vmatpush3.bf16.msra.mxu0 %v12758_v14  ;;  %v682_v45 = vld [vmem:[%s16515_s5 + $0x60] sm:$0xff]  ;;  %v683_v48 = vld [vmem:[%s16515_s5 + $0x68] sm:$0xff]  ;;  %v12783_v61 = vld [vmem:[#allocation4 + $0x1b0] sm:$0xff]  }
 0x114   : > { %12306 = vmatpush3.bf16.msra.mxu1 %v12759_v15  ;;  %12213 = vmatprep.subr.bf16.mxu0 %v12760_v16  ;;  %v10319_v46 = vcombine.high %v678_v44, %v682_v45  ;;  %v10321_v49 = vcombine.high %v679_v47, %v683_v48  ;;  %v10318_v51 = vcombine.low %v678_v44, %v682_v45  ;;  %v686_v53 = vld [vmem:[%s16515_s5 + $0x80] sm:$0xff]  ;;  %v687_v56 = vld [vmem:[%s16515_s5 + $0x88] sm:$0xff]  ;;  %v12784_v2 = vld [vmem:[#allocation4 + $0x168] sm:$0xff]  }
 0x115   : > { %12307 = vmatprep.subr.bf16.mxu1 %v12761_v17  ;;  %1965 = vmatprep.mubr.bf16.mxu1 %v10313_v39  ;;  %v10320_v54 = vcombine.low %v679_v47, %v683_v48  ;;  %v690_v55 = vld [vmem:[%s16515_s5 + $0xa0] sm:$0xff]  ;;  %v691_v57 = vld [vmem:[%s16515_s5 + $0xa8] sm:$0xff]  ;;  %v12785_v3 = vld [vmem:[#allocation4 + $0x128] sm:$0xff]  }
 0x116   : > { %v10327_v58 = vcombine.high %v686_v53, %v690_v55  ;;  %v10329_v59 = vcombine.high %v687_v56, %v691_v57  ;;  %v694_v62 = vld [vmem:[%s16515_s5 + $0xc0] sm:$0xff]  ;;  %v695_v0 = vld [vmem:[%s16515_s5 + $0xc8] sm:$0xff]  ;;  %v10326_v4 = vcombine.low %v686_v53, %v690_v55  ;;  %v12786_v5 = vld [vmem:[#allocation4 + $0x1e8] sm:$0xff]   ;;  %v10328_v6 = vcombine.low %v687_v56, %v691_v57 }
 0x117   : > { %12214 = vmatpush3.bf16.msra.mxu0 %v12762_v18  ;;  %v698_v63 = vld [vmem:[%s16515_s5 + $0xe0] sm:$0xff]  ;;  %v699_v1 = vld [vmem:[%s16515_s5 + $0xe8] sm:$0xff]  ;;  %v12787_v8 = vld [vmem:[#allocation4 + $0x1a8] sm:$0xff]  }
 0x118   : > { %12308 = vmatpush3.bf16.msra.mxu1 %v12763_v19  ;;  %12215 = vmatprep.subr.bf16.mxu0 %v12764_v20  ;;  %v10335_v7 = vcombine.high %v694_v62, %v698_v63  ;;  %v10337_v9 = vcombine.high %v695_v0, %v699_v1  ;;  %v702_v10 = vld [vmem:[%s16515_s5 + $0x100] sm:$0xff]  ;;  %v12788_v12 = vld [vmem:[#allocation4 + $0x160] sm:$0xff]   ;;  %v10334_v18 = vcombine.low %v694_v62, %v698_v63  ;;  %v12797_v34 = vld [vmem:[#allocation4 + $0x110] sm:$0xff]  }
 0x119   : > { %12309 = vmatprep.subr.bf16.mxu1 %v12765_v21  ;;  %v706_v11 = vld [vmem:[%s16515_s5 + $0x120] sm:$0xff]  ;;  %v703_v13 = vld [vmem:[%s16515_s5 + $0x108] sm:$0xff]  ;;  %v10336_v19 = vcombine.low %v695_v0, %v699_v1  ;;  %v12798_v36 = vld [vmem:[#allocation4 + $0x1d0] sm:$0xff]  }
 0x11a   : > { %v707_v14 = vld [vmem:[%s16515_s5 + $0x128] sm:$0xff]  ;;  %v10343_v20 = vcombine.high %v702_v10, %v706_v11  ;;  %v12799_v37 = vld [vmem:[#allocation4 + $0x190] sm:$0xff]   ;;  %v722_v39 = vld [vmem:[%s16515_s5 + $0x1a0] sm:$0xff] }
 0x11b   : > { %12216 = vmatpush3.bf16.msra.mxu0 %v12766_v22  ;;  %v12789_v15 = vld [vmem:[#allocation4 + $0x120] sm:$0xff]   ;;  %v10345_v21 = vcombine.high %v703_v13, %v707_v14  ;;  %v12792_v22 = vld [vmem:[#allocation4 + $0x158] sm:$0xff]   ;;  %v10344_v32 = vcombine.low %v703_v13, %v707_v14  ;;  %v12801_v44 = vld [vmem:[#allocation4 + $0x108] sm:$0xff]  }
 0x11c   : > { %12310 = vmatpush3.bf16.msra.mxu1 %v12767_v23  ;;  %12217 = vmatprep.subr.bf16.mxu0 %v12768_v24  ;;  %v12790_v16 = vld [vmem:[#allocation4 + $0x1e0] sm:$0xff]   ;;  %v12793_v23 = vld [vmem:[#allocation4 + $0x118] sm:$0xff]   ;;  %v12802_v47 = vld [vmem:[#allocation4 + $0x1c8] sm:$0xff]  }
 0x11d   : > { %12311 = vmatprep.subr.bf16.mxu1 %v12769_v25  ;;  %v12791_v17 = vld [vmem:[#allocation4 + $0x1a0] sm:$0xff]   ;;  %v12794_v24 = vld [vmem:[#allocation4 + $0x1d8] sm:$0xff]  }
 0x11e   : > { %v710_v25 = vld [vmem:[%s16515_s5 + $0x140] sm:$0xff]  ;;  %v727_v53 = vld [vmem:[%s16515_s5 + $0x1c8] sm:$0xff] }
 0x11f   : > { %12218 = vmatpush3.bf16.msra.mxu0 %v12770_v26  ;;  %v714_v26 = vld [vmem:[%s16515_s5 + $0x160] sm:$0xff]  ;;  %v12805_v55 = vld [vmem:[#allocation4 + $0x100] sm:$0xff]  }
 0x120   : > { %12312 = vmatpush3.bf16.msra.mxu1 %v12771_v27  ;;  %12219 = vmatprep.subr.bf16.mxu0 %v12772_v28  ;;  %v12795_v27 = vld [vmem:[#allocation4 + $0x198] sm:$0xff]   ;;  %v711_v28 = vld [vmem:[%s16515_s5 + $0x148] sm:$0xff]  ;;  %v10351_v33 = vcombine.high %v710_v25, %v714_v26 }
 0x121   : > { %12313 = vmatprep.subr.bf16.mxu1 %v12773_v29  ;;  %v715_v29 = vld [vmem:[%s16515_s5 + $0x168] sm:$0xff]  ;;  %v734_v62 = vld [vmem:[%s16515_s5 + $0x200] sm:$0xff] }
 0x122   : > { %v10352_v45 = vcombine.low %v711_v28, %v715_v29  ;;  %v12806_v56 = vld [vmem:[#allocation4 + $0x1c0] sm:$0xff]   ;;  %v738_v63 = vld [vmem:[%s16515_s5 + $0x220] sm:$0xff] }
 0x123   : > { %12220 = vmatpush3.bf16.msra.mxu0 %v12774_v30  ;;  %v10342_v30 = vcombine.low %v702_v10, %v706_v11  ;;  %v12807_v57 = vld [vmem:[#allocation4 + $0x180] sm:$0xff]   ;;  %v10374_v10 = vcombine.low %v734_v62, %v738_v63  ;;  %v750_v14 = vld [vmem:[%s16515_s5 + $0x280] sm:$0xff] }
 0x124   : > { %12314 = vmatpush3.bf16.msra.mxu1 %v12775_v31  ;;  %12393 = vmatprep.subr.bf16.mxu0 %v12776_v40  ;;  %v12796_v31 = vld [vmem:[#allocation4 + $0x150] sm:$0xff]   ;;  %v12800_v40 = vld [vmem:[#allocation4 + $0x148] sm:$0xff]   ;;  %v735_v0 = vld [vmem:[%s16515_s5 + $0x208] sm:$0xff] }
 0x125   : > { %12487 = vmatprep.subr.bf16.mxu1 %v12778_v42  ;;  %v723_v42 = vld [vmem:[%s16515_s5 + $0x1a8] sm:$0xff] }
 0x126   : > { %1830 = vmatmul.mubr.bf16.vlgmr.msra.gmra.mxu0 %v10310_v35  ;;  %v10353_v35 = vcombine.high %v711_v28, %v715_v29  ;;  %v739_v1 = vld [vmem:[%s16515_s5 + $0x228] sm:$0xff] }
 0x127   : > { %1966 = vmatmul.mubr.bf16.vlgmr.msra.gmra.mxu1 %v10312_v38  ;;  %12394 = vmatpush3.bf16.msra.mxu0 %v12777_v41  ;;  %v718_v38 = vld [vmem:[%s16515_s5 + $0x180] sm:$0xff]  ;;  %v719_v41 = vld [vmem:[%s16515_s5 + $0x188] sm:$0xff]  ;;  %v10376_v11 = vcombine.low %v735_v0, %v739_v1 }
 0x128   : > { %12488 = vmatpush3.bf16.msra.mxu1 %v12779_v43  ;;  %1837 = vmatprep.mubr.bf16.mxu0 %v10319_v46  ;;  %v10350_v43 = vcombine.low %v710_v25, %v714_v26  ;;  %v10359_v46 = vcombine.high %v718_v38, %v722_v39  ;;  %v10361_v48 = vcombine.high %v719_v41, %v723_v42  ;;  %v763_v25 = vld [vmem:[%s16515_s5 + $0x2e8] sm:$0xff] }
 0x129   : > { %1973 = vmatprep.mubr.bf16.mxu1 %v10321_v49  ;;  %12395 = vmatprep.subr.bf16.mxu0 %v12780_v50  ;;  %v12803_v49 = vld [vmem:[#allocation4 + $0x188] sm:$0xff]   ;;  %v726_v50 = vld [vmem:[%s16515_s5 + $0x1c0] sm:$0xff] }
 0x12a   : > { %12489 = vmatprep.subr.bf16.mxu1 %v12782_v60 }
 0x12b   : > { %12396 = vmatpush3.bf16.msra.mxu0 %v12781_v52  ;;  %v12804_v52 = vld [vmem:[#allocation4 + $0x140] sm:$0xff]  }
 0x12c   : > { %12490 = vmatpush3.bf16.msra.mxu1 %v12783_v61  ;;  %12397 = vmatprep.subr.bf16.mxu0 %v12784_v2 }
 0x12d   : > { %12491 = vmatprep.subr.bf16.mxu1 %v12786_v5  ;;  %v10377_v5 = vcombine.high %v735_v0, %v739_v1 }
 0x12e   : > { %1838 = vmatmul.mubr.bf16.gmra.mxu0 %v10318_v51  ;;  %v730_v51 = vld [vmem:[%s16515_s5 + $0x1e0] sm:$0xff] }
 0x12f   : > { %1974 = vmatmul.mubr.bf16.gmra.mxu1 %v10320_v54  ;;  %1845 = vmatprep.mubr.bf16.mxu0 %v10327_v58  ;;  %v731_v54 = vld [vmem:[%s16515_s5 + $0x1e8] sm:$0xff]  ;;  %v10358_v58 = vcombine.low %v718_v38, %v722_v39  ;;  %v10367_v60 = vcombine.high %v726_v50, %v730_v51  ;;  %v10366_v2 = vcombine.low %v726_v50, %v730_v51  ;;  %v673_v38 = vld [vmem:[%s16515_s5 + $0x18] sm:$0xff] }
 0x130   : > { %1981 = vmatprep.mubr.bf16.mxu1 %v10329_v59  ;;  %12398 = vmatpush3.bf16.msra.mxu0 %v12785_v3  ;;  %v10360_v59 = vcombine.low %v719_v41, %v723_v42  ;;  %v10369_v61 = vcombine.high %v727_v53, %v731_v54  ;;  %v10368_v3 = vcombine.low %v727_v53, %v731_v54  ;;  %v677_v39 = vld [vmem:[%s16515_s5 + $0x38] sm:$0xff]  ;;  %v692_v53 = vld [vmem:[%s16515_s5 + $0xb0] sm:$0xff] }
 0x131   : > { %12492 = vmatpush3.bf16.msra.mxu1 %v12787_v8  ;;  %12399 = vmatprep.subr.bf16.mxu0 %v12788_v12  ;;  %v743_v8 = vld [vmem:[%s16515_s5 + $0x248] sm:$0xff]  ;;  %v689_v54 = vld [vmem:[%s16515_s5 + $0x98] sm:$0xff] }
 0x132   : > { %12493 = vmatprep.subr.bf16.mxu1 %v12790_v16  ;;  %v751_v16 = vld [vmem:[%s16515_s5 + $0x288] sm:$0xff] }
 0x134   : > { %12400 = vmatpush3.bf16.msra.mxu0 %v12789_v15  ;;  %v754_v15 = vld [vmem:[%s16515_s5 + $0x2a0] sm:$0xff] }
 0x135   : > { %12494 = vmatpush3.bf16.msra.mxu1 %v12791_v17  ;;  %12401 = vmatprep.subr.bf16.mxu0 %v12792_v22  ;;  %v755_v17 = vld [vmem:[%s16515_s5 + $0x2a8] sm:$0xff]  ;;  %v758_v22 = vld [vmem:[%s16515_s5 + $0x2c0] sm:$0xff]  ;;  %v10390_v26 = vcombine.low %v750_v14, %v754_v15 }
 0x136   : > { %1846 = vmatmul.mubr.bf16.gmra.mxu0 %v10326_v4  ;;  %12495 = vmatprep.subr.bf16.mxu1 %v12794_v24  ;;  %v10375_v4 = vcombine.high %v734_v62, %v738_v63  ;;  %v759_v24 = vld [vmem:[%s16515_s5 + $0x2c8] sm:$0xff]  ;;  %v697_v62 = vld [vmem:[%s16515_s5 + $0xd8] sm:$0xff] }
 0x137   : > { %1982 = vmatmul.mubr.bf16.gmra.mxu1 %v10328_v6  ;;  %1853 = vmatprep.mubr.bf16.mxu0 %v10335_v7  ;;  %v742_v6 = vld [vmem:[%s16515_s5 + $0x240] sm:$0xff]  ;;  %v10401_v29 = vcombine.high %v759_v24, %v763_v25  ;;  %v701_v63 = vld [vmem:[%s16515_s5 + $0xf8] sm:$0xff] }
 0x138   : > { %1989 = vmatprep.mubr.bf16.mxu1 %v10337_v9  ;;  %12402 = vmatpush3.bf16.msra.mxu0 %v12793_v23  ;;  %v746_v7 = vld [vmem:[%s16515_s5 + $0x260] sm:$0xff]  ;;  %v747_v9 = vld [vmem:[%s16515_s5 + $0x268] sm:$0xff] }
 0x139   : > { %12496 = vmatpush3.bf16.msra.mxu1 %v12795_v27  ;;  %12403 = vmatprep.subr.bf16.mxu0 %v12796_v31  ;;  %v10383_v12 = vcombine.high %v742_v6, %v746_v7  ;;  %v10385_v13 = vcombine.high %v743_v8, %v747_v9  ;;  %v762_v23 = vld [vmem:[%s16515_s5 + $0x2e0] sm:$0xff]  ;;  %v10392_v27 = vcombine.low %v751_v16, %v755_v17  ;;  %v767_v31 = vld [vmem:[%s16515_s5 + $0x308] sm:$0x33] }
 0x13a   : > { %12497 = vmatprep.subr.bf16.mxu1 %v12798_v36  ;;  %v10399_v28 = vcombine.high %v758_v22, %v762_v23  ;;  %v672_v36 = vld [vmem:[%s16515_s5 + $0x10] sm:$0xff]  ;;  %v10408_v41 = vcombine.low %v767_v31, %v767_v31 }
 0x13c   : > { %12404 = vmatpush3.bf16.msra.mxu0 %v12797_v34 }
 0x13d   : > { %12498 = vmatpush3.bf16.msra.mxu1 %v12799_v37  ;;  %12405 = vmatprep.subr.bf16.mxu0 %v12800_v40  ;;  %v676_v37 = vld [vmem:[%s16515_s5 + $0x30] sm:$0xff] }
 0x13e   : > { %1854 = vmatmul.mubr.bf16.gmra.mxu0 %v10334_v18  ;;  %12499 = vmatprep.subr.bf16.mxu1 %v12802_v47  ;;  %v10382_v18 = vcombine.low %v742_v6, %v746_v7  ;;  %v10315_v42 = vcombine.high %v672_v36, %v676_v37  ;;  %v685_v47 = vld [vmem:[%s16515_s5 + $0x78] sm:$0xff] }
 0x13f   : > { %1990 = vmatmul.mubr.bf16.gmra.mxu1 %v10336_v19  ;;  %1861 = vmatprep.mubr.bf16.mxu0 %v10343_v20  ;;  %v10384_v19 = vcombine.low %v743_v8, %v747_v9  ;;  %v10391_v20 = vcombine.high %v750_v14, %v754_v15  ;;  %v705_v6 = vld [vmem:[%s16515_s5 + $0x118] sm:$0xff]  ;;  %v10340_v9 = vcombine.low %v697_v62, %v701_v63 }
 0x140   : > { %1997 = vmatprep.mubr.bf16.mxu1 %v10345_v21  ;;  %12406 = vmatpush3.bf16.msra.mxu0 %v12801_v44  ;;  %v10393_v21 = vcombine.high %v751_v16, %v755_v17  ;;  %v680_v44 = vld [vmem:[%s16515_s5 + $0x50] sm:$0xff]  ;;  %v709_v7 = vld [vmem:[%s16515_s5 + $0x138] sm:$0xff] }
 0x141   : > { %12500 = vmatpush3.bf16.msra.mxu1 %v12803_v49  ;;  %12407 = vmatprep.subr.bf16.mxu0 %v12804_v52  ;;  %v10316_v49 = vcombine.low %v673_v38, %v677_v39  ;;  %v688_v52 = vld [vmem:[%s16515_s5 + $0x90] sm:$0xff]  ;;  %v713_v14 = vld [vmem:[%s16515_s5 + $0x158] sm:$0xff]  ;;  %v10348_v17 = vcombine.low %v705_v6, %v709_v7 }
 0x142   : > { %12501 = vmatprep.subr.bf16.mxu1 %v12806_v56  ;;  %v10330_v0 = vcombine.low %v688_v52, %v692_v53  ;;  %v717_v15 = vld [vmem:[%s16515_s5 + $0x178] sm:$0xff] }
 0x144   : > { %12408 = vmatpush3.bf16.msra.mxu0 %v12805_v55  ;;  %v693_v55 = vld [vmem:[%s16515_s5 + $0xb8] sm:$0xff] }
 0x145   : > { %12502 = vmatpush3.bf16.msra.mxu1 %v12807_v57  ;;  %v10332_v1 = vcombine.low %v689_v54, %v693_v55 }
 0x146   : > { %1862 = vmatmul.mubr.bf16.gmra.mxu0 %v10342_v30  ;;  %v766_v30 = vld [vmem:[%s16515_s5 + $0x300] sm:$0x33] }
 0x147   : > { %1998 = vmatmul.mubr.bf16.gmra.mxu1 %v10344_v32  ;;  %1869 = vmatprep.mubr.bf16.mxu0 %v10351_v33  ;;  %v10398_v32 = vcombine.low %v758_v22, %v762_v23  ;;  %v10400_v33 = vcombine.low %v759_v24, %v763_v25  ;;  %v10407_v34 = vcombine.high %v766_v30, %v766_v30  ;;  %v721_v22 = vld [vmem:[%s16515_s5 + $0x198] sm:$0xff] }
 0x148   : > { %2005 = vmatprep.mubr.bf16.mxu1 %v10353_v35  ;;  %v10409_v35 = vcombine.high %v767_v31, %v767_v31  ;;  %v10406_v40 = vcombine.low %v766_v30, %v766_v30  ;;  %v725_v23 = vld [vmem:[%s16515_s5 + $0x1b8] sm:$0xff]  ;;  %v10356_v25 = vcombine.low %v713_v14, %v717_v15 }
 0x149   : > { %v729_v30 = vld [vmem:[%s16515_s5 + $0x1d8] sm:$0xff] }
 0x14a   : > { %v733_v31 = vld [vmem:[%s16515_s5 + $0x1f8] sm:$0xff] }
 0x14e   : > { %1870 = vmatmul.mubr.bf16.gmra.mxu0 %v10350_v43  ;;  %v10317_v43 = vcombine.high %v673_v38, %v677_v39  ;;  %v737_v38 = vld [vmem:[%s16515_s5 + $0x218] sm:$0xff] }
 0x14f   : > { %2006 = vmatmul.mubr.bf16.gmra.mxu1 %v10352_v45  ;;  %1877 = vmatprep.mubr.bf16.mxu0 %v10359_v46  ;;  %v684_v45 = vld [vmem:[%s16515_s5 + $0x70] sm:$0xff]  ;;  %v681_v46 = vld [vmem:[%s16515_s5 + $0x58] sm:$0xff] }
 0x150   : > { %2013 = vmatprep.mubr.bf16.mxu1 %v10361_v48  ;;  %v10314_v48 = vcombine.low %v672_v36, %v676_v37  ;;  %v10323_v50 = vcombine.high %v680_v44, %v684_v45  ;;  %v10325_v51 = vcombine.high %v681_v46, %v685_v47  ;;  %v10322_v56 = vcombine.low %v680_v44, %v684_v45  ;;  %v736_v36 = vld [vmem:[%s16515_s5 + $0x210] sm:$0xff]  ;;  %v741_v39 = vld [vmem:[%s16515_s5 + $0x238] sm:$0xff] }
 0x151   : > { %v10324_v57 = vcombine.low %v681_v46, %v685_v47  ;;  %v740_v37 = vld [vmem:[%s16515_s5 + $0x230] sm:$0xff]  ;;  %v745_v46 = vld [vmem:[%s16515_s5 + $0x258] sm:$0xff] }
 0x152   : > { %v744_v44 = vld [vmem:[%s16515_s5 + $0x250] sm:$0xff]  ;;  %v749_v47 = vld [vmem:[%s16515_s5 + $0x278] sm:$0xff] }
 0x153   : > { %v748_v45 = vld [vmem:[%s16515_s5 + $0x270] sm:$0xff] }
 0x156   : > { %1878 = vmatmul.mubr.bf16.gmra.mxu0 %v10358_v58  ;;  %v10331_v58 = vcombine.high %v688_v52, %v692_v53  ;;  %v752_v52 = vld [vmem:[%s16515_s5 + $0x290] sm:$0xff] }
 0x157   : > { %2014 = vmatmul.mubr.bf16.gmra.mxu1 %v10360_v59  ;;  %1885 = vmatprep.mubr.bf16.mxu0 %v10367_v60  ;;  %v10333_v59 = vcombine.high %v689_v54, %v693_v55  ;;  %v696_v60 = vld [vmem:[%s16515_s5 + $0xd0] sm:$0xff]  ;;  %v753_v54 = vld [vmem:[%s16515_s5 + $0x298] sm:$0xff] }
 0x158   : > { %2021 = vmatprep.mubr.bf16.mxu1 %v10369_v61  ;;  %v700_v61 = vld [vmem:[%s16515_s5 + $0xf0] sm:$0xff]  ;;  %v757_v55 = vld [vmem:[%s16515_s5 + $0x2b8] sm:$0xff] }
 0x159   : > { %v10338_v8 = vcombine.low %v696_v60, %v700_v61  ;;  %v756_v53 = vld [vmem:[%s16515_s5 + $0x2b0] sm:$0xff] }
 0x15e   : > { %1886 = vmatmul.mubr.bf16.gmra.mxu0 %v10366_v2  ;;  %v10339_v2 = vcombine.high %v696_v60, %v700_v61  ;;  %v760_v60 = vld [vmem:[%s16515_s5 + $0x2d0] sm:$0xff] }
 0x15f   : > { %2022 = vmatmul.mubr.bf16.gmra.mxu1 %v10368_v3  ;;  %1893 = vmatprep.mubr.bf16.mxu0 %v10375_v4  ;;  %v10341_v3 = vcombine.high %v697_v62, %v701_v63  ;;  %v704_v4 = vld [vmem:[%s16515_s5 + $0x110] sm:$0xff]  ;;  %v761_v62 = vld [vmem:[%s16515_s5 + $0x2d8] sm:$0xff] }
 0x160   : > { %2029 = vmatprep.mubr.bf16.mxu1 %v10377_v5  ;;  %v708_v5 = vld [vmem:[%s16515_s5 + $0x130] sm:$0xff]  ;;  %v765_v63 = vld [vmem:[%s16515_s5 + $0x2f8] sm:$0xff] }
 0x161   : > { %v10346_v16 = vcombine.low %v704_v4, %v708_v5  ;;  %v764_v61 = vld [vmem:[%s16515_s5 + $0x2f0] sm:$0xff] }
 0x166   : > { %1894 = vmatmul.mubr.bf16.gmra.mxu0 %v10374_v10  ;;  %v10347_v10 = vcombine.high %v704_v4, %v708_v5  ;;  %v768_v4 = vld [vmem:[%s16515_s5 + $0x310] sm:$0x33]  ;;  %v769_v5 = vld [vmem:[%s16515_s5 + $0x318] sm:$0x33] }
 0x167   : > { %2030 = vmatmul.mubr.bf16.gmra.mxu1 %v10376_v11  ;;  %1901 = vmatprep.mubr.bf16.mxu0 %v10383_v12  ;;  %v10349_v11 = vcombine.high %v705_v6, %v709_v7  ;;  %v712_v12 = vld [vmem:[%s16515_s5 + $0x150] sm:$0xff]  ;;  %v10402_v6 = vcombine.low %v760_v60, %v764_v61  ;;  %v10404_v7 = vcombine.low %v761_v62, %v765_v63 }
 0x168   : > { %2037 = vmatprep.mubr.bf16.mxu1 %v10385_v13  ;;  %v716_v13 = vld [vmem:[%s16515_s5 + $0x170] sm:$0xff] }
 0x169   : > { %v10354_v24 = vcombine.low %v712_v12, %v716_v13 }
 0x16e   : > { %1902 = vmatmul.mubr.bf16.gmra.mxu0 %v10382_v18  ;;  %v10355_v18 = vcombine.high %v712_v12, %v716_v13  ;;  %v15085_v12 = vld [vmem:[#allocation7] ss:$0 sm:$0xff] }
 0x16f   : > { %2038 = vmatmul.mubr.bf16.gmra.mxu1 %v10384_v19  ;;  %1909 = vmatprep.mubr.bf16.mxu0 %v10391_v20  ;;  %v10357_v19 = vcombine.high %v713_v14, %v717_v15  ;;  %v720_v20 = vld [vmem:[%s16515_s5 + $0x190] sm:$0xff] }
 0x170   : > { %2045 = vmatprep.mubr.bf16.mxu1 %v10393_v21  ;;  %v724_v21 = vld [vmem:[%s16515_s5 + $0x1b0] sm:$0xff] }
 0x176   : > { %1910 = vmatmul.mubr.bf16.gmra.mxu0 %v10390_v26  ;;  %v10363_v26 = vcombine.high %v720_v20, %v724_v21 }
 0x177   : > { %2046 = vmatmul.mubr.bf16.gmra.mxu1 %v10392_v27  ;;  %1917 = vmatprep.mubr.bf16.mxu0 %v10399_v28  ;;  %v10365_v27 = vcombine.high %v721_v22, %v725_v23  ;;  %v728_v28 = vld [vmem:[%s16515_s5 + $0x1d0] sm:$0xff] }
 0x178   : > { %2053 = vmatprep.mubr.bf16.mxu1 %v10401_v29  ;;  %v732_v29 = vld [vmem:[%s16515_s5 + $0x1f0] sm:$0xff] }
 0x17e   : > { %1918 = vmatmul.mubr.bf16.gmra.mxu0 %v10398_v32  ;;  %v10362_v32 = vcombine.low %v720_v20, %v724_v21  ;;  %v10412_v21 = vcombine.low %v769_v5, %v769_v5 }
 0x17f   : > { %2054 = vmatmul.mubr.bf16.gmra.mxu1 %v10400_v33  ;;  %1925 = vmatprep.mubr.bf16.mxu0 %v10407_v34  ;;  %v10364_v33 = vcombine.low %v721_v22, %v725_v23  ;;  %v10371_v34 = vcombine.high %v728_v28, %v732_v29 }
 0x180   : > { %2061 = vmatprep.mubr.bf16.mxu1 %v10409_v35  ;;  %v10373_v35 = vcombine.high %v729_v30, %v733_v31 }
 0x186   : > { %1926 = vmatmul.mubr.bf16.gmra.mxu0 %v10406_v40  ;;  %v10370_v40 = vcombine.low %v728_v28, %v732_v29 }
 0x187   : > { %2062 = vmatmul.mubr.bf16.gmra.mxu1 %v10408_v41  ;;  %2101 = vmatprep.mubr.bf16.mxu0 %v10315_v42  ;;  %v10372_v41 = vcombine.low %v729_v30, %v733_v31  ;;  %v10379_v42 = vcombine.high %v736_v36, %v740_v37 }
 0x188   : > { %2237 = vmatprep.mubr.bf16.mxu1 %v10317_v43  ;;  %v10381_v43 = vcombine.high %v737_v38, %v741_v39 }
 0x18e   : > { %2102 = vmatmul.mubr.bf16.vlgmr.msra.gmra.mxu0 %v10314_v48  ;;  %v10378_v48 = vcombine.low %v736_v36, %v740_v37 }
 0x18f   : > { %2238 = vmatmul.mubr.bf16.vlgmr.msra.gmra.mxu1 %v10316_v49  ;;  %2109 = vmatprep.mubr.bf16.mxu0 %v10323_v50  ;;  %v10380_v49 = vcombine.low %v737_v38, %v741_v39  ;;  %v10387_v50 = vcombine.high %v744_v44, %v748_v45 }
 0x190   : > { %2245 = vmatprep.mubr.bf16.mxu1 %v10325_v51  ;;  %v10389_v51 = vcombine.high %v745_v46, %v749_v47 }
 0x196   : > { %2110 = vmatmul.mubr.bf16.gmra.mxu0 %v10322_v56  ;;  %v10386_v56 = vcombine.low %v744_v44, %v748_v45 }
 0x197   : > { %2246 = vmatmul.mubr.bf16.gmra.mxu1 %v10324_v57  ;;  %2117 = vmatprep.mubr.bf16.mxu0 %v10331_v58  ;;  %v10388_v57 = vcombine.low %v745_v46, %v749_v47  ;;  %v10395_v58 = vcombine.high %v752_v52, %v756_v53 }
 0x198   : > { %2253 = vmatprep.mubr.bf16.mxu1 %v10333_v59  ;;  %v10397_v59 = vcombine.high %v753_v54, %v757_v55 }
 0x19e   : > { %2118 = vmatmul.mubr.bf16.gmra.mxu0 %v10330_v0  ;;  %v10394_v0 = vcombine.low %v752_v52, %v756_v53 }
 0x19f   : > { %2254 = vmatmul.mubr.bf16.gmra.mxu1 %v10332_v1  ;;  %2125 = vmatprep.mubr.bf16.mxu0 %v10339_v2  ;;  %v10396_v1 = vcombine.low %v753_v54, %v757_v55  ;;  %v10403_v2 = vcombine.high %v760_v60, %v764_v61 }
 0x1a0   : > { %2261 = vmatprep.mubr.bf16.mxu1 %v10341_v3  ;;  %v10405_v3 = vcombine.high %v761_v62, %v765_v63 }
 0x1a6   : > { %2126 = vmatmul.mubr.bf16.gmra.mxu0 %v10338_v8  ;;  %v10411_v8 = vcombine.high %v768_v4, %v768_v4 }
 0x1a7   : > { %2262 = vmatmul.mubr.bf16.gmra.mxu1 %v10340_v9  ;;  %2133 = vmatprep.mubr.bf16.mxu0 %v10347_v10  ;;  %v10413_v9 = vcombine.high %v769_v5, %v769_v5 }
 0x1a8   : > { %2269 = vmatprep.mubr.bf16.mxu1 %v10349_v11 }
 0x1ae   : > { %2134 = vmatmul.mubr.bf16.gmra.mxu0 %v10346_v16 }
 0x1af   : > { %2270 = vmatmul.mubr.bf16.gmra.mxu1 %v10348_v17  ;;  %2141 = vmatprep.mubr.bf16.mxu0 %v10355_v18  ;;  %v10410_v18 = vcombine.low %v768_v4, %v768_v4 }
 0x1b0   : > { %2277 = vmatprep.mubr.bf16.mxu1 %v10357_v19 }
 0x1b6   : > { %2142 = vmatmul.mubr.bf16.gmra.mxu0 %v10354_v24 }
 0x1b7   : > { %2278 = vmatmul.mubr.bf16.gmra.mxu1 %v10356_v25  ;;  %2149 = vmatprep.mubr.bf16.mxu0 %v10363_v26 }
 0x1b8   : > { %2285 = vmatprep.mubr.bf16.mxu1 %v10365_v27 }
 0x1be   : > { %2150 = vmatmul.mubr.bf16.gmra.mxu0 %v10362_v32 }
 0x1bf   : > { %2286 = vmatmul.mubr.bf16.gmra.mxu1 %v10364_v33  ;;  %2157 = vmatprep.mubr.bf16.mxu0 %v10371_v34 }
 0x1c0   : > { %2293 = vmatprep.mubr.bf16.mxu1 %v10373_v35 }
 0x1c6   : > { %2158 = vmatmul.mubr.bf16.gmra.mxu0 %v10370_v40 }
 0x1c7   : > { %2294 = vmatmul.mubr.bf16.gmra.mxu1 %v10372_v41  ;;  %2165 = vmatprep.mubr.bf16.mxu0 %v10379_v42 }
 0x1c8   : > { %2301 = vmatprep.mubr.bf16.mxu1 %v10381_v43 }
 0x1ce   : > { %2166 = vmatmul.mubr.bf16.gmra.mxu0 %v10378_v48 }
 0x1cf   : > { %2302 = vmatmul.mubr.bf16.gmra.mxu1 %v10380_v49  ;;  %2173 = vmatprep.mubr.bf16.mxu0 %v10387_v50 }
 0x1d0   : > { %2309 = vmatprep.mubr.bf16.mxu1 %v10389_v51 }
 0x1d6   : > { %2174 = vmatmul.mubr.bf16.gmra.mxu0 %v10386_v56 }
 0x1d7   : > { %2310 = vmatmul.mubr.bf16.gmra.mxu1 %v10388_v57  ;;  %2181 = vmatprep.mubr.bf16.mxu0 %v10395_v58 }
 0x1d8   : > { %2317 = vmatprep.mubr.bf16.mxu1 %v10397_v59 }
 0x1de   : > { %2182 = vmatmul.mubr.bf16.gmra.mxu0 %v10394_v0 }
 0x1df   : > { %2318 = vmatmul.mubr.bf16.gmra.mxu1 %v10396_v1  ;;  %2189 = vmatprep.mubr.bf16.mxu0 %v10403_v2 }
 0x1e0   : > { %2325 = vmatprep.mubr.bf16.mxu1 %v10405_v3 }
 0x1e6   : > { %v12221_v10 = vpop.f32.mrf.mxu0  ;;  %2190 = vmatmul.mubr.bf16.gmra.mxu0 %v10402_v6 }
 0x1e7   : > { %v12315_v11 = vpop.f32.mrf.mxu1  ;;  %2326 = vmatmul.mubr.bf16.gmra.mxu1 %v10404_v7  ;;  %2197 = vmatprep.mubr.bf16.mxu0 %v10411_v8 }
 0x1e8   : > { %v12222_v13 = vpop.f32.mrf.mxu0  ;;  %2333 = vmatprep.mubr.bf16.mxu1 %v10413_v9 }
 0x1e9   : > { %v12223_v14 = vadd.f32 %v12222_v13, %v12221_v10  ;;  %v12316_v15 = vpop.f32.mrf.mxu1 }
 0x1ea   : > { %v12317_v16 = vadd.f32 %v12316_v15, %v12315_v11  ;;  %v12224_v17 = vpop.f32.mrf.mxu0 }
 0x1eb   : > { %v1832_v19 = vadd.f32 %v12223_v14, %v15085_v12  ;;  %v12318_v20 = vpop.f32.mrf.mxu1 }
 0x1ec   : > { %v12225_v22 = vpop.f32.mrf.mxu0 }
 0x1ed   : > { %v15088_v23 = vadd.f32 %v12317_v16, %v1832_v19  ;;  %v12226_v24 = vadd.f32 %v12225_v22, %v12224_v17  ;;  %v12319_v25 = vpop.f32.mrf.mxu1 }
 0x1ee   : > { %v12320_v26 = vadd.f32 %v12319_v25, %v12318_v20  ;;  %v12227_v27 = vpop.f32.mrf.mxu0  ;;  %2198 = vmatmul.mubr.bf16.gmra.mxu0 %v10410_v18 }
 0x1ef   : > { %v1835_v28 = vadd.f32 %v12226_v24, %v15085_v12  ;;  %v12321_v29 = vpop.f32.mrf.mxu1  ;;  %2334 = vmatmul.mubr.bf16.gmra.mxu1 %v10412_v21 }
 0x1f0   : > { %v12228_v30 = vpop.f32.mrf.mxu0 }
 0x1f1   : > { %v15091_v31 = vadd.f32 %v12320_v26, %v1835_v28  ;;  %v12229_v32 = vadd.f32 %v12228_v30, %v12227_v27  ;;  %v12322_v33 = vpop.f32.mrf.mxu1 }
 0x1f2   : > { %v12323_v34 = vadd.f32 %v12322_v33, %v12321_v29  ;;  %v12230_v35 = vpop.f32.mrf.mxu0 }
 0x1f3   : > { %v1840_v36 = vadd.f32 %v12229_v32, %v15085_v12  ;;  %v12324_v37 = vpop.f32.mrf.mxu1 }
 0x1f4   : > { %v12231_v38 = vpop.f32.mrf.mxu0 }
 0x1f5   : > { %v15094_v39 = vadd.f32 %v12323_v34, %v1840_v36  ;;  %v12232_v40 = vadd.f32 %v12231_v38, %v12230_v35  ;;  %v12325_v41 = vpop.f32.mrf.mxu1 }
 0x1f6   : > { %v12326_v42 = vadd.f32 %v12325_v41, %v12324_v37  ;;  %v12233_v43 = vpop.f32.mrf.mxu0 }
 0x1f7   : > { %v1843_v44 = vadd.f32 %v12232_v40, %v15085_v12  ;;  %v12327_v45 = vpop.f32.mrf.mxu1 }
 0x1f8   : > { %v12234_v46 = vpop.f32.mrf.mxu0 }
 0x1f9   : > { %v15097_v47 = vadd.f32 %v12326_v42, %v1843_v44  ;;  %v12235_v48 = vadd.f32 %v12234_v46, %v12233_v43  ;;  %v12328_v49 = vpop.f32.mrf.mxu1 }
 0x1fa   : > { %v12329_v50 = vadd.f32 %v12328_v49, %v12327_v45  ;;  %v12236_v51 = vpop.f32.mrf.mxu0 }
 0x1fb   : > { %v1848_v52 = vadd.f32 %v12235_v48, %v15085_v12  ;;  %v12330_v53 = vpop.f32.mrf.mxu1 }
 0x1fc   : > { %v12237_v54 = vpop.f32.mrf.mxu0 }
 0x1fd   : > { %v15100_v55 = vadd.f32 %v12329_v50, %v1848_v52  ;;  %v12238_v56 = vadd.f32 %v12237_v54, %v12236_v51  ;;  %v12331_v57 = vpop.f32.mrf.mxu1 }
 0x1fe   : > { %v12332_v58 = vadd.f32 %v12331_v57, %v12330_v53  ;;  %v12239_v59 = vpop.f32.mrf.mxu0 }
 0x1ff   : > { %v1851_v60 = vadd.f32 %v12238_v56, %v15085_v12  ;;  %v12333_v61 = vpop.f32.mrf.mxu1 }
 0x200   : > { %v12240_v62 = vpop.f32.mrf.mxu0 }
 0x201   : > { %v15103_v63 = vadd.f32 %v12332_v58, %v1851_v60  ;;  %v12241_v0 = vadd.f32 %v12240_v62, %v12239_v59  ;;  %v12334_v1 = vpop.f32.mrf.mxu1 }
 0x202   : > { %v12335_v2 = vadd.f32 %v12334_v1, %v12333_v61  ;;  %v12242_v3 = vpop.f32.mrf.mxu0 }
 0x203   : > { %v1856_v4 = vadd.f32 %v12241_v0, %v15085_v12  ;;  %v12336_v5 = vpop.f32.mrf.mxu1 }
 0x204   : > { %v12243_v6 = vpop.f32.mrf.mxu0 }
 0x205   : > { %v15106_v7 = vadd.f32 %v12335_v2, %v1856_v4  ;;  %v12244_v8 = vadd.f32 %v12243_v6, %v12242_v3  ;;  %v12337_v9 = vpop.f32.mrf.mxu1 }
 0x206   : > { %v12338_v10 = vadd.f32 %v12337_v9, %v12336_v5  ;;  %v12245_v11 = vpop.f32.mrf.mxu0 }
 0x207   : > { %v1859_v13 = vadd.f32 %v12244_v8, %v15085_v12  ;;  %v12339_v14 = vpop.f32.mrf.mxu1 }
 0x208   : > { %v12246_v15 = vpop.f32.mrf.mxu0 }
 0x209   : > { %v15109_v16 = vadd.f32 %v12338_v10, %v1859_v13  ;;  %v12247_v17 = vadd.f32 %v12246_v15, %v12245_v11  ;;  %v12340_v18 = vpop.f32.mrf.mxu1 }
 0x20a   : > { %v12341_v19 = vadd.f32 %v12340_v18, %v12339_v14  ;;  %v12248_v20 = vpop.f32.mrf.mxu0 }
 0x20b   : > { %v1864_v21 = vadd.f32 %v12247_v17, %v15085_v12  ;;  %v12342_v22 = vpop.f32.mrf.mxu1 }
 0x20c   : > { %v12249_v24 = vpop.f32.mrf.mxu0 }
 0x20d   : > { %v15112_v25 = vadd.f32 %v12341_v19, %v1864_v21  ;;  %v12250_v26 = vadd.f32 %v12249_v24, %v12248_v20  ;;  %v12343_v27 = vpop.f32.mrf.mxu1 }
 0x20e   : > { %v12344_v28 = vadd.f32 %v12343_v27, %v12342_v22  ;;  %v12251_v29 = vpop.f32.mrf.mxu0 }
 0x20f   : > { %v1867_v30 = vadd.f32 %v12250_v26, %v15085_v12  ;;  %v12345_v32 = vpop.f32.mrf.mxu1 }
 0x210   : > { %v12252_v33 = vpop.f32.mrf.mxu0 }
 0x211   : > { %v15115_v34 = vadd.f32 %v12344_v28, %v1867_v30  ;;  %v12253_v35 = vadd.f32 %v12252_v33, %v12251_v29  ;;  %v12346_v36 = vpop.f32.mrf.mxu1 }
 0x212   : > { %v12347_v37 = vadd.f32 %v12346_v36, %v12345_v32  ;;  %v12254_v38 = vpop.f32.mrf.mxu0 }
 0x213   : > { %v1872_v40 = vadd.f32 %v12253_v35, %v15085_v12  ;;  %v12348_v41 = vpop.f32.mrf.mxu1 }
 0x214   : > { %v12255_v42 = vpop.f32.mrf.mxu0 }
 0x215   : > { %v15118_v43 = vadd.f32 %v12347_v37, %v1872_v40  ;;  %v12256_v44 = vadd.f32 %v12255_v42, %v12254_v38  ;;  %v12349_v45 = vpop.f32.mrf.mxu1 }
 0x216   : > { %v12350_v46 = vadd.f32 %v12349_v45, %v12348_v41  ;;  %v12257_v48 = vpop.f32.mrf.mxu0 }
 0x217   : > { %v1875_v49 = vadd.f32 %v12256_v44, %v15085_v12  ;;  %v12351_v50 = vpop.f32.mrf.mxu1 }
 0x218   : > { %v12258_v51 = vpop.f32.mrf.mxu0 }
 0x219   : > { %v15121_v52 = vadd.f32 %v12350_v46, %v1875_v49  ;;  %v12259_v53 = vadd.f32 %v12258_v51, %v12257_v48  ;;  %v12352_v54 = vpop.f32.mrf.mxu1 }
 0x21a   : > { %v12353_v56 = vadd.f32 %v12352_v54, %v12351_v50  ;;  %v12260_v57 = vpop.f32.mrf.mxu0 }
 0x21b   : > { %v1880_v58 = vadd.f32 %v12259_v53, %v15085_v12  ;;  %v12354_v59 = vpop.f32.mrf.mxu1 }
 0x21c   : > { %v12261_v60 = vpop.f32.mrf.mxu0 }
 0x21d   : > { %v15124_v61 = vadd.f32 %v12353_v56, %v1880_v58  ;;  %v12262_v62 = vadd.f32 %v12261_v60, %v12260_v57  ;;  %v12355_v0 = vpop.f32.mrf.mxu1 }
 0x21e   : > { %v12356_v1 = vadd.f32 %v12355_v0, %v12354_v59  ;;  %v12263_v2 = vpop.f32.mrf.mxu0 }
 0x21f   : > { %v1883_v3 = vadd.f32 %v12262_v62, %v15085_v12  ;;  %v12357_v4 = vpop.f32.mrf.mxu1 }
 0x220   : > { %v12264_v5 = vpop.f32.mrf.mxu0 }
 0x221   : > { %v15127_v6 = vadd.f32 %v12356_v1, %v1883_v3  ;;  %v12265_v8 = vadd.f32 %v12264_v5, %v12263_v2  ;;  %v12358_v9 = vpop.f32.mrf.mxu1 }
 0x222   : > { %v12359_v10 = vadd.f32 %v12358_v9, %v12357_v4  ;;  %v12266_v11 = vpop.f32.mrf.mxu0 }
 0x223   : > { %v1888_v13 = vadd.f32 %v12265_v8, %v15085_v12  ;;  %v12360_v14 = vpop.f32.mrf.mxu1 }
 0x224   : > { %v12267_v15 = vpop.f32.mrf.mxu0 }
 0x225   : > { %v15130_v17 = vadd.f32 %v12359_v10, %v1888_v13  ;;  %v12268_v18 = vadd.f32 %v12267_v15, %v12266_v11  ;;  %v12361_v19 = vpop.f32.mrf.mxu1 }
 0x226   : > { %v12362_v20 = vadd.f32 %v12361_v19, %v12360_v14  ;;  %v12269_v21 = vpop.f32.mrf.mxu0 }
 0x227   : > { %v1891_v22 = vadd.f32 %v12268_v18, %v15085_v12  ;;  %v12363_v24 = vpop.f32.mrf.mxu1 }
 0x228   : > { %v12270_v26 = vpop.f32.mrf.mxu0 }
 0x229   : > { %v15133_v27 = vadd.f32 %v12362_v20, %v1891_v22  ;;  %v12271_v28 = vadd.f32 %v12270_v26, %v12269_v21  ;;  %v12364_v29 = vpop.f32.mrf.mxu1 }
 0x22a   : > { %v12365_v30 = vadd.f32 %v12364_v29, %v12363_v24  ;;  %v12272_v32 = vpop.f32.mrf.mxu0 }
 0x22b   : > { %v1896_v33 = vadd.f32 %v12271_v28, %v15085_v12  ;;  %v12366_v35 = vpop.f32.mrf.mxu1 }
 0x22c   : > { %v12273_v36 = vpop.f32.mrf.mxu0 }
 0x22d   : > { %v15136_v37 = vadd.f32 %v12365_v30, %v1896_v33  ;;  %v12274_v38 = vadd.f32 %v12273_v36, %v12272_v32  ;;  %v12367_v40 = vpop.f32.mrf.mxu1 }
 0x22e   : > { %v12368_v41 = vadd.f32 %v12367_v40, %v12366_v35  ;;  %v12275_v42 = vpop.f32.mrf.mxu0 }
 0x22f   : > { %v1899_v44 = vadd.f32 %v12274_v38, %v15085_v12  ;;  %v12369_v45 = vpop.f32.mrf.mxu1 }
 0x230   : > { %v12276_v46 = vpop.f32.mrf.mxu0 }
 0x231   : > { %v15139_v48 = vadd.f32 %v12368_v41, %v1899_v44  ;;  %v12277_v49 = vadd.f32 %v12276_v46, %v12275_v42  ;;  %v12370_v50 = vpop.f32.mrf.mxu1 }
 0x232   : > { %v12371_v51 = vadd.f32 %v12370_v50, %v12369_v45  ;;  %v12278_v53 = vpop.f32.mrf.mxu0 }
 0x233   : > { %v1904_v54 = vadd.f32 %v12277_v49, %v15085_v12  ;;  %v12372_v56 = vpop.f32.mrf.mxu1 }
 0x234   : > { %v12279_v57 = vpop.f32.mrf.mxu0 }
 0x235   : > { %v15142_v58 = vadd.f32 %v12371_v51, %v1904_v54  ;;  %v12280_v59 = vadd.f32 %v12279_v57, %v12278_v53  ;;  %v12373_v60 = vpop.f32.mrf.mxu1 }
 0x236   : > { %v12374_v62 = vadd.f32 %v12373_v60, %v12372_v56  ;;  %v12281_v0 = vpop.f32.mrf.mxu0 }
 0x237   : > { %v1907_v1 = vadd.f32 %v12280_v59, %v15085_v12  ;;  %v12375_v2 = vpop.f32.mrf.mxu1 }
 0x238   : > { %v12282_v3 = vpop.f32.mrf.mxu0 }
 0x239   : > { %v15145_v4 = vadd.f32 %v12374_v62, %v1907_v1  ;;  %v12283_v5 = vadd.f32 %v12282_v3, %v12281_v0  ;;  %v12376_v8 = vpop.f32.mrf.mxu1 }
 0x23a   : > { %v12377_v9 = vadd.f32 %v12376_v8, %v12375_v2  ;;  %v12284_v10 = vpop.f32.mrf.mxu0 }
 0x23b   : > { %v1912_v11 = vadd.f32 %v12283_v5, %v15085_v12  ;;  %v12378_v13 = vpop.f32.mrf.mxu1 }
 0x23c   : > { %v12285_v14 = vpop.f32.mrf.mxu0 }
 0x23d   : > { %v15148_v15 = vadd.f32 %v12377_v9, %v1912_v11  ;;  %v12286_v18 = vadd.f32 %v12285_v14, %v12284_v10  ;;  %v12379_v19 = vpop.f32.mrf.mxu1 }
 0x23e   : > { %v12380_v20 = vadd.f32 %v12379_v19, %v12378_v13  ;;  %v12287_v21 = vpop.f32.mrf.mxu0 }
 0x23f   : > { %v1915_v22 = vadd.f32 %v12286_v18, %v15085_v12  ;;  %v12381_v24 = vpop.f32.mrf.mxu1 }
 0x240   : > { %v12288_v26 = vpop.f32.mrf.mxu0 }
 0x241   : > { %v15151_v28 = vadd.f32 %v12380_v20, %v1915_v22  ;;  %v12289_v29 = vadd.f32 %v12288_v26, %v12287_v21  ;;  %v12382_v30 = vpop.f32.mrf.mxu1 }
 0x242   : > { %v12383_v32 = vadd.f32 %v12382_v30, %v12381_v24  ;;  %v12290_v33 = vpop.f32.mrf.mxu0 }
 0x243   : > { %v1920_v35 = vadd.f32 %v12289_v29, %v15085_v12  ;;  %v12384_v36 = vpop.f32.mrf.mxu1 }
 0x244   : > { %v12291_v38 = vpop.f32.mrf.mxu0 }
 0x245   : > { %v15154_v40 = vadd.f32 %v12383_v32, %v1920_v35  ;;  %v12292_v41 = vadd.f32 %v12291_v38, %v12290_v33  ;;  %v12385_v42 = vpop.f32.mrf.mxu1 }
 0x246   : > { %v12386_v44 = vadd.f32 %v12385_v42, %v12384_v36  ;;  %v12293_v45 = vpop.f32.mrf.mxu0 }
 0x247   : > { %v1923_v46 = vadd.f32 %v12292_v41, %v15085_v12  ;;  %v12387_v49 = vpop.f32.mrf.mxu1 }
 0x248   : > { %v12294_v50 = vpop.f32.mrf.mxu0 }
 0x249   : > { %v15157_v51 = vadd.f32 %v12386_v44, %v1923_v46  ;;  %v12295_v53 = vadd.f32 %v12294_v50, %v12293_v45  ;;  %v12388_v54 = vpop.f32.mrf.mxu1 }
 0x24a   : > { %v12389_v56 = vadd.f32 %v12388_v54, %v12387_v49  ;;  %v12296_v57 = vpop.f32.mrf.mxu0 }
 0x24b   : > { %v1928_v59 = vadd.f32 %v12295_v53, %v15085_v12  ;;  %v12390_v60 = vpop.f32.mrf.mxu1 }
 0x24c   : > { %v12297_v62 = vpop.f32.mrf.mxu0 }
 0x24d   : > { %v15160_v0 = vadd.f32 %v12389_v56, %v1928_v59  ;;  %v12391_v1 = vpop.f32.mrf.mxu1 }
 0x24e   : > { %v12409_v2 = vpop.f32.mrf.mxu0 }
 0x24f   : > { %v12503_v3 = vpop.f32.mrf.mxu1 }
 0x250   : > { %v12410_v5 = vpop.f32.mrf.mxu0 }
 0x251   : > { %v12411_v8 = vadd.f32 %v12410_v5, %v12409_v2  ;;  %v12504_v9 = vpop.f32.mrf.mxu1 }
 0x252   : > { %v12505_v10 = vadd.f32 %v12504_v9, %v12503_v3  ;;  %v12412_v11 = vpop.f32.mrf.mxu0 }
 0x253   : > { %v2104_v13 = vadd.f32 %v12411_v8, %v15088_v23  ;;  %v12506_v14 = vpop.f32.mrf.mxu1 }
 0x254   : > { %v12413_v18 = vpop.f32.mrf.mxu0 }
 0x255   : > { %v15163_v19 = vadd.f32 %v12505_v10, %v2104_v13  ;;  %v12414_v20 = vadd.f32 %v12413_v18, %v12412_v11  ;;  %v12507_v12 = vpop.f32.mrf.mxu1 }
 0x256   : > { %v12508_v21 = vadd.f32 %v12507_v12, %v12506_v14  ;;  %v12415_v22 = vpop.f32.mrf.mxu0 }
 0x257   : > { %v2107_v24 = vadd.f32 %v12414_v20, %v15091_v31  ;;  %v12509_v26 = vpop.f32.mrf.mxu1 }
 0x258   : > { %v12416_v29 = vpop.f32.mrf.mxu0 }
 0x259   : > { %v15166_v30 = vadd.f32 %v12508_v21, %v2107_v24  ;;  %v12417_v32 = vadd.f32 %v12416_v29, %v12415_v22  ;;  %v12510_v33 = vpop.f32.mrf.mxu1  ;;  %v2377_v29 = vmul.f32 %v15163_v19, %v15163_v19 }
 0x25a   : > { %v12511_v35 = vadd.f32 %v12510_v33, %v12509_v26  ;;  %v12418_v36 = vpop.f32.mrf.mxu0 }
 0x25b   : > { %v2112_v23 = vadd.f32 %v12417_v32, %v15094_v39  ;;  %v12512_v38 = vpop.f32.mrf.mxu1 }
 0x25c   : > { %v12419_v41 = vpop.f32.mrf.mxu0 }
 0x25d   : > { %v15169_v42 = vadd.f32 %v12511_v35, %v2112_v23  ;;  %v12420_v44 = vadd.f32 %v12419_v41, %v12418_v36  ;;  %v12513_v45 = vpop.f32.mrf.mxu1  ;;  %v2343_v36 = vadd.f32 %v15166_v30, %v15163_v19 }
 0x25e   : > { %v12514_v46 = vadd.f32 %v12513_v45, %v12512_v38  ;;  %v12421_v49 = vpop.f32.mrf.mxu0 }
 0x25f   : > { %v2115_v31 = vadd.f32 %v12420_v44, %v15097_v47  ;;  %v12515_v50 = vpop.f32.mrf.mxu1 }
 0x260   : > { %v12422_v53 = vpop.f32.mrf.mxu0 }
 0x261   : > { %v15172_v54 = vadd.f32 %v12514_v46, %v2115_v31  ;;  %v12423_v56 = vadd.f32 %v12422_v53, %v12421_v49  ;;  %v12516_v57 = vpop.f32.mrf.mxu1  ;;  %v2344_v31 = vadd.f32 %v2343_v36, %v15169_v42 }
 0x262   : > { %v12517_v59 = vadd.f32 %v12516_v57, %v12515_v50  ;;  %v12424_v60 = vpop.f32.mrf.mxu0 }
 0x263   : > { %v2120_v39 = vadd.f32 %v12423_v56, %v15100_v55  ;;  %v12518_v62 = vpop.f32.mrf.mxu1  ;;  %v2378_v55 = vmul.f32 %v15166_v30, %v15166_v30  ;;  %v2380_v44 = vmul.f32 %v15172_v54, %v15172_v54 }
 0x264   : > { %v12425_v1 = vpop.f32.mrf.mxu0 }
 0x265   : > { %v15175_v2 = vadd.f32 %v12517_v59, %v2120_v39  ;;  %v12426_v3 = vadd.f32 %v12425_v1, %v12424_v60  ;;  %v12519_v5 = vpop.f32.mrf.mxu1  ;;  %v2402_v23 = vadd.f32 %v2378_v55, %v2377_v29  ;;  %v2345_v39 = vadd.f32 %v2344_v31, %v15172_v54 }
 0x266   : > { %v12427_v8 = vpop.f32.mrf.mxu0  ;;  %v12520_v47 = vadd.f32 %v12519_v5, %v12518_v62 }
 0x267   : > { %v2123_v9 = vadd.f32 %v12426_v3, %v15103_v63  ;;  %v12521_v10 = vpop.f32.mrf.mxu1  ;;  %v2379_v63 = vmul.f32 %v15169_v42, %v15169_v42 }
 0x268   : > { %v12428_v11 = vpop.f32.mrf.mxu0 }
 0x269   : > { %v15178_v13 = vadd.f32 %v12520_v47, %v2123_v9  ;;  %v12522_v14 = vpop.f32.mrf.mxu1  ;;  %v12429_v12 = vadd.f32 %v12428_v11, %v12427_v8  ;;  %v2403_v50 = vadd.f32 %v2402_v23, %v2379_v63  ;;  %v2346_v47 = vadd.f32 %v2345_v39, %v15175_v2 }
 0x26a   : > { %v12430_v18 = vpop.f32.mrf.mxu0  ;;  %v12523_v45 = vadd.f32 %v12522_v14, %v12521_v10 }
 0x26b   : > { %v12524_v20 = vpop.f32.mrf.mxu1  ;;  %v2128_v33 = vadd.f32 %v12429_v12, %v15106_v7  ;;  %v2381_v7 = vmul.f32 %v15175_v2, %v15175_v2  ;;  %v2404_v3 = vadd.f32 %v2403_v50, %v2380_v44 }
 0x26c   : > { %v12431_v21 = vpop.f32.mrf.mxu0 }
 0x26d   : > { %v12525_v22 = vpop.f32.mrf.mxu1  ;;  %v12432_v24 = vadd.f32 %v12431_v21, %v12430_v18  ;;  %v15195_v56 = vadd.f32 %v12523_v45, %v2128_v33  ;;  %v2405_v14 = vadd.f32 %v2404_v3, %v2381_v7  ;;  %v2347_v21 = vadd.f32 %v2346_v47, %v15178_v13 }
 0x26e   : > { %v12433_v26 = vpop.f32.mrf.mxu0  ;;  %v12526_v57 = vadd.f32 %v12525_v22, %v12524_v20 }
 0x26f   : > { %v12527_v32 = vpop.f32.mrf.mxu1  ;;  %v2131_v46 = vadd.f32 %v12432_v24, %v15109_v16  ;;  %v2382_v16 = vmul.f32 %v15178_v13, %v15178_v13  ;;  %v2348_v63 = vadd.f32 %v2347_v21, %v15195_v56 }
 0x270   : > { %v12434_v35 = vpop.f32.mrf.mxu0 }
 0x271   : > { %v12435_v38 = vadd.f32 %v12434_v35, %v12433_v26  ;;  %v12528_v41 = vpop.f32.mrf.mxu1  ;;  %v15201_v5 = vadd.f32 %v12526_v57, %v2131_v46  ;;  %v2406_v24 = vadd.f32 %v2405_v14, %v2382_v16 }
 0x272   : > { %v12436_v49 = vpop.f32.mrf.mxu0  ;;  %v12529_v8 = vadd.f32 %v12528_v41, %v12527_v32 }
 0x273   : > { %v12530_v53 = vpop.f32.mrf.mxu1  ;;  %v2136_v59 = vadd.f32 %v12435_v38, %v15112_v25  ;;  %v2383_v25 = vmul.f32 %v15195_v56, %v15195_v56  ;;  %v2384_v26 = vmul.f32 %v15201_v5, %v15201_v5  ;;  %v2349_v41 = vadd.f32 %v2348_v63, %v15201_v5 }
 0x274   : > { %v12437_v60 = vpop.f32.mrf.mxu0 }
 0x275   : > { %v12438_v62 = vadd.f32 %v12437_v60, %v12436_v49  ;;  %v12531_v1 = vpop.f32.mrf.mxu1  ;;  %v15207_v18 = vadd.f32 %v12529_v8, %v2136_v59  ;;  %v2407_v36 = vadd.f32 %v2406_v24, %v2383_v25  ;;  %v14438_v25 = vmov 0.0  }
 0x276   : > { %v12439_v9 = vpop.f32.mrf.mxu0  ;;  %v12532_v20 = vadd.f32 %v12531_v1, %v12530_v53  ;;  %2728 = vst.msk [vmem:[#allocation3] sm:$0xf] %vm2727_vm0, %v14438_v25 }
 0x277   : > { %v2139_v10 = vadd.f32 %v12438_v62, %v15115_v34  ;;  %v12533_v11 = vpop.f32.mrf.mxu1  ;;  %v2385_v23 = vmul.f32 %v15207_v18, %v15207_v18  ;;  %v2408_v49 = vadd.f32 %v2407_v36, %v2384_v26 }
 0x278   : > { %v12440_v12 = vpop.f32.mrf.mxu0 }
 0x279   : > { %v12441_v55 = vadd.f32 %v12440_v12, %v12439_v9  ;;  %v12534_v22 = vpop.f32.mrf.mxu1  ;;  %v15212_v29 = vadd.f32 %v12532_v20, %v2139_v10  ;;  %v2409_v59 = vadd.f32 %v2408_v49, %v2385_v23 }
 0x27a   : > { %v12442_v34 = vpop.f32.mrf.mxu0  ;;  %v12535_v33 = vadd.f32 %v12534_v22, %v12533_v11 }
 0x27b   : > { %v2144_v32 = vadd.f32 %v12441_v55, %v15118_v43  ;;  %v12536_v35 = vpop.f32.mrf.mxu1  ;;  %v2386_v31 = vmul.f32 %v15212_v29, %v15212_v29  ;;  %v2350_v43 = vadd.f32 %v2349_v41, %v15207_v18 }
 0x27c   : > { %v12443_v38 = vpop.f32.mrf.mxu0 }
 0x27d   : > { %v15219_v44 = vadd.f32 %v12535_v33, %v2144_v32  ;;  %v12444_v45 = vadd.f32 %v12443_v38, %v12442_v34  ;;  %v12537_v46 = vpop.f32.mrf.mxu1  ;;  %v2351_v62 = vadd.f32 %v2350_v43, %v15212_v29  ;;  %v2410_v8 = vadd.f32 %v2409_v59, %v2386_v31 }
 0x27e   : > { %v12445_v50 = vpop.f32.mrf.mxu0  ;;  %v12538_v7 = vadd.f32 %v12537_v46, %v12536_v35 }
 0x27f   : > { %v2147_v53 = vadd.f32 %v12444_v45, %v15121_v52  ;;  %v12539_v57 = vpop.f32.mrf.mxu1  ;;  %v2387_v60 = vmul.f32 %v15219_v44, %v15219_v44  ;;  %v2352_v47 = vadd.f32 %v2351_v62, %v15219_v44 }
 0x280   : > { %v12446_v39 = vpop.f32.mrf.mxu0 }
 0x281   : > { %v15228_v1 = vadd.f32 %v12538_v7, %v2147_v53  ;;  %v12447_v3 = vadd.f32 %v12446_v39, %v12445_v50  ;;  %v12540_v16 = vpop.f32.mrf.mxu1  ;;  %v2411_v20 = vadd.f32 %v2410_v8, %v2387_v60 }
 0x282   : > { %v12448_v9 = vpop.f32.mrf.mxu0  ;;  %v12541_v11 = vadd.f32 %v12540_v16, %v12539_v57 }
 0x283   : > { %v2388_v52 = vmul.f32 %v15228_v1, %v15228_v1  ;;  %v2152_v10 = vadd.f32 %v12447_v3, %v15124_v61  ;;  %v12542_v14 = vpop.f32.mrf.mxu1  ;;  %v2353_v21 = vadd.f32 %v2352_v47, %v15228_v1 }
 0x284   : > { %v12449_v12 = vpop.f32.mrf.mxu0 }
 0x285   : > { %v15235_v55 = vadd.f32 %v12541_v11, %v2152_v10  ;;  %v12450_v22 = vadd.f32 %v12449_v12, %v12448_v9  ;;  %v12543_v24 = vpop.f32.mrf.mxu1  ;;  %v2412_v26 = vadd.f32 %v2411_v20, %v2388_v52 }
 0x286   : > { %v12451_v34 = vpop.f32.mrf.mxu0  ;;  %v12544_v33 = vadd.f32 %v12543_v24, %v12542_v14 }
 0x287   : > { %v2354_v63 = vadd.f32 %v2353_v21, %v15235_v55  ;;  %v2389_v32 = vmul.f32 %v15235_v55, %v15235_v55  ;;  %v2155_v61 = vadd.f32 %v12450_v22, %v15127_v6  ;;  %v12545_v35 = vpop.f32.mrf.mxu1 }
 0x288   : > { %v12452_v36 = vpop.f32.mrf.mxu0 }
 0x289   : > { %v2413_v23 = vadd.f32 %v2412_v26, %v2389_v32  ;;  %v15241_v38 = vadd.f32 %v12544_v33, %v2155_v61  ;;  %v12453_v41 = vadd.f32 %v12452_v36, %v12451_v34  ;;  %v12546_v45 = vpop.f32.mrf.mxu1 }
 0x28a   : > { %v12454_v46 = vpop.f32.mrf.mxu0  ;;  %v12547_v43 = vadd.f32 %v12546_v45, %v12545_v35 }
 0x28b   : > { %v2355_v49 = vadd.f32 %v2354_v63, %v15241_v38  ;;  %v2390_v31 = vmul.f32 %v15241_v38, %v15241_v38  ;;  %v2160_v50 = vadd.f32 %v12453_v41, %v15130_v17  ;;  %v12548_v53 = vpop.f32.mrf.mxu1 }
 0x28c   : > { %v12455_v7 = vpop.f32.mrf.mxu0 }
 0x28d   : > { %v2414_v6 = vadd.f32 %v2413_v23, %v2390_v31  ;;  %v15247_v57 = vadd.f32 %v12547_v43, %v2160_v50  ;;  %v12456_v59 = vadd.f32 %v12455_v7, %v12454_v46  ;;  %v12549_v60 = vpop.f32.mrf.mxu1 }
 0x28e   : > { %v12457_v39 = vpop.f32.mrf.mxu0  ;;  %v12550_v8 = vadd.f32 %v12549_v60, %v12548_v53 }
 0x28f   : > { %v2356_v62 = vadd.f32 %v2355_v49, %v15247_v57  ;;  %v2391_v3 = vmul.f32 %v15247_v57, %v15247_v57  ;;  %v2163_v16 = vadd.f32 %v12456_v59, %v15133_v27  ;;  %v12551_v9 = vpop.f32.mrf.mxu1 }
 0x290   : > { %v12458_v47 = vpop.f32.mrf.mxu0 }
 0x291   : > { %v2415_v17 = vadd.f32 %v2414_v6, %v2391_v3  ;;  %v15253_v52 = vadd.f32 %v12550_v8, %v2163_v16  ;;  %v12459_v10 = vadd.f32 %v12458_v47, %v12457_v39  ;;  %v12552_v11 = vpop.f32.mrf.mxu1 }
 0x292   : > { %v12460_v14 = vpop.f32.mrf.mxu0  ;;  %v12553_v21 = vadd.f32 %v12552_v11, %v12551_v9 }
 0x293   : > { %v2357_v25 = vadd.f32 %v2356_v62, %v15253_v52  ;;  %v2392_v20 = vmul.f32 %v15253_v52, %v15253_v52  ;;  %v2168_v12 = vadd.f32 %v12459_v10, %v15136_v37  ;;  %v12554_v22 = vpop.f32.mrf.mxu1 }
 0x294   : > { %v12461_v24 = vpop.f32.mrf.mxu0 }
 0x295   : > { %v2416_v27 = vadd.f32 %v2415_v17, %v2392_v20  ;;  %v15259_v26 = vadd.f32 %v12553_v21, %v2168_v12  ;;  %v12462_v34 = vadd.f32 %v12461_v24, %v12460_v14  ;;  %v12555_v63 = vpop.f32.mrf.mxu1 }
 0x296   : > { %v12463_v32 = vpop.f32.mrf.mxu0  ;;  %v12556_v36 = vadd.f32 %v12555_v63, %v12554_v22 }
 0x297   : > { %v2358_v61 = vadd.f32 %v2357_v25, %v15259_v26  ;;  %v2393_v33 = vmul.f32 %v15259_v26, %v15259_v26  ;;  %v2171_v35 = vadd.f32 %v12462_v34, %v15139_v48  ;;  %v12557_v23 = vpop.f32.mrf.mxu1 }
 0x298   : > { %v12464_v41 = vpop.f32.mrf.mxu0 }
 0x299   : > { %v2417_v37 = vadd.f32 %v2416_v27, %v2393_v33  ;;  %v15265_v45 = vadd.f32 %v12556_v36, %v2171_v35  ;;  %v12465_v46 = vadd.f32 %v12464_v41, %v12463_v32  ;;  %v12558_v49 = vpop.f32.mrf.mxu1 }
 0x29a   : > { %v12466_v31 = vpop.f32.mrf.mxu0  ;;  %v12559_v7 = vadd.f32 %v12558_v49, %v12557_v23 }
 0x29b   : > { %v2359_v50 = vadd.f32 %v2358_v61, %v15265_v45  ;;  %v2394_v43 = vmul.f32 %v15265_v45, %v15265_v45  ;;  %v2176_v53 = vadd.f32 %v12465_v46, %v15142_v58  ;;  %v12560_v6 = vpop.f32.mrf.mxu1 }
 0x29c   : > { %v12467_v59 = vpop.f32.mrf.mxu0 }
 0x29d   : > { %v2418_v48 = vadd.f32 %v2417_v37, %v2394_v43  ;;  %v15271_v60 = vadd.f32 %v12559_v7, %v2176_v53  ;;  %v12468_v39 = vadd.f32 %v12467_v59, %v12466_v31  ;;  %v12561_v62 = vpop.f32.mrf.mxu1 }
 0x29e   : > { %v12469_v3 = vpop.f32.mrf.mxu0  ;;  %v12562_v47 = vadd.f32 %v12561_v62, %v12560_v6 }
 0x29f   : > { %v2360_v16 = vadd.f32 %v2359_v50, %v15271_v60  ;;  %v2395_v8 = vmul.f32 %v15271_v60, %v15271_v60  ;;  %v2179_v9 = vadd.f32 %v12468_v39, %v15145_v4  ;;  %v12563_v17 = vpop.f32.mrf.mxu1 }
 0x2a0   : > { %v12470_v10 = vpop.f32.mrf.mxu0 }
 0x2a1   : > { %v2419_v58 = vadd.f32 %v2418_v48, %v2395_v8  ;;  %v15277_v11 = vadd.f32 %v12562_v47, %v2179_v9  ;;  %v12471_v14 = vadd.f32 %v12470_v10, %v12469_v3  ;;  %v12564_v25 = vpop.f32.mrf.mxu1 }
 0x2a2   : > { %v12472_v20 = vpop.f32.mrf.mxu0  ;;  %v12565_v24 = vadd.f32 %v12564_v25, %v12563_v17 }
 0x2a3   : > { %v2361_v12 = vadd.f32 %v2360_v16, %v15277_v11  ;;  %v2396_v21 = vmul.f32 %v15277_v11, %v15277_v11  ;;  %v2184_v22 = vadd.f32 %v12471_v14, %v15148_v15  ;;  %v12566_v27 = vpop.f32.mrf.mxu1 }
 0x2a4   : > { %v12473_v34 = vpop.f32.mrf.mxu0 }
 0x2a5   : > { %v2420_v4 = vadd.f32 %v2419_v58, %v2396_v21  ;;  %v15283_v63 = vadd.f32 %v12565_v24, %v2184_v22  ;;  %v12474_v32 = vadd.f32 %v12473_v34, %v12472_v20  ;;  %v12567_v61 = vpop.f32.mrf.mxu1 }
 0x2a6   : > { %v12475_v33 = vpop.f32.mrf.mxu0  ;;  %v12568_v41 = vadd.f32 %v12567_v61, %v12566_v27 }
 0x2a7   : > { %v2362_v35 = vadd.f32 %v2361_v12, %v15283_v63  ;;  %v2397_v36 = vmul.f32 %v15283_v63, %v15283_v63  ;;  %v2187_v23 = vadd.f32 %v12474_v32, %v15151_v28  ;;  %v12569_v37 = vpop.f32.mrf.mxu1 }
 0x2a8   : > { %v12476_v46 = vpop.f32.mrf.mxu0 }
 0x2a9   : > { %v2421_v15 = vadd.f32 %v2420_v4, %v2397_v36  ;;  %v15289_v49 = vadd.f32 %v12568_v41, %v2187_v23  ;;  %v12477_v31 = vadd.f32 %v12476_v46, %v12475_v33  ;;  %v12570_v50 = vpop.f32.mrf.mxu1 }
 0x2aa   : > { %v12478_v43 = vpop.f32.mrf.mxu0  ;;  %v12571_v59 = vadd.f32 %v12570_v50, %v12569_v37 }
 0x2ab   : > { %v2363_v53 = vadd.f32 %v2362_v35, %v15289_v49  ;;  %v2398_v7 = vmul.f32 %v15289_v49, %v15289_v49  ;;  %v2192_v6 = vadd.f32 %v12477_v31, %v15154_v40  ;;  %v12572_v48 = vpop.f32.mrf.mxu1 }
 0x2ac   : > { %v12479_v39 = vpop.f32.mrf.mxu0 }
 0x2ad   : > { %v2422_v28 = vadd.f32 %v2421_v15, %v2398_v7  ;;  %v15295_v62 = vadd.f32 %v12571_v59, %v2192_v6  ;;  %v12480_v3 = vadd.f32 %v12479_v39, %v12478_v43  ;;  %v12573_v16 = vpop.f32.mrf.mxu1 }
 0x2ae   : > { %v12481_v8 = vpop.f32.mrf.mxu0  ;;  %v12574_v10 = vadd.f32 %v12573_v16, %v12572_v48 }
 0x2af   : > { %v2364_v9 = vadd.f32 %v2363_v53, %v15295_v62  ;;  %v2399_v47 = vmul.f32 %v15295_v62, %v15295_v62  ;;  %v2195_v17 = vadd.f32 %v12480_v3, %v15157_v51  ;;  %v12575_v58 = vpop.f32.mrf.mxu1 }
 0x2b0   : > { %v12482_v14 = vpop.f32.mrf.mxu0 }
 0x2b1   : > { %v2423_v40 = vadd.f32 %v2422_v28, %v2399_v47  ;;  %v15301_v25 = vadd.f32 %v12574_v10, %v2195_v17  ;;  %v12483_v20 = vadd.f32 %v12482_v14, %v12481_v8  ;;  %v12576_v12 = vpop.f32.mrf.mxu1 }
 0x2b2   : > { %v12484_v21 = vpop.f32.mrf.mxu0  ;;  %v12577_v34 = vadd.f32 %v12576_v12, %v12575_v58 }
 0x2b3   : > { %v2365_v22 = vadd.f32 %v2364_v9, %v15301_v25  ;;  %v2400_v24 = vmul.f32 %v15301_v25, %v15301_v25  ;;  %v2200_v27 = vadd.f32 %v12483_v20, %v15160_v0  ;;  %v12578_v4 = vpop.f32.mrf.mxu1 }
 0x2b4   : > { %v12485_v51 = vpop.f32.mrf.mxu0 }
 0x2b5   : > { %v2424_v32 = vadd.f32 %v2423_v40, %v2400_v24  ;;  %v15307_v61 = vadd.f32 %v12577_v34, %v2200_v27  ;;  %v12579_v33 = vpop.f32.mrf.mxu1 }
 0x2b7   : > { %v2367_v35 = vsel %vm2366_vm1, %v15307_v61, 0.0  ;;  %v2401_v36 = vmul.f32 %v15307_v61, %v15307_v61 }
 0x2b8   : > { %v2368_v23 = vadd.f32 %v2367_v35, %v2365_v22 }
 0x2b9   : > { %v2425_v41 = vsel %vm2366_vm1, %v2401_v36, 0.0  ;;  %v10478_v36 = vld [vmem:[#allocation9] ss:$0 sm:$0xff] }
 0x2ba   : > { %v2369_v37 = vrot.slane %v2368_v23, 4  ;;  %v2426_v46 = vadd.f32 %v2425_v41, %v2424_v32 }
 0x2bc   : > { %v2370_v15 = vadd.f32 %v2369_v37, %v2368_v23  ;;  %v2427_v31 = vrot.slane %v2426_v46, 4 }
 0x2be   : > { %v2371_v0 = vrot.slane %v2370_v15, 2  ;;  %v2428_v50 = vadd.f32 %v2427_v31, %v2426_v46 }
 0x2c0   : > { %v2372_v43 = vadd.f32 %v2371_v0, %v2370_v15  ;;  %v2429_v53 = vrot.slane %v2428_v50, 2 }
 0x2c2   : > { %v2373_v7 = vrot.slane %v2372_v43, 1  ;;  %v2430_v6 = vadd.f32 %v2429_v53, %v2428_v50 }
 0x2c4   : > { %v2374_v59 = vadd.f32 %v2373_v7, %v2372_v43  ;;  %v2431_v48 = vrot.slane %v2430_v6, 1 }
 0x2c6   : > { %v2376_v39 = vmul.f32 0.0051020407, %v2374_v59  ;;  %v2432_v28 = vadd.f32 %v2431_v48, %v2430_v6 }
 0x2c8   : > { %v2433_v3 = vmul.f32 0.0051020407, %v2432_v28  ;;  %v2434_v16 = vmul.f32 %v2376_v39, %v2376_v39  ;;  %v2448_v9 = vsub.f32 %v15228_v1, %v2376_v39  ;;  %v2449_v47 = vsub.f32 %v15235_v55, %v2376_v39 }
 0x2c9   : > { %v2450_v10 = vsub.f32 %v15241_v38, %v2376_v39  ;;  %v2451_v58 = vsub.f32 %v15247_v57, %v2376_v39  ;;  %v2452_v14 = vsub.f32 %v15253_v52, %v2376_v39  ;;  %v2453_v40 = vsub.f32 %v15259_v26, %v2376_v39 }
 0x2ca   : > { %v2435_v8 = vsub.f32 %v2433_v3, %v2434_v16  ;;  %v2454_v20 = vsub.f32 %v15265_v45, %v2376_v39  ;;  %v2455_v12 = vsub.f32 %v15271_v60, %v2376_v39  ;;  %v2456_v21 = vsub.f32 %v15277_v11, %v2376_v39 }
 0x2cb   : > { %v2457_v22 = vsub.f32 %v15283_v63, %v2376_v39  ;;  %v2458_v1 = vsub.f32 %v15289_v49, %v2376_v39  ;;  %v2459_v55 = vsub.f32 %v15295_v62, %v2376_v39  ;;  %v2460_v38 = vsub.f32 %v15301_v25, %v2376_v39 }
 0x2cc   : > { %v2436_v17 = vmax.f32 %v2435_v8, 0.0  ;;  %v2461_v57 = vsub.f32 %v15307_v61, %v2376_v39  ;;  %v2437_v52 = vsub.f32 %v15163_v19, %v2376_v39  ;;  %v2438_v26 = vsub.f32 %v15166_v30, %v2376_v39 }
 0x2cd   : > { %v2439_v45 = vsub.f32 %v15169_v42, %v2376_v39  ;;  %v2440_v60 = vsub.f32 %v15172_v54, %v2376_v39  ;;  %v2441_v11 = vsub.f32 %v15175_v2, %v2376_v39  ;;  %v2442_v63 = vsub.f32 %v15178_v13, %v2376_v39 }
 0x2ce   : > { %v2462_v24 = vadd.f32 1e-05, %v2436_v17  ;;  %v2443_v49 = vsub.f32 %v15195_v56, %v2376_v39  ;;  %v2444_v25 = vsub.f32 %v15201_v5, %v2376_v39  ;;  %v2445_v27 = vsub.f32 %v15207_v18, %v2376_v39 }
 0x2cf   : > { %v2446_v34 = vsub.f32 %v15212_v29, %v2376_v39  ;;  %v2447_v19 = vsub.f32 %v15219_v44, %v2376_v39 }
 0x2d0   : > { %12816 = vrsqrt.f32 %v2462_v24 }
 0x2dd   : > { %v12817_v62 = vpop.eup %12816 }
 0x2de   : > { %v2464_v30 = vmul.f32 %v12817_v62, %v2437_v52  ;;  %v2465_v4 = vmul.f32 %v12817_v62, %v2438_v26  ;;  %v2466_v42 = vmul.f32 %v12817_v62, %v2439_v45  ;;  %v2467_v51 = vmul.f32 %v12817_v62, %v2440_v60 }
 0x2df   : > { %v2468_v54 = vmul.f32 %v12817_v62, %v2441_v11  ;;  %v2469_v32 = vmul.f32 %v12817_v62, %v2442_v63  ;;  %v2470_v2 = vmul.f32 %v12817_v62, %v2443_v49  ;;  %v2471_v61 = vmul.f32 %v12817_v62, %v2444_v25 }
 0x2e0   : > { %v2472_v13 = vmul.f32 %v12817_v62, %v2445_v27  ;;  %v2473_v33 = vmul.f32 %v12817_v62, %v2446_v34  ;;  %v2474_v56 = vmul.f32 %v12817_v62, %v2447_v19  ;;  %v2475_v35 = vmul.f32 %v12817_v62, %v2448_v9  ;;  %v10479_v9 = vld [vmem:[#allocation10] ss:$0 sm:$0xff] }
 0x2e1   : > { %v2476_v5 = vmul.f32 %v12817_v62, %v2449_v47  ;;  %v2477_v23 = vmul.f32 %v12817_v62, %v2450_v10  ;;  %v2478_v18 = vmul.f32 %v12817_v62, %v2451_v58  ;;  %v2479_v41 = vmul.f32 %v12817_v62, %v2452_v14 }
 0x2e2   : > { %v2480_v29 = vmul.f32 %v12817_v62, %v2453_v40  ;;  %v2481_v37 = vmul.f32 %v12817_v62, %v2454_v20  ;;  %v2482_v44 = vmul.f32 %v12817_v62, %v2455_v12  ;;  %v2483_v46 = vmul.f32 %v12817_v62, %v2456_v21 }
 0x2e3   : > { %v2484_v15 = vmul.f32 %v12817_v62, %v2457_v22  ;;  %v2485_v31 = vmul.f32 %v12817_v62, %v2458_v1  ;;  %v2486_v0 = vmul.f32 %v12817_v62, %v2459_v55  ;;  %v2487_v50 = vmul.f32 %v12817_v62, %v2460_v38 }
 0x2e4   : > { %v2488_v43 = vmul.f32 %v12817_v62, %v2461_v57  ;;  %v2495_v53 = vmul.f32 %v10478_v36, %v2464_v30  ;;  %v2496_v7 = vmul.f32 %v10478_v36, %v2465_v4  ;;  %v2497_v6 = vmul.f32 %v10478_v36, %v2466_v42 }
 0x2e5   : > { %v2498_v59 = vmul.f32 %v10478_v36, %v2467_v51  ;;  %v2499_v48 = vmul.f32 %v10478_v36, %v2468_v54  ;;  %v2500_v39 = vmul.f32 %v10478_v36, %v2469_v32  ;;  %v2501_v28 = vmul.f32 %v10478_v36, %v2470_v2 }
 0x2e6   : > { %v2502_v3 = vmul.f32 %v10478_v36, %v2471_v61  ;;  %v2503_v16 = vmul.f32 %v10478_v36, %v2472_v13  ;;  %v2504_v8 = vmul.f32 %v10478_v36, %v2473_v33  ;;  %v2505_v47 = vmul.f32 %v10478_v36, %v2474_v56 }
 0x2e7   : > { %v2506_v17 = vmul.f32 %v10478_v36, %v2475_v35  ;;  %v2507_v10 = vmul.f32 %v10478_v36, %v2476_v5  ;;  %v2508_v58 = vmul.f32 %v10478_v36, %v2477_v23  ;;  %v2509_v14 = vmul.f32 %v10478_v36, %v2478_v18 }
 0x2e8   : > { %v2510_v40 = vmul.f32 %v10478_v36, %v2479_v41  ;;  %v2511_v20 = vmul.f32 %v10478_v36, %v2480_v29  ;;  %v2512_v12 = vmul.f32 %v10478_v36, %v2481_v37  ;;  %v2513_v21 = vmul.f32 %v10478_v36, %v2482_v44 }
 0x2e9   : > { %v2514_v22 = vmul.f32 %v10478_v36, %v2483_v46  ;;  %v2515_v1 = vmul.f32 %v10478_v36, %v2484_v15  ;;  %v2516_v55 = vmul.f32 %v10478_v36, %v2485_v31  ;;  %v2517_v38 = vmul.f32 %v10478_v36, %v2486_v0 }
 0x2ea   : > { %v2518_v57 = vmul.f32 %v10478_v36, %v2487_v50  ;;  %v2519_v24 = vmul.f32 %v10478_v36, %v2488_v43  ;;  %v15337_v52 = vadd.f32 %v10479_v9, %v2495_v53  ;;  %v15339_v26 = vadd.f32 %v10479_v9, %v2496_v7 }
 0x2eb   : > { %v15341_v45 = vadd.f32 %v10479_v9, %v2497_v6  ;;  %v15343_v60 = vadd.f32 %v10479_v9, %v2498_v59  ;;  %v15345_v11 = vadd.f32 %v10479_v9, %v2499_v48  ;;  %v15347_v63 = vadd.f32 %v10479_v9, %v2500_v39 }
 0x2ec   : > { %v15349_v49 = vadd.f32 %v10479_v9, %v2501_v28  ;;  %v15351_v62 = vadd.f32 %v10479_v9, %v2502_v3  ;;  %v15353_v25 = vadd.f32 %v10479_v9, %v2503_v16  ;;  %v15355_v27 = vadd.f32 %v10479_v9, %v2504_v8 }
 0x2ed   : > { %v15357_v34 = vadd.f32 %v10479_v9, %v2505_v47  ;;  %v15359_v19 = vadd.f32 %v10479_v9, %v2506_v17  ;;  %v15361_v30 = vadd.f32 %v10479_v9, %v2507_v10  ;;  %v15363_v4 = vadd.f32 %v10479_v9, %v2508_v58 }
 0x2ee   : > { %v15365_v42 = vadd.f32 %v10479_v9, %v2509_v14  ;;  %v15367_v51 = vadd.f32 %v10479_v9, %v2510_v40  ;;  %v15369_v54 = vadd.f32 %v10479_v9, %v2511_v20  ;;  %v15371_v32 = vadd.f32 %v10479_v9, %v2512_v12 }
 0x2ef   : > { %v15373_v2 = vadd.f32 %v10479_v9, %v2513_v21  ;;  %v15375_v61 = vadd.f32 %v10479_v9, %v2514_v22  ;;  %v15377_v13 = vadd.f32 %v10479_v9, %v2515_v1  ;;  %v15379_v33 = vadd.f32 %v10479_v9, %v2516_v55 }
 0x2f0   : > { %v15381_v56 = vadd.f32 %v10479_v9, %v2517_v38  ;;  %v15383_v35 = vadd.f32 %v10479_v9, %v2518_v57  ;;  %v2551_v36 = vmul.f32 0.1, %v15337_v52  ;;  %v2550_v5 = vadd.f32 %v10479_v9, %v2519_v24 }
 0x2f1   : > { %v2552_v23 = vmul.f32 0.1, %v15339_v26  ;;  %v2553_v18 = vmul.f32 0.1, %v15341_v45  ;;  %v2554_v41 = vmul.f32 0.1, %v15343_v60 }
 0x2f2   : > { %v2555_v29 = vmul.f32 0.1, %v15345_v11  ;;  %v2556_v37 = vmul.f32 0.1, %v15347_v63  ;;  %v2557_v44 = vmul.f32 0.1, %v15349_v49  ;;  %v2576_v46 = vmax.f32 %v15337_v52, %v2551_v36 }
 0x2f3   : > { %v2558_v15 = vmul.f32 0.1, %v15351_v62  ;;  %v2559_v31 = vmul.f32 0.1, %v15353_v25  ;;  %v2560_v0 = vmul.f32 0.1, %v15355_v27  ;;  %v2577_v50 = vmax.f32 %v15339_v26, %v2552_v23 }
 0x2f4   : > { %v2561_v43 = vmul.f32 0.1, %v15357_v34  ;;  %v2562_v53 = vmul.f32 0.1, %v15359_v19  ;;  %v2563_v7 = vmul.f32 0.1, %v15361_v30  ;;  %v2578_v6 = vmax.f32 %v15341_v45, %v2553_v18 }
 0x2f5   : > { %v2564_v59 = vmul.f32 0.1, %v15363_v4  ;;  %v2565_v48 = vmul.f32 0.1, %v15365_v42  ;;  %v2566_v39 = vmul.f32 0.1, %v15367_v51  ;;  %v2579_v28 = vmax.f32 %v15343_v60, %v2554_v41 }
 0x2f6   : > { %v2567_v3 = vmul.f32 0.1, %v15369_v54  ;;  %v2568_v16 = vmul.f32 0.1, %v15371_v32  ;;  %v2569_v8 = vmul.f32 0.1, %v15373_v2  ;;  %v2580_v9 = vmax.f32 %v15345_v11, %v2555_v29 }
 0x2f7   : > { %v2570_v47 = vmul.f32 0.1, %v15375_v61  ;;  %v2571_v17 = vmul.f32 0.1, %v15377_v13  ;;  %v2572_v10 = vmul.f32 0.1, %v15379_v33  ;;  %v2581_v58 = vmax.f32 %v15347_v63, %v2556_v37 }
 0x2f8   : > { %v2573_v14 = vmul.f32 0.1, %v15381_v56  ;;  %v2574_v40 = vmul.f32 0.1, %v15383_v35  ;;  %v2575_v20 = vmul.f32 0.1, %v2550_v5  ;;  %v2582_v12 = vmax.f32 %v15349_v49, %v2557_v44 }
 0x2f9   : > { %v2583_v21 = vmax.f32 %v15351_v62, %v2558_v15  ;;  %v2584_v22 = vmax.f32 %v15353_v25, %v2559_v31  ;;  %v2585_v1 = vmax.f32 %v15355_v27, %v2560_v0  ;;  %v2586_v55 = vmax.f32 %v15357_v34, %v2561_v43 }
 0x2fa   : > { %v2587_v38 = vmax.f32 %v15359_v19, %v2562_v53  ;;  %v2588_v57 = vmax.f32 %v15361_v30, %v2563_v7  ;;  %v2589_v24 = vmax.f32 %v15363_v4, %v2564_v59  ;;  %v2590_v52 = vmax.f32 %v15365_v42, %v2565_v48 }
 0x2fb   : > { %v2591_v26 = vmax.f32 %v15367_v51, %v2566_v39  ;;  %v2592_v45 = vmax.f32 %v15369_v54, %v2567_v3  ;;  %v2593_v60 = vmax.f32 %v15371_v32, %v2568_v16  ;;  %v2594_v11 = vmax.f32 %v15373_v2, %v2569_v8 }
 0x2fc   : > { %v2595_v63 = vmax.f32 %v15375_v61, %v2570_v47  ;;  %v2596_v49 = vmax.f32 %v15377_v13, %v2571_v17  ;;  %v2597_v62 = vmax.f32 %v15379_v33, %v2572_v10  ;;  %v2598_v25 = vmax.f32 %v15381_v56, %v2573_v14 }
 0x2fd   : > { %v2599_v27 = vmax.f32 %v15383_v35, %v2574_v40  ;;  %v2600_v34 = vmax.f32 %v2550_v5, %v2575_v20  ;;  %v12137_v19 = vpack.c.bf16 %v2577_v50, %v2576_v46  ;;  %v12142_v30 = vpack.c.bf16 %v2579_v28, %v2578_v6 }
 0x2fe   : > { %v12147_v4 = vpack.c.bf16 %v2581_v58, %v2580_v9  ;;  %v12152_v42 = vpack.c.bf16 %v2583_v21, %v2582_v12  ;;  %v12157_v51 = vpack.c.bf16 %v2585_v1, %v2584_v22  ;;  %v12162_v54 = vpack.c.bf16 %v2587_v38, %v2586_v55 }
 0x2ff   : > { %v12133_v32 = vpack.c.bf16 %v2600_v34, %v2600_v34  ;;  %12138 = vst [vmem:[#allocation2] sm:$0xff] %v12137_v19   ;;  %12194 = vst [vmem:[#allocation2 + $0x8] sm:$0xff] %v12142_v30   ;;  %v12167_v2 = vpack.c.bf16 %v2589_v24, %v2588_v57  ;;  %v12172_v61 = vpack.c.bf16 %v2591_v26, %v2590_v52 }
 0x300   : > { %v12177_v36 = vpack.c.bf16 %v2593_v60, %v2592_v45  ;;  %12195 = vst [vmem:[#allocation2 + $0x10] sm:$0xff] %v12147_v4   ;;  %12196 = vst [vmem:[#allocation2 + $0x18] sm:$0xff] %v12152_v42   ;;  %v12182_v13 = vpack.c.bf16 %v2595_v63, %v2594_v11  ;;  %v12187_v33 = vpack.c.bf16 %v2597_v62, %v2596_v49 }
 0x301   : > { %12197 = vst [vmem:[#allocation2 + $0x20] sm:$0xff] %v12157_v51   ;;  %12198 = vst [vmem:[#allocation2 + $0x28] sm:$0xff] %v12162_v54   ;;  %v12192_v56 = vpack.c.bf16 %v2599_v27, %v2598_v25 }
 0x302   : > { %12199 = vst [vmem:[#allocation2 + $0x30] sm:$0xff] %v12167_v2   ;;  %12200 = vst [vmem:[#allocation2 + $0x38] sm:$0xff] %v12172_v61  }
 0x303   : > { %12201 = vst [vmem:[#allocation2 + $0x40] sm:$0xff] %v12177_v36   ;;  %2726 = vst [vmem:[#allocation2 + $0x60] sm:$0x3] %v12133_v32 }
 0x304   : > { %12202 = vst [vmem:[#allocation2 + $0x48] sm:$0xff] %v12182_v13   ;;  %12203 = vst [vmem:[#allocation2 + $0x50] sm:$0xff] %v12187_v33  }
 0x305   : > { %12204 = vst [vmem:[#allocation2 + $0x58] sm:$0xff] %v12192_v56  }
 0x306 PF: > { %v12818_v35 = vld [vmem:[%s14754_s3 + $0xf4] ss:$8 sps:$4 sm:$0xff]   ;;  %v14439_v23 = vmov 0   ;;  %v12822_v18 = vld [vmem:[%s14754_s3 + $0xf0] ss:$8 sps:$4 sm:$0xff]   ;;  %vm9769_vm2 = vcmask 1043456  }
 0x307   : > { %v12820_v5 = vld [vmem:[%s14754_s3 + $0x74] ss:$8 sps:$4 sm:$0xff]   ;;  %2881 = vmatprep.mubr.bf16.mxu0 %v14439_v23  ;;  %3002 = vmatprep.mubr.bf16.mxu1 %v14439_v23  ;;  %v12823_v41 = vld [vmem:[%s14754_s3 + $0x70] ss:$8 sps:$4 sm:$0xff]   ;;  %v12824_v29 = vld [vmem:[%s14754_s3 + $0xe4] ss:$8 sps:$4 sm:$0xff]  }
 0x308   : > { %2849 = vmatprep.subr.bf16.mxu0 %v12818_v35  ;;  %2970 = vmatprep.subr.bf16.mxu1 %v12820_v5  ;;  %v12826_v37 = vld [vmem:[%s14754_s3 + $0x64] ss:$8 sps:$4 sm:$0xff]   ;;  %v12828_v44 = vld [vmem:[%s14754_s3 + $0xe0] ss:$8 sps:$4 sm:$0xff]   ;;  %v12830_v15 = vld [vmem:[%s14754_s3 + $0xd4] ss:$8 sps:$4 sm:$0xff]  }
 0x309   : > { %2850 = vmatpush1.bf16.msra.mxu0 %v12822_v18  ;;  %2971 = vmatpush1.bf16.msra.mxu1 %v12823_v41  ;;  %v12829_v46 = vld [vmem:[%s14754_s3 + $0x60] ss:$8 sps:$4 sm:$0xff]   ;;  %v12832_v31 = vld [vmem:[%s14754_s3 + $0x54] ss:$8 sps:$4 sm:$0xff]   ;;  %v12834_v0 = vld [vmem:[%s14754_s3 + $0xd0] ss:$8 sps:$4 sm:$0xff]  }
 0x30a   : > { %2851 = vmatprep.subr.bf16.mxu0 %v12824_v29  ;;  %2972 = vmatprep.subr.bf16.mxu1 %v12826_v37  ;;  %v12835_v50 = vld [vmem:[%s14754_s3 + $0x50] ss:$8 sps:$4 sm:$0xff]   ;;  %v12836_v43 = vld [vmem:[%s14754_s3 + $0xc4] ss:$8 sps:$4 sm:$0xff]   ;;  %v12840_v7 = vld [vmem:[%s14754_s3 + $0xc0] ss:$8 sps:$4 sm:$0xff]  }
 0x30b   : > { %v12838_v53 = vld [vmem:[%s14754_s3 + $0x44] ss:$8 sps:$4 sm:$0xff]   ;;  %v12841_v6 = vld [vmem:[%s14754_s3 + $0x40] ss:$8 sps:$4 sm:$0xff]   ;;  %v12842_v59 = vld [vmem:[%s14754_s3 + $0xb4] ss:$8 sps:$4 sm:$0xff]  }
 0x30c   : > { %v12844_v48 = vld [vmem:[%s14754_s3 + $0x34] ss:$8 sps:$4 sm:$0xff]   ;;  %v12846_v39 = vld [vmem:[%s14754_s3 + $0xb0] ss:$8 sps:$4 sm:$0xff]   ;;  %v12848_v3 = vld [vmem:[%s14754_s3 + $0xa4] ss:$8 sps:$4 sm:$0xff]  }
 0x30d   : > { %2852 = vmatpush1.bf16.msra.mxu0 %v12828_v44  ;;  %2973 = vmatpush1.bf16.msra.mxu1 %v12829_v46  ;;  %v12847_v28 = vld [vmem:[%s14754_s3 + $0x30] ss:$8 sps:$4 sm:$0xff]   ;;  %v12850_v16 = vld [vmem:[%s14754_s3 + $0x24] ss:$8 sps:$4 sm:$0xff]   ;;  %v12852_v8 = vld [vmem:[%s14754_s3 + $0xa0] ss:$8 sps:$4 sm:$0xff]  }
 0x30e   : > { %2853 = vmatprep.subr.bf16.mxu0 %v12830_v15  ;;  %2974 = vmatprep.subr.bf16.mxu1 %v12832_v31  ;;  %v12853_v9 = vld [vmem:[%s14754_s3 + $0x20] ss:$8 sps:$4 sm:$0xff]   ;;  %v12854_v47 = vld [vmem:[%s14754_s3 + $0x94] ss:$8 sps:$4 sm:$0xff]   ;;  %v12858_v10 = vld [vmem:[%s14754_s3 + $0x90] ss:$8 sps:$4 sm:$0xff]  }
 0x30f   : > { %v12856_v17 = vld [vmem:[%s14754_s3 + $0x14] ss:$8 sps:$4 sm:$0xff]   ;;  %v12859_v58 = vld [vmem:[%s14754_s3 + $0x10] ss:$8 sps:$4 sm:$0xff]   ;;  %v12860_v14 = vld [vmem:[%s14754_s3 + $0x84] ss:$8 sps:$4 sm:$0xff]  }
 0x310   : > { %v12862_v40 = vld [vmem:[%s14754_s3 + $0x4] ss:$8 sps:$4 sm:$0xff]   ;;  %v12864_v20 = vld [vmem:[%s14754_s3 + $0x80] ss:$8 sps:$4 sm:$0xff]   ;;  %v12869_v22 = vld [vmem:[%s14754_s3 + $0x174] ss:$8 sps:$4 sm:$0xff]  }
 0x311   : > { %2854 = vmatpush1.bf16.msra.mxu0 %v12834_v0  ;;  %2975 = vmatpush1.bf16.msra.mxu1 %v12835_v50  ;;  %v12866_v12 = vld [vmem:[#allocation2] ss:$0 sps:$4 sm:$0xcc]   ;;  %v12865_v21 = vld [vmem:[%s14754_s3] ss:$8 sps:$4 sm:$0xff]   ;;  %vm10021_vm3 = vcmask 257024  }
 0x312   : > { %2855 = vmatprep.subr.bf16.mxu0 %v12836_v43  ;;  %2976 = vmatprep.subr.bf16.mxu1 %v12838_v53  ;;  %v12872_v1 = vld [vmem:[%s14754_s3 + $0x1f4] ss:$8 sps:$4 sm:$0xff]   ;;  %v2767_v55 = vrot.slane %v12866_v12, 2  ;;  %v2729_v38 = vld [vmem:[#allocation2] sm:$0x3]  ;;  %p12097_p13 = scmp.ne.s32.totalorder %s14532_s14, 3 }
 0x313   : > { %v12867_v57 = vld [vmem:[%s14754_s3 + $0x170] ss:$8 sps:$4 sm:$0xff]   ;;  %v12875_v52 = vld [vmem:[%s14754_s3 + $0x164] ss:$8 sps:$4 sm:$0xff]   ;;  %v12873_v45 = vld [vmem:[%s14754_s3 + $0x160] ss:$8 sps:$4 sm:$0xff]  }
 0x314   : > { %v12870_v24 = vld [vmem:[%s14754_s3 + $0x1f0] ss:$8 sps:$4 sm:$0xff]   ;;  %v12878_v26 = vld [vmem:[%s14754_s3 + $0x1e4] ss:$8 sps:$4 sm:$0xff]   ;;  %v12876_v60 = vld [vmem:[%s14754_s3 + $0x1e0] ss:$8 sps:$4 sm:$0xff]  }
 0x315   : > { %2856 = vmatpush1.bf16.msra.mxu0 %v12840_v7  ;;  %2977 = vmatpush1.bf16.msra.mxu1 %v12841_v6  ;;  %v12881_v11 = vld [vmem:[%s14754_s3 + $0x154] ss:$8 sps:$4 sm:$0xff]   ;;  %v12879_v49 = vld [vmem:[%s14754_s3 + $0x150] ss:$8 sps:$4 sm:$0xff]   ;;  %v12887_v25 = vld [vmem:[%s14754_s3 + $0x144] ss:$8 sps:$4 sm:$0xff]  }
 0x316   : > { %2857 = vmatprep.subr.bf16.mxu0 %v12842_v59  ;;  %2978 = vmatprep.subr.bf16.mxu1 %v12844_v48  ;;  %v12884_v63 = vld [vmem:[%s14754_s3 + $0x1d4] ss:$8 sps:$4 sm:$0xff]   ;;  %v12882_v62 = vld [vmem:[%s14754_s3 + $0x1d0] ss:$8 sps:$4 sm:$0xff]   ;;  %v12890_v27 = vld [vmem:[%s14754_s3 + $0x1c4] ss:$8 sps:$4 sm:$0xff]  }
 0x317   : > { %v12885_v34 = vld [vmem:[%s14754_s3 + $0x140] ss:$8 sps:$4 sm:$0xff]   ;;  %v12893_v30 = vld [vmem:[%s14754_s3 + $0x134] ss:$8 sps:$4 sm:$0xff]   ;;  %v12891_v42 = vld [vmem:[%s14754_s3 + $0x130] ss:$8 sps:$4 sm:$0xff]  }
 0x318   : > { %v12888_v19 = vld [vmem:[%s14754_s3 + $0x1c0] ss:$8 sps:$4 sm:$0xff]   ;;  %v12896_v4 = vld [vmem:[%s14754_s3 + $0x1b4] ss:$8 sps:$4 sm:$0xff]   ;;  %v12894_v51 = vld [vmem:[%s14754_s3 + $0x1b0] ss:$8 sps:$4 sm:$0xff]  }
 0x319   : > { %2858 = vmatpush1.bf16.msra.mxu0 %v12846_v39  ;;  %2979 = vmatpush1.bf16.msra.mxu1 %v12847_v28  ;;  %v12899_v54 = vld [vmem:[%s14754_s3 + $0x124] ss:$8 sps:$4 sm:$0xff]   ;;  %v12897_v2 = vld [vmem:[%s14754_s3 + $0x120] ss:$8 sps:$4 sm:$0xff]   ;;  %v12905_v36 = vld [vmem:[%s14754_s3 + $0x114] ss:$8 sps:$4 sm:$0xff]  }
 0x31a   : > { %2859 = vmatprep.subr.bf16.mxu0 %v12848_v3  ;;  %2980 = vmatprep.subr.bf16.mxu1 %v12850_v16  ;;  %v12902_v32 = vld [vmem:[%s14754_s3 + $0x1a4] ss:$8 sps:$4 sm:$0xff]   ;;  %v12900_v61 = vld [vmem:[%s14754_s3 + $0x1a0] ss:$8 sps:$4 sm:$0xff]   ;;  %v12908_v13 = vld [vmem:[%s14754_s3 + $0x194] ss:$8 sps:$4 sm:$0xff]  }
 0x31b   : > { %v12903_v33 = vld [vmem:[%s14754_s3 + $0x110] ss:$8 sps:$4 sm:$0xff]   ;;  %v12911_v35 = vld [vmem:[%s14754_s3 + $0x104] ss:$8 sps:$4 sm:$0xff]   ;;  %v12909_v41 = vld [vmem:[%s14754_s3 + $0x100] ss:$8 sps:$4 sm:$0xff]  }
 0x31c   : > { %v12906_v56 = vld [vmem:[%s14754_s3 + $0x190] ss:$8 sps:$4 sm:$0xff]   ;;  %v12914_v5 = vld [vmem:[%s14754_s3 + $0x184] ss:$8 sps:$4 sm:$0xff]   ;;  %v12912_v29 = vld [vmem:[%s14754_s3 + $0x180] ss:$8 sps:$4 sm:$0xff]  }
 0x31d   : > { %2860 = vmatpush1.bf16.msra.mxu0 %v12852_v8  ;;  %2981 = vmatpush1.bf16.msra.mxu1 %v12853_v9  ;;  %v12918_v18 = vld [vmem:[#allocation2 + $0x4] ss:$0 sps:$4 sm:$0xcc]   ;;  %v12915_v31 = vld [vmem:[%s14754_s3 + $0x270] ss:$8 sps:$4 sm:$0xff]  }
 0x31e   : > { %2861 = vmatprep.subr.bf16.mxu0 %v12854_v47  ;;  %2982 = vmatprep.subr.bf16.mxu1 %v12856_v17  ;;  %v12917_v37 = vld [vmem:[%s14754_s3 + $0x274] ss:$8 sps:$4 sm:$0xff]   ;;  %v3173_v15 = vrot.slane %v12918_v18, 2  ;;  %v12919_v0 = vld [vmem:[%s14754_s3 + $0x2f0] ss:$8 sps:$4 sm:$0xff]  }
 0x31f   : > { %v12921_v44 = vld [vmem:[%s14754_s3 + $0x2f4] ss:$8 sps:$4 sm:$0xff]   ;;  %v12924_v50 = vld [vmem:[%s14754_s3 + $0x264] ss:$8 sps:$4 sm:$0xff]   ;;  %v12922_v53 = vld [vmem:[%s14754_s3 + $0x260] ss:$8 sps:$4 sm:$0xff]  }
 0x320   : > { %v3011_v46 = vld [vmem:[#allocation2 + $0x4] sm:$0x3]  ;;  %v12927_v43 = vld [vmem:[%s14754_s3 + $0x2e4] ss:$8 sps:$4 sm:$0xff]   ;;  %v12925_v7 = vld [vmem:[%s14754_s3 + $0x2e0] ss:$8 sps:$4 sm:$0xff]  }
 0x321   : > { %2862 = vmatpush1.bf16.msra.mxu0 %v12858_v10  ;;  %2983 = vmatpush1.bf16.msra.mxu1 %v12859_v58  ;;  %v12930_v6 = vld [vmem:[%s14754_s3 + $0x254] ss:$8 sps:$4 sm:$0xff]   ;;  %v12928_v48 = vld [vmem:[%s14754_s3 + $0x250] ss:$8 sps:$4 sm:$0xff]   ;;  %v12936_v28 = vld [vmem:[%s14754_s3 + $0x244] ss:$8 sps:$4 sm:$0xff]  }
 0x322   : > { %2863 = vmatprep.subr.bf16.mxu0 %v12860_v14  ;;  %2984 = vmatprep.subr.bf16.mxu1 %v12862_v40  ;;  %v12933_v59 = vld [vmem:[%s14754_s3 + $0x2d4] ss:$8 sps:$4 sm:$0xff]   ;;  %v12931_v39 = vld [vmem:[%s14754_s3 + $0x2d0] ss:$8 sps:$4 sm:$0xff]   ;;  %v12939_v3 = vld [vmem:[%s14754_s3 + $0x2c4] ss:$8 sps:$4 sm:$0xff]  }
 0x323   : > { %v12934_v16 = vld [vmem:[%s14754_s3 + $0x240] ss:$8 sps:$4 sm:$0xff]   ;;  %v12942_v9 = vld [vmem:[%s14754_s3 + $0x234] ss:$8 sps:$4 sm:$0xff]   ;;  %v12940_v17 = vld [vmem:[%s14754_s3 + $0x230] ss:$8 sps:$4 sm:$0xff]  }
 0x324   : > { %v12937_v8 = vld [vmem:[%s14754_s3 + $0x2c0] ss:$8 sps:$4 sm:$0xff]   ;;  %v12945_v47 = vld [vmem:[%s14754_s3 + $0x2b4] ss:$8 sps:$4 sm:$0xff]   ;;  %v12943_v10 = vld [vmem:[%s14754_s3 + $0x2b0] ss:$8 sps:$4 sm:$0xff]  }
 0x325   : > { %2864 = vmatpush1.bf16.msra.mxu0 %v12864_v20  ;;  %2985 = vmatpush1.bf16.msra.mxu1 %v12865_v21  ;;  %v12948_v58 = vld [vmem:[%s14754_s3 + $0x224] ss:$8 sps:$4 sm:$0xff]   ;;  %v12946_v40 = vld [vmem:[%s14754_s3 + $0x220] ss:$8 sps:$4 sm:$0xff]   ;;  %v12954_v12 = vld [vmem:[%s14754_s3 + $0x214] ss:$8 sps:$4 sm:$0xff]  }
 0x326   : > { %3109 = vmatprep.subr.bf16.mxu0 %v12869_v22  ;;  %3255 = vmatprep.subr.bf16.mxu1 %v12872_v1  ;;  %v12951_v14 = vld [vmem:[%s14754_s3 + $0x2a4] ss:$8 sps:$4 sm:$0xff]   ;;  %v12949_v20 = vld [vmem:[%s14754_s3 + $0x2a0] ss:$8 sps:$4 sm:$0xff]   ;;  %v12957_v21 = vld [vmem:[%s14754_s3 + $0x294] ss:$8 sps:$4 sm:$0xff]  }
 0x327   : > { %v12952_v22 = vld [vmem:[%s14754_s3 + $0x210] ss:$8 sps:$4 sm:$0xff]   ;;  %v12998_v18 = vld [vmem:[%s14754_s3 + $0x3a0] ss:$8 sps:$4 sm:$0xff]  }
 0x328   : > { %2882 = vmatmul.mubr.bf16.vlgmr.msra.gmra.mxu0 %v2767_v55  ;;  %3003 = vmatmul.mubr.bf16.vlgmr.msra.gmra.mxu1 %v2729_v38  ;;  %v12955_v1 = vld [vmem:[%s14754_s3 + $0x290] ss:$8 sps:$4 sm:$0xff]   ;;  %v12960_v55 = vld [vmem:[%s14754_s3 + $0x204] ss:$8 sps:$4 sm:$0xff]  }
 0x329   : > { %3110 = vmatpush1.bf16.msra.mxu0 %v12867_v57  ;;  %3256 = vmatpush1.bf16.msra.mxu1 %v12870_v24  ;;  %v12963_v38 = vld [vmem:[%s14754_s3 + $0x284] ss:$8 sps:$4 sm:$0xff]   ;;  %v12958_v57 = vld [vmem:[%s14754_s3 + $0x200] ss:$8 sps:$4 sm:$0xff]  }
 0x32a   : > { %3111 = vmatprep.subr.bf16.mxu0 %v12875_v52  ;;  %3257 = vmatprep.subr.bf16.mxu1 %v12878_v26  ;;  %v12961_v24 = vld [vmem:[%s14754_s3 + $0x280] ss:$8 sps:$4 sm:$0xff]   ;;  %v12967_v52 = vld [vmem:[#allocation2 + $0x8] ss:$0 sps:$4 sm:$0xcc]  }
 0x32b   : > { %3141 = vmatprep.mubr.bf16.mxu0 %v14439_v23  ;;  %3287 = vmatprep.mubr.bf16.mxu1 %v14439_v23  ;;  %v12966_v26 = vld [vmem:[%s14754_s3 + $0x374] ss:$8 sps:$4 sm:$0xff]  }
 0x32d   : > { %3112 = vmatpush1.bf16.msra.mxu0 %v12873_v45  ;;  %3258 = vmatpush1.bf16.msra.mxu1 %v12876_v60  ;;  %v12970_v45 = vld [vmem:[%s14754_s3 + $0x3f4] ss:$8 sps:$4 sm:$0xff]   ;;  %v3298_v60 = vld [vmem:[#allocation2 + $0x8] sm:$0x3] }
 0x32e   : > { %3113 = vmatprep.subr.bf16.mxu0 %v12881_v11  ;;  %3259 = vmatprep.subr.bf16.mxu1 %v12884_v63  ;;  %v12964_v11 = vld [vmem:[%s14754_s3 + $0x370] ss:$8 sps:$4 sm:$0xff]   ;;  %v3460_v63 = vrot.slane %v12967_v52, 2  ;;  %v13055_v52 = vld [vmem:[%s14754_s3 + $0x494] ss:$8 sps:$4 sm:$0xff]  }
 0x331   : > { %3114 = vmatpush1.bf16.msra.mxu0 %v12879_v49  ;;  %3260 = vmatpush1.bf16.msra.mxu1 %v12882_v62  ;;  %v12968_v49 = vld [vmem:[%s14754_s3 + $0x3f0] ss:$8 sps:$4 sm:$0xff]   ;;  %v12973_v62 = vld [vmem:[%s14754_s3 + $0x364] ss:$8 sps:$4 sm:$0xff]  }
 0x332   : > { %3115 = vmatprep.subr.bf16.mxu0 %v12887_v25  ;;  %3261 = vmatprep.subr.bf16.mxu1 %v12890_v27  ;;  %v12976_v25 = vld [vmem:[%s14754_s3 + $0x3e4] ss:$8 sps:$4 sm:$0xff]   ;;  %v12971_v27 = vld [vmem:[%s14754_s3 + $0x360] ss:$8 sps:$4 sm:$0xff]  }
 0x335   : > { %3116 = vmatpush1.bf16.msra.mxu0 %v12885_v34  ;;  %3262 = vmatpush1.bf16.msra.mxu1 %v12888_v19  ;;  %v12974_v34 = vld [vmem:[%s14754_s3 + $0x3e0] ss:$8 sps:$4 sm:$0xff]   ;;  %v12979_v19 = vld [vmem:[%s14754_s3 + $0x354] ss:$8 sps:$4 sm:$0xff]  }
 0x336   : > { %3117 = vmatprep.subr.bf16.mxu0 %v12893_v30  ;;  %3263 = vmatprep.subr.bf16.mxu1 %v12896_v4  ;;  %v12982_v30 = vld [vmem:[%s14754_s3 + $0x3d4] ss:$8 sps:$4 sm:$0xff]   ;;  %v12977_v4 = vld [vmem:[%s14754_s3 + $0x350] ss:$8 sps:$4 sm:$0xff]  }
 0x339   : > { %3118 = vmatpush1.bf16.msra.mxu0 %v12891_v42  ;;  %3264 = vmatpush1.bf16.msra.mxu1 %v12894_v51  ;;  %v12980_v42 = vld [vmem:[%s14754_s3 + $0x3d0] ss:$8 sps:$4 sm:$0xff]   ;;  %v12985_v51 = vld [vmem:[%s14754_s3 + $0x344] ss:$8 sps:$4 sm:$0xff]  }
 0x33a   : > { %3119 = vmatprep.subr.bf16.mxu0 %v12899_v54  ;;  %3265 = vmatprep.subr.bf16.mxu1 %v12902_v32  ;;  %v12988_v54 = vld [vmem:[%s14754_s3 + $0x3c4] ss:$8 sps:$4 sm:$0xff]   ;;  %v12983_v32 = vld [vmem:[%s14754_s3 + $0x340] ss:$8 sps:$4 sm:$0xff]  }
 0x33d   : > { %3120 = vmatpush1.bf16.msra.mxu0 %v12897_v2  ;;  %3266 = vmatpush1.bf16.msra.mxu1 %v12900_v61  ;;  %v12986_v2 = vld [vmem:[%s14754_s3 + $0x3c0] ss:$8 sps:$4 sm:$0xff]   ;;  %v12991_v61 = vld [vmem:[%s14754_s3 + $0x334] ss:$8 sps:$4 sm:$0xff]  }
 0x33e   : > { %3121 = vmatprep.subr.bf16.mxu0 %v12905_v36  ;;  %3267 = vmatprep.subr.bf16.mxu1 %v12908_v13  ;;  %v12994_v36 = vld [vmem:[%s14754_s3 + $0x3b4] ss:$8 sps:$4 sm:$0xff]   ;;  %v12989_v13 = vld [vmem:[%s14754_s3 + $0x330] ss:$8 sps:$4 sm:$0xff]  }
 0x341   : > { %3122 = vmatpush1.bf16.msra.mxu0 %v12903_v33  ;;  %3268 = vmatpush1.bf16.msra.mxu1 %v12906_v56  ;;  %v12992_v33 = vld [vmem:[%s14754_s3 + $0x3b0] ss:$8 sps:$4 sm:$0xff]   ;;  %v12997_v56 = vld [vmem:[%s14754_s3 + $0x324] ss:$8 sps:$4 sm:$0xff]  }
 0x342   : > { %3123 = vmatprep.subr.bf16.mxu0 %v12911_v35  ;;  %3269 = vmatprep.subr.bf16.mxu1 %v12914_v5  ;;  %v13000_v35 = vld [vmem:[%s14754_s3 + $0x3a4] ss:$8 sps:$4 sm:$0xff]   ;;  %v12995_v5 = vld [vmem:[%s14754_s3 + $0x320] ss:$8 sps:$4 sm:$0xff]  }
 0x345   : > { %3124 = vmatpush1.bf16.msra.mxu0 %v12909_v41  ;;  %3270 = vmatpush1.bf16.msra.mxu1 %v12912_v29  ;;  %v13003_v41 = vld [vmem:[%s14754_s3 + $0x314] ss:$8 sps:$4 sm:$0xff]  }
 0x346   : > { %3396 = vmatprep.subr.bf16.mxu0 %v12917_v37  ;;  %3542 = vmatprep.subr.bf16.mxu1 %v12921_v44  ;;  %v13006_v29 = vld [vmem:[%s14754_s3 + $0x394] ss:$8 sps:$4 sm:$0xff]   ;;  %v13001_v37 = vld [vmem:[%s14754_s3 + $0x310] ss:$8 sps:$4 sm:$0xff]  }
 0x347   : > { %v13004_v44 = vld [vmem:[%s14754_s3 + $0x390] ss:$8 sps:$4 sm:$0xff]  }
 0x348   : > { %3142 = vmatmul.mubr.bf16.vlgmr.msra.gmra.mxu0 %v3011_v46  ;;  %3288 = vmatmul.mubr.bf16.vlgmr.msra.gmra.mxu1 %v3173_v15  ;;  %v13009_v46 = vld [vmem:[%s14754_s3 + $0x304] ss:$8 sps:$4 sm:$0xff]  }
 0x349   : > { %3397 = vmatpush1.bf16.msra.mxu0 %v12915_v31  ;;  %3543 = vmatpush1.bf16.msra.mxu1 %v12919_v0  ;;  %v13012_v15 = vld [vmem:[%s14754_s3 + $0x384] ss:$8 sps:$4 sm:$0xff]   ;;  %v13007_v31 = vld [vmem:[%s14754_s3 + $0x300] ss:$8 sps:$4 sm:$0xff]  }
 0x34a   : > { %3398 = vmatprep.subr.bf16.mxu0 %v12924_v50  ;;  %3544 = vmatprep.subr.bf16.mxu1 %v12927_v43  ;;  %v13016_v0 = vld [vmem:[#allocation2 + $0xc] ss:$0 sps:$4 sm:$0xcc]   ;;  %v13010_v50 = vld [vmem:[%s14754_s3 + $0x380] ss:$8 sps:$4 sm:$0xff]  }
 0x34b   : > { %3428 = vmatprep.mubr.bf16.mxu0 %v14439_v23  ;;  %3574 = vmatprep.mubr.bf16.mxu1 %v14439_v23  ;;  %v13015_v43 = vld [vmem:[%s14754_s3 + $0x474] ss:$8 sps:$4 sm:$0xff]  }
 0x34d   : > { %3399 = vmatpush1.bf16.msra.mxu0 %v12922_v53  ;;  %3545 = vmatpush1.bf16.msra.mxu1 %v12925_v7  ;;  %v13019_v53 = vld [vmem:[%s14754_s3 + $0x4f4] ss:$8 sps:$4 sm:$0xff]  }
 0x34e   : > { %3400 = vmatprep.subr.bf16.mxu0 %v12930_v6  ;;  %3546 = vmatprep.subr.bf16.mxu1 %v12933_v59  ;;  %v3585_v7 = vld [vmem:[#allocation2 + $0xc] sm:$0x3]  ;;  %v13013_v6 = vld [vmem:[%s14754_s3 + $0x470] ss:$8 sps:$4 sm:$0xff]   ;;  %v3747_v59 = vrot.slane %v13016_v0, 2 }
 0x34f   : > { %v13101_v0 = vld [vmem:[%s14754_s3 + $0x514] ss:$8 sps:$4 sm:$0xff]  }
 0x351   : > { %3401 = vmatpush1.bf16.msra.mxu0 %v12928_v48  ;;  %3547 = vmatpush1.bf16.msra.mxu1 %v12931_v39  ;;  %v13017_v48 = vld [vmem:[%s14754_s3 + $0x4f0] ss:$8 sps:$4 sm:$0xff]   ;;  %v13022_v39 = vld [vmem:[%s14754_s3 + $0x464] ss:$8 sps:$4 sm:$0xff]  }
 0x352   : > { %3402 = vmatprep.subr.bf16.mxu0 %v12936_v28  ;;  %3548 = vmatprep.subr.bf16.mxu1 %v12939_v3  ;;  %v13025_v28 = vld [vmem:[%s14754_s3 + $0x4e4] ss:$8 sps:$4 sm:$0xff]   ;;  %v13020_v3 = vld [vmem:[%s14754_s3 + $0x460] ss:$8 sps:$4 sm:$0xff]  }
 0x355   : > { %3403 = vmatpush1.bf16.msra.mxu0 %v12934_v16  ;;  %3549 = vmatpush1.bf16.msra.mxu1 %v12937_v8  ;;  %v13023_v16 = vld [vmem:[%s14754_s3 + $0x4e0] ss:$8 sps:$4 sm:$0xff]   ;;  %v13028_v8 = vld [vmem:[%s14754_s3 + $0x454] ss:$8 sps:$4 sm:$0xff]  }
 0x356   : > { %3404 = vmatprep.subr.bf16.mxu0 %v12942_v9  ;;  %3550 = vmatprep.subr.bf16.mxu1 %v12945_v47  ;;  %v13031_v9 = vld [vmem:[%s14754_s3 + $0x4d4] ss:$8 sps:$4 sm:$0xff]   ;;  %v13026_v47 = vld [vmem:[%s14754_s3 + $0x450] ss:$8 sps:$4 sm:$0xff]  }
 0x359   : > { %3405 = vmatpush1.bf16.msra.mxu0 %v12940_v17  ;;  %3551 = vmatpush1.bf16.msra.mxu1 %v12943_v10  ;;  %v13029_v17 = vld [vmem:[%s14754_s3 + $0x4d0] ss:$8 sps:$4 sm:$0xff]   ;;  %v13034_v10 = vld [vmem:[%s14754_s3 + $0x444] ss:$8 sps:$4 sm:$0xff]  }
 0x35a   : > { %3406 = vmatprep.subr.bf16.mxu0 %v12948_v58  ;;  %3552 = vmatprep.subr.bf16.mxu1 %v12951_v14  ;;  %v13037_v58 = vld [vmem:[%s14754_s3 + $0x4c4] ss:$8 sps:$4 sm:$0xff]   ;;  %v13032_v14 = vld [vmem:[%s14754_s3 + $0x440] ss:$8 sps:$4 sm:$0xff]  }
 0x35d   : > { %3407 = vmatpush1.bf16.msra.mxu0 %v12946_v40  ;;  %3553 = vmatpush1.bf16.msra.mxu1 %v12949_v20  ;;  %v13035_v40 = vld [vmem:[%s14754_s3 + $0x4c0] ss:$8 sps:$4 sm:$0xff]   ;;  %v13040_v20 = vld [vmem:[%s14754_s3 + $0x434] ss:$8 sps:$4 sm:$0xff]  }
 0x35e   : > { %3408 = vmatprep.subr.bf16.mxu0 %v12954_v12  ;;  %3554 = vmatprep.subr.bf16.mxu1 %v12957_v21  ;;  %v13043_v12 = vld [vmem:[%s14754_s3 + $0x4b4] ss:$8 sps:$4 sm:$0xff]   ;;  %v13038_v21 = vld [vmem:[%s14754_s3 + $0x430] ss:$8 sps:$4 sm:$0xff]  }
 0x361   : > { %3409 = vmatpush1.bf16.msra.mxu0 %v12952_v22  ;;  %3555 = vmatpush1.bf16.msra.mxu1 %v12955_v1  ;;  %v13041_v22 = vld [vmem:[%s14754_s3 + $0x4b0] ss:$8 sps:$4 sm:$0xff]   ;;  %v13046_v1 = vld [vmem:[%s14754_s3 + $0x424] ss:$8 sps:$4 sm:$0xff]  }
 0x362   : > { %3410 = vmatprep.subr.bf16.mxu0 %v12960_v55  ;;  %3556 = vmatprep.subr.bf16.mxu1 %v12963_v38  ;;  %v13049_v55 = vld [vmem:[%s14754_s3 + $0x4a4] ss:$8 sps:$4 sm:$0xff]   ;;  %v13044_v38 = vld [vmem:[%s14754_s3 + $0x420] ss:$8 sps:$4 sm:$0xff]  }
 0x365   : > { %3411 = vmatpush1.bf16.msra.mxu0 %v12958_v57  ;;  %3557 = vmatpush1.bf16.msra.mxu1 %v12961_v24  ;;  %v13047_v57 = vld [vmem:[%s14754_s3 + $0x4a0] ss:$8 sps:$4 sm:$0xff]   ;;  %v13052_v24 = vld [vmem:[%s14754_s3 + $0x414] ss:$8 sps:$4 sm:$0xff]  }
 0x366   : > { %3683 = vmatprep.subr.bf16.mxu0 %v12966_v26  ;;  %3829 = vmatprep.subr.bf16.mxu1 %v12970_v45  ;;  %v13050_v26 = vld [vmem:[%s14754_s3 + $0x410] ss:$8 sps:$4 sm:$0xff]  }
 0x367   : > { %v13053_v45 = vld [vmem:[%s14754_s3 + $0x490] ss:$8 sps:$4 sm:$0xff]  }
 0x368   : > { %3429 = vmatmul.mubr.bf16.vlgmr.msra.gmra.mxu0 %v3298_v60  ;;  %3575 = vmatmul.mubr.bf16.vlgmr.msra.gmra.mxu1 %v3460_v63  ;;  %v13058_v60 = vld [vmem:[%s14754_s3 + $0x404] ss:$8 sps:$4 sm:$0xff]   ;;  %v13056_v63 = vld [vmem:[%s14754_s3 + $0x400] ss:$8 sps:$4 sm:$0xff]  }
 0x369   : > { %3684 = vmatpush1.bf16.msra.mxu0 %v12964_v11  ;;  %3830 = vmatpush1.bf16.msra.mxu1 %v12968_v49  ;;  %v13061_v11 = vld [vmem:[%s14754_s3 + $0x484] ss:$8 sps:$4 sm:$0xff]   ;;  %v13065_v49 = vld [vmem:[#allocation2 + $0x10] ss:$0 sps:$4 sm:$0xcc]  }
 0x36a   : > { %3685 = vmatprep.subr.bf16.mxu0 %v12973_v62  ;;  %3831 = vmatprep.subr.bf16.mxu1 %v12976_v25  ;;  %v13059_v62 = vld [vmem:[%s14754_s3 + $0x480] ss:$8 sps:$4 sm:$0xff]   ;;  %v13064_v25 = vld [vmem:[%s14754_s3 + $0x574] ss:$8 sps:$4 sm:$0xff]  }
 0x36b   : > { %3715 = vmatprep.mubr.bf16.mxu0 %v14439_v23  ;;  %3861 = vmatprep.mubr.bf16.mxu1 %v14439_v23 }
 0x36d   : > { %3686 = vmatpush1.bf16.msra.mxu0 %v12971_v27  ;;  %3832 = vmatpush1.bf16.msra.mxu1 %v12974_v34  ;;  %v13068_v27 = vld [vmem:[%s14754_s3 + $0x5f4] ss:$8 sps:$4 sm:$0xff]   ;;  %v3872_v34 = vld [vmem:[#allocation2 + $0x10] sm:$0x3] }
 0x36e   : > { %3687 = vmatprep.subr.bf16.mxu0 %v12979_v19  ;;  %3833 = vmatprep.subr.bf16.mxu1 %v12982_v30  ;;  %v13062_v19 = vld [vmem:[%s14754_s3 + $0x570] ss:$8 sps:$4 sm:$0xff]   ;;  %v4034_v30 = vrot.slane %v13065_v49, 2  ;;  %v13150_v49 = vld [vmem:[%s14754_s3 + $0x614] ss:$8 sps:$4 sm:$0xff]  }
 0x371   : > { %3688 = vmatpush1.bf16.msra.mxu0 %v12977_v4  ;;  %3834 = vmatpush1.bf16.msra.mxu1 %v12980_v42  ;;  %v13066_v4 = vld [vmem:[%s14754_s3 + $0x5f0] ss:$8 sps:$4 sm:$0xff]   ;;  %v13071_v42 = vld [vmem:[%s14754_s3 + $0x564] ss:$8 sps:$4 sm:$0xff]  }
 0x372   : > { %3689 = vmatprep.subr.bf16.mxu0 %v12985_v51  ;;  %3835 = vmatprep.subr.bf16.mxu1 %v12988_v54  ;;  %v13074_v51 = vld [vmem:[%s14754_s3 + $0x5e4] ss:$8 sps:$4 sm:$0xff]   ;;  %v13069_v54 = vld [vmem:[%s14754_s3 + $0x560] ss:$8 sps:$4 sm:$0xff]  }
 0x375   : > { %3690 = vmatpush1.bf16.msra.mxu0 %v12983_v32  ;;  %3836 = vmatpush1.bf16.msra.mxu1 %v12986_v2  ;;  %v13072_v32 = vld [vmem:[%s14754_s3 + $0x5e0] ss:$8 sps:$4 sm:$0xff]   ;;  %v13077_v2 = vld [vmem:[%s14754_s3 + $0x554] ss:$8 sps:$4 sm:$0xff]  }
 0x376   : > { %3691 = vmatprep.subr.bf16.mxu0 %v12991_v61  ;;  %3837 = vmatprep.subr.bf16.mxu1 %v12994_v36  ;;  %v13080_v61 = vld [vmem:[%s14754_s3 + $0x5d4] ss:$8 sps:$4 sm:$0xff]   ;;  %v13075_v36 = vld [vmem:[%s14754_s3 + $0x550] ss:$8 sps:$4 sm:$0xff]  }
 0x379   : > { %3692 = vmatpush1.bf16.msra.mxu0 %v12989_v13  ;;  %3838 = vmatpush1.bf16.msra.mxu1 %v12992_v33  ;;  %v13078_v13 = vld [vmem:[%s14754_s3 + $0x5d0] ss:$8 sps:$4 sm:$0xff]   ;;  %v13083_v33 = vld [vmem:[%s14754_s3 + $0x544] ss:$8 sps:$4 sm:$0xff]  }
 0x37a   : > { %3693 = vmatprep.subr.bf16.mxu0 %v12997_v56  ;;  %3839 = vmatprep.subr.bf16.mxu1 %v13000_v35  ;;  %v13086_v56 = vld [vmem:[%s14754_s3 + $0x5c4] ss:$8 sps:$4 sm:$0xff]   ;;  %v13081_v35 = vld [vmem:[%s14754_s3 + $0x540] ss:$8 sps:$4 sm:$0xff]  }
 0x37d   : > { %3694 = vmatpush1.bf16.msra.mxu0 %v12995_v5  ;;  %3840 = vmatpush1.bf16.msra.mxu1 %v12998_v18  ;;  %v13084_v5 = vld [vmem:[%s14754_s3 + $0x5c0] ss:$8 sps:$4 sm:$0xff]   ;;  %v13089_v18 = vld [vmem:[%s14754_s3 + $0x534] ss:$8 sps:$4 sm:$0xff]  }
 0x37e   : > { %3695 = vmatprep.subr.bf16.mxu0 %v13003_v41  ;;  %3841 = vmatprep.subr.bf16.mxu1 %v13006_v29  ;;  %v13092_v41 = vld [vmem:[%s14754_s3 + $0x5b4] ss:$8 sps:$4 sm:$0xff]   ;;  %v13087_v29 = vld [vmem:[%s14754_s3 + $0x530] ss:$8 sps:$4 sm:$0xff]  }
 0x381   : > { %3696 = vmatpush1.bf16.msra.mxu0 %v13001_v37  ;;  %3842 = vmatpush1.bf16.msra.mxu1 %v13004_v44  ;;  %v13090_v37 = vld [vmem:[%s14754_s3 + $0x5b0] ss:$8 sps:$4 sm:$0xff]   ;;  %v13095_v44 = vld [vmem:[%s14754_s3 + $0x524] ss:$8 sps:$4 sm:$0xff]  }
 0x382   : > { %3697 = vmatprep.subr.bf16.mxu0 %v13009_v46  ;;  %3843 = vmatprep.subr.bf16.mxu1 %v13012_v15  ;;  %v13098_v46 = vld [vmem:[%s14754_s3 + $0x5a4] ss:$8 sps:$4 sm:$0xff]   ;;  %v13093_v15 = vld [vmem:[%s14754_s3 + $0x520] ss:$8 sps:$4 sm:$0xff]  }
 0x385   : > { %3698 = vmatpush1.bf16.msra.mxu0 %v13007_v31  ;;  %3844 = vmatpush1.bf16.msra.mxu1 %v13010_v50  ;;  %v13096_v31 = vld [vmem:[%s14754_s3 + $0x5a0] ss:$8 sps:$4 sm:$0xff]   ;;  %v13104_v50 = vld [vmem:[%s14754_s3 + $0x594] ss:$8 sps:$4 sm:$0xff]  }
 0x386   : > { %3970 = vmatprep.subr.bf16.mxu0 %v13015_v43  ;;  %4116 = vmatprep.subr.bf16.mxu1 %v13019_v53  ;;  %v13099_v43 = vld [vmem:[%s14754_s3 + $0x510] ss:$8 sps:$4 sm:$0xff]  }
 0x387   : > { %v13102_v53 = vld [vmem:[%s14754_s3 + $0x590] ss:$8 sps:$4 sm:$0xff]  }
 0x388   : > { %3716 = vmatmul.mubr.bf16.vlgmr.msra.gmra.mxu0 %v3585_v7  ;;  %3862 = vmatmul.mubr.bf16.vlgmr.msra.gmra.mxu1 %v3747_v59  ;;  %v13107_v7 = vld [vmem:[%s14754_s3 + $0x504] ss:$8 sps:$4 sm:$0xff]   ;;  %v13105_v59 = vld [vmem:[%s14754_s3 + $0x500] ss:$8 sps:$4 sm:$0xff]  }
 0x389   : > { %3971 = vmatpush1.bf16.msra.mxu0 %v13013_v6  ;;  %4117 = vmatpush1.bf16.msra.mxu1 %v13017_v48  ;;  %v13110_v6 = vld [vmem:[%s14754_s3 + $0x584] ss:$8 sps:$4 sm:$0xff]   ;;  %v13108_v48 = vld [vmem:[%s14754_s3 + $0x580] ss:$8 sps:$4 sm:$0xff]  }
 0x38a   : > { %3972 = vmatprep.subr.bf16.mxu0 %v13022_v39  ;;  %4118 = vmatprep.subr.bf16.mxu1 %v13025_v28  ;;  %v13114_v39 = vld [vmem:[#allocation2 + $0x14] ss:$0 sps:$4 sm:$0xcc]   ;;  %v13113_v28 = vld [vmem:[%s14754_s3 + $0x674] ss:$8 sps:$4 sm:$0xff]  }
 0x38b   : > { %4002 = vmatprep.mubr.bf16.mxu0 %v14439_v23  ;;  %4148 = vmatprep.mubr.bf16.mxu1 %v14439_v23 }
 0x38d   : > { %3973 = vmatpush1.bf16.msra.mxu0 %v13020_v3  ;;  %4119 = vmatpush1.bf16.msra.mxu1 %v13023_v16  ;;  %v13117_v3 = vld [vmem:[%s14754_s3 + $0x6f4] ss:$8 sps:$4 sm:$0xff]   ;;  %v4159_v16 = vld [vmem:[#allocation2 + $0x14] sm:$0x3] }
 0x38e   : > { %3974 = vmatprep.subr.bf16.mxu0 %v13028_v8  ;;  %4120 = vmatprep.subr.bf16.mxu1 %v13031_v9  ;;  %v13111_v8 = vld [vmem:[%s14754_s3 + $0x670] ss:$8 sps:$4 sm:$0xff]   ;;  %v4321_v9 = vrot.slane %v13114_v39, 2  ;;  %v13182_v39 = vld [vmem:[%s14754_s3 + $0x7c0] ss:$8 sps:$4 sm:$0xff]  }
 0x391   : > { %3975 = vmatpush1.bf16.msra.mxu0 %v13026_v47  ;;  %4121 = vmatpush1.bf16.msra.mxu1 %v13029_v17  ;;  %v13115_v47 = vld [vmem:[%s14754_s3 + $0x6f0] ss:$8 sps:$4 sm:$0xff]   ;;  %v13120_v17 = vld [vmem:[%s14754_s3 + $0x664] ss:$8 sps:$4 sm:$0xff]  }
 0x392   : > { %3976 = vmatprep.subr.bf16.mxu0 %v13034_v10  ;;  %4122 = vmatprep.subr.bf16.mxu1 %v13037_v58  ;;  %v13123_v10 = vld [vmem:[%s14754_s3 + $0x6e4] ss:$8 sps:$4 sm:$0xff]   ;;  %v13118_v58 = vld [vmem:[%s14754_s3 + $0x660] ss:$8 sps:$4 sm:$0xff]  }
 0x395   : > { %3977 = vmatpush1.bf16.msra.mxu0 %v13032_v14  ;;  %4123 = vmatpush1.bf16.msra.mxu1 %v13035_v40  ;;  %v13121_v14 = vld [vmem:[%s14754_s3 + $0x6e0] ss:$8 sps:$4 sm:$0xff]   ;;  %v13126_v40 = vld [vmem:[%s14754_s3 + $0x654] ss:$8 sps:$4 sm:$0xff]  }
 0x396   : > { %3978 = vmatprep.subr.bf16.mxu0 %v13040_v20  ;;  %4124 = vmatprep.subr.bf16.mxu1 %v13043_v12  ;;  %v13129_v20 = vld [vmem:[%s14754_s3 + $0x6d4] ss:$8 sps:$4 sm:$0xff]   ;;  %v13124_v12 = vld [vmem:[%s14754_s3 + $0x650] ss:$8 sps:$4 sm:$0xff]  }
 0x399   : > { %3979 = vmatpush1.bf16.msra.mxu0 %v13038_v21  ;;  %4125 = vmatpush1.bf16.msra.mxu1 %v13041_v22  ;;  %v13127_v21 = vld [vmem:[%s14754_s3 + $0x6d0] ss:$8 sps:$4 sm:$0xff]   ;;  %v13132_v22 = vld [vmem:[%s14754_s3 + $0x644] ss:$8 sps:$4 sm:$0xff]  }
 0x39a   : > { %3980 = vmatprep.subr.bf16.mxu0 %v13046_v1  ;;  %4126 = vmatprep.subr.bf16.mxu1 %v13049_v55  ;;  %v13135_v1 = vld [vmem:[%s14754_s3 + $0x6c4] ss:$8 sps:$4 sm:$0xff]   ;;  %v13130_v55 = vld [vmem:[%s14754_s3 + $0x640] ss:$8 sps:$4 sm:$0xff]  }
 0x39d   : > { %3981 = vmatpush1.bf16.msra.mxu0 %v13044_v38  ;;  %4127 = vmatpush1.bf16.msra.mxu1 %v13047_v57  ;;  %v13133_v38 = vld [vmem:[%s14754_s3 + $0x6c0] ss:$8 sps:$4 sm:$0xff]   ;;  %v13138_v57 = vld [vmem:[%s14754_s3 + $0x634] ss:$8 sps:$4 sm:$0xff]  }
 0x39e   : > { %3982 = vmatprep.subr.bf16.mxu0 %v13052_v24  ;;  %4128 = vmatprep.subr.bf16.mxu1 %v13055_v52  ;;  %v13141_v24 = vld [vmem:[%s14754_s3 + $0x6b4] ss:$8 sps:$4 sm:$0xff]   ;;  %v13136_v52 = vld [vmem:[%s14754_s3 + $0x630] ss:$8 sps:$4 sm:$0xff]  }
 0x3a1   : > { %3983 = vmatpush1.bf16.msra.mxu0 %v13050_v26  ;;  %4129 = vmatpush1.bf16.msra.mxu1 %v13053_v45  ;;  %v13139_v26 = vld [vmem:[%s14754_s3 + $0x6b0] ss:$8 sps:$4 sm:$0xff]   ;;  %v13144_v45 = vld [vmem:[%s14754_s3 + $0x624] ss:$8 sps:$4 sm:$0xff]  }
 0x3a2   : > { %3984 = vmatprep.subr.bf16.mxu0 %v13058_v60  ;;  %4130 = vmatprep.subr.bf16.mxu1 %v13061_v11  ;;  %v13147_v60 = vld [vmem:[%s14754_s3 + $0x6a4] ss:$8 sps:$4 sm:$0xff]   ;;  %v13142_v11 = vld [vmem:[%s14754_s3 + $0x620] ss:$8 sps:$4 sm:$0xff]  }
 0x3a5   : > { %3985 = vmatpush1.bf16.msra.mxu0 %v13056_v63  ;;  %4131 = vmatpush1.bf16.msra.mxu1 %v13059_v62  ;;  %v13145_v63 = vld [vmem:[%s14754_s3 + $0x6a0] ss:$8 sps:$4 sm:$0xff]   ;;  %v13153_v62 = vld [vmem:[%s14754_s3 + $0x694] ss:$8 sps:$4 sm:$0xff]  }
 0x3a6   : > { %4257 = vmatprep.subr.bf16.mxu0 %v13064_v25  ;;  %4403 = vmatprep.subr.bf16.mxu1 %v13068_v27  ;;  %v13148_v25 = vld [vmem:[%s14754_s3 + $0x610] ss:$8 sps:$4 sm:$0xff]  }
 0x3a7   : > { %v13151_v27 = vld [vmem:[%s14754_s3 + $0x690] ss:$8 sps:$4 sm:$0xff]  }
 0x3a8   : > { %4003 = vmatmul.mubr.bf16.vlgmr.msra.gmra.mxu0 %v3872_v34  ;;  %4149 = vmatmul.mubr.bf16.vlgmr.msra.gmra.mxu1 %v4034_v30  ;;  %v13156_v34 = vld [vmem:[%s14754_s3 + $0x604] ss:$8 sps:$4 sm:$0xff]   ;;  %v13154_v30 = vld [vmem:[%s14754_s3 + $0x600] ss:$8 sps:$4 sm:$0xff]  }
 0x3a9   : > { %4258 = vmatpush1.bf16.msra.mxu0 %v13062_v19  ;;  %4404 = vmatpush1.bf16.msra.mxu1 %v13066_v4  ;;  %v13159_v19 = vld [vmem:[%s14754_s3 + $0x684] ss:$8 sps:$4 sm:$0xff]   ;;  %v13163_v4 = vld [vmem:[#allocation2 + $0x18] ss:$0 sps:$4 sm:$0xcc]  }
 0x3aa   : > { %4259 = vmatprep.subr.bf16.mxu0 %v13071_v42  ;;  %4405 = vmatprep.subr.bf16.mxu1 %v13074_v51  ;;  %v13157_v42 = vld [vmem:[%s14754_s3 + $0x680] ss:$8 sps:$4 sm:$0xff]   ;;  %v13162_v51 = vld [vmem:[%s14754_s3 + $0x774] ss:$8 sps:$4 sm:$0xff]  }
 0x3ab   : > { %4289 = vmatprep.mubr.bf16.mxu0 %v14439_v23  ;;  %4435 = vmatprep.mubr.bf16.mxu1 %v14439_v23 }
 0x3ad   : > { %4260 = vmatpush1.bf16.msra.mxu0 %v13069_v54  ;;  %4406 = vmatpush1.bf16.msra.mxu1 %v13072_v32  ;;  %v13166_v54 = vld [vmem:[%s14754_s3 + $0x7f4] ss:$8 sps:$4 sm:$0xff]   ;;  %v4446_v32 = vld [vmem:[#allocation2 + $0x18] sm:$0x3] }
 0x3ae   : > { %4261 = vmatprep.subr.bf16.mxu0 %v13077_v2  ;;  %4407 = vmatprep.subr.bf16.mxu1 %v13080_v61  ;;  %v13160_v2 = vld [vmem:[%s14754_s3 + $0x770] ss:$8 sps:$4 sm:$0xff]   ;;  %v4608_v61 = vrot.slane %v13163_v4, 2  ;;  %v13227_v4 = vld [vmem:[%s14754_s3 + $0x8d4] ss:$8 sps:$4 sm:$0xff]  }
 0x3b1   : > { %4262 = vmatpush1.bf16.msra.mxu0 %v13075_v36  ;;  %4408 = vmatpush1.bf16.msra.mxu1 %v13078_v13  ;;  %v13164_v36 = vld [vmem:[%s14754_s3 + $0x7f0] ss:$8 sps:$4 sm:$0xff]   ;;  %v13169_v13 = vld [vmem:[%s14754_s3 + $0x764] ss:$8 sps:$4 sm:$0xff]  }
 0x3b2   : > { %4263 = vmatprep.subr.bf16.mxu0 %v13083_v33  ;;  %4409 = vmatprep.subr.bf16.mxu1 %v13086_v56  ;;  %v13172_v33 = vld [vmem:[%s14754_s3 + $0x7e4] ss:$8 sps:$4 sm:$0xff]  }
 0x3b5   : > { %4264 = vmatpush1.bf16.msra.mxu0 %v13081_v35  ;;  %4410 = vmatpush1.bf16.msra.mxu1 %v13084_v5 }
 0x3b6   : > { %4265 = vmatprep.subr.bf16.mxu0 %v13089_v18  ;;  %4411 = vmatprep.subr.bf16.mxu1 %v13092_v41  ;;  %v13167_v18 = vld [vmem:[%s14754_s3 + $0x760] ss:$8 sps:$4 sm:$0xff]  }
 0x3b7   : > { %v13170_v41 = vld [vmem:[%s14754_s3 + $0x7e0] ss:$8 sps:$4 sm:$0xff]  }
 0x3b9   : > { %4266 = vmatpush1.bf16.msra.mxu0 %v13087_v29  ;;  %4412 = vmatpush1.bf16.msra.mxu1 %v13090_v37 }
 0x3ba   : > { %4267 = vmatprep.subr.bf16.mxu0 %v13095_v44  ;;  %4413 = vmatprep.subr.bf16.mxu1 %v13098_v46  ;;  %v13175_v44 = vld [vmem:[%s14754_s3 + $0x754] ss:$8 sps:$4 sm:$0xff]  }
 0x3bb   : > { %v13178_v46 = vld [vmem:[%s14754_s3 + $0x7d4] ss:$8 sps:$4 sm:$0xff]  }
 0x3bd   : > { %4268 = vmatpush1.bf16.msra.mxu0 %v13093_v15  ;;  %4414 = vmatpush1.bf16.msra.mxu1 %v13096_v31 }
 0x3be   : > { %4269 = vmatprep.subr.bf16.mxu0 %v13101_v0  ;;  %4415 = vmatprep.subr.bf16.mxu1 %v13104_v50  ;;  %v13173_v50 = vld [vmem:[%s14754_s3 + $0x750] ss:$8 sps:$4 sm:$0xff]  }
 0x3c1   : > { %4270 = vmatpush1.bf16.msra.mxu0 %v13099_v43  ;;  %4416 = vmatpush1.bf16.msra.mxu1 %v13102_v53  ;;  %v13176_v43 = vld [vmem:[%s14754_s3 + $0x7d0] ss:$8 sps:$4 sm:$0xff]  }
 0x3c2   : > { %4271 = vmatprep.subr.bf16.mxu0 %v13107_v7  ;;  %4417 = vmatprep.subr.bf16.mxu1 %v13110_v6  ;;  %v13181_v7 = vld [vmem:[%s14754_s3 + $0x744] ss:$8 sps:$4 sm:$0xff]  }
 0x3c3   : > { %v13184_v6 = vld [vmem:[%s14754_s3 + $0x7c4] ss:$8 sps:$4 sm:$0xff]  }
 0x3c5   : > { %4272 = vmatpush1.bf16.msra.mxu0 %v13105_v59  ;;  %4418 = vmatpush1.bf16.msra.mxu1 %v13108_v48  ;;  %v13179_v48 = vld [vmem:[%s14754_s3 + $0x740] ss:$8 sps:$4 sm:$0xff]  }
 0x3c6   : > { %4544 = vmatprep.subr.bf16.mxu0 %v13113_v28  ;;  %4690 = vmatprep.subr.bf16.mxu1 %v13117_v3  ;;  %v13187_v28 = vld [vmem:[%s14754_s3 + $0x734] ss:$8 sps:$4 sm:$0xff]  }
 0x3c7   : > { %v13190_v3 = vld [vmem:[%s14754_s3 + $0x7b4] ss:$8 sps:$4 sm:$0xff]  }
 0x3c8   : > { %4290 = vmatmul.mubr.bf16.vlgmr.msra.gmra.mxu0 %v4159_v16  ;;  %4436 = vmatmul.mubr.bf16.vlgmr.msra.gmra.mxu1 %v4321_v9  ;;  %v13185_v16 = vld [vmem:[%s14754_s3 + $0x730] ss:$8 sps:$4 sm:$0xff]   ;;  %v13193_v9 = vld [vmem:[%s14754_s3 + $0x724] ss:$8 sps:$4 sm:$0xff]  }
 0x3c9   : > { %4545 = vmatpush1.bf16.msra.mxu0 %v13111_v8  ;;  %4691 = vmatpush1.bf16.msra.mxu1 %v13115_v47  ;;  %v13188_v8 = vld [vmem:[%s14754_s3 + $0x7b0] ss:$8 sps:$4 sm:$0xff]   ;;  %v13196_v47 = vld [vmem:[%s14754_s3 + $0x7a4] ss:$8 sps:$4 sm:$0xff]  }
 0x3ca   : > { %4546 = vmatprep.subr.bf16.mxu0 %v13120_v17  ;;  %4692 = vmatprep.subr.bf16.mxu1 %v13123_v10  ;;  %v13191_v17 = vld [vmem:[%s14754_s3 + $0x720] ss:$8 sps:$4 sm:$0xff]  }
 0x3cb   : > { %4576 = vmatprep.mubr.bf16.mxu0 %v14439_v23  ;;  %4722 = vmatprep.mubr.bf16.mxu1 %v14439_v23  ;;  %v13194_v10 = vld [vmem:[%s14754_s3 + $0x7a0] ss:$8 sps:$4 sm:$0xff]  }
 0x3cd   : > { %4547 = vmatpush1.bf16.msra.mxu0 %v13118_v58  ;;  %4693 = vmatpush1.bf16.msra.mxu1 %v13121_v14  ;;  %v13199_v58 = vld [vmem:[%s14754_s3 + $0x714] ss:$8 sps:$4 sm:$0xff]  }
 0x3ce   : > { %4548 = vmatprep.subr.bf16.mxu0 %v13126_v40  ;;  %4694 = vmatprep.subr.bf16.mxu1 %v13129_v20  ;;  %v13202_v14 = vld [vmem:[%s14754_s3 + $0x794] ss:$8 sps:$4 sm:$0xff]   ;;  %v13197_v40 = vld [vmem:[%s14754_s3 + $0x710] ss:$8 sps:$4 sm:$0xff]  }
 0x3cf   : > { %v13200_v20 = vld [vmem:[%s14754_s3 + $0x790] ss:$8 sps:$4 sm:$0xff]  }
 0x3d1   : > { %4549 = vmatpush1.bf16.msra.mxu0 %v13124_v12  ;;  %4695 = vmatpush1.bf16.msra.mxu1 %v13127_v21  ;;  %v13205_v12 = vld [vmem:[%s14754_s3 + $0x704] ss:$8 sps:$4 sm:$0xff]  }
 0x3d2   : > { %4550 = vmatprep.subr.bf16.mxu0 %v13132_v22  ;;  %4696 = vmatprep.subr.bf16.mxu1 %v13135_v1  ;;  %v13208_v21 = vld [vmem:[%s14754_s3 + $0x784] ss:$8 sps:$4 sm:$0xff]   ;;  %v13203_v22 = vld [vmem:[%s14754_s3 + $0x700] ss:$8 sps:$4 sm:$0xff]  }
 0x3d3   : > { %v13212_v1 = vld [vmem:[#allocation2 + $0x1c] ss:$0 sps:$4 sm:$0xcc]  }
 0x3d5   : > { %4551 = vmatpush1.bf16.msra.mxu0 %v13130_v55  ;;  %4697 = vmatpush1.bf16.msra.mxu1 %v13133_v38  ;;  %v13206_v55 = vld [vmem:[%s14754_s3 + $0x780] ss:$8 sps:$4 sm:$0xff]   ;;  %v13211_v38 = vld [vmem:[%s14754_s3 + $0x874] ss:$8 sps:$4 sm:$0xff]  }
 0x3d6   : > { %4552 = vmatprep.subr.bf16.mxu0 %v13138_v57  ;;  %4698 = vmatprep.subr.bf16.mxu1 %v13141_v24  ;;  %v13215_v57 = vld [vmem:[%s14754_s3 + $0x8f4] ss:$8 sps:$4 sm:$0xff]   ;;  %v4733_v24 = vld [vmem:[#allocation2 + $0x1c] sm:$0x3] }
 0x3d9   : > { %4553 = vmatpush1.bf16.msra.mxu0 %v13136_v52  ;;  %4699 = vmatpush1.bf16.msra.mxu1 %v13139_v26  ;;  %v13209_v52 = vld [vmem:[%s14754_s3 + $0x870] ss:$8 sps:$4 sm:$0xff]   ;;  %v4895_v26 = vrot.slane %v13212_v1, 2 }
 0x3da   : > { %4554 = vmatprep.subr.bf16.mxu0 %v13144_v45  ;;  %4700 = vmatprep.subr.bf16.mxu1 %v13147_v60  ;;  %v13213_v45 = vld [vmem:[%s14754_s3 + $0x8f0] ss:$8 sps:$4 sm:$0xff]   ;;  %v13218_v60 = vld [vmem:[%s14754_s3 + $0x864] ss:$8 sps:$4 sm:$0xff]  }
 0x3dd   : > { %4555 = vmatpush1.bf16.msra.mxu0 %v13142_v11  ;;  %4701 = vmatpush1.bf16.msra.mxu1 %v13145_v63  ;;  %v13221_v11 = vld [vmem:[%s14754_s3 + $0x8e4] ss:$8 sps:$4 sm:$0xff]  }
 0x3de   : > { %4556 = vmatprep.subr.bf16.mxu0 %v13150_v49  ;;  %4702 = vmatprep.subr.bf16.mxu1 %v13153_v62  ;;  %v13216_v62 = vld [vmem:[%s14754_s3 + $0x860] ss:$8 sps:$4 sm:$0xff]  }
 0x3e1   : > { %4557 = vmatpush1.bf16.msra.mxu0 %v13148_v25  ;;  %4703 = vmatpush1.bf16.msra.mxu1 %v13151_v27  ;;  %v13219_v27 = vld [vmem:[%s14754_s3 + $0x8e0] ss:$8 sps:$4 sm:$0xff]  }
 0x3e2   : > { %4558 = vmatprep.subr.bf16.mxu0 %v13156_v34  ;;  %4704 = vmatprep.subr.bf16.mxu1 %v13159_v19 }
 0x3e5   : > { %4559 = vmatpush1.bf16.msra.mxu0 %v13154_v30  ;;  %4705 = vmatpush1.bf16.msra.mxu1 %v13157_v42  ;;  %v13224_v30 = vld [vmem:[%s14754_s3 + $0x854] ss:$8 sps:$4 sm:$0xff]  }
 0x3e6   : > { %4831 = vmatprep.subr.bf16.mxu0 %v13162_v51  ;;  %4977 = vmatprep.subr.bf16.mxu1 %v13166_v54 }
 0x3e8   : > { %v2883_v56 = vpop.f32.mrf.mxu0  ;;  %v3004_v35 = vpop.f32.mrf.mxu1  ;;  %4577 = vmatmul.mubr.bf16.vlgmr.msra.gmra.mxu0 %v4446_v32  ;;  %4723 = vmatmul.mubr.bf16.vlgmr.msra.gmra.mxu1 %v4608_v61  ;;  %v13222_v32 = vld [vmem:[%s14754_s3 + $0x850] ss:$8 sps:$4 sm:$0xff]  }
 0x3e9   : > { %v15677_v5 = vadd.f32 %v3004_v35, %v2883_v56  ;;  %4832 = vmatpush1.bf16.msra.mxu0 %v13160_v2  ;;  %4978 = vmatpush1.bf16.msra.mxu1 %v13164_v36  ;;  %v13225_v36 = vld [vmem:[%s14754_s3 + $0x8d0] ss:$8 sps:$4 sm:$0xff]   ;;  %v13233_v56 = vld [vmem:[%s14754_s3 + $0x8c4] ss:$8 sps:$4 sm:$0xff]  }
 0x3ea   : > { %v2885_v29 = vpop.f32.mrf.mxu0  ;;  %v3006_v37 = vpop.f32.mrf.mxu1  ;;  %4833 = vmatprep.subr.bf16.mxu0 %v13169_v13  ;;  %4979 = vmatprep.subr.bf16.mxu1 %v13172_v33  ;;  %v13230_v33 = vld [vmem:[%s14754_s3 + $0x844] ss:$8 sps:$4 sm:$0xff]  }
 0x3eb   : > { %v15683_v15 = vadd.f32 %v3006_v37, %v2885_v29  ;;  %4863 = vmatprep.mubr.bf16.mxu0 %v14439_v23  ;;  %5009 = vmatprep.mubr.bf16.mxu1 %v14439_v23  ;;  %v13239_v29 = vld [vmem:[%s14754_s3 + $0x8b4] ss:$8 sps:$4 sm:$0xff]   ;;  %v13234_v37 = vld [vmem:[%s14754_s3 + $0x830] ss:$8 sps:$4 sm:$0xff]  }
 0x3ec   : > { %v2887_v31 = vpop.f32.mrf.mxu0  ;;  %v3008_v0 = vpop.f32.mrf.mxu1 }
 0x3ed   : > { %4834 = vmatpush1.bf16.msra.mxu0 %v13167_v18  ;;  %4980 = vmatpush1.bf16.msra.mxu1 %v13170_v41  ;;  %v13231_v18 = vld [vmem:[%s14754_s3 + $0x8c0] ss:$8 sps:$4 sm:$0xff]   ;;  %v13236_v41 = vld [vmem:[%s14754_s3 + $0x834] ss:$8 sps:$4 sm:$0xff]  }
 0x3ee   : > { %v2888_v53 = vpop.f32.mrf.mxu0  ;;  %4835 = vmatprep.subr.bf16.mxu0 %v13175_v44  ;;  %4981 = vmatprep.subr.bf16.mxu1 %v13178_v46  ;;  %v3009_v59 = vpop.f32.mrf.mxu1  ;;  %v13237_v44 = vld [vmem:[%s14754_s3 + $0x8b0] ss:$8 sps:$4 sm:$0xff]   ;;  %v13242_v46 = vld [vmem:[%s14754_s3 + $0x824] ss:$8 sps:$4 sm:$0xff]   ;;  %v13240_v31 = vld [vmem:[%s14754_s3 + $0x820] ss:$8 sps:$4 sm:$0xff]  }
 0x3ef   : > { %v13243_v0 = vld [vmem:[%s14754_s3 + $0x8a0] ss:$8 sps:$4 sm:$0xff]   ;;  %v13246_v53 = vld [vmem:[%s14754_s3 + $0x810] ss:$8 sps:$4 sm:$0xff]   ;;  %v13257_v59 = vld [vmem:[%s14754_s3 + $0x884] ss:$8 sps:$4 sm:$0xff]  }
 0x3f1   : > { %4836 = vmatpush1.bf16.msra.mxu0 %v13173_v50  ;;  %4982 = vmatpush1.bf16.msra.mxu1 %v13176_v43  ;;  %v13248_v50 = vld [vmem:[%s14754_s3 + $0x814] ss:$8 sps:$4 sm:$0xff]  }
 0x3f2   : > { %4837 = vmatprep.subr.bf16.mxu0 %v13181_v7  ;;  %4983 = vmatprep.subr.bf16.mxu1 %v13184_v6  ;;  %v13251_v43 = vld [vmem:[%s14754_s3 + $0x894] ss:$8 sps:$4 sm:$0xff]   ;;  %v13249_v7 = vld [vmem:[%s14754_s3 + $0x890] ss:$8 sps:$4 sm:$0xff]   ;;  %v13254_v6 = vld [vmem:[%s14754_s3 + $0x804] ss:$8 sps:$4 sm:$0xff]  }
 0x3f5   : > { %4838 = vmatpush1.bf16.msra.mxu0 %v13179_v48  ;;  %4984 = vmatpush1.bf16.msra.mxu1 %v13182_v39  ;;  %v13252_v48 = vld [vmem:[%s14754_s3 + $0x800] ss:$8 sps:$4 sm:$0xff]  }
 0x3f6   : > { %4839 = vmatprep.subr.bf16.mxu0 %v13187_v28  ;;  %4985 = vmatprep.subr.bf16.mxu1 %v13190_v3  ;;  %v13255_v39 = vld [vmem:[%s14754_s3 + $0x880] ss:$8 sps:$4 sm:$0xff]   ;;  %v13261_v28 = vld [vmem:[#allocation2 + $0x20] ss:$0 sps:$4 sm:$0xcc]  }
 0x3f7   : > { %v13260_v3 = vld [vmem:[%s14754_s3 + $0x974] ss:$8 sps:$4 sm:$0xff]  }
 0x3f9   : > { %4840 = vmatpush1.bf16.msra.mxu0 %v13185_v16  ;;  %4986 = vmatpush1.bf16.msra.mxu1 %v13188_v8  ;;  %v13264_v16 = vld [vmem:[%s14754_s3 + $0x9f4] ss:$8 sps:$4 sm:$0xff]   ;;  %v5020_v8 = vld [vmem:[#allocation2 + $0x20] sm:$0x3] }
 0x3fa   : > { %4841 = vmatprep.subr.bf16.mxu0 %v13193_v9  ;;  %4987 = vmatprep.subr.bf16.mxu1 %v13196_v47  ;;  %v13258_v9 = vld [vmem:[%s14754_s3 + $0x970] ss:$8 sps:$4 sm:$0xff]   ;;  %v5182_v47 = vrot.slane %v13261_v28, 2 }
 0x3fd   : > { %4842 = vmatpush1.bf16.msra.mxu0 %v13191_v17  ;;  %4988 = vmatpush1.bf16.msra.mxu1 %v13194_v10  ;;  %v13262_v17 = vld [vmem:[%s14754_s3 + $0x9f0] ss:$8 sps:$4 sm:$0xff]   ;;  %v13267_v10 = vld [vmem:[%s14754_s3 + $0x964] ss:$8 sps:$4 sm:$0xff]  }
 0x3fe   : > { %4843 = vmatprep.subr.bf16.mxu0 %v13199_v58  ;;  %4989 = vmatprep.subr.bf16.mxu1 %v13202_v14  ;;  %v13270_v58 = vld [vmem:[%s14754_s3 + $0x9e4] ss:$8 sps:$4 sm:$0xff]  }
 0x401   : > { %4844 = vmatpush1.bf16.msra.mxu0 %v13197_v40  ;;  %4990 = vmatpush1.bf16.msra.mxu1 %v13200_v20  ;;  %v13265_v20 = vld [vmem:[%s14754_s3 + $0x960] ss:$8 sps:$4 sm:$0xff]  }
 0x402   : > { %4845 = vmatprep.subr.bf16.mxu0 %v13205_v12  ;;  %4991 = vmatprep.subr.bf16.mxu1 %v13208_v21  ;;  %v13268_v21 = vld [vmem:[%s14754_s3 + $0x9e0] ss:$8 sps:$4 sm:$0xff]  }
 0x405   : > { %4846 = vmatpush1.bf16.msra.mxu0 %v13203_v22  ;;  %4992 = vmatpush1.bf16.msra.mxu1 %v13206_v55  ;;  %v13273_v22 = vld [vmem:[%s14754_s3 + $0x954] ss:$8 sps:$4 sm:$0xff]  }
 0x406   : > { %5118 = vmatprep.subr.bf16.mxu0 %v13211_v38  ;;  %5264 = vmatprep.subr.bf16.mxu1 %v13215_v57  ;;  %v13276_v38 = vld [vmem:[%s14754_s3 + $0x9d4] ss:$8 sps:$4 sm:$0xff]  }
 0x408   : > { %v3143_v63 = vpop.f32.mrf.mxu0  ;;  %4864 = vmatmul.mubr.bf16.vlgmr.msra.gmra.mxu0 %v4733_v24  ;;  %v3289_v49 = vpop.f32.mrf.mxu1  ;;  %5010 = vmatmul.mubr.bf16.vlgmr.msra.gmra.mxu1 %v4895_v26  ;;  %v13271_v26 = vld [vmem:[%s14754_s3 + $0x950] ss:$8 sps:$4 sm:$0xff]  }
 0x409   : > { %v3150_v25 = vadd.f32 %v3143_v63, %v15677_v5  ;;  %5119 = vmatpush1.bf16.msra.mxu0 %v13209_v52  ;;  %5265 = vmatpush1.bf16.msra.mxu1 %v13213_v45  ;;  %v13228_v5 = vld [vmem:[%s14754_s3 + $0x840] ss:$8 sps:$4 sm:$0xff]  }
 0x40a   : > { %v3145_v34 = vpop.f32.mrf.mxu0  ;;  %v3291_v19 = vpop.f32.mrf.mxu1  ;;  %5120 = vmatprep.subr.bf16.mxu0 %v13218_v60  ;;  %5266 = vmatprep.subr.bf16.mxu1 %v13221_v11  ;;  %v13274_v11 = vld [vmem:[%s14754_s3 + $0x9d0] ss:$8 sps:$4 sm:$0xff]  }
 0x40b   : > { %v3151_v42 = vadd.f32 %v3145_v34, %v15683_v15  ;;  %v15721_v51 = vadd.f32 %v3289_v49, %v3150_v25  ;;  %5150 = vmatprep.mubr.bf16.mxu0 %v14439_v23  ;;  %5296 = vmatprep.mubr.bf16.mxu1 %v14439_v23  ;;  %v13245_v15 = vld [vmem:[%s14754_s3 + $0x8a4] ss:$8 sps:$4 sm:$0xff]   ;;  %v13280_v34 = vld [vmem:[%s14754_s3 + $0x9c0] ss:$8 sps:$4 sm:$0xff]  }
 0x40c   : > { %v3147_v54 = vpop.f32.mrf.mxu0  ;;  %v3293_v2 = vpop.f32.mrf.mxu1  ;;  %v13279_v49 = vld [vmem:[%s14754_s3 + $0x944] ss:$8 sps:$4 sm:$0xff]  }
 0x40d   : > { %v15726_v61 = vadd.f32 %v3291_v19, %v3151_v42  ;;  %5121 = vmatpush1.bf16.msra.mxu0 %v13216_v62  ;;  %5267 = vmatpush1.bf16.msra.mxu1 %v13219_v27  ;;  %v13282_v62 = vld [vmem:[%s14754_s3 + $0x9c4] ss:$8 sps:$4 sm:$0xff]   ;;  %v13277_v27 = vld [vmem:[%s14754_s3 + $0x940] ss:$8 sps:$4 sm:$0xff]   ;;  %v13285_v19 = vld [vmem:[%s14754_s3 + $0x934] ss:$8 sps:$4 sm:$0xff]  }
 0x40e   : > { %v3148_v13 = vpop.f32.mrf.mxu0  ;;  %5122 = vmatprep.subr.bf16.mxu0 %v13224_v30  ;;  %5268 = vmatprep.subr.bf16.mxu1 %v13227_v4  ;;  %v3294_v35 = vpop.f32.mrf.mxu1  ;;  %v13288_v30 = vld [vmem:[%s14754_s3 + $0x9b4] ss:$8 sps:$4 sm:$0xff]   ;;  %v13283_v4 = vld [vmem:[%s14754_s3 + $0x930] ss:$8 sps:$4 sm:$0xff]   ;;  %v13294_v54 = vld [vmem:[%s14754_s3 + $0x9a4] ss:$8 sps:$4 sm:$0xff]  }
 0x40f   : > { %v13286_v42 = vld [vmem:[%s14754_s3 + $0x9b0] ss:$8 sps:$4 sm:$0xff]   ;;  %v13292_v2 = vld [vmem:[%s14754_s3 + $0x9a0] ss:$8 sps:$4 sm:$0xff]   ;;  %v13306_v35 = vld [vmem:[%s14754_s3 + $0x984] ss:$8 sps:$4 sm:$0xff]  }
 0x410   : > { %v13295_v13 = vld [vmem:[%s14754_s3 + $0x910] ss:$8 sps:$4 sm:$0xff]  }
 0x411   : > { %5123 = vmatpush1.bf16.msra.mxu0 %v13222_v32  ;;  %5269 = vmatpush1.bf16.msra.mxu1 %v13225_v36  ;;  %v13289_v32 = vld [vmem:[%s14754_s3 + $0x920] ss:$8 sps:$4 sm:$0xff]   ;;  %v13300_v36 = vld [vmem:[%s14754_s3 + $0x994] ss:$8 sps:$4 sm:$0xff]  }
 0x412   : > { %5124 = vmatprep.subr.bf16.mxu0 %v13230_v33  ;;  %5270 = vmatprep.subr.bf16.mxu1 %v13233_v56  ;;  %v13298_v33 = vld [vmem:[%s14754_s3 + $0x990] ss:$8 sps:$4 sm:$0xff]   ;;  %v13303_v56 = vld [vmem:[%s14754_s3 + $0x904] ss:$8 sps:$4 sm:$0xff]  }
 0x415   : > { %5125 = vmatpush1.bf16.msra.mxu0 %v13228_v5  ;;  %5271 = vmatpush1.bf16.msra.mxu1 %v13231_v18  ;;  %v13301_v5 = vld [vmem:[%s14754_s3 + $0x900] ss:$8 sps:$4 sm:$0xff]   ;;  %v13310_v18 = vld [vmem:[#allocation2 + $0x24] ss:$0 sps:$4 sm:$0xcc]  }
 0x416   : > { %5126 = vmatprep.subr.bf16.mxu0 %v13236_v41  ;;  %5272 = vmatprep.subr.bf16.mxu1 %v13239_v29  ;;  %v13304_v41 = vld [vmem:[%s14754_s3 + $0x980] ss:$8 sps:$4 sm:$0xff]   ;;  %v13309_v29 = vld [vmem:[%s14754_s3 + $0xa74] ss:$8 sps:$4 sm:$0xff]  }
 0x419   : > { %5127 = vmatpush1.bf16.msra.mxu0 %v13234_v37  ;;  %5273 = vmatpush1.bf16.msra.mxu1 %v13237_v44  ;;  %v13313_v37 = vld [vmem:[%s14754_s3 + $0xaf4] ss:$8 sps:$4 sm:$0xff]  }
 0x41a   : > { %5128 = vmatprep.subr.bf16.mxu0 %v13242_v46  ;;  %5274 = vmatprep.subr.bf16.mxu1 %v13245_v15  ;;  %v5307_v44 = vld [vmem:[#allocation2 + $0x24] sm:$0x3]  ;;  %v13307_v46 = vld [vmem:[%s14754_s3 + $0xa70] ss:$8 sps:$4 sm:$0xff]   ;;  %v5469_v15 = vrot.slane %v13310_v18, 2 }
 0x41d   : > { %5129 = vmatpush1.bf16.msra.mxu0 %v13240_v31  ;;  %5275 = vmatpush1.bf16.msra.mxu1 %v13243_v0  ;;  %v13311_v31 = vld [vmem:[%s14754_s3 + $0xaf0] ss:$8 sps:$4 sm:$0xff]   ;;  %v13316_v0 = vld [vmem:[%s14754_s3 + $0xa64] ss:$8 sps:$4 sm:$0xff]  }
 0x41e   : > { %5130 = vmatprep.subr.bf16.mxu0 %v13248_v50  ;;  %5276 = vmatprep.subr.bf16.mxu1 %v13251_v43  ;;  %v13319_v50 = vld [vmem:[%s14754_s3 + $0xae4] ss:$8 sps:$4 sm:$0xff]   ;;  %v13314_v43 = vld [vmem:[%s14754_s3 + $0xa60] ss:$8 sps:$4 sm:$0xff]  }
 0x421   : > { %5131 = vmatpush1.bf16.msra.mxu0 %v13246_v53  ;;  %5277 = vmatpush1.bf16.msra.mxu1 %v13249_v7 }
 0x422   : > { %5132 = vmatprep.subr.bf16.mxu0 %v13254_v6  ;;  %5278 = vmatprep.subr.bf16.mxu1 %v13257_v59  ;;  %v13317_v6 = vld [vmem:[%s14754_s3 + $0xae0] ss:$8 sps:$4 sm:$0xff]  }
 0x425   : > { %5133 = vmatpush1.bf16.msra.mxu0 %v13252_v48  ;;  %5279 = vmatpush1.bf16.msra.mxu1 %v13255_v39  ;;  %v13322_v48 = vld [vmem:[%s14754_s3 + $0xa54] ss:$8 sps:$4 sm:$0xff]  }
 0x426   : > { %5405 = vmatprep.subr.bf16.mxu0 %v13260_v3  ;;  %5551 = vmatprep.subr.bf16.mxu1 %v13264_v16  ;;  %v13325_v3 = vld [vmem:[%s14754_s3 + $0xad4] ss:$8 sps:$4 sm:$0xff]  }
 0x428   : > { %v3430_v14 = vpop.f32.mrf.mxu0  ;;  %5151 = vmatmul.mubr.bf16.vlgmr.msra.gmra.mxu0 %v5020_v8  ;;  %v3576_v40 = vpop.f32.mrf.mxu1  ;;  %5297 = vmatmul.mubr.bf16.vlgmr.msra.gmra.mxu1 %v5182_v47  ;;  %v13320_v47 = vld [vmem:[%s14754_s3 + $0xa50] ss:$8 sps:$4 sm:$0xff]  }
 0x429   : > { %v3437_v12 = vadd.f32 %v3430_v14, %v15721_v51  ;;  %5406 = vmatpush1.bf16.msra.mxu0 %v13258_v9  ;;  %5552 = vmatpush1.bf16.msra.mxu1 %v13262_v17  ;;  %v13291_v51 = vld [vmem:[%s14754_s3 + $0x924] ss:$8 sps:$4 sm:$0xff]  }
 0x42a   : > { %v3432_v1 = vpop.f32.mrf.mxu0  ;;  %v3578_v55 = vpop.f32.mrf.mxu1  ;;  %5407 = vmatprep.subr.bf16.mxu0 %v13267_v10  ;;  %5553 = vmatprep.subr.bf16.mxu1 %v13270_v58  ;;  %v13323_v58 = vld [vmem:[%s14754_s3 + $0xad0] ss:$8 sps:$4 sm:$0xff]  }
 0x42b   : > { %v3438_v57 = vadd.f32 %v3432_v1, %v15726_v61  ;;  %v15761_v24 = vadd.f32 %v3576_v40, %v3437_v12  ;;  %5437 = vmatprep.mubr.bf16.mxu0 %v14439_v23  ;;  %5583 = vmatprep.mubr.bf16.mxu1 %v14439_v23  ;;  %v13297_v61 = vld [vmem:[%s14754_s3 + $0x914] ss:$8 sps:$4 sm:$0xff]   ;;  %v13328_v40 = vld [vmem:[%s14754_s3 + $0xa44] ss:$8 sps:$4 sm:$0xff]  }
 0x42c   : > { %v3434_v52 = vpop.f32.mrf.mxu0  ;;  %v3580_v45 = vpop.f32.mrf.mxu1  ;;  %v13334_v1 = vld [vmem:[%s14754_s3 + $0xa34] ss:$8 sps:$4 sm:$0xff]  }
 0x42d   : > { %v15766_v60 = vadd.f32 %v3578_v55, %v3438_v57  ;;  %5408 = vmatpush1.bf16.msra.mxu0 %v13265_v20  ;;  %5554 = vmatpush1.bf16.msra.mxu1 %v13268_v21  ;;  %v13331_v20 = vld [vmem:[%s14754_s3 + $0xac4] ss:$8 sps:$4 sm:$0xff]   ;;  %v13326_v21 = vld [vmem:[%s14754_s3 + $0xa40] ss:$8 sps:$4 sm:$0xff]   ;;  %v13337_v55 = vld [vmem:[%s14754_s3 + $0xab4] ss:$8 sps:$4 sm:$0xff]  }
 0x42e   : > { %v3435_v63 = vpop.f32.mrf.mxu0  ;;  %5409 = vmatprep.subr.bf16.mxu0 %v13273_v22  ;;  %5555 = vmatprep.subr.bf16.mxu1 %v13276_v38  ;;  %v3581_v25 = vpop.f32.mrf.mxu1  ;;  %v13329_v22 = vld [vmem:[%s14754_s3 + $0xac0] ss:$8 sps:$4 sm:$0xff]   ;;  %v13332_v38 = vld [vmem:[%s14754_s3 + $0xa30] ss:$8 sps:$4 sm:$0xff]   ;;  %v13343_v52 = vld [vmem:[%s14754_s3 + $0xaa4] ss:$8 sps:$4 sm:$0xff]  }
 0x42f   : > { %v13335_v57 = vld [vmem:[%s14754_s3 + $0xab0] ss:$8 sps:$4 sm:$0xff]   ;;  %v13341_v45 = vld [vmem:[%s14754_s3 + $0xaa0] ss:$8 sps:$4 sm:$0xff]   ;;  %v13355_v25 = vld [vmem:[%s14754_s3 + $0xa84] ss:$8 sps:$4 sm:$0xff]  }
 0x430   : > { %v13344_v63 = vld [vmem:[%s14754_s3 + $0xa10] ss:$8 sps:$4 sm:$0xff]  }
 0x431   : > { %5410 = vmatpush1.bf16.msra.mxu0 %v13271_v26  ;;  %5556 = vmatpush1.bf16.msra.mxu1 %v13274_v11  ;;  %v13338_v26 = vld [vmem:[%s14754_s3 + $0xa20] ss:$8 sps:$4 sm:$0xff]   ;;  %v13349_v11 = vld [vmem:[%s14754_s3 + $0xa94] ss:$8 sps:$4 sm:$0xff]  }
 0x432   : > { %5411 = vmatprep.subr.bf16.mxu0 %v13279_v49  ;;  %5557 = vmatprep.subr.bf16.mxu1 %v13282_v62  ;;  %v13347_v49 = vld [vmem:[%s14754_s3 + $0xa90] ss:$8 sps:$4 sm:$0xff]   ;;  %v13352_v62 = vld [vmem:[%s14754_s3 + $0xa04] ss:$8 sps:$4 sm:$0xff]  }
 0x435   : > { %5412 = vmatpush1.bf16.msra.mxu0 %v13277_v27  ;;  %5558 = vmatpush1.bf16.msra.mxu1 %v13280_v34  ;;  %v13350_v27 = vld [vmem:[%s14754_s3 + $0xa00] ss:$8 sps:$4 sm:$0xff]   ;;  %v13359_v34 = vld [vmem:[#allocation2 + $0x28] ss:$0 sps:$4 sm:$0xcc]  }
 0x436   : > { %5413 = vmatprep.subr.bf16.mxu0 %v13285_v19  ;;  %5559 = vmatprep.subr.bf16.mxu1 %v13288_v30  ;;  %v13353_v19 = vld [vmem:[%s14754_s3 + $0xa80] ss:$8 sps:$4 sm:$0xff]   ;;  %v13358_v30 = vld [vmem:[%s14754_s3 + $0xb74] ss:$8 sps:$4 sm:$0xff]  }
 0x439   : > { %5414 = vmatpush1.bf16.msra.mxu0 %v13283_v4  ;;  %5560 = vmatpush1.bf16.msra.mxu1 %v13286_v42  ;;  %v13362_v4 = vld [vmem:[%s14754_s3 + $0xbf4] ss:$8 sps:$4 sm:$0xff]   ;;  %v5594_v42 = vld [vmem:[#allocation2 + $0x28] sm:$0x3] }
 0x43a   : > { %5415 = vmatprep.subr.bf16.mxu0 %v13291_v51  ;;  %5561 = vmatprep.subr.bf16.mxu1 %v13294_v54  ;;  %v13356_v51 = vld [vmem:[%s14754_s3 + $0xb70] ss:$8 sps:$4 sm:$0xff]   ;;  %v5756_v54 = vrot.slane %v13359_v34, 2 }
 0x43d   : > { %5416 = vmatpush1.bf16.msra.mxu0 %v13289_v32  ;;  %5562 = vmatpush1.bf16.msra.mxu1 %v13292_v2  ;;  %v13360_v32 = vld [vmem:[%s14754_s3 + $0xbf0] ss:$8 sps:$4 sm:$0xff]   ;;  %v13365_v2 = vld [vmem:[%s14754_s3 + $0xb64] ss:$8 sps:$4 sm:$0xff]  }
 0x43e   : > { %5417 = vmatprep.subr.bf16.mxu0 %v13297_v61  ;;  %5563 = vmatprep.subr.bf16.mxu1 %v13300_v36  ;;  %v13368_v61 = vld [vmem:[%s14754_s3 + $0xbe4] ss:$8 sps:$4 sm:$0xff]   ;;  %v13363_v36 = vld [vmem:[%s14754_s3 + $0xb60] ss:$8 sps:$4 sm:$0xff]  }
 0x441   : > { %5418 = vmatpush1.bf16.msra.mxu0 %v13295_v13  ;;  %5564 = vmatpush1.bf16.msra.mxu1 %v13298_v33 }
 0x442   : > { %5419 = vmatprep.subr.bf16.mxu0 %v13303_v56  ;;  %5565 = vmatprep.subr.bf16.mxu1 %v13306_v35  ;;  %v13366_v56 = vld [vmem:[%s14754_s3 + $0xbe0] ss:$8 sps:$4 sm:$0xff]  }
 0x445   : > { %5420 = vmatpush1.bf16.msra.mxu0 %v13301_v5  ;;  %5566 = vmatpush1.bf16.msra.mxu1 %v13304_v41  ;;  %v13371_v5 = vld [vmem:[%s14754_s3 + $0xb54] ss:$8 sps:$4 sm:$0xff]  }
 0x446   : > { %5692 = vmatprep.subr.bf16.mxu0 %v13309_v29  ;;  %5838 = vmatprep.subr.bf16.mxu1 %v13313_v37  ;;  %v13374_v29 = vld [vmem:[%s14754_s3 + $0xbd4] ss:$8 sps:$4 sm:$0xff]  }
 0x448   : > { %v3717_v53 = vpop.f32.mrf.mxu0  ;;  %5438 = vmatmul.mubr.bf16.vlgmr.msra.gmra.mxu0 %v5307_v44  ;;  %v3863_v7 = vpop.f32.mrf.mxu1  ;;  %5584 = vmatmul.mubr.bf16.vlgmr.msra.gmra.mxu1 %v5469_v15  ;;  %v13369_v15 = vld [vmem:[%s14754_s3 + $0xb50] ss:$8 sps:$4 sm:$0xff]  }
 0x449   : > { %v3724_v59 = vadd.f32 %v3717_v53, %v15761_v24  ;;  %5693 = vmatpush1.bf16.msra.mxu0 %v13307_v46  ;;  %5839 = vmatpush1.bf16.msra.mxu1 %v13311_v31  ;;  %v13340_v24 = vld [vmem:[%s14754_s3 + $0xa24] ss:$8 sps:$4 sm:$0xff]  }
 0x44a   : > { %v3719_v39 = vpop.f32.mrf.mxu0  ;;  %v3865_v28 = vpop.f32.mrf.mxu1  ;;  %5694 = vmatprep.subr.bf16.mxu0 %v13316_v0  ;;  %5840 = vmatprep.subr.bf16.mxu1 %v13319_v50  ;;  %v13372_v50 = vld [vmem:[%s14754_s3 + $0xbd0] ss:$8 sps:$4 sm:$0xff]   ;;  %v13377_v53 = vld [vmem:[%s14754_s3 + $0xb44] ss:$8 sps:$4 sm:$0xff]  }
 0x44b   : > { %v3725_v16 = vadd.f32 %v3719_v39, %v15766_v60  ;;  %v15801_v8 = vadd.f32 %v3863_v7, %v3724_v59  ;;  %5724 = vmatprep.mubr.bf16.mxu0 %v14439_v23  ;;  %5870 = vmatprep.mubr.bf16.mxu1 %v14439_v23  ;;  %v13346_v60 = vld [vmem:[%s14754_s3 + $0xa14] ss:$8 sps:$4 sm:$0xff]   ;;  %v13380_v7 = vld [vmem:[%s14754_s3 + $0xbc4] ss:$8 sps:$4 sm:$0xff]   ;;  %v13375_v59 = vld [vmem:[%s14754_s3 + $0xb40] ss:$8 sps:$4 sm:$0xff]  }
 0x44c   : > { %v3721_v9 = vpop.f32.mrf.mxu0  ;;  %v3867_v17 = vpop.f32.mrf.mxu1  ;;  %v13383_v39 = vld [vmem:[%s14754_s3 + $0xb34] ss:$8 sps:$4 sm:$0xff]  }
 0x44d   : > { %v15806_v10 = vadd.f32 %v3865_v28, %v3725_v16  ;;  %5695 = vmatpush1.bf16.msra.mxu0 %v13314_v43  ;;  %5841 = vmatpush1.bf16.msra.mxu1 %v13317_v6  ;;  %v13386_v28 = vld [vmem:[%s14754_s3 + $0xbb4] ss:$8 sps:$4 sm:$0xff]   ;;  %v13384_v16 = vld [vmem:[%s14754_s3 + $0xbb0] ss:$8 sps:$4 sm:$0xff]   ;;  %v13392_v9 = vld [vmem:[%s14754_s3 + $0xba4] ss:$8 sps:$4 sm:$0xff]  }
 0x44e   : > { %v3722_v14 = vpop.f32.mrf.mxu0  ;;  %5696 = vmatprep.subr.bf16.mxu0 %v13322_v48  ;;  %5842 = vmatprep.subr.bf16.mxu1 %v13325_v3  ;;  %v3868_v12 = vpop.f32.mrf.mxu1  ;;  %v13378_v48 = vld [vmem:[%s14754_s3 + $0xbc0] ss:$8 sps:$4 sm:$0xff]   ;;  %v13381_v3 = vld [vmem:[%s14754_s3 + $0xb30] ss:$8 sps:$4 sm:$0xff]  }
 0x44f   : > { %v13390_v17 = vld [vmem:[%s14754_s3 + $0xba0] ss:$8 sps:$4 sm:$0xff]   ;;  %v13393_v14 = vld [vmem:[%s14754_s3 + $0xb10] ss:$8 sps:$4 sm:$0xff]   ;;  %v13404_v12 = vld [vmem:[%s14754_s3 + $0xb84] ss:$8 sps:$4 sm:$0xff]  }
 0x451   : > { %5697 = vmatpush1.bf16.msra.mxu0 %v13320_v47  ;;  %5843 = vmatpush1.bf16.msra.mxu1 %v13323_v58  ;;  %v13387_v47 = vld [vmem:[%s14754_s3 + $0xb20] ss:$8 sps:$4 sm:$0xff]   ;;  %v13398_v58 = vld [vmem:[%s14754_s3 + $0xb94] ss:$8 sps:$4 sm:$0xff]  }
 0x452   : > { %5698 = vmatprep.subr.bf16.mxu0 %v13328_v40  ;;  %5844 = vmatprep.subr.bf16.mxu1 %v13331_v20  ;;  %v13396_v40 = vld [vmem:[%s14754_s3 + $0xb90] ss:$8 sps:$4 sm:$0xff]   ;;  %v13401_v20 = vld [vmem:[%s14754_s3 + $0xb04] ss:$8 sps:$4 sm:$0xff]  }
 0x455   : > { %5699 = vmatpush1.bf16.msra.mxu0 %v13326_v21  ;;  %5845 = vmatpush1.bf16.msra.mxu1 %v13329_v22  ;;  %v13399_v21 = vld [vmem:[%s14754_s3 + $0xb00] ss:$8 sps:$4 sm:$0xff]   ;;  %v13408_v22 = vld [vmem:[#allocation2 + $0x2c] ss:$0 sps:$4 sm:$0xcc]  }
 0x456   : > { %5700 = vmatprep.subr.bf16.mxu0 %v13334_v1  ;;  %5846 = vmatprep.subr.bf16.mxu1 %v13337_v55  ;;  %v13402_v1 = vld [vmem:[%s14754_s3 + $0xb80] ss:$8 sps:$4 sm:$0xff]   ;;  %v13407_v55 = vld [vmem:[%s14754_s3 + $0xc74] ss:$8 sps:$4 sm:$0xff]  }
 0x459   : > { %5701 = vmatpush1.bf16.msra.mxu0 %v13332_v38  ;;  %5847 = vmatpush1.bf16.msra.mxu1 %v13335_v57  ;;  %v13411_v38 = vld [vmem:[%s14754_s3 + $0xcf4] ss:$8 sps:$4 sm:$0xff]  }
 0x45a   : > { %5702 = vmatprep.subr.bf16.mxu0 %v13340_v24  ;;  %5848 = vmatprep.subr.bf16.mxu1 %v13343_v52  ;;  %v5881_v57 = vld [vmem:[#allocation2 + $0x2c] sm:$0x3]  ;;  %v13405_v24 = vld [vmem:[%s14754_s3 + $0xc70] ss:$8 sps:$4 sm:$0xff]   ;;  %v6043_v52 = vrot.slane %v13408_v22, 2 }
 0x45d   : > { %5703 = vmatpush1.bf16.msra.mxu0 %v13338_v26  ;;  %5849 = vmatpush1.bf16.msra.mxu1 %v13341_v45  ;;  %v13409_v26 = vld [vmem:[%s14754_s3 + $0xcf0] ss:$8 sps:$4 sm:$0xff]   ;;  %v13414_v45 = vld [vmem:[%s14754_s3 + $0xc64] ss:$8 sps:$4 sm:$0xff]  }
 0x45e   : > { %5704 = vmatprep.subr.bf16.mxu0 %v13346_v60  ;;  %5850 = vmatprep.subr.bf16.mxu1 %v13349_v11  ;;  %v13417_v60 = vld [vmem:[%s14754_s3 + $0xce4] ss:$8 sps:$4 sm:$0xff]   ;;  %v13412_v11 = vld [vmem:[%s14754_s3 + $0xc60] ss:$8 sps:$4 sm:$0xff]  }
 0x461   : > { %5705 = vmatpush1.bf16.msra.mxu0 %v13344_v63  ;;  %5851 = vmatpush1.bf16.msra.mxu1 %v13347_v49 }
 0x462   : > { %5706 = vmatprep.subr.bf16.mxu0 %v13352_v62  ;;  %5852 = vmatprep.subr.bf16.mxu1 %v13355_v25  ;;  %v13415_v62 = vld [vmem:[%s14754_s3 + $0xce0] ss:$8 sps:$4 sm:$0xff]  }
 0x465   : > { %5707 = vmatpush1.bf16.msra.mxu0 %v13350_v27  ;;  %5853 = vmatpush1.bf16.msra.mxu1 %v13353_v19  ;;  %v13420_v27 = vld [vmem:[%s14754_s3 + $0xc54] ss:$8 sps:$4 sm:$0xff]  }
 0x466   : > { %5979 = vmatprep.subr.bf16.mxu0 %v13358_v30  ;;  %6125 = vmatprep.subr.bf16.mxu1 %v13362_v4  ;;  %v13423_v30 = vld [vmem:[%s14754_s3 + $0xcd4] ss:$8 sps:$4 sm:$0xff]  }
 0x468   : > { %v4004_v13 = vpop.f32.mrf.mxu0  ;;  %5725 = vmatmul.mubr.bf16.vlgmr.msra.gmra.mxu0 %v5594_v42  ;;  %v4150_v33 = vpop.f32.mrf.mxu1  ;;  %5871 = vmatmul.mubr.bf16.vlgmr.msra.gmra.mxu1 %v5756_v54  ;;  %v13418_v54 = vld [vmem:[%s14754_s3 + $0xc50] ss:$8 sps:$4 sm:$0xff]  }
 0x469   : > { %v4011_v35 = vadd.f32 %v4004_v13, %v15801_v8  ;;  %5980 = vmatpush1.bf16.msra.mxu0 %v13356_v51  ;;  %6126 = vmatpush1.bf16.msra.mxu1 %v13360_v32  ;;  %v13389_v8 = vld [vmem:[%s14754_s3 + $0xb24] ss:$8 sps:$4 sm:$0xff]  }
 0x46a   : > { %v4006_v18 = vpop.f32.mrf.mxu0  ;;  %v4152_v41 = vpop.f32.mrf.mxu1  ;;  %5981 = vmatprep.subr.bf16.mxu0 %v13365_v2  ;;  %6127 = vmatprep.subr.bf16.mxu1 %v13368_v61  ;;  %v13421_v61 = vld [vmem:[%s14754_s3 + $0xcd0] ss:$8 sps:$4 sm:$0xff]   ;;  %v13426_v13 = vld [vmem:[%s14754_s3 + $0xc44] ss:$8 sps:$4 sm:$0xff]  }
 0x46b   : > { %v4012_v37 = vadd.f32 %v4006_v18, %v15806_v10  ;;  %v15841_v44 = vadd.f32 %v4150_v33, %v4011_v35  ;;  %6011 = vmatprep.mubr.bf16.mxu0 %v14439_v23  ;;  %6157 = vmatprep.mubr.bf16.mxu1 %v14439_v23  ;;  %v13395_v10 = vld [vmem:[%s14754_s3 + $0xb14] ss:$8 sps:$4 sm:$0xff]   ;;  %v13429_v33 = vld [vmem:[%s14754_s3 + $0xcc4] ss:$8 sps:$4 sm:$0xff]   ;;  %v13424_v35 = vld [vmem:[%s14754_s3 + $0xc40] ss:$8 sps:$4 sm:$0xff]  }
 0x46c   : > { %v4008_v46 = vpop.f32.mrf.mxu0  ;;  %v4154_v31 = vpop.f32.mrf.mxu1  ;;  %v13432_v18 = vld [vmem:[%s14754_s3 + $0xc34] ss:$8 sps:$4 sm:$0xff]  }
 0x46d   : > { %v15846_v0 = vadd.f32 %v4152_v41, %v4012_v37  ;;  %5982 = vmatpush1.bf16.msra.mxu0 %v13363_v36  ;;  %6128 = vmatpush1.bf16.msra.mxu1 %v13366_v56  ;;  %v13435_v41 = vld [vmem:[%s14754_s3 + $0xcb4] ss:$8 sps:$4 sm:$0xff]   ;;  %v13433_v37 = vld [vmem:[%s14754_s3 + $0xcb0] ss:$8 sps:$4 sm:$0xff]   ;;  %v13441_v46 = vld [vmem:[%s14754_s3 + $0xca4] ss:$8 sps:$4 sm:$0xff]  }
 0x46e   : > { %v4009_v43 = vpop.f32.mrf.mxu0  ;;  %5983 = vmatprep.subr.bf16.mxu0 %v13371_v5  ;;  %6129 = vmatprep.subr.bf16.mxu1 %v13374_v29  ;;  %v4155_v6 = vpop.f32.mrf.mxu1  ;;  %v13427_v5 = vld [vmem:[%s14754_s3 + $0xcc0] ss:$8 sps:$4 sm:$0xff]   ;;  %v13430_v29 = vld [vmem:[%s14754_s3 + $0xc30] ss:$8 sps:$4 sm:$0xff]  }
 0x46f   : > { %v13439_v31 = vld [vmem:[%s14754_s3 + $0xca0] ss:$8 sps:$4 sm:$0xff]   ;;  %v13442_v43 = vld [vmem:[%s14754_s3 + $0xc10] ss:$8 sps:$4 sm:$0xff]   ;;  %v13453_v6 = vld [vmem:[%s14754_s3 + $0xc84] ss:$8 sps:$4 sm:$0xff]  }
 0x471   : > { %5984 = vmatpush1.bf16.msra.mxu0 %v13369_v15  ;;  %6130 = vmatpush1.bf16.msra.mxu1 %v13372_v50  ;;  %v13436_v15 = vld [vmem:[%s14754_s3 + $0xc20] ss:$8 sps:$4 sm:$0xff]   ;;  %v13447_v50 = vld [vmem:[%s14754_s3 + $0xc94] ss:$8 sps:$4 sm:$0xff]  }
 0x472   : > { %5985 = vmatprep.subr.bf16.mxu0 %v13377_v53  ;;  %6131 = vmatprep.subr.bf16.mxu1 %v13380_v7  ;;  %v13445_v53 = vld [vmem:[%s14754_s3 + $0xc90] ss:$8 sps:$4 sm:$0xff]   ;;  %v13450_v7 = vld [vmem:[%s14754_s3 + $0xc04] ss:$8 sps:$4 sm:$0xff]  }
 0x475   : > { %5986 = vmatpush1.bf16.msra.mxu0 %v13375_v59  ;;  %6132 = vmatpush1.bf16.msra.mxu1 %v13378_v48  ;;  %v13448_v59 = vld [vmem:[%s14754_s3 + $0xc00] ss:$8 sps:$4 sm:$0xff]  }
 0x476   : > { %5987 = vmatprep.subr.bf16.mxu0 %v13383_v39  ;;  %6133 = vmatprep.subr.bf16.mxu1 %v13386_v28  ;;  %v13457_v48 = vld [vmem:[#allocation2 + $0x30] ss:$0 sps:$4 sm:$0xcc]   ;;  %v13456_v28 = vld [vmem:[%s14754_s3 + $0xd74] ss:$8 sps:$4 sm:$0xff]  }
 0x477   : > { %v13451_v39 = vld [vmem:[%s14754_s3 + $0xc80] ss:$8 sps:$4 sm:$0xff]  }
 0x479   : > { %5988 = vmatpush1.bf16.msra.mxu0 %v13381_v3  ;;  %6134 = vmatpush1.bf16.msra.mxu1 %v13384_v16  ;;  %v13460_v3 = vld [vmem:[%s14754_s3 + $0xdf4] ss:$8 sps:$4 sm:$0xff]   ;;  %v6168_v16 = vld [vmem:[#allocation2 + $0x30] sm:$0x3] }
 0x47a   : > { %5989 = vmatprep.subr.bf16.mxu0 %v13389_v8  ;;  %6135 = vmatprep.subr.bf16.mxu1 %v13392_v9  ;;  %v13454_v8 = vld [vmem:[%s14754_s3 + $0xd70] ss:$8 sps:$4 sm:$0xff]   ;;  %v6330_v9 = vrot.slane %v13457_v48, 2 }
 0x47d   : > { %5990 = vmatpush1.bf16.msra.mxu0 %v13387_v47  ;;  %6136 = vmatpush1.bf16.msra.mxu1 %v13390_v17  ;;  %v13458_v47 = vld [vmem:[%s14754_s3 + $0xdf0] ss:$8 sps:$4 sm:$0xff]   ;;  %v13463_v17 = vld [vmem:[%s14754_s3 + $0xd64] ss:$8 sps:$4 sm:$0xff]  }
 0x47e   : > { %5991 = vmatprep.subr.bf16.mxu0 %v13395_v10  ;;  %6137 = vmatprep.subr.bf16.mxu1 %v13398_v58  ;;  %v13466_v10 = vld [vmem:[%s14754_s3 + $0xde4] ss:$8 sps:$4 sm:$0xff]   ;;  %v13461_v58 = vld [vmem:[%s14754_s3 + $0xd60] ss:$8 sps:$4 sm:$0xff]  }
 0x481   : > { %5992 = vmatpush1.bf16.msra.mxu0 %v13393_v14  ;;  %6138 = vmatpush1.bf16.msra.mxu1 %v13396_v40 }
 0x482   : > { %5993 = vmatprep.subr.bf16.mxu0 %v13401_v20  ;;  %6139 = vmatprep.subr.bf16.mxu1 %v13404_v12  ;;  %v13464_v20 = vld [vmem:[%s14754_s3 + $0xde0] ss:$8 sps:$4 sm:$0xff]  }
 0x485   : > { %5994 = vmatpush1.bf16.msra.mxu0 %v13399_v21  ;;  %6140 = vmatpush1.bf16.msra.mxu1 %v13402_v1  ;;  %v13469_v21 = vld [vmem:[%s14754_s3 + $0xd54] ss:$8 sps:$4 sm:$0xff]  }
 0x486   : > { %6266 = vmatprep.subr.bf16.mxu0 %v13407_v55  ;;  %6412 = vmatprep.subr.bf16.mxu1 %v13411_v38  ;;  %v13472_v55 = vld [vmem:[%s14754_s3 + $0xdd4] ss:$8 sps:$4 sm:$0xff]  }
 0x488   : > { %v4291_v63 = vpop.f32.mrf.mxu0  ;;  %6012 = vmatmul.mubr.bf16.vlgmr.msra.gmra.mxu0 %v5881_v57  ;;  %v4437_v49 = vpop.f32.mrf.mxu1  ;;  %6158 = vmatmul.mubr.bf16.vlgmr.msra.gmra.mxu1 %v6043_v52  ;;  %v13467_v52 = vld [vmem:[%s14754_s3 + $0xd50] ss:$8 sps:$4 sm:$0xff]  }
 0x489   : > { %v4298_v25 = vadd.f32 %v4291_v63, %v15841_v44  ;;  %6267 = vmatpush1.bf16.msra.mxu0 %v13405_v24  ;;  %6413 = vmatpush1.bf16.msra.mxu1 %v13409_v26  ;;  %v13438_v44 = vld [vmem:[%s14754_s3 + $0xc24] ss:$8 sps:$4 sm:$0xff]  }
 0x48a   : > { %v4293_v34 = vpop.f32.mrf.mxu0  ;;  %v4439_v19 = vpop.f32.mrf.mxu1  ;;  %6268 = vmatprep.subr.bf16.mxu0 %v13414_v45  ;;  %6414 = vmatprep.subr.bf16.mxu1 %v13417_v60  ;;  %v13470_v60 = vld [vmem:[%s14754_s3 + $0xdd0] ss:$8 sps:$4 sm:$0xff]   ;;  %v13475_v63 = vld [vmem:[%s14754_s3 + $0xd44] ss:$8 sps:$4 sm:$0xff]  }
 0x48b   : > { %v4299_v4 = vadd.f32 %v4293_v34, %v15846_v0  ;;  %v15881_v42 = vadd.f32 %v4437_v49, %v4298_v25  ;;  %6298 = vmatprep.mubr.bf16.mxu0 %v14439_v23  ;;  %6444 = vmatprep.mubr.bf16.mxu1 %v14439_v23  ;;  %v13444_v0 = vld [vmem:[%s14754_s3 + $0xc14] ss:$8 sps:$4 sm:$0xff]   ;;  %v13478_v49 = vld [vmem:[%s14754_s3 + $0xdc4] ss:$8 sps:$4 sm:$0xff]   ;;  %v13473_v25 = vld [vmem:[%s14754_s3 + $0xd40] ss:$8 sps:$4 sm:$0xff]  }
 0x48c   : > { %v4295_v51 = vpop.f32.mrf.mxu0  ;;  %v4441_v32 = vpop.f32.mrf.mxu1  ;;  %v13481_v34 = vld [vmem:[%s14754_s3 + $0xd34] ss:$8 sps:$4 sm:$0xff]  }
 0x48d   : > { %v15886_v2 = vadd.f32 %v4439_v19, %v4299_v4  ;;  %6269 = vmatpush1.bf16.msra.mxu0 %v13412_v11  ;;  %6415 = vmatpush1.bf16.msra.mxu1 %v13415_v62  ;;  %v13484_v19 = vld [vmem:[%s14754_s3 + $0xdb4] ss:$8 sps:$4 sm:$0xff]   ;;  %v13482_v4 = vld [vmem:[%s14754_s3 + $0xdb0] ss:$8 sps:$4 sm:$0xff]   ;;  %v13490_v51 = vld [vmem:[%s14754_s3 + $0xda4] ss:$8 sps:$4 sm:$0xff]  }
 0x48e   : > { %v4296_v36 = vpop.f32.mrf.mxu0  ;;  %6270 = vmatprep.subr.bf16.mxu0 %v13420_v27  ;;  %6416 = vmatprep.subr.bf16.mxu1 %v13423_v30  ;;  %v4442_v56 = vpop.f32.mrf.mxu1  ;;  %v13476_v27 = vld [vmem:[%s14754_s3 + $0xdc0] ss:$8 sps:$4 sm:$0xff]   ;;  %v13479_v30 = vld [vmem:[%s14754_s3 + $0xd30] ss:$8 sps:$4 sm:$0xff]  }
 0x48f   : > { %v13488_v32 = vld [vmem:[%s14754_s3 + $0xda0] ss:$8 sps:$4 sm:$0xff]   ;;  %v13491_v36 = vld [vmem:[%s14754_s3 + $0xd10] ss:$8 sps:$4 sm:$0xff]   ;;  %v13502_v56 = vld [vmem:[%s14754_s3 + $0xd84] ss:$8 sps:$4 sm:$0xff]  }
 0x491   : > { %6271 = vmatpush1.bf16.msra.mxu0 %v13418_v54  ;;  %6417 = vmatpush1.bf16.msra.mxu1 %v13421_v61  ;;  %v13485_v54 = vld [vmem:[%s14754_s3 + $0xd20] ss:$8 sps:$4 sm:$0xff]   ;;  %v13496_v61 = vld [vmem:[%s14754_s3 + $0xd94] ss:$8 sps:$4 sm:$0xff]  }
 0x492   : > { %6272 = vmatprep.subr.bf16.mxu0 %v13426_v13  ;;  %6418 = vmatprep.subr.bf16.mxu1 %v13429_v33  ;;  %v13494_v13 = vld [vmem:[%s14754_s3 + $0xd90] ss:$8 sps:$4 sm:$0xff]   ;;  %v13499_v33 = vld [vmem:[%s14754_s3 + $0xd04] ss:$8 sps:$4 sm:$0xff]  }
 0x495   : > { %6273 = vmatpush1.bf16.msra.mxu0 %v13424_v35  ;;  %6419 = vmatpush1.bf16.msra.mxu1 %v13427_v5  ;;  %v13497_v35 = vld [vmem:[%s14754_s3 + $0xd00] ss:$8 sps:$4 sm:$0xff]   ;;  %v13506_v5 = vld [vmem:[#allocation2 + $0x34] ss:$0 sps:$4 sm:$0xcc]  }
 0x496   : > { %6274 = vmatprep.subr.bf16.mxu0 %v13432_v18  ;;  %6420 = vmatprep.subr.bf16.mxu1 %v13435_v41  ;;  %v13500_v18 = vld [vmem:[%s14754_s3 + $0xd80] ss:$8 sps:$4 sm:$0xff]   ;;  %v13505_v41 = vld [vmem:[%s14754_s3 + $0xe74] ss:$8 sps:$4 sm:$0xff]  }
 0x499   : > { %6275 = vmatpush1.bf16.msra.mxu0 %v13430_v29  ;;  %6421 = vmatpush1.bf16.msra.mxu1 %v13433_v37  ;;  %v13509_v29 = vld [vmem:[%s14754_s3 + $0xef4] ss:$8 sps:$4 sm:$0xff]   ;;  %v6455_v37 = vld [vmem:[#allocation2 + $0x34] sm:$0x3] }
 0x49a   : > { %6276 = vmatprep.subr.bf16.mxu0 %v13438_v44  ;;  %6422 = vmatprep.subr.bf16.mxu1 %v13441_v46  ;;  %v13503_v44 = vld [vmem:[%s14754_s3 + $0xe70] ss:$8 sps:$4 sm:$0xff]   ;;  %v6617_v46 = vrot.slane %v13506_v5, 2 }
 0x49d   : > { %6277 = vmatpush1.bf16.msra.mxu0 %v13436_v15  ;;  %6423 = vmatpush1.bf16.msra.mxu1 %v13439_v31  ;;  %v13507_v15 = vld [vmem:[%s14754_s3 + $0xef0] ss:$8 sps:$4 sm:$0xff]   ;;  %v13512_v31 = vld [vmem:[%s14754_s3 + $0xe64] ss:$8 sps:$4 sm:$0xff]  }
 0x49e   : > { %6278 = vmatprep.subr.bf16.mxu0 %v13444_v0  ;;  %6424 = vmatprep.subr.bf16.mxu1 %v13447_v50  ;;  %v13515_v0 = vld [vmem:[%s14754_s3 + $0xee4] ss:$8 sps:$4 sm:$0xff]   ;;  %v13510_v50 = vld [vmem:[%s14754_s3 + $0xe60] ss:$8 sps:$4 sm:$0xff]  }
 0x4a1   : > { %6279 = vmatpush1.bf16.msra.mxu0 %v13442_v43  ;;  %6425 = vmatpush1.bf16.msra.mxu1 %v13445_v53 }
 0x4a2   : > { %6280 = vmatprep.subr.bf16.mxu0 %v13450_v7  ;;  %6426 = vmatprep.subr.bf16.mxu1 %v13453_v6  ;;  %v13513_v7 = vld [vmem:[%s14754_s3 + $0xee0] ss:$8 sps:$4 sm:$0xff]  }
 0x4a5   : > { %6281 = vmatpush1.bf16.msra.mxu0 %v13448_v59  ;;  %6427 = vmatpush1.bf16.msra.mxu1 %v13451_v39  ;;  %v13518_v59 = vld [vmem:[%s14754_s3 + $0xe54] ss:$8 sps:$4 sm:$0xff]  }
 0x4a6   : > { %6553 = vmatprep.subr.bf16.mxu0 %v13456_v28  ;;  %6699 = vmatprep.subr.bf16.mxu1 %v13460_v3  ;;  %v13521_v28 = vld [vmem:[%s14754_s3 + $0xed4] ss:$8 sps:$4 sm:$0xff]  }
 0x4a8   : > { %v4578_v14 = vpop.f32.mrf.mxu0  ;;  %6299 = vmatmul.mubr.bf16.vlgmr.msra.gmra.mxu0 %v6168_v16  ;;  %v4724_v40 = vpop.f32.mrf.mxu1  ;;  %6445 = vmatmul.mubr.bf16.vlgmr.msra.gmra.mxu1 %v6330_v9  ;;  %v13516_v9 = vld [vmem:[%s14754_s3 + $0xe50] ss:$8 sps:$4 sm:$0xff]  }
 0x4a9   : > { %v4585_v12 = vadd.f32 %v4578_v14, %v15881_v42  ;;  %6554 = vmatpush1.bf16.msra.mxu0 %v13454_v8  ;;  %6700 = vmatpush1.bf16.msra.mxu1 %v13458_v47  ;;  %v13487_v42 = vld [vmem:[%s14754_s3 + $0xd24] ss:$8 sps:$4 sm:$0xff]  }
 0x4aa   : > { %v4580_v22 = vpop.f32.mrf.mxu0  ;;  %v4726_v1 = vpop.f32.mrf.mxu1  ;;  %6555 = vmatprep.subr.bf16.mxu0 %v13463_v17  ;;  %6701 = vmatprep.subr.bf16.mxu1 %v13466_v10  ;;  %v13519_v10 = vld [vmem:[%s14754_s3 + $0xed0] ss:$8 sps:$4 sm:$0xff]   ;;  %v13524_v14 = vld [vmem:[%s14754_s3 + $0xe44] ss:$8 sps:$4 sm:$0xff]  }
 0x4ab   : > { %v4586_v38 = vadd.f32 %v4580_v22, %v15886_v2  ;;  %v15921_v57 = vadd.f32 %v4724_v40, %v4585_v12  ;;  %6585 = vmatprep.mubr.bf16.mxu0 %v14439_v23  ;;  %6731 = vmatprep.mubr.bf16.mxu1 %v14439_v23  ;;  %v13493_v2 = vld [vmem:[%s14754_s3 + $0xd14] ss:$8 sps:$4 sm:$0xff]   ;;  %v13527_v40 = vld [vmem:[%s14754_s3 + $0xec4] ss:$8 sps:$4 sm:$0xff]   ;;  %v13522_v12 = vld [vmem:[%s14754_s3 + $0xe40] ss:$8 sps:$4 sm:$0xff]  }
 0x4ac   : > { %v4582_v24 = vpop.f32.mrf.mxu0  ;;  %v4728_v26 = vpop.f32.mrf.mxu1  ;;  %v13530_v22 = vld [vmem:[%s14754_s3 + $0xe34] ss:$8 sps:$4 sm:$0xff]  }
 0x4ad   : > { %v15926_v45 = vadd.f32 %v4726_v1, %v4586_v38  ;;  %6556 = vmatpush1.bf16.msra.mxu0 %v13461_v58  ;;  %6702 = vmatpush1.bf16.msra.mxu1 %v13464_v20  ;;  %v13533_v1 = vld [vmem:[%s14754_s3 + $0xeb4] ss:$8 sps:$4 sm:$0xff]   ;;  %v13531_v38 = vld [vmem:[%s14754_s3 + $0xeb0] ss:$8 sps:$4 sm:$0xff]   ;;  %v13539_v24 = vld [vmem:[%s14754_s3 + $0xea4] ss:$8 sps:$4 sm:$0xff]  }
 0x4ae   : > { %v4583_v11 = vpop.f32.mrf.mxu0  ;;  %6557 = vmatprep.subr.bf16.mxu0 %v13469_v21  ;;  %6703 = vmatprep.subr.bf16.mxu1 %v13472_v55  ;;  %v4729_v62 = vpop.f32.mrf.mxu1  ;;  %v13525_v21 = vld [vmem:[%s14754_s3 + $0xec0] ss:$8 sps:$4 sm:$0xff]   ;;  %v13528_v55 = vld [vmem:[%s14754_s3 + $0xe30] ss:$8 sps:$4 sm:$0xff]  }
 0x4af   : > { %v13537_v26 = vld [vmem:[%s14754_s3 + $0xea0] ss:$8 sps:$4 sm:$0xff]   ;;  %v13540_v11 = vld [vmem:[%s14754_s3 + $0xe10] ss:$8 sps:$4 sm:$0xff]   ;;  %v13551_v62 = vld [vmem:[%s14754_s3 + $0xe84] ss:$8 sps:$4 sm:$0xff]  }
 0x4b1   : > { %6558 = vmatpush1.bf16.msra.mxu0 %v13467_v52  ;;  %6704 = vmatpush1.bf16.msra.mxu1 %v13470_v60  ;;  %v13534_v52 = vld [vmem:[%s14754_s3 + $0xe20] ss:$8 sps:$4 sm:$0xff]   ;;  %v13545_v60 = vld [vmem:[%s14754_s3 + $0xe94] ss:$8 sps:$4 sm:$0xff]  }
 0x4b2   : > { %6559 = vmatprep.subr.bf16.mxu0 %v13475_v63  ;;  %6705 = vmatprep.subr.bf16.mxu1 %v13478_v49  ;;  %v13543_v63 = vld [vmem:[%s14754_s3 + $0xe90] ss:$8 sps:$4 sm:$0xff]   ;;  %v13548_v49 = vld [vmem:[%s14754_s3 + $0xe04] ss:$8 sps:$4 sm:$0xff]  }
 0x4b5   : > { %6560 = vmatpush1.bf16.msra.mxu0 %v13473_v25  ;;  %6706 = vmatpush1.bf16.msra.mxu1 %v13476_v27  ;;  %v13546_v25 = vld [vmem:[%s14754_s3 + $0xe00] ss:$8 sps:$4 sm:$0xff]  }
 0x4b6   : > { %6561 = vmatprep.subr.bf16.mxu0 %v13481_v34  ;;  %6707 = vmatprep.subr.bf16.mxu1 %v13484_v19  ;;  %v13555_v27 = vld [vmem:[#allocation2 + $0x38] ss:$0 sps:$4 sm:$0xcc]   ;;  %v13554_v19 = vld [vmem:[%s14754_s3 + $0xf74] ss:$8 sps:$4 sm:$0xff]  }
 0x4b7   : > { %v13549_v34 = vld [vmem:[%s14754_s3 + $0xe80] ss:$8 sps:$4 sm:$0xff]  }
 0x4b9   : > { %6562 = vmatpush1.bf16.msra.mxu0 %v13479_v30  ;;  %6708 = vmatpush1.bf16.msra.mxu1 %v13482_v4  ;;  %v13558_v30 = vld [vmem:[%s14754_s3 + $0xff4] ss:$8 sps:$4 sm:$0xff]   ;;  %v6742_v4 = vld [vmem:[#allocation2 + $0x38] sm:$0x3] }
 0x4ba   : > { %6563 = vmatprep.subr.bf16.mxu0 %v13487_v42  ;;  %6709 = vmatprep.subr.bf16.mxu1 %v13490_v51  ;;  %v13552_v42 = vld [vmem:[%s14754_s3 + $0xf70] ss:$8 sps:$4 sm:$0xff]   ;;  %v6904_v51 = vrot.slane %v13555_v27, 2 }
 0x4bd   : > { %6564 = vmatpush1.bf16.msra.mxu0 %v13485_v54  ;;  %6710 = vmatpush1.bf16.msra.mxu1 %v13488_v32  ;;  %v13556_v54 = vld [vmem:[%s14754_s3 + $0xff0] ss:$8 sps:$4 sm:$0xff]   ;;  %v13561_v32 = vld [vmem:[%s14754_s3 + $0xf64] ss:$8 sps:$4 sm:$0xff]  }
 0x4be   : > { %6565 = vmatprep.subr.bf16.mxu0 %v13493_v2  ;;  %6711 = vmatprep.subr.bf16.mxu1 %v13496_v61  ;;  %v13564_v2 = vld [vmem:[%s14754_s3 + $0xfe4] ss:$8 sps:$4 sm:$0xff]   ;;  %v13559_v61 = vld [vmem:[%s14754_s3 + $0xf60] ss:$8 sps:$4 sm:$0xff]  }
 0x4c1   : > { %6566 = vmatpush1.bf16.msra.mxu0 %v13491_v36  ;;  %6712 = vmatpush1.bf16.msra.mxu1 %v13494_v13 }
 0x4c2   : > { %6567 = vmatprep.subr.bf16.mxu0 %v13499_v33  ;;  %6713 = vmatprep.subr.bf16.mxu1 %v13502_v56  ;;  %v13562_v33 = vld [vmem:[%s14754_s3 + $0xfe0] ss:$8 sps:$4 sm:$0xff]  }
 0x4c5   : > { %6568 = vmatpush1.bf16.msra.mxu0 %v13497_v35  ;;  %6714 = vmatpush1.bf16.msra.mxu1 %v13500_v18  ;;  %v13567_v35 = vld [vmem:[%s14754_s3 + $0xf54] ss:$8 sps:$4 sm:$0xff]  }
 0x4c6   : > { %6840 = vmatprep.subr.bf16.mxu0 %v13505_v41  ;;  %6986 = vmatprep.subr.bf16.mxu1 %v13509_v29  ;;  %v13570_v41 = vld [vmem:[%s14754_s3 + $0xfd4] ss:$8 sps:$4 sm:$0xff]  }
 0x4c8   : > { %v4865_v43 = vpop.f32.mrf.mxu0  ;;  %6586 = vmatmul.mubr.bf16.vlgmr.msra.gmra.mxu0 %v6455_v37  ;;  %v5011_v53 = vpop.f32.mrf.mxu1  ;;  %6732 = vmatmul.mubr.bf16.vlgmr.msra.gmra.mxu1 %v6617_v46  ;;  %v13565_v46 = vld [vmem:[%s14754_s3 + $0xf50] ss:$8 sps:$4 sm:$0xff]  }
 0x4c9   : > { %v4872_v6 = vadd.f32 %v4865_v43, %v15921_v57  ;;  %6841 = vmatpush1.bf16.msra.mxu0 %v13503_v44  ;;  %6987 = vmatpush1.bf16.msra.mxu1 %v13507_v15  ;;  %v13536_v57 = vld [vmem:[%s14754_s3 + $0xe24] ss:$8 sps:$4 sm:$0xff]  }
 0x4ca   : > { %v4867_v48 = vpop.f32.mrf.mxu0  ;;  %v5013_v39 = vpop.f32.mrf.mxu1  ;;  %6842 = vmatprep.subr.bf16.mxu0 %v13512_v31  ;;  %6988 = vmatprep.subr.bf16.mxu1 %v13515_v0  ;;  %v13568_v0 = vld [vmem:[%s14754_s3 + $0xfd0] ss:$8 sps:$4 sm:$0xff]   ;;  %v13573_v43 = vld [vmem:[%s14754_s3 + $0xf44] ss:$8 sps:$4 sm:$0xff]  }
 0x4cb   : > { %v4873_v3 = vadd.f32 %v4867_v48, %v15926_v45  ;;  %v15961_v16 = vadd.f32 %v5011_v53, %v4872_v6  ;;  %6872 = vmatprep.mubr.bf16.mxu0 %v14439_v23  ;;  %7018 = vmatprep.mubr.bf16.mxu1 %v14439_v23  ;;  %v13542_v45 = vld [vmem:[%s14754_s3 + $0xe14] ss:$8 sps:$4 sm:$0xff]   ;;  %v13576_v53 = vld [vmem:[%s14754_s3 + $0xfc4] ss:$8 sps:$4 sm:$0xff]   ;;  %v13571_v6 = vld [vmem:[%s14754_s3 + $0xf40] ss:$8 sps:$4 sm:$0xff]  }
 0x4cc   : > { %v4869_v8 = vpop.f32.mrf.mxu0  ;;  %v5015_v47 = vpop.f32.mrf.mxu1  ;;  %v13579_v48 = vld [vmem:[%s14754_s3 + $0xf34] ss:$8 sps:$4 sm:$0xff]  }
 0x4cd   : > { %v15966_v17 = vadd.f32 %v5013_v39, %v4873_v3  ;;  %6843 = vmatpush1.bf16.msra.mxu0 %v13510_v50  ;;  %6989 = vmatpush1.bf16.msra.mxu1 %v13513_v7  ;;  %v13582_v39 = vld [vmem:[%s14754_s3 + $0xfb4] ss:$8 sps:$4 sm:$0xff]   ;;  %v13580_v3 = vld [vmem:[%s14754_s3 + $0xfb0] ss:$8 sps:$4 sm:$0xff]   ;;  %v13588_v8 = vld [vmem:[%s14754_s3 + $0xfa4] ss:$8 sps:$4 sm:$0xff]  }
 0x4ce   : > { %v4870_v58 = vpop.f32.mrf.mxu0  ;;  %6844 = vmatprep.subr.bf16.mxu0 %v13518_v59  ;;  %6990 = vmatprep.subr.bf16.mxu1 %v13521_v28  ;;  %v5016_v20 = vpop.f32.mrf.mxu1  ;;  %v13574_v59 = vld [vmem:[%s14754_s3 + $0xfc0] ss:$8 sps:$4 sm:$0xff]   ;;  %v13577_v28 = vld [vmem:[%s14754_s3 + $0xf30] ss:$8 sps:$4 sm:$0xff]  }
 0x4cf   : > { %v13586_v47 = vld [vmem:[%s14754_s3 + $0xfa0] ss:$8 sps:$4 sm:$0xff]   ;;  %v13589_v58 = vld [vmem:[%s14754_s3 + $0xf10] ss:$8 sps:$4 sm:$0xff]   ;;  %v13600_v20 = vld [vmem:[%s14754_s3 + $0xf84] ss:$8 sps:$4 sm:$0xff]  }
 0x4d1   : > { %6845 = vmatpush1.bf16.msra.mxu0 %v13516_v9  ;;  %6991 = vmatpush1.bf16.msra.mxu1 %v13519_v10  ;;  %v13583_v9 = vld [vmem:[%s14754_s3 + $0xf20] ss:$8 sps:$4 sm:$0xff]   ;;  %v13594_v10 = vld [vmem:[%s14754_s3 + $0xf94] ss:$8 sps:$4 sm:$0xff]  }
 0x4d2   : > { %6846 = vmatprep.subr.bf16.mxu0 %v13524_v14  ;;  %6992 = vmatprep.subr.bf16.mxu1 %v13527_v40  ;;  %v13592_v14 = vld [vmem:[%s14754_s3 + $0xf90] ss:$8 sps:$4 sm:$0xff]   ;;  %v13597_v40 = vld [vmem:[%s14754_s3 + $0xf04] ss:$8 sps:$4 sm:$0xff]  }
 0x4d5   : > { %6847 = vmatpush1.bf16.msra.mxu0 %v13522_v12  ;;  %6993 = vmatpush1.bf16.msra.mxu1 %v13525_v21  ;;  %v13604_v12 = vld [vmem:[#allocation2 + $0x3c] ss:$0 sps:$4 sm:$0xcc]   ;;  %v13595_v21 = vld [vmem:[%s14754_s3 + $0xf00] ss:$8 sps:$4 sm:$0xff]  }
 0x4d6   : > { %6848 = vmatprep.subr.bf16.mxu0 %v13530_v22  ;;  %6994 = vmatprep.subr.bf16.mxu1 %v13533_v1  ;;  %v13598_v22 = vld [vmem:[%s14754_s3 + $0xf80] ss:$8 sps:$4 sm:$0xff]   ;;  %v13603_v1 = vld [vmem:[%s14754_s3 + $0x1074] ss:$8 sps:$4 sm:$0xff]  }
 0x4d9   : > { %6849 = vmatpush1.bf16.msra.mxu0 %v13528_v55  ;;  %6995 = vmatpush1.bf16.msra.mxu1 %v13531_v38  ;;  %v13607_v55 = vld [vmem:[%s14754_s3 + $0x10f4] ss:$8 sps:$4 sm:$0xff]   ;;  %v7191_v38 = vrot.slane %v13604_v12, 2 }
 0x4da   : > { %6850 = vmatprep.subr.bf16.mxu0 %v13536_v57  ;;  %6996 = vmatprep.subr.bf16.mxu1 %v13539_v24  ;;  %v7029_v57 = vld [vmem:[#allocation2 + $0x3c] sm:$0x3]  ;;  %v13601_v24 = vld [vmem:[%s14754_s3 + $0x1070] ss:$8 sps:$4 sm:$0xff]  }
 0x4dd   : > { %6851 = vmatpush1.bf16.msra.mxu0 %v13534_v52  ;;  %6997 = vmatpush1.bf16.msra.mxu1 %v13537_v26  ;;  %v13605_v52 = vld [vmem:[%s14754_s3 + $0x10f0] ss:$8 sps:$4 sm:$0xff]   ;;  %v13610_v26 = vld [vmem:[%s14754_s3 + $0x1064] ss:$8 sps:$4 sm:$0xff]  }
 0x4de   : > { %6852 = vmatprep.subr.bf16.mxu0 %v13542_v45  ;;  %6998 = vmatprep.subr.bf16.mxu1 %v13545_v60  ;;  %v13613_v45 = vld [vmem:[%s14754_s3 + $0x10e4] ss:$8 sps:$4 sm:$0xff]  }
 0x4e1   : > { %6853 = vmatpush1.bf16.msra.mxu0 %v13540_v11  ;;  %6999 = vmatpush1.bf16.msra.mxu1 %v13543_v63 }
 0x4e2   : > { %6854 = vmatprep.subr.bf16.mxu0 %v13548_v49  ;;  %7000 = vmatprep.subr.bf16.mxu1 %v13551_v62  ;;  %v13608_v49 = vld [vmem:[%s14754_s3 + $0x1060] ss:$8 sps:$4 sm:$0xff]  }
 0x4e3   : > { %v13611_v62 = vld [vmem:[%s14754_s3 + $0x10e0] ss:$8 sps:$4 sm:$0xff]  }
 0x4e5   : > { %6855 = vmatpush1.bf16.msra.mxu0 %v13546_v25  ;;  %7001 = vmatpush1.bf16.msra.mxu1 %v13549_v34  ;;  %v13616_v34 = vld [vmem:[%s14754_s3 + $0x1054] ss:$8 sps:$4 sm:$0xff]  }
 0x4e6   : > { %7127 = vmatprep.subr.bf16.mxu0 %v13554_v19  ;;  %7273 = vmatprep.subr.bf16.mxu1 %v13558_v30  ;;  %v13619_v19 = vld [vmem:[%s14754_s3 + $0x10d4] ss:$8 sps:$4 sm:$0xff]  }
 0x4e8   : > { %v5152_v36 = vpop.f32.mrf.mxu0  ;;  %6873 = vmatmul.mubr.bf16.vlgmr.msra.gmra.mxu0 %v6742_v4  ;;  %v5298_v13 = vpop.f32.mrf.mxu1  ;;  %7019 = vmatmul.mubr.bf16.vlgmr.msra.gmra.mxu1 %v6904_v51 }
 0x4e9   : > { %v5159_v56 = vadd.f32 %v5152_v36, %v15961_v16  ;;  %7128 = vmatpush1.bf16.msra.mxu0 %v13552_v42  ;;  %7274 = vmatpush1.bf16.msra.mxu1 %v13556_v54  ;;  %v13585_v16 = vld [vmem:[%s14754_s3 + $0xf24] ss:$8 sps:$4 sm:$0xff]  }
 0x4ea   : > { %v5154_v5 = vpop.f32.mrf.mxu0  ;;  %v5300_v18 = vpop.f32.mrf.mxu1  ;;  %7129 = vmatprep.subr.bf16.mxu0 %v13561_v32  ;;  %7275 = vmatprep.subr.bf16.mxu1 %v13564_v2  ;;  %v13614_v32 = vld [vmem:[%s14754_s3 + $0x1050] ss:$8 sps:$4 sm:$0xff]   ;;  %v13622_v36 = vld [vmem:[%s14754_s3 + $0x1044] ss:$8 sps:$4 sm:$0xff]  }
 0x4eb   : > { %v5160_v29 = vadd.f32 %v5154_v5, %v15966_v17  ;;  %v16001_v37 = vadd.f32 %v5298_v13, %v5159_v56  ;;  %7159 = vmatprep.mubr.bf16.mxu0 %v14439_v23  ;;  %7305 = vmatprep.mubr.bf16.mxu1 %v14439_v23  ;;  %v13591_v17 = vld [vmem:[%s14754_s3 + $0xf14] ss:$8 sps:$4 sm:$0xff]   ;;  %v13617_v2 = vld [vmem:[%s14754_s3 + $0x10d0] ss:$8 sps:$4 sm:$0xff]   ;;  %v13625_v13 = vld [vmem:[%s14754_s3 + $0x10c4] ss:$8 sps:$4 sm:$0xff]  }
 0x4ec   : > { %v5156_v44 = vpop.f32.mrf.mxu0  ;;  %v5302_v15 = vpop.f32.mrf.mxu1  ;;  %v13620_v56 = vld [vmem:[%s14754_s3 + $0x1040] ss:$8 sps:$4 sm:$0xff]   ;;  %v13628_v5 = vld [vmem:[%s14754_s3 + $0x1034] ss:$8 sps:$4 sm:$0xff]  }
 0x4ed   : > { %v16006_v31 = vadd.f32 %v5300_v18, %v5160_v29  ;;  %7130 = vmatpush1.bf16.msra.mxu0 %v13559_v61  ;;  %7276 = vmatpush1.bf16.msra.mxu1 %v13562_v33  ;;  %v13631_v18 = vld [vmem:[%s14754_s3 + $0x10b4] ss:$8 sps:$4 sm:$0xff]   ;;  %v13629_v29 = vld [vmem:[%s14754_s3 + $0x10b0] ss:$8 sps:$4 sm:$0xff]   ;;  %v13637_v44 = vld [vmem:[%s14754_s3 + $0x10a4] ss:$8 sps:$4 sm:$0xff]  }
 0x4ee   : > { %v5157_v50 = vpop.f32.mrf.mxu0  ;;  %7131 = vmatprep.subr.bf16.mxu0 %v13567_v35  ;;  %7277 = vmatprep.subr.bf16.mxu1 %v13570_v41  ;;  %v5303_v7 = vpop.f32.mrf.mxu1  ;;  %v13623_v35 = vld [vmem:[%s14754_s3 + $0x10c0] ss:$8 sps:$4 sm:$0xff]   ;;  %v13626_v41 = vld [vmem:[%s14754_s3 + $0x1030] ss:$8 sps:$4 sm:$0xff]  }
 0x4ef   : > { %v13635_v15 = vld [vmem:[%s14754_s3 + $0x10a0] ss:$8 sps:$4 sm:$0xff]   ;;  %v13638_v50 = vld [vmem:[%s14754_s3 + $0x1010] ss:$8 sps:$4 sm:$0xff]   ;;  %v13649_v7 = vld [vmem:[%s14754_s3 + $0x1084] ss:$8 sps:$4 sm:$0xff]  }
 0x4f1   : > { %7132 = vmatpush1.bf16.msra.mxu0 %v13565_v46  ;;  %7278 = vmatpush1.bf16.msra.mxu1 %v13568_v0  ;;  %v13632_v46 = vld [vmem:[%s14754_s3 + $0x1020] ss:$8 sps:$4 sm:$0xff]   ;;  %v13643_v0 = vld [vmem:[%s14754_s3 + $0x1094] ss:$8 sps:$4 sm:$0xff]  }
 0x4f2   : > { %7133 = vmatprep.subr.bf16.mxu0 %v13573_v43  ;;  %7279 = vmatprep.subr.bf16.mxu1 %v13576_v53  ;;  %v13641_v43 = vld [vmem:[%s14754_s3 + $0x1090] ss:$8 sps:$4 sm:$0xff]   ;;  %v13646_v53 = vld [vmem:[%s14754_s3 + $0x1004] ss:$8 sps:$4 sm:$0xff]  }
 0x4f5   : > { %7134 = vmatpush1.bf16.msra.mxu0 %v13571_v6  ;;  %7280 = vmatpush1.bf16.msra.mxu1 %v13574_v59  ;;  %v13653_v6 = vld [vmem:[#allocation2 + $0x40] ss:$0 sps:$4 sm:$0xcc]   ;;  %v13644_v59 = vld [vmem:[%s14754_s3 + $0x1000] ss:$8 sps:$4 sm:$0xff]  }
 0x4f6   : > { %7135 = vmatprep.subr.bf16.mxu0 %v13579_v48  ;;  %7281 = vmatprep.subr.bf16.mxu1 %v13582_v39  ;;  %v13647_v48 = vld [vmem:[%s14754_s3 + $0x1080] ss:$8 sps:$4 sm:$0xff]   ;;  %v13652_v39 = vld [vmem:[%s14754_s3 + $0x1174] ss:$8 sps:$4 sm:$0xff]  }
 0x4f9   : > { %7136 = vmatpush1.bf16.msra.mxu0 %v13577_v28  ;;  %7282 = vmatpush1.bf16.msra.mxu1 %v13580_v3  ;;  %v13656_v28 = vld [vmem:[%s14754_s3 + $0x11f4] ss:$8 sps:$4 sm:$0xff]   ;;  %v7478_v3 = vrot.slane %v13653_v6, 2 }
 0x4fa   : > { %7137 = vmatprep.subr.bf16.mxu0 %v13585_v16  ;;  %7283 = vmatprep.subr.bf16.mxu1 %v13588_v8  ;;  %v7316_v16 = vld [vmem:[#allocation2 + $0x40] sm:$0x3] }
 0x4fb   : > { %v13650_v8 = vld [vmem:[%s14754_s3 + $0x1170] ss:$8 sps:$4 sm:$0xff]  }
 0x4fd   : > { %7138 = vmatpush1.bf16.msra.mxu0 %v13583_v9  ;;  %7284 = vmatpush1.bf16.msra.mxu1 %v13586_v47  ;;  %v13654_v9 = vld [vmem:[%s14754_s3 + $0x11f0] ss:$8 sps:$4 sm:$0xff]   ;;  %v13659_v47 = vld [vmem:[%s14754_s3 + $0x1164] ss:$8 sps:$4 sm:$0xff]  }
 0x4fe   : > { %7139 = vmatprep.subr.bf16.mxu0 %v13591_v17  ;;  %7285 = vmatprep.subr.bf16.mxu1 %v13594_v10  ;;  %v13662_v17 = vld [vmem:[%s14754_s3 + $0x11e4] ss:$8 sps:$4 sm:$0xff]  }
 0x501   : > { %7140 = vmatpush1.bf16.msra.mxu0 %v13589_v58  ;;  %7286 = vmatpush1.bf16.msra.mxu1 %v13592_v14 }
 0x502   : > { %7141 = vmatprep.subr.bf16.mxu0 %v13597_v40  ;;  %7287 = vmatprep.subr.bf16.mxu1 %v13600_v20  ;;  %v13657_v40 = vld [vmem:[%s14754_s3 + $0x1160] ss:$8 sps:$4 sm:$0xff]  }
 0x503   : > { %v13660_v20 = vld [vmem:[%s14754_s3 + $0x11e0] ss:$8 sps:$4 sm:$0xff]  }
 0x505   : > { %7142 = vmatpush1.bf16.msra.mxu0 %v13595_v21  ;;  %7288 = vmatpush1.bf16.msra.mxu1 %v13598_v22  ;;  %v13665_v22 = vld [vmem:[%s14754_s3 + $0x1154] ss:$8 sps:$4 sm:$0xff]  }
 0x506   : > { %7414 = vmatprep.subr.bf16.mxu0 %v13603_v1  ;;  %7560 = vmatprep.subr.bf16.mxu1 %v13607_v55  ;;  %v13668_v1 = vld [vmem:[%s14754_s3 + $0x11d4] ss:$8 sps:$4 sm:$0xff]  }
 0x508   : > { %v5439_v60 = vpop.f32.mrf.mxu0  ;;  %7160 = vmatmul.mubr.bf16.vlgmr.msra.gmra.mxu0 %v7029_v57  ;;  %v5585_v11 = vpop.f32.mrf.mxu1  ;;  %7306 = vmatmul.mubr.bf16.vlgmr.msra.gmra.mxu1 %v7191_v38 }
 0x509   : > { %v5446_v63 = vadd.f32 %v5439_v60, %v16001_v37  ;;  %7415 = vmatpush1.bf16.msra.mxu0 %v13601_v24  ;;  %7561 = vmatpush1.bf16.msra.mxu1 %v13605_v52  ;;  %v13634_v37 = vld [vmem:[%s14754_s3 + $0x1024] ss:$8 sps:$4 sm:$0xff]  }
 0x50a   : > { %v5441_v25 = vpop.f32.mrf.mxu0  ;;  %v5587_v27 = vpop.f32.mrf.mxu1  ;;  %7416 = vmatprep.subr.bf16.mxu0 %v13610_v26  ;;  %7562 = vmatprep.subr.bf16.mxu1 %v13613_v45  ;;  %v13663_v26 = vld [vmem:[%s14754_s3 + $0x1150] ss:$8 sps:$4 sm:$0xff]  }
 0x50b   : > { %v5447_v30 = vadd.f32 %v5441_v25, %v16006_v31  ;;  %v16041_v4 = vadd.f32 %v5585_v11, %v5446_v63  ;;  %7446 = vmatprep.mubr.bf16.mxu0 %v14439_v23  ;;  %7592 = vmatprep.mubr.bf16.mxu1 %v14439_v23  ;;  %v13640_v31 = vld [vmem:[%s14754_s3 + $0x1014] ss:$8 sps:$4 sm:$0xff]   ;;  %v13666_v45 = vld [vmem:[%s14754_s3 + $0x11d0] ss:$8 sps:$4 sm:$0xff]   ;;  %v13671_v11 = vld [vmem:[%s14754_s3 + $0x1144] ss:$8 sps:$4 sm:$0xff]  }
 0x50c   : > { %v5443_v42 = vpop.f32.mrf.mxu0  ;;  %v5589_v51 = vpop.f32.mrf.mxu1  ;;  %v13674_v63 = vld [vmem:[%s14754_s3 + $0x11c4] ss:$8 sps:$4 sm:$0xff]   ;;  %v13672_v25 = vld [vmem:[%s14754_s3 + $0x11c0] ss:$8 sps:$4 sm:$0xff]  }
 0x50d   : > { %v16045_v54 = vadd.f32 %v5587_v27, %v5447_v30  ;;  %7417 = vmatpush1.bf16.msra.mxu0 %v13608_v49  ;;  %7563 = vmatpush1.bf16.msra.mxu1 %v13611_v62  ;;  %v13669_v62 = vld [vmem:[%s14754_s3 + $0x1140] ss:$8 sps:$4 sm:$0xff]   ;;  %v13677_v27 = vld [vmem:[%s14754_s3 + $0x1134] ss:$8 sps:$4 sm:$0xff]   ;;  %v13678_v30 = vld [vmem:[%s14754_s3 + $0x11b0] ss:$8 sps:$4 sm:$0xff]  }
 0x50e   : > { %v5444_v61 = vpop.f32.mrf.mxu0  ;;  %7418 = vmatprep.subr.bf16.mxu0 %v13616_v34  ;;  %7564 = vmatprep.subr.bf16.mxu1 %v13619_v19  ;;  %v5590_v33 = vpop.f32.mrf.mxu1  ;;  %v13680_v34 = vld [vmem:[%s14754_s3 + $0x11b4] ss:$8 sps:$4 sm:$0xff]   ;;  %v13675_v19 = vld [vmem:[%s14754_s3 + $0x1130] ss:$8 sps:$4 sm:$0xff]   ;;  %v13686_v42 = vld [vmem:[%s14754_s3 + $0x11a4] ss:$8 sps:$4 sm:$0xff]  }
 0x50f   : > { %v13681_v51 = vld [vmem:[%s14754_s3 + $0x1120] ss:$8 sps:$4 sm:$0xff]   ;;  %v13687_v61 = vld [vmem:[%s14754_s3 + $0x1110] ss:$8 sps:$4 sm:$0xff]   ;;  %v13698_v33 = vld [vmem:[%s14754_s3 + $0x1184] ss:$8 sps:$4 sm:$0xff]  }
 0x511   : > { %7419 = vmatpush1.bf16.msra.mxu0 %v13614_v32  ;;  %7565 = vmatpush1.bf16.msra.mxu1 %v13617_v2  ;;  %v13689_v32 = vld [vmem:[%s14754_s3 + $0x1114] ss:$8 sps:$4 sm:$0xff]  }
 0x512   : > { %7420 = vmatprep.subr.bf16.mxu0 %v13622_v36  ;;  %7566 = vmatprep.subr.bf16.mxu1 %v13625_v13  ;;  %v13692_v2 = vld [vmem:[%s14754_s3 + $0x1194] ss:$8 sps:$4 sm:$0xff]   ;;  %v13690_v36 = vld [vmem:[%s14754_s3 + $0x1190] ss:$8 sps:$4 sm:$0xff]   ;;  %v13695_v13 = vld [vmem:[%s14754_s3 + $0x1104] ss:$8 sps:$4 sm:$0xff]  }
 0x515   : > { %7421 = vmatpush1.bf16.msra.mxu0 %v13620_v56  ;;  %7567 = vmatpush1.bf16.msra.mxu1 %v13623_v35  ;;  %v13702_v56 = vld [vmem:[#allocation2 + $0x44] ss:$0 sps:$4 sm:$0xcc]   ;;  %v13693_v35 = vld [vmem:[%s14754_s3 + $0x1100] ss:$8 sps:$4 sm:$0xff]  }
 0x516   : > { %7422 = vmatprep.subr.bf16.mxu0 %v13628_v5  ;;  %7568 = vmatprep.subr.bf16.mxu1 %v13631_v18  ;;  %v13696_v5 = vld [vmem:[%s14754_s3 + $0x1180] ss:$8 sps:$4 sm:$0xff]   ;;  %v13701_v18 = vld [vmem:[%s14754_s3 + $0x1274] ss:$8 sps:$4 sm:$0xff]  }
 0x519   : > { %7423 = vmatpush1.bf16.msra.mxu0 %v13626_v41  ;;  %7569 = vmatpush1.bf16.msra.mxu1 %v13629_v29  ;;  %v13705_v41 = vld [vmem:[%s14754_s3 + $0x12f4] ss:$8 sps:$4 sm:$0xff]   ;;  %v7765_v29 = vrot.slane %v13702_v56, 2 }
 0x51a   : > { %7424 = vmatprep.subr.bf16.mxu0 %v13634_v37  ;;  %7570 = vmatprep.subr.bf16.mxu1 %v13637_v44  ;;  %v7603_v37 = vld [vmem:[#allocation2 + $0x44] sm:$0x3]  ;;  %v13699_v44 = vld [vmem:[%s14754_s3 + $0x1270] ss:$8 sps:$4 sm:$0xff]  }
 0x51d   : > { %7425 = vmatpush1.bf16.msra.mxu0 %v13632_v46  ;;  %7571 = vmatpush1.bf16.msra.mxu1 %v13635_v15  ;;  %v13703_v46 = vld [vmem:[%s14754_s3 + $0x12f0] ss:$8 sps:$4 sm:$0xff]   ;;  %v13708_v15 = vld [vmem:[%s14754_s3 + $0x1264] ss:$8 sps:$4 sm:$0xff]  }
 0x51e   : > { %7426 = vmatprep.subr.bf16.mxu0 %v13640_v31  ;;  %7572 = vmatprep.subr.bf16.mxu1 %v13643_v0  ;;  %v13711_v31 = vld [vmem:[%s14754_s3 + $0x12e4] ss:$8 sps:$4 sm:$0xff]  }
 0x521   : > { %7427 = vmatpush1.bf16.msra.mxu0 %v13638_v50  ;;  %7573 = vmatpush1.bf16.msra.mxu1 %v13641_v43 }
 0x522   : > { %7428 = vmatprep.subr.bf16.mxu0 %v13646_v53  ;;  %7574 = vmatprep.subr.bf16.mxu1 %v13649_v7  ;;  %v13706_v53 = vld [vmem:[%s14754_s3 + $0x1260] ss:$8 sps:$4 sm:$0xff]  }
 0x523   : > { %v13709_v7 = vld [vmem:[%s14754_s3 + $0x12e0] ss:$8 sps:$4 sm:$0xff]  }
 0x525   : > { %7429 = vmatpush1.bf16.msra.mxu0 %v13644_v59  ;;  %7575 = vmatpush1.bf16.msra.mxu1 %v13647_v48  ;;  %v13714_v48 = vld [vmem:[%s14754_s3 + $0x1254] ss:$8 sps:$4 sm:$0xff]  }
 0x526   : > { %7701 = vmatprep.subr.bf16.mxu0 %v13652_v39  ;;  %7847 = vmatprep.subr.bf16.mxu1 %v13656_v28  ;;  %v13717_v39 = vld [vmem:[%s14754_s3 + $0x12d4] ss:$8 sps:$4 sm:$0xff]  }
 0x528   : > { %v5726_v10 = vpop.f32.mrf.mxu0  ;;  %7447 = vmatmul.mubr.bf16.vlgmr.msra.gmra.mxu0 %v7316_v16  ;;  %v5872_v58 = vpop.f32.mrf.mxu1  ;;  %7593 = vmatmul.mubr.bf16.vlgmr.msra.gmra.mxu1 %v7478_v3 }
 0x529   : > { %v5733_v14 = vadd.f32 %v5726_v10, %v16041_v4  ;;  %7702 = vmatpush1.bf16.msra.mxu0 %v13650_v8  ;;  %7848 = vmatpush1.bf16.msra.mxu1 %v13654_v9  ;;  %v13683_v4 = vld [vmem:[%s14754_s3 + $0x1124] ss:$8 sps:$4 sm:$0xff]  }
 0x52a   : > { %v5728_v12 = vpop.f32.mrf.mxu0  ;;  %v5874_v21 = vpop.f32.mrf.mxu1  ;;  %7703 = vmatprep.subr.bf16.mxu0 %v13659_v47  ;;  %7849 = vmatprep.subr.bf16.mxu1 %v13662_v17  ;;  %v13712_v47 = vld [vmem:[%s14754_s3 + $0x1250] ss:$8 sps:$4 sm:$0xff]  }
 0x52b   : > { %v5734_v55 = vadd.f32 %v5728_v12, %v16045_v54  ;;  %v16081_v38 = vadd.f32 %v5872_v58, %v5733_v14  ;;  %7733 = vmatprep.mubr.bf16.mxu0 %v14439_v23  ;;  %7879 = vmatprep.mubr.bf16.mxu1 %v14439_v23  ;;  %v13684_v54 = vld [vmem:[%s14754_s3 + $0x11a0] ss:$8 sps:$4 sm:$0xff]   ;;  %v13715_v17 = vld [vmem:[%s14754_s3 + $0x12d0] ss:$8 sps:$4 sm:$0xff]   ;;  %v13720_v58 = vld [vmem:[%s14754_s3 + $0x1244] ss:$8 sps:$4 sm:$0xff]  }
 0x52c   : > { %v5730_v57 = vpop.f32.mrf.mxu0  ;;  %v5876_v24 = vpop.f32.mrf.mxu1  ;;  %v13723_v14 = vld [vmem:[%s14754_s3 + $0x12c4] ss:$8 sps:$4 sm:$0xff]   ;;  %v13721_v12 = vld [vmem:[%s14754_s3 + $0x12c0] ss:$8 sps:$4 sm:$0xff]  }
 0x52d   : > { %v16085_v52 = vadd.f32 %v5874_v21, %v5734_v55  ;;  %7704 = vmatpush1.bf16.msra.mxu0 %v13657_v40  ;;  %7850 = vmatpush1.bf16.msra.mxu1 %v13660_v20  ;;  %v13718_v20 = vld [vmem:[%s14754_s3 + $0x1240] ss:$8 sps:$4 sm:$0xff]   ;;  %v13726_v21 = vld [vmem:[%s14754_s3 + $0x1234] ss:$8 sps:$4 sm:$0xff]   ;;  %v13727_v55 = vld [vmem:[%s14754_s3 + $0x12b0] ss:$8 sps:$4 sm:$0xff]  }
 0x52e   : > { %v5731_v60 = vpop.f32.mrf.mxu0  ;;  %7705 = vmatprep.subr.bf16.mxu0 %v13665_v22  ;;  %7851 = vmatprep.subr.bf16.mxu1 %v13668_v1  ;;  %v5877_v49 = vpop.f32.mrf.mxu1  ;;  %v13729_v22 = vld [vmem:[%s14754_s3 + $0x12b4] ss:$8 sps:$4 sm:$0xff]   ;;  %v13724_v1 = vld [vmem:[%s14754_s3 + $0x1230] ss:$8 sps:$4 sm:$0xff]   ;;  %v13735_v57 = vld [vmem:[%s14754_s3 + $0x12a4] ss:$8 sps:$4 sm:$0xff]  }
 0x52f   : > { %v13730_v24 = vld [vmem:[%s14754_s3 + $0x1220] ss:$8 sps:$4 sm:$0xff]   ;;  %v13736_v60 = vld [vmem:[%s14754_s3 + $0x1210] ss:$8 sps:$4 sm:$0xff]   ;;  %v13747_v49 = vld [vmem:[%s14754_s3 + $0x1284] ss:$8 sps:$4 sm:$0xff]  }
 0x531   : > { %7706 = vmatpush1.bf16.msra.mxu0 %v13663_v26  ;;  %7852 = vmatpush1.bf16.msra.mxu1 %v13666_v45  ;;  %v13738_v26 = vld [vmem:[%s14754_s3 + $0x1214] ss:$8 sps:$4 sm:$0xff]  }
 0x532   : > { %7707 = vmatprep.subr.bf16.mxu0 %v13671_v11  ;;  %7853 = vmatprep.subr.bf16.mxu1 %v13674_v63  ;;  %v13741_v45 = vld [vmem:[%s14754_s3 + $0x1294] ss:$8 sps:$4 sm:$0xff]   ;;  %v13739_v11 = vld [vmem:[%s14754_s3 + $0x1290] ss:$8 sps:$4 sm:$0xff]   ;;  %v13744_v63 = vld [vmem:[%s14754_s3 + $0x1204] ss:$8 sps:$4 sm:$0xff]  }
 0x535   : > { %7708 = vmatpush1.bf16.msra.mxu0 %v13669_v62  ;;  %7854 = vmatpush1.bf16.msra.mxu1 %v13672_v25  ;;  %v13751_v62 = vld [vmem:[#allocation2 + $0x48] ss:$0 sps:$4 sm:$0xcc]   ;;  %v13742_v25 = vld [vmem:[%s14754_s3 + $0x1200] ss:$8 sps:$4 sm:$0xff]  }
 0x536   : > { %7709 = vmatprep.subr.bf16.mxu0 %v13677_v27  ;;  %7855 = vmatprep.subr.bf16.mxu1 %v13680_v34  ;;  %v13745_v27 = vld [vmem:[%s14754_s3 + $0x1280] ss:$8 sps:$4 sm:$0xff]   ;;  %v13750_v34 = vld [vmem:[%s14754_s3 + $0x1374] ss:$8 sps:$4 sm:$0xff]  }
 0x539   : > { %7710 = vmatpush1.bf16.msra.mxu0 %v13675_v19  ;;  %7856 = vmatpush1.bf16.msra.mxu1 %v13678_v30  ;;  %v13754_v19 = vld [vmem:[%s14754_s3 + $0x13f4] ss:$8 sps:$4 sm:$0xff]   ;;  %v8052_v30 = vrot.slane %v13751_v62, 2 }
 0x53a   : > { %7711 = vmatprep.subr.bf16.mxu0 %v13683_v4  ;;  %7857 = vmatprep.subr.bf16.mxu1 %v13686_v42  ;;  %v7890_v4 = vld [vmem:[#allocation2 + $0x48] sm:$0x3] }
 0x53b   : > { %v13748_v42 = vld [vmem:[%s14754_s3 + $0x1370] ss:$8 sps:$4 sm:$0xff]  }
 0x53d   : > { %7712 = vmatpush1.bf16.msra.mxu0 %v13681_v51  ;;  %7858 = vmatpush1.bf16.msra.mxu1 %v13684_v54  ;;  %v13752_v51 = vld [vmem:[%s14754_s3 + $0x13f0] ss:$8 sps:$4 sm:$0xff]   ;;  %v13757_v54 = vld [vmem:[%s14754_s3 + $0x1364] ss:$8 sps:$4 sm:$0xff]  }
 0x53e   : > { %7713 = vmatprep.subr.bf16.mxu0 %v13689_v32  ;;  %7859 = vmatprep.subr.bf16.mxu1 %v13692_v2  ;;  %v13760_v32 = vld [vmem:[%s14754_s3 + $0x13e4] ss:$8 sps:$4 sm:$0xff]  }
 0x541   : > { %7714 = vmatpush1.bf16.msra.mxu0 %v13687_v61  ;;  %7860 = vmatpush1.bf16.msra.mxu1 %v13690_v36 }
 0x542   : > { %7715 = vmatprep.subr.bf16.mxu0 %v13695_v13  ;;  %7861 = vmatprep.subr.bf16.mxu1 %v13698_v33  ;;  %v13755_v13 = vld [vmem:[%s14754_s3 + $0x1360] ss:$8 sps:$4 sm:$0xff]  }
 0x543   : > { %v13758_v33 = vld [vmem:[%s14754_s3 + $0x13e0] ss:$8 sps:$4 sm:$0xff]  }
 0x545   : > { %7716 = vmatpush1.bf16.msra.mxu0 %v13693_v35  ;;  %7862 = vmatpush1.bf16.msra.mxu1 %v13696_v5  ;;  %v13763_v5 = vld [vmem:[%s14754_s3 + $0x1354] ss:$8 sps:$4 sm:$0xff]  }
 0x546   : > { %7988 = vmatprep.subr.bf16.mxu0 %v13701_v18  ;;  %8134 = vmatprep.subr.bf16.mxu1 %v13705_v41  ;;  %v13766_v18 = vld [vmem:[%s14754_s3 + $0x13d4] ss:$8 sps:$4 sm:$0xff]  }
 0x548   : > { %v6013_v0 = vpop.f32.mrf.mxu0  ;;  %7734 = vmatmul.mubr.bf16.vlgmr.msra.gmra.mxu0 %v7603_v37  ;;  %v6159_v50 = vpop.f32.mrf.mxu1  ;;  %7880 = vmatmul.mubr.bf16.vlgmr.msra.gmra.mxu1 %v7765_v29 }
 0x549   : > { %v6020_v43 = vadd.f32 %v6013_v0, %v16081_v38  ;;  %7989 = vmatpush1.bf16.msra.mxu0 %v13699_v44  ;;  %8135 = vmatpush1.bf16.msra.mxu1 %v13703_v46  ;;  %v13732_v38 = vld [vmem:[%s14754_s3 + $0x1224] ss:$8 sps:$4 sm:$0xff]  }
 0x54a   : > { %v6015_v6 = vpop.f32.mrf.mxu0  ;;  %v6161_v59 = vpop.f32.mrf.mxu1  ;;  %7990 = vmatprep.subr.bf16.mxu0 %v13708_v15  ;;  %8136 = vmatprep.subr.bf16.mxu1 %v13711_v31  ;;  %v13761_v15 = vld [vmem:[%s14754_s3 + $0x1350] ss:$8 sps:$4 sm:$0xff]  }
 0x54b   : > { %v6021_v28 = vadd.f32 %v6015_v6, %v16085_v52  ;;  %v16121_v3 = vadd.f32 %v6159_v50, %v6020_v43  ;;  %8020 = vmatprep.mubr.bf16.mxu0 %v14439_v23  ;;  %8166 = vmatprep.mubr.bf16.mxu1 %v14439_v23  ;;  %v13733_v52 = vld [vmem:[%s14754_s3 + $0x12a0] ss:$8 sps:$4 sm:$0xff]   ;;  %v13764_v31 = vld [vmem:[%s14754_s3 + $0x13d0] ss:$8 sps:$4 sm:$0xff]   ;;  %v13769_v50 = vld [vmem:[%s14754_s3 + $0x1344] ss:$8 sps:$4 sm:$0xff]  }
 0x54c   : > { %v6017_v16 = vpop.f32.mrf.mxu0  ;;  %v6163_v8 = vpop.f32.mrf.mxu1  ;;  %v13772_v43 = vld [vmem:[%s14754_s3 + $0x13c4] ss:$8 sps:$4 sm:$0xff]   ;;  %v13770_v6 = vld [vmem:[%s14754_s3 + $0x13c0] ss:$8 sps:$4 sm:$0xff]  }
 0x54d   : > { %v16125_v9 = vadd.f32 %v6161_v59, %v6021_v28  ;;  %7991 = vmatpush1.bf16.msra.mxu0 %v13706_v53  ;;  %8137 = vmatpush1.bf16.msra.mxu1 %v13709_v7  ;;  %v13767_v7 = vld [vmem:[%s14754_s3 + $0x1340] ss:$8 sps:$4 sm:$0xff]   ;;  %v13775_v59 = vld [vmem:[%s14754_s3 + $0x1334] ss:$8 sps:$4 sm:$0xff]   ;;  %v13776_v28 = vld [vmem:[%s14754_s3 + $0x13b0] ss:$8 sps:$4 sm:$0xff]  }
 0x54e   : > { %v6018_v10 = vpop.f32.mrf.mxu0  ;;  %7992 = vmatprep.subr.bf16.mxu0 %v13714_v48  ;;  %8138 = vmatprep.subr.bf16.mxu1 %v13717_v39  ;;  %v6164_v40 = vpop.f32.mrf.mxu1  ;;  %v13778_v48 = vld [vmem:[%s14754_s3 + $0x13b4] ss:$8 sps:$4 sm:$0xff]   ;;  %v13773_v39 = vld [vmem:[%s14754_s3 + $0x1330] ss:$8 sps:$4 sm:$0xff]   ;;  %v13784_v16 = vld [vmem:[%s14754_s3 + $0x13a4] ss:$8 sps:$4 sm:$0xff]  }
 0x54f   : > { %v13779_v8 = vld [vmem:[%s14754_s3 + $0x1320] ss:$8 sps:$4 sm:$0xff]   ;;  %v13785_v10 = vld [vmem:[%s14754_s3 + $0x1310] ss:$8 sps:$4 sm:$0xff]   ;;  %v13796_v40 = vld [vmem:[%s14754_s3 + $0x1384] ss:$8 sps:$4 sm:$0xff]  }
 0x551   : > { %7993 = vmatpush1.bf16.msra.mxu0 %v13712_v47  ;;  %8139 = vmatpush1.bf16.msra.mxu1 %v13715_v17  ;;  %v13787_v47 = vld [vmem:[%s14754_s3 + $0x1314] ss:$8 sps:$4 sm:$0xff]  }
 0x552   : > { %7994 = vmatprep.subr.bf16.mxu0 %v13720_v58  ;;  %8140 = vmatprep.subr.bf16.mxu1 %v13723_v14  ;;  %v13790_v17 = vld [vmem:[%s14754_s3 + $0x1394] ss:$8 sps:$4 sm:$0xff]   ;;  %v13788_v58 = vld [vmem:[%s14754_s3 + $0x1390] ss:$8 sps:$4 sm:$0xff]   ;;  %v13793_v14 = vld [vmem:[%s14754_s3 + $0x1304] ss:$8 sps:$4 sm:$0xff]  }
 0x555   : > { %7995 = vmatpush1.bf16.msra.mxu0 %v13718_v20  ;;  %8141 = vmatpush1.bf16.msra.mxu1 %v13721_v12  ;;  %v13800_v20 = vld [vmem:[#allocation2 + $0x4c] ss:$0 sps:$4 sm:$0xcc]   ;;  %v13791_v12 = vld [vmem:[%s14754_s3 + $0x1300] ss:$8 sps:$4 sm:$0xff]  }
 0x556   : > { %7996 = vmatprep.subr.bf16.mxu0 %v13726_v21  ;;  %8142 = vmatprep.subr.bf16.mxu1 %v13729_v22  ;;  %v13794_v21 = vld [vmem:[%s14754_s3 + $0x1380] ss:$8 sps:$4 sm:$0xff]   ;;  %v13799_v22 = vld [vmem:[%s14754_s3 + $0x1474] ss:$8 sps:$4 sm:$0xff]  }
 0x559   : > { %7997 = vmatpush1.bf16.msra.mxu0 %v13724_v1  ;;  %8143 = vmatpush1.bf16.msra.mxu1 %v13727_v55  ;;  %v13803_v1 = vld [vmem:[%s14754_s3 + $0x14f4] ss:$8 sps:$4 sm:$0xff]   ;;  %v8339_v55 = vrot.slane %v13800_v20, 2 }
 0x55a   : > { %7998 = vmatprep.subr.bf16.mxu0 %v13732_v38  ;;  %8144 = vmatprep.subr.bf16.mxu1 %v13735_v57  ;;  %v8177_v38 = vld [vmem:[#allocation2 + $0x4c] sm:$0x3]  ;;  %v13797_v57 = vld [vmem:[%s14754_s3 + $0x1470] ss:$8 sps:$4 sm:$0xff]  }
 0x55d   : > { %7999 = vmatpush1.bf16.msra.mxu0 %v13730_v24  ;;  %8145 = vmatpush1.bf16.msra.mxu1 %v13733_v52  ;;  %v13801_v24 = vld [vmem:[%s14754_s3 + $0x14f0] ss:$8 sps:$4 sm:$0xff]   ;;  %v13806_v52 = vld [vmem:[%s14754_s3 + $0x1464] ss:$8 sps:$4 sm:$0xff]  }
 0x55e   : > { %8000 = vmatprep.subr.bf16.mxu0 %v13738_v26  ;;  %8146 = vmatprep.subr.bf16.mxu1 %v13741_v45  ;;  %v13809_v26 = vld [vmem:[%s14754_s3 + $0x14e4] ss:$8 sps:$4 sm:$0xff]  }
 0x561   : > { %8001 = vmatpush1.bf16.msra.mxu0 %v13736_v60  ;;  %8147 = vmatpush1.bf16.msra.mxu1 %v13739_v11 }
 0x562   : > { %8002 = vmatprep.subr.bf16.mxu0 %v13744_v63  ;;  %8148 = vmatprep.subr.bf16.mxu1 %v13747_v49  ;;  %v13804_v63 = vld [vmem:[%s14754_s3 + $0x1460] ss:$8 sps:$4 sm:$0xff]  }
 0x563   : > { %v13807_v49 = vld [vmem:[%s14754_s3 + $0x14e0] ss:$8 sps:$4 sm:$0xff]  }
 0x565   : > { %8003 = vmatpush1.bf16.msra.mxu0 %v13742_v25  ;;  %8149 = vmatpush1.bf16.msra.mxu1 %v13745_v27  ;;  %v13812_v27 = vld [vmem:[%s14754_s3 + $0x1454] ss:$8 sps:$4 sm:$0xff]  }
 0x566   : > { %8275 = vmatprep.subr.bf16.mxu0 %v13750_v34  ;;  %8421 = vmatprep.subr.bf16.mxu1 %v13754_v19  ;;  %v13815_v34 = vld [vmem:[%s14754_s3 + $0x14d4] ss:$8 sps:$4 sm:$0xff]  }
 0x568   : > { %v6300_v2 = vpop.f32.mrf.mxu0  ;;  %8021 = vmatmul.mubr.bf16.vlgmr.msra.gmra.mxu0 %v7890_v4  ;;  %v6446_v61 = vpop.f32.mrf.mxu1  ;;  %8167 = vmatmul.mubr.bf16.vlgmr.msra.gmra.mxu1 %v8052_v30 }
 0x569   : > { %v6307_v36 = vadd.f32 %v6300_v2, %v16121_v3  ;;  %8276 = vmatpush1.bf16.msra.mxu0 %v13748_v42  ;;  %8422 = vmatpush1.bf16.msra.mxu1 %v13752_v51  ;;  %v13781_v3 = vld [vmem:[%s14754_s3 + $0x1324] ss:$8 sps:$4 sm:$0xff]  }
 0x56a   : > { %v6302_v56 = vpop.f32.mrf.mxu0  ;;  %v6448_v35 = vpop.f32.mrf.mxu1  ;;  %8277 = vmatprep.subr.bf16.mxu0 %v13757_v54  ;;  %8423 = vmatprep.subr.bf16.mxu1 %v13760_v32  ;;  %v13810_v54 = vld [vmem:[%s14754_s3 + $0x1450] ss:$8 sps:$4 sm:$0xff]  }
 0x56b   : > { %v6308_v41 = vadd.f32 %v6302_v56, %v16125_v9  ;;  %v16161_v29 = vadd.f32 %v6446_v61, %v6307_v36  ;;  %8307 = vmatprep.mubr.bf16.mxu0 %v14439_v23  ;;  %8453 = vmatprep.mubr.bf16.mxu1 %v14439_v23  ;;  %v13782_v9 = vld [vmem:[%s14754_s3 + $0x13a0] ss:$8 sps:$4 sm:$0xff]   ;;  %v13813_v32 = vld [vmem:[%s14754_s3 + $0x14d0] ss:$8 sps:$4 sm:$0xff]   ;;  %v13818_v61 = vld [vmem:[%s14754_s3 + $0x1444] ss:$8 sps:$4 sm:$0xff]  }
 0x56c   : > { %v6304_v37 = vpop.f32.mrf.mxu0  ;;  %v6450_v44 = vpop.f32.mrf.mxu1  ;;  %v13821_v36 = vld [vmem:[%s14754_s3 + $0x14c4] ss:$8 sps:$4 sm:$0xff]   ;;  %v13819_v56 = vld [vmem:[%s14754_s3 + $0x14c0] ss:$8 sps:$4 sm:$0xff]  }
 0x56d   : > { %v16165_v46 = vadd.f32 %v6448_v35, %v6308_v41  ;;  %8278 = vmatpush1.bf16.msra.mxu0 %v13755_v13  ;;  %8424 = vmatpush1.bf16.msra.mxu1 %v13758_v33  ;;  %v13816_v33 = vld [vmem:[%s14754_s3 + $0x1440] ss:$8 sps:$4 sm:$0xff]   ;;  %v13824_v35 = vld [vmem:[%s14754_s3 + $0x1434] ss:$8 sps:$4 sm:$0xff]   ;;  %v13825_v41 = vld [vmem:[%s14754_s3 + $0x14b0] ss:$8 sps:$4 sm:$0xff]  }
 0x56e   : > { %v6305_v0 = vpop.f32.mrf.mxu0  ;;  %8279 = vmatprep.subr.bf16.mxu0 %v13763_v5  ;;  %8425 = vmatprep.subr.bf16.mxu1 %v13766_v18  ;;  %v6451_v53 = vpop.f32.mrf.mxu1  ;;  %v13827_v5 = vld [vmem:[%s14754_s3 + $0x14b4] ss:$8 sps:$4 sm:$0xff]   ;;  %v13822_v18 = vld [vmem:[%s14754_s3 + $0x1430] ss:$8 sps:$4 sm:$0xff]   ;;  %v13833_v37 = vld [vmem:[%s14754_s3 + $0x14a4] ss:$8 sps:$4 sm:$0xff]  }
 0x56f   : > { %v13828_v44 = vld [vmem:[%s14754_s3 + $0x1420] ss:$8 sps:$4 sm:$0xff]   ;;  %v13834_v0 = vld [vmem:[%s14754_s3 + $0x1410] ss:$8 sps:$4 sm:$0xff]   ;;  %v13845_v53 = vld [vmem:[%s14754_s3 + $0x1484] ss:$8 sps:$4 sm:$0xff]  }
 0x571   : > { %8280 = vmatpush1.bf16.msra.mxu0 %v13761_v15  ;;  %8426 = vmatpush1.bf16.msra.mxu1 %v13764_v31  ;;  %v13836_v15 = vld [vmem:[%s14754_s3 + $0x1414] ss:$8 sps:$4 sm:$0xff]  }
 0x572   : > { %8281 = vmatprep.subr.bf16.mxu0 %v13769_v50  ;;  %8427 = vmatprep.subr.bf16.mxu1 %v13772_v43  ;;  %v13839_v31 = vld [vmem:[%s14754_s3 + $0x1494] ss:$8 sps:$4 sm:$0xff]   ;;  %v13837_v50 = vld [vmem:[%s14754_s3 + $0x1490] ss:$8 sps:$4 sm:$0xff]   ;;  %v13842_v43 = vld [vmem:[%s14754_s3 + $0x1404] ss:$8 sps:$4 sm:$0xff]  }
 0x575   : > { %8282 = vmatpush1.bf16.msra.mxu0 %v13767_v7  ;;  %8428 = vmatpush1.bf16.msra.mxu1 %v13770_v6  ;;  %v13849_v7 = vld [vmem:[#allocation2 + $0x50] ss:$0 sps:$4 sm:$0xcc]  }
 0x576   : > { %8283 = vmatprep.subr.bf16.mxu0 %v13775_v59  ;;  %8429 = vmatprep.subr.bf16.mxu1 %v13778_v48  ;;  %v13840_v6 = vld [vmem:[%s14754_s3 + $0x1400] ss:$8 sps:$4 sm:$0xff]   ;;  %v13848_v48 = vld [vmem:[%s14754_s3 + $0x1574] ss:$8 sps:$4 sm:$0xff]  }
 0x577   : > { %v13843_v59 = vld [vmem:[%s14754_s3 + $0x1480] ss:$8 sps:$4 sm:$0xff]  }
 0x579   : > { %8284 = vmatpush1.bf16.msra.mxu0 %v13773_v39  ;;  %8430 = vmatpush1.bf16.msra.mxu1 %v13776_v28  ;;  %v13852_v39 = vld [vmem:[%s14754_s3 + $0x15f4] ss:$8 sps:$4 sm:$0xff]   ;;  %v8626_v28 = vrot.slane %v13849_v7, 2 }
 0x57a   : > { %8285 = vmatprep.subr.bf16.mxu0 %v13781_v3  ;;  %8431 = vmatprep.subr.bf16.mxu1 %v13784_v16  ;;  %v8464_v3 = vld [vmem:[#allocation2 + $0x50] sm:$0x3]  ;;  %v13846_v16 = vld [vmem:[%s14754_s3 + $0x1570] ss:$8 sps:$4 sm:$0xff]  }
 0x57d   : > { %8286 = vmatpush1.bf16.msra.mxu0 %v13779_v8  ;;  %8432 = vmatpush1.bf16.msra.mxu1 %v13782_v9  ;;  %v13850_v8 = vld [vmem:[%s14754_s3 + $0x15f0] ss:$8 sps:$4 sm:$0xff]   ;;  %v13855_v9 = vld [vmem:[%s14754_s3 + $0x1564] ss:$8 sps:$4 sm:$0xff]  }
 0x57e   : > { %8287 = vmatprep.subr.bf16.mxu0 %v13787_v47  ;;  %8433 = vmatprep.subr.bf16.mxu1 %v13790_v17  ;;  %v13858_v47 = vld [vmem:[%s14754_s3 + $0x15e4] ss:$8 sps:$4 sm:$0xff]  }
 0x581   : > { %8288 = vmatpush1.bf16.msra.mxu0 %v13785_v10  ;;  %8434 = vmatpush1.bf16.msra.mxu1 %v13788_v58 }
 0x582   : > { %8289 = vmatprep.subr.bf16.mxu0 %v13793_v14  ;;  %8435 = vmatprep.subr.bf16.mxu1 %v13796_v40  ;;  %v13853_v14 = vld [vmem:[%s14754_s3 + $0x1560] ss:$8 sps:$4 sm:$0xff]  }
 0x583   : > { %v13856_v40 = vld [vmem:[%s14754_s3 + $0x15e0] ss:$8 sps:$4 sm:$0xff]  }
 0x585   : > { %8290 = vmatpush1.bf16.msra.mxu0 %v13791_v12  ;;  %8436 = vmatpush1.bf16.msra.mxu1 %v13794_v21  ;;  %v13861_v21 = vld [vmem:[%s14754_s3 + $0x1554] ss:$8 sps:$4 sm:$0xff]  }
 0x586   : > { %8562 = vmatprep.subr.bf16.mxu0 %v13799_v22  ;;  %8708 = vmatprep.subr.bf16.mxu1 %v13803_v1  ;;  %v13864_v22 = vld [vmem:[%s14754_s3 + $0x15d4] ss:$8 sps:$4 sm:$0xff]  }
 0x588   : > { %v6587_v45 = vpop.f32.mrf.mxu0  ;;  %8308 = vmatmul.mubr.bf16.vlgmr.msra.gmra.mxu0 %v8177_v38  ;;  %v6733_v60 = vpop.f32.mrf.mxu1  ;;  %8454 = vmatmul.mubr.bf16.vlgmr.msra.gmra.mxu1 %v8339_v55 }
 0x589   : > { %v6594_v11 = vadd.f32 %v6587_v45, %v16161_v29  ;;  %8563 = vmatpush1.bf16.msra.mxu0 %v13797_v57  ;;  %8709 = vmatpush1.bf16.msra.mxu1 %v13801_v24  ;;  %v13830_v29 = vld [vmem:[%s14754_s3 + $0x1424] ss:$8 sps:$4 sm:$0xff]  }
 0x58a   : > { %v6589_v62 = vpop.f32.mrf.mxu0  ;;  %v6735_v25 = vpop.f32.mrf.mxu1  ;;  %8564 = vmatprep.subr.bf16.mxu0 %v13806_v52  ;;  %8710 = vmatprep.subr.bf16.mxu1 %v13809_v26  ;;  %v13859_v52 = vld [vmem:[%s14754_s3 + $0x1550] ss:$8 sps:$4 sm:$0xff]  }
 0x58b   : > { %v6595_v19 = vadd.f32 %v6589_v62, %v16165_v46  ;;  %v16201_v30 = vadd.f32 %v6733_v60, %v6594_v11  ;;  %8594 = vmatprep.mubr.bf16.mxu0 %v14439_v23  ;;  %8740 = vmatprep.mubr.bf16.mxu1 %v14439_v23  ;;  %v13831_v46 = vld [vmem:[%s14754_s3 + $0x14a0] ss:$8 sps:$4 sm:$0xff]   ;;  %v13862_v26 = vld [vmem:[%s14754_s3 + $0x15d0] ss:$8 sps:$4 sm:$0xff]   ;;  %v13867_v60 = vld [vmem:[%s14754_s3 + $0x1544] ss:$8 sps:$4 sm:$0xff]  }
 0x58c   : > { %v6591_v4 = vpop.f32.mrf.mxu0  ;;  %v6737_v42 = vpop.f32.mrf.mxu1  ;;  %v13870_v11 = vld [vmem:[%s14754_s3 + $0x15c4] ss:$8 sps:$4 sm:$0xff]   ;;  %v13868_v62 = vld [vmem:[%s14754_s3 + $0x15c0] ss:$8 sps:$4 sm:$0xff]  }
 0x58d   : > { %v16205_v51 = vadd.f32 %v6735_v25, %v6595_v19  ;;  %8565 = vmatpush1.bf16.msra.mxu0 %v13804_v63  ;;  %8711 = vmatpush1.bf16.msra.mxu1 %v13807_v49  ;;  %v13865_v49 = vld [vmem:[%s14754_s3 + $0x1540] ss:$8 sps:$4 sm:$0xff]   ;;  %v13873_v25 = vld [vmem:[%s14754_s3 + $0x1534] ss:$8 sps:$4 sm:$0xff]   ;;  %v13874_v19 = vld [vmem:[%s14754_s3 + $0x15b0] ss:$8 sps:$4 sm:$0xff]  }
 0x58e   : > { %v6592_v2 = vpop.f32.mrf.mxu0  ;;  %8566 = vmatprep.subr.bf16.mxu0 %v13812_v27  ;;  %8712 = vmatprep.subr.bf16.mxu1 %v13815_v34  ;;  %v6738_v13 = vpop.f32.mrf.mxu1  ;;  %v13876_v27 = vld [vmem:[%s14754_s3 + $0x15b4] ss:$8 sps:$4 sm:$0xff]   ;;  %v13871_v34 = vld [vmem:[%s14754_s3 + $0x1530] ss:$8 sps:$4 sm:$0xff]   ;;  %v13882_v4 = vld [vmem:[%s14754_s3 + $0x15a4] ss:$8 sps:$4 sm:$0xff]  }
 0x58f   : > { %v13877_v42 = vld [vmem:[%s14754_s3 + $0x1520] ss:$8 sps:$4 sm:$0xff]   ;;  %v13883_v2 = vld [vmem:[%s14754_s3 + $0x1510] ss:$8 sps:$4 sm:$0xff]   ;;  %v13894_v13 = vld [vmem:[%s14754_s3 + $0x1584] ss:$8 sps:$4 sm:$0xff]  }
 0x591   : > { %8567 = vmatpush1.bf16.msra.mxu0 %v13810_v54  ;;  %8713 = vmatpush1.bf16.msra.mxu1 %v13813_v32  ;;  %v13885_v54 = vld [vmem:[%s14754_s3 + $0x1514] ss:$8 sps:$4 sm:$0xff]  }
 0x592   : > { %8568 = vmatprep.subr.bf16.mxu0 %v13818_v61  ;;  %8714 = vmatprep.subr.bf16.mxu1 %v13821_v36  ;;  %v13888_v32 = vld [vmem:[%s14754_s3 + $0x1594] ss:$8 sps:$4 sm:$0xff]   ;;  %v13886_v61 = vld [vmem:[%s14754_s3 + $0x1590] ss:$8 sps:$4 sm:$0xff]   ;;  %v13891_v36 = vld [vmem:[%s14754_s3 + $0x1504] ss:$8 sps:$4 sm:$0xff]  }
 0x595   : > { %8569 = vmatpush1.bf16.msra.mxu0 %v13816_v33  ;;  %8715 = vmatpush1.bf16.msra.mxu1 %v13819_v56  ;;  %v13898_v33 = vld [vmem:[#allocation2 + $0x54] ss:$0 sps:$4 sm:$0xcc]   ;;  %v13889_v56 = vld [vmem:[%s14754_s3 + $0x1500] ss:$8 sps:$4 sm:$0xff]  }
 0x596   : > { %8570 = vmatprep.subr.bf16.mxu0 %v13824_v35  ;;  %8716 = vmatprep.subr.bf16.mxu1 %v13827_v5  ;;  %v13892_v35 = vld [vmem:[%s14754_s3 + $0x1580] ss:$8 sps:$4 sm:$0xff]   ;;  %v13897_v5 = vld [vmem:[%s14754_s3 + $0x1674] ss:$8 sps:$4 sm:$0xff]  }
 0x599   : > { %8571 = vmatpush1.bf16.msra.mxu0 %v13822_v18  ;;  %8717 = vmatpush1.bf16.msra.mxu1 %v13825_v41  ;;  %v13901_v18 = vld [vmem:[%s14754_s3 + $0x16f4] ss:$8 sps:$4 sm:$0xff]   ;;  %v8913_v41 = vrot.slane %v13898_v33, 2 }
 0x59a   : > { %8572 = vmatprep.subr.bf16.mxu0 %v13830_v29  ;;  %8718 = vmatprep.subr.bf16.mxu1 %v13833_v37  ;;  %v8751_v29 = vld [vmem:[#allocation2 + $0x54] sm:$0x3]  ;;  %v13895_v37 = vld [vmem:[%s14754_s3 + $0x1670] ss:$8 sps:$4 sm:$0xff]  }
 0x59d   : > { %8573 = vmatpush1.bf16.msra.mxu0 %v13828_v44  ;;  %8719 = vmatpush1.bf16.msra.mxu1 %v13831_v46  ;;  %v13899_v44 = vld [vmem:[%s14754_s3 + $0x16f0] ss:$8 sps:$4 sm:$0xff]   ;;  %v13904_v46 = vld [vmem:[%s14754_s3 + $0x1664] ss:$8 sps:$4 sm:$0xff]  }
 0x59e   : > { %8574 = vmatprep.subr.bf16.mxu0 %v13836_v15  ;;  %8720 = vmatprep.subr.bf16.mxu1 %v13839_v31  ;;  %v13907_v15 = vld [vmem:[%s14754_s3 + $0x16e4] ss:$8 sps:$4 sm:$0xff]  }
 0x5a1   : > { %8575 = vmatpush1.bf16.msra.mxu0 %v13834_v0  ;;  %8721 = vmatpush1.bf16.msra.mxu1 %v13837_v50 }
 0x5a2   : > { %8576 = vmatprep.subr.bf16.mxu0 %v13842_v43  ;;  %8722 = vmatprep.subr.bf16.mxu1 %v13845_v53  ;;  %v13902_v43 = vld [vmem:[%s14754_s3 + $0x1660] ss:$8 sps:$4 sm:$0xff]  }
 0x5a3   : > { %v13905_v53 = vld [vmem:[%s14754_s3 + $0x16e0] ss:$8 sps:$4 sm:$0xff]  }
 0x5a5   : > { %8577 = vmatpush1.bf16.msra.mxu0 %v13840_v6  ;;  %8723 = vmatpush1.bf16.msra.mxu1 %v13843_v59  ;;  %v13910_v59 = vld [vmem:[%s14754_s3 + $0x1654] ss:$8 sps:$4 sm:$0xff]  }
 0x5a6   : > { %8849 = vmatprep.subr.bf16.mxu0 %v13848_v48  ;;  %8995 = vmatprep.subr.bf16.mxu1 %v13852_v39  ;;  %v13913_v48 = vld [vmem:[%s14754_s3 + $0x16d4] ss:$8 sps:$4 sm:$0xff]  }
 0x5a8   : > { %v6874_v17 = vpop.f32.mrf.mxu0  ;;  %8595 = vmatmul.mubr.bf16.vlgmr.msra.gmra.mxu0 %v8464_v3  ;;  %v7020_v10 = vpop.f32.mrf.mxu1  ;;  %8741 = vmatmul.mubr.bf16.vlgmr.msra.gmra.mxu1 %v8626_v28 }
 0x5a9   : > { %v6881_v58 = vadd.f32 %v6874_v17, %v16201_v30  ;;  %8850 = vmatpush1.bf16.msra.mxu0 %v13846_v16  ;;  %8996 = vmatpush1.bf16.msra.mxu1 %v13850_v8  ;;  %v13879_v30 = vld [vmem:[%s14754_s3 + $0x1524] ss:$8 sps:$4 sm:$0xff]  }
 0x5aa   : > { %v6876_v20 = vpop.f32.mrf.mxu0  ;;  %v7022_v12 = vpop.f32.mrf.mxu1  ;;  %8851 = vmatprep.subr.bf16.mxu0 %v13855_v9  ;;  %8997 = vmatprep.subr.bf16.mxu1 %v13858_v47  ;;  %v13908_v9 = vld [vmem:[%s14754_s3 + $0x1650] ss:$8 sps:$4 sm:$0xff]  }
 0x5ab   : > { %v6882_v1 = vadd.f32 %v6876_v20, %v16205_v51  ;;  %v16241_v55 = vadd.f32 %v7020_v10, %v6881_v58  ;;  %8881 = vmatprep.mubr.bf16.mxu0 %v14439_v23  ;;  %9027 = vmatprep.mubr.bf16.mxu1 %v14439_v23  ;;  %v13880_v51 = vld [vmem:[%s14754_s3 + $0x15a0] ss:$8 sps:$4 sm:$0xff]   ;;  %v13911_v47 = vld [vmem:[%s14754_s3 + $0x16d0] ss:$8 sps:$4 sm:$0xff]   ;;  %v13916_v10 = vld [vmem:[%s14754_s3 + $0x1644] ss:$8 sps:$4 sm:$0xff]  }
 0x5ac   : > { %v6878_v38 = vpop.f32.mrf.mxu0  ;;  %v7024_v57 = vpop.f32.mrf.mxu1  ;;  %v13919_v58 = vld [vmem:[%s14754_s3 + $0x16c4] ss:$8 sps:$4 sm:$0xff]   ;;  %v13917_v20 = vld [vmem:[%s14754_s3 + $0x16c0] ss:$8 sps:$4 sm:$0xff]  }
 0x5ad   : > { %v16245_v24 = vadd.f32 %v7022_v12, %v6882_v1  ;;  %8852 = vmatpush1.bf16.msra.mxu0 %v13853_v14  ;;  %8998 = vmatpush1.bf16.msra.mxu1 %v13856_v40  ;;  %v13914_v40 = vld [vmem:[%s14754_s3 + $0x1640] ss:$8 sps:$4 sm:$0xff]   ;;  %v13922_v12 = vld [vmem:[%s14754_s3 + $0x1634] ss:$8 sps:$4 sm:$0xff]   ;;  %v13923_v1 = vld [vmem:[%s14754_s3 + $0x16b0] ss:$8 sps:$4 sm:$0xff]  }
 0x5ae   : > { %v6879_v45 = vpop.f32.mrf.mxu0  ;;  %8853 = vmatprep.subr.bf16.mxu0 %v13861_v21  ;;  %8999 = vmatprep.subr.bf16.mxu1 %v13864_v22  ;;  %v7025_v63 = vpop.f32.mrf.mxu1  ;;  %v13925_v21 = vld [vmem:[%s14754_s3 + $0x16b4] ss:$8 sps:$4 sm:$0xff]   ;;  %v13920_v22 = vld [vmem:[%s14754_s3 + $0x1630] ss:$8 sps:$4 sm:$0xff]   ;;  %v13931_v38 = vld [vmem:[%s14754_s3 + $0x16a4] ss:$8 sps:$4 sm:$0xff]  }
 0x5af   : > { %v13926_v57 = vld [vmem:[%s14754_s3 + $0x1620] ss:$8 sps:$4 sm:$0xff]   ;;  %v13932_v45 = vld [vmem:[%s14754_s3 + $0x1610] ss:$8 sps:$4 sm:$0xff]   ;;  %v13943_v63 = vld [vmem:[%s14754_s3 + $0x1684] ss:$8 sps:$4 sm:$0xff]  }
 0x5b1   : > { %8854 = vmatpush1.bf16.msra.mxu0 %v13859_v52  ;;  %9000 = vmatpush1.bf16.msra.mxu1 %v13862_v26  ;;  %v13934_v52 = vld [vmem:[%s14754_s3 + $0x1614] ss:$8 sps:$4 sm:$0xff]  }
 0x5b2   : > { %8855 = vmatprep.subr.bf16.mxu0 %v13867_v60  ;;  %9001 = vmatprep.subr.bf16.mxu1 %v13870_v11  ;;  %v13937_v26 = vld [vmem:[%s14754_s3 + $0x1694] ss:$8 sps:$4 sm:$0xff]   ;;  %v13935_v60 = vld [vmem:[%s14754_s3 + $0x1690] ss:$8 sps:$4 sm:$0xff]   ;;  %v13940_v11 = vld [vmem:[%s14754_s3 + $0x1604] ss:$8 sps:$4 sm:$0xff]  }
 0x5b5   : > { %8856 = vmatpush1.bf16.msra.mxu0 %v13865_v49  ;;  %9002 = vmatpush1.bf16.msra.mxu1 %v13868_v62  ;;  %v13947_v49 = vld [vmem:[#allocation2 + $0x58] ss:$0 sps:$4 sm:$0xcc]  }
 0x5b6   : > { %8857 = vmatprep.subr.bf16.mxu0 %v13873_v25  ;;  %9003 = vmatprep.subr.bf16.mxu1 %v13876_v27  ;;  %v13938_v62 = vld [vmem:[%s14754_s3 + $0x1600] ss:$8 sps:$4 sm:$0xff]   ;;  %v13946_v27 = vld [vmem:[%s14754_s3 + $0x1774] ss:$8 sps:$4 sm:$0xff]  }
 0x5b7   : > { %v13941_v25 = vld [vmem:[%s14754_s3 + $0x1680] ss:$8 sps:$4 sm:$0xff]  }
 0x5b9   : > { %8858 = vmatpush1.bf16.msra.mxu0 %v13871_v34  ;;  %9004 = vmatpush1.bf16.msra.mxu1 %v13874_v19  ;;  %v13950_v34 = vld [vmem:[%s14754_s3 + $0x17f4] ss:$8 sps:$4 sm:$0xff]   ;;  %v9200_v19 = vrot.slane %v13947_v49, 2 }
 0x5ba   : > { %8859 = vmatprep.subr.bf16.mxu0 %v13879_v30  ;;  %9005 = vmatprep.subr.bf16.mxu1 %v13882_v4  ;;  %v9038_v30 = vld [vmem:[#allocation2 + $0x58] sm:$0x3]  ;;  %v13944_v4 = vld [vmem:[%s14754_s3 + $0x1770] ss:$8 sps:$4 sm:$0xff]  }
 0x5bd   : > { %8860 = vmatpush1.bf16.msra.mxu0 %v13877_v42  ;;  %9006 = vmatpush1.bf16.msra.mxu1 %v13880_v51  ;;  %v13948_v42 = vld [vmem:[%s14754_s3 + $0x17f0] ss:$8 sps:$4 sm:$0xff]   ;;  %v13953_v51 = vld [vmem:[%s14754_s3 + $0x1764] ss:$8 sps:$4 sm:$0xff]  }
 0x5be   : > { %8861 = vmatprep.subr.bf16.mxu0 %v13885_v54  ;;  %9007 = vmatprep.subr.bf16.mxu1 %v13888_v32  ;;  %v13956_v54 = vld [vmem:[%s14754_s3 + $0x17e4] ss:$8 sps:$4 sm:$0xff]  }
 0x5c1   : > { %8862 = vmatpush1.bf16.msra.mxu0 %v13883_v2  ;;  %9008 = vmatpush1.bf16.msra.mxu1 %v13886_v61 }
 0x5c2   : > { %8863 = vmatprep.subr.bf16.mxu0 %v13891_v36  ;;  %9009 = vmatprep.subr.bf16.mxu1 %v13894_v13  ;;  %v13951_v36 = vld [vmem:[%s14754_s3 + $0x1760] ss:$8 sps:$4 sm:$0xff]  }
 0x5c3   : > { %v13954_v13 = vld [vmem:[%s14754_s3 + $0x17e0] ss:$8 sps:$4 sm:$0xff]  }
 0x5c5   : > { %8864 = vmatpush1.bf16.msra.mxu0 %v13889_v56  ;;  %9010 = vmatpush1.bf16.msra.mxu1 %v13892_v35  ;;  %v13959_v35 = vld [vmem:[%s14754_s3 + $0x1754] ss:$8 sps:$4 sm:$0xff]  }
 0x5c6   : > { %9136 = vmatprep.subr.bf16.mxu0 %v13897_v5  ;;  %9282 = vmatprep.subr.bf16.mxu1 %v13901_v18  ;;  %v13962_v5 = vld [vmem:[%s14754_s3 + $0x17d4] ss:$8 sps:$4 sm:$0xff]  }
 0x5c8   : > { %v7161_v31 = vpop.f32.mrf.mxu0  ;;  %8882 = vmatmul.mubr.bf16.vlgmr.msra.gmra.mxu0 %v8751_v29  ;;  %v7307_v0 = vpop.f32.mrf.mxu1  ;;  %9028 = vmatmul.mubr.bf16.vlgmr.msra.gmra.mxu1 %v8913_v41 }
 0x5c9   : > { %v7168_v50 = vadd.f32 %v7161_v31, %v16241_v55  ;;  %9137 = vmatpush1.bf16.msra.mxu0 %v13895_v37  ;;  %9283 = vmatpush1.bf16.msra.mxu1 %v13899_v44  ;;  %v13928_v55 = vld [vmem:[%s14754_s3 + $0x1624] ss:$8 sps:$4 sm:$0xff]  }
 0x5ca   : > { %v7163_v7 = vpop.f32.mrf.mxu0  ;;  %v7309_v6 = vpop.f32.mrf.mxu1  ;;  %9138 = vmatprep.subr.bf16.mxu0 %v13904_v46  ;;  %9284 = vmatprep.subr.bf16.mxu1 %v13907_v15  ;;  %v13957_v46 = vld [vmem:[%s14754_s3 + $0x1750] ss:$8 sps:$4 sm:$0xff]  }
 0x5cb   : > { %v7169_v39 = vadd.f32 %v7163_v7, %v16245_v24  ;;  %v16281_v28 = vadd.f32 %v7307_v0, %v7168_v50  ;;  %9168 = vmatprep.mubr.bf16.mxu0 %v14439_v23  ;;  %9314 = vmatprep.mubr.bf16.mxu1 %v14439_v23  ;;  %v13929_v24 = vld [vmem:[%s14754_s3 + $0x16a0] ss:$8 sps:$4 sm:$0xff]   ;;  %v13960_v15 = vld [vmem:[%s14754_s3 + $0x17d0] ss:$8 sps:$4 sm:$0xff]   ;;  %v13965_v0 = vld [vmem:[%s14754_s3 + $0x1744] ss:$8 sps:$4 sm:$0xff]  }
 0x5cc   : > { %v7165_v3 = vpop.f32.mrf.mxu0  ;;  %v7311_v16 = vpop.f32.mrf.mxu1  ;;  %v13968_v50 = vld [vmem:[%s14754_s3 + $0x17c4] ss:$8 sps:$4 sm:$0xff]   ;;  %v13966_v7 = vld [vmem:[%s14754_s3 + $0x17c0] ss:$8 sps:$4 sm:$0xff]  }
 0x5cd   : > { %v16285_v8 = vadd.f32 %v7309_v6, %v7169_v39  ;;  %9139 = vmatpush1.bf16.msra.mxu0 %v13902_v43  ;;  %9285 = vmatpush1.bf16.msra.mxu1 %v13905_v53  ;;  %v13963_v53 = vld [vmem:[%s14754_s3 + $0x1740] ss:$8 sps:$4 sm:$0xff]   ;;  %v13971_v6 = vld [vmem:[%s14754_s3 + $0x1734] ss:$8 sps:$4 sm:$0xff]   ;;  %v13972_v39 = vld [vmem:[%s14754_s3 + $0x17b0] ss:$8 sps:$4 sm:$0xff]  }
 0x5ce   : > { %v7166_v17 = vpop.f32.mrf.mxu0  ;;  %9140 = vmatprep.subr.bf16.mxu0 %v13910_v59  ;;  %9286 = vmatprep.subr.bf16.mxu1 %v13913_v48  ;;  %v7312_v14 = vpop.f32.mrf.mxu1  ;;  %v13974_v59 = vld [vmem:[%s14754_s3 + $0x17b4] ss:$8 sps:$4 sm:$0xff]   ;;  %v13969_v48 = vld [vmem:[%s14754_s3 + $0x1730] ss:$8 sps:$4 sm:$0xff]   ;;  %v13980_v3 = vld [vmem:[%s14754_s3 + $0x17a4] ss:$8 sps:$4 sm:$0xff]  }
 0x5cf   : > { %v13975_v16 = vld [vmem:[%s14754_s3 + $0x1720] ss:$8 sps:$4 sm:$0xff]   ;;  %v13981_v17 = vld [vmem:[%s14754_s3 + $0x1710] ss:$8 sps:$4 sm:$0xff]   ;;  %v13992_v14 = vld [vmem:[%s14754_s3 + $0x1784] ss:$8 sps:$4 sm:$0xff]  }
 0x5d1   : > { %9141 = vmatpush1.bf16.msra.mxu0 %v13908_v9  ;;  %9287 = vmatpush1.bf16.msra.mxu1 %v13911_v47  ;;  %v13983_v9 = vld [vmem:[%s14754_s3 + $0x1714] ss:$8 sps:$4 sm:$0xff]  }
 0x5d2   : > { %9142 = vmatprep.subr.bf16.mxu0 %v13916_v10  ;;  %9288 = vmatprep.subr.bf16.mxu1 %v13919_v58  ;;  %v13986_v47 = vld [vmem:[%s14754_s3 + $0x1794] ss:$8 sps:$4 sm:$0xff]   ;;  %v13984_v10 = vld [vmem:[%s14754_s3 + $0x1790] ss:$8 sps:$4 sm:$0xff]   ;;  %v13989_v58 = vld [vmem:[%s14754_s3 + $0x1704] ss:$8 sps:$4 sm:$0xff]  }
 0x5d5   : > { %9143 = vmatpush1.bf16.msra.mxu0 %v13914_v40  ;;  %9289 = vmatpush1.bf16.msra.mxu1 %v13917_v20  ;;  %v13996_v40 = vld [vmem:[#allocation2 + $0x5c] ss:$0 sps:$4 sm:$0xcc]   ;;  %v13987_v20 = vld [vmem:[%s14754_s3 + $0x1700] ss:$8 sps:$4 sm:$0xff]  }
 0x5d6   : > { %9144 = vmatprep.subr.bf16.mxu0 %v13922_v12  ;;  %9290 = vmatprep.subr.bf16.mxu1 %v13925_v21  ;;  %v13990_v12 = vld [vmem:[%s14754_s3 + $0x1780] ss:$8 sps:$4 sm:$0xff]   ;;  %v13995_v21 = vld [vmem:[%s14754_s3 + $0x1874] ss:$8 sps:$4 sm:$0xff]  }
 0x5d9   : > { %9145 = vmatpush1.bf16.msra.mxu0 %v13920_v22  ;;  %9291 = vmatpush1.bf16.msra.mxu1 %v13923_v1  ;;  %v9487_v22 = vrot.slane %v13996_v40, 2  ;;  %v9325_v1 = vld [vmem:[#allocation2 + $0x5c] sm:$0x3] }
 0x5da   : > { %9146 = vmatprep.subr.bf16.mxu0 %v13928_v55  ;;  %9292 = vmatprep.subr.bf16.mxu1 %v13931_v38  ;;  %v13993_v55 = vld [vmem:[%s14754_s3 + $0x1870] ss:$8 sps:$4 sm:$0xff]   ;;  %v13999_v38 = vld [vmem:[%s14754_s3 + $0x1864] ss:$8 sps:$4 sm:$0xff]  }
 0x5dd   : > { %9147 = vmatpush1.bf16.msra.mxu0 %v13926_v57  ;;  %9293 = vmatpush1.bf16.msra.mxu1 %v13929_v24 }
 0x5de   : > { %9148 = vmatprep.subr.bf16.mxu0 %v13934_v52  ;;  %9294 = vmatprep.subr.bf16.mxu1 %v13937_v26  ;;  %v13997_v26 = vld [vmem:[%s14754_s3 + $0x1860] ss:$8 sps:$4 sm:$0xff]  }
 0x5e1   : > { %9149 = vmatpush1.bf16.msra.mxu0 %v13932_v45  ;;  %9295 = vmatpush1.bf16.msra.mxu1 %v13935_v60 }
 0x5e2   : > { %9150 = vmatprep.subr.bf16.mxu0 %v13940_v11  ;;  %9296 = vmatprep.subr.bf16.mxu1 %v13943_v63  ;;  %v14002_v11 = vld [vmem:[%s14754_s3 + $0x1854] ss:$8 sps:$4 sm:$0xff]  }
 0x5e5   : > { %9151 = vmatpush1.bf16.msra.mxu0 %v13938_v62  ;;  %9297 = vmatpush1.bf16.msra.mxu1 %v13941_v25 }
 0x5e6   : > { %9423 = vmatprep.subr.bf16.mxu0 %v13946_v27  ;;  %9569 = vmatprep.subr.bf16.mxu1 %v13950_v34  ;;  %v14000_v34 = vld [vmem:[%s14754_s3 + $0x1850] ss:$8 sps:$4 sm:$0xff]  }
 0x5e8   : > { %v7448_v32 = vpop.f32.mrf.mxu0  ;;  %9169 = vmatmul.mubr.bf16.vlgmr.msra.gmra.mxu0 %v9038_v30  ;;  %v7594_v2 = vpop.f32.mrf.mxu1  ;;  %9315 = vmatmul.mubr.bf16.vlgmr.msra.gmra.mxu1 %v9200_v19 }
 0x5e9   : > { %v7455_v61 = vadd.f32 %v7448_v32, %v16281_v28  ;;  %9424 = vmatpush1.bf16.msra.mxu0 %v13944_v4  ;;  %9570 = vmatpush1.bf16.msra.mxu1 %v13948_v42  ;;  %v13977_v28 = vld [vmem:[%s14754_s3 + $0x1724] ss:$8 sps:$4 sm:$0xff]   ;;  %v14003_v4 = vld [vmem:[%s14754_s3 + $0x1840] ss:$8 sps:$4 sm:$0xff]   ;;  %v14008_v42 = vld [vmem:[%s14754_s3 + $0x1834] ss:$8 sps:$4 sm:$0xff]  }
 0x5ea   : > { %v7450_v33 = vpop.f32.mrf.mxu0  ;;  %v7596_v56 = vpop.f32.mrf.mxu1  ;;  %9425 = vmatprep.subr.bf16.mxu0 %v13953_v51  ;;  %9571 = vmatprep.subr.bf16.mxu1 %v13956_v54  ;;  %v14006_v51 = vld [vmem:[%s14754_s3 + $0x1830] ss:$8 sps:$4 sm:$0xff]   ;;  %v14011_v54 = vld [vmem:[%s14754_s3 + $0x1824] ss:$8 sps:$4 sm:$0xff]   ;;  %v14009_v32 = vld [vmem:[%s14754_s3 + $0x1820] ss:$8 sps:$4 sm:$0xff]  }
 0x5eb   : > { %v7456_v18 = vadd.f32 %v7450_v33, %v16285_v8  ;;  %v16321_v41 = vadd.f32 %v7594_v2, %v7455_v61  ;;  %9455 = vmatprep.mubr.bf16.mxu0 %v14439_v23  ;;  %9601 = vmatprep.mubr.bf16.mxu1 %v14439_v23  ;;  %v13978_v8 = vld [vmem:[%s14754_s3 + $0x17a0] ss:$8 sps:$4 sm:$0xff]   ;;  %v14014_v2 = vld [vmem:[%s14754_s3 + $0x1814] ss:$8 sps:$4 sm:$0xff]   ;;  %v14012_v61 = vld [vmem:[%s14754_s3 + $0x1810] ss:$8 sps:$4 sm:$0xff]  }
 0x5ec   : > { %v7452_v29 = vpop.f32.mrf.mxu0  ;;  %v7598_v37 = vpop.f32.mrf.mxu1  ;;  %v9612_v33 = vld [vmem:[#allocation2 + $0x60] sm:$0x3] }
 0x5ed   : > { %v16325_v44 = vadd.f32 %v7596_v56, %v7456_v18  ;;  %9426 = vmatpush1.bf16.msra.mxu0 %v13951_v36  ;;  %9572 = vmatpush1.bf16.msra.mxu1 %v13954_v13  ;;  %v14017_v36 = vld [vmem:[%s14754_s3 + $0x1804] ss:$8 sps:$4 sm:$0xff]   ;;  %v14015_v13 = vld [vmem:[%s14754_s3 + $0x1800] ss:$8 sps:$4 sm:$0xff]  }
 0x5ee   : > { %v7453_v31 = vpop.f32.mrf.mxu0  ;;  %9427 = vmatprep.subr.bf16.mxu0 %v13959_v35  ;;  %9573 = vmatprep.subr.bf16.mxu1 %v13962_v5  ;;  %v7599_v43 = vpop.f32.mrf.mxu1 }
 0x5f1   : > { %9428 = vmatpush1.bf16.msra.mxu0 %v13957_v46  ;;  %9574 = vmatpush1.bf16.msra.mxu1 %v13960_v15 }
 0x5f2   : > { %9429 = vmatprep.subr.bf16.mxu0 %v13965_v0  ;;  %9575 = vmatprep.subr.bf16.mxu1 %v13968_v50 }
 0x5f5   : > { %9430 = vmatpush1.bf16.msra.mxu0 %v13963_v53  ;;  %9576 = vmatpush1.bf16.msra.mxu1 %v13966_v7 }
 0x5f6   : > { %9431 = vmatprep.subr.bf16.mxu0 %v13971_v6  ;;  %9577 = vmatprep.subr.bf16.mxu1 %v13974_v59 }
 0x5f9   : > { %9432 = vmatpush1.bf16.msra.mxu0 %v13969_v48  ;;  %9578 = vmatpush1.bf16.msra.mxu1 %v13972_v39 }
 0x5fa   : > { %9433 = vmatprep.subr.bf16.mxu0 %v13977_v28  ;;  %9579 = vmatprep.subr.bf16.mxu1 %v13980_v3 }
 0x5fd   : > { %9434 = vmatpush1.bf16.msra.mxu0 %v13975_v16  ;;  %9580 = vmatpush1.bf16.msra.mxu1 %v13978_v8 }
 0x5fe   : > { %9435 = vmatprep.subr.bf16.mxu0 %v13983_v9  ;;  %9581 = vmatprep.subr.bf16.mxu1 %v13986_v47 }
 0x601   : > { %9436 = vmatpush1.bf16.msra.mxu0 %v13981_v17  ;;  %9582 = vmatpush1.bf16.msra.mxu1 %v13984_v10 }
 0x602   : > { %9437 = vmatprep.subr.bf16.mxu0 %v13989_v58  ;;  %9583 = vmatprep.subr.bf16.mxu1 %v13992_v14 }
 0x605   : > { %9438 = vmatpush1.bf16.msra.mxu0 %v13987_v20  ;;  %9584 = vmatpush1.bf16.msra.mxu1 %v13990_v12 }
 0x606   : > { %9710 = vmatprep.subr.bf16.mxu0 %v13995_v21 }
 0x608   : > { %v7735_v57 = vpop.f32.mrf.mxu0  ;;  %9456 = vmatmul.mubr.bf16.vlgmr.msra.gmra.mxu0 %v9325_v1  ;;  %v7881_v24 = vpop.f32.mrf.mxu1  ;;  %9602 = vmatmul.mubr.bf16.vlgmr.msra.gmra.mxu1 %v9487_v22 }
 0x609   : > { %v7742_v52 = vadd.f32 %v7735_v57, %v16321_v41  ;;  %9711 = vmatpush1.bf16.msra.mxu0 %v13993_v55  ;;  %9742 = vmatprep.mubr.bf16.mxu0 %v14439_v23  ;;  %v14005_v23 = vld [vmem:[%s14754_s3 + $0x1844] ss:$8 sps:$4 sm:$0xff]  }
 0x60a   : > { %v7737_v45 = vpop.f32.mrf.mxu0  ;;  %v7883_v60 = vpop.f32.mrf.mxu1  ;;  %9712 = vmatprep.subr.bf16.mxu0 %v13999_v38  ;;  %v14018_v55 = vld [vmem:[%s14781_s24 + $0x78] sm:$0xff]   ;;  %v14020_v57 = vld [vmem:[%s14781_s24 + $0x70] sm:$0xff]  }
 0x60b   : > { %v7743_v63 = vadd.f32 %v7737_v45, %v16325_v44  ;;  %v7888_v49 = vadd.f32 %v7881_v24, %v7742_v52  ;;  %v14019_v38 = vld [vmem:[%s14781_s24 + $0x38] sm:$0xff]   ;;  %12581 = vmatprep.subr.bf16.mxu1 %v14018_v55  ;;  %v14021_v24 = vld [vmem:[%s14781_s24 + $0x30] sm:$0xff]   ;;  %v14022_v45 = vld [vmem:[%s14781_s24 + $0x68] sm:$0xff]  }
 0x60c   : > { %v7739_v62 = vpop.f32.mrf.mxu0  ;;  %v7885_v25 = vpop.f32.mrf.mxu1  ;;  %12582 = vmatpush3.bf16.msra.mxu1 %v14019_v38 }
 0x60d   : > { %v7889_v27 = vadd.f32 %v7883_v60, %v7743_v63  ;;  %9713 = vmatpush1.bf16.msra.mxu0 %v13997_v26  ;;  %12583 = vmatprep.subr.bf16.mxu1 %v14020_v57 }
 0x60e   : > { %v7740_v19 = vpop.f32.mrf.mxu0  ;;  %9714 = vmatprep.subr.bf16.mxu0 %v14002_v11  ;;  %v7886_v30 = vpop.f32.mrf.mxu1  ;;  %v14023_v11 = vld [vmem:[%s14781_s24 + $0x28] sm:$0xff]  }
 0x60f   : > { %v14024_v19 = vld [vmem:[%s14781_s24 + $0x60] sm:$0xff]  }
 0x610   : > { %12584 = vmatpush3.bf16.msra.mxu1 %v14021_v24  ;;  %v14025_v30 = vld [vmem:[%s14781_s24 + $0x20] sm:$0xff]  }
 0x611   : > { %9715 = vmatpush1.bf16.msra.mxu0 %v14000_v34  ;;  %12585 = vmatprep.subr.bf16.mxu1 %v14022_v45 }
 0x612   : > { %9716 = vmatprep.subr.bf16.mxu0 %v14005_v23 }
 0x614   : > { %12586 = vmatpush3.bf16.msra.mxu1 %v14023_v11 }
 0x615   : > { %9717 = vmatpush1.bf16.msra.mxu0 %v14003_v4  ;;  %12587 = vmatprep.subr.bf16.mxu1 %v14024_v19 }
 0x616   : > { %9718 = vmatprep.subr.bf16.mxu0 %v14008_v42 }
 0x618   : > { %12588 = vmatpush3.bf16.msra.mxu1 %v14025_v30 }
 0x619   : > { %9719 = vmatpush1.bf16.msra.mxu0 %v14006_v51  ;;  %v14026_v51 = vld [vmem:[%s14781_s24 + $0x58] sm:$0xff]  }
 0x61a   : > { %9720 = vmatprep.subr.bf16.mxu0 %v14011_v54  ;;  %v14027_v54 = vld [vmem:[%s14781_s24 + $0x18] sm:$0xff]   ;;  %12589 = vmatprep.subr.bf16.mxu1 %v14026_v51 }
 0x61c   : > { %12590 = vmatpush3.bf16.msra.mxu1 %v14027_v54 }
 0x61d   : > { %9721 = vmatpush1.bf16.msra.mxu0 %v14009_v32  ;;  %v14028_v32 = vld [vmem:[%s14781_s24 + $0x50] sm:$0xff]  }
 0x61e   : > { %9722 = vmatprep.subr.bf16.mxu0 %v14014_v2  ;;  %v14029_v2 = vld [vmem:[%s14781_s24 + $0x10] sm:$0xff]   ;;  %12591 = vmatprep.subr.bf16.mxu1 %v14028_v32 }
 0x620   : > { %12592 = vmatpush3.bf16.msra.mxu1 %v14029_v2 }
 0x621   : > { %9723 = vmatpush1.bf16.msra.mxu0 %v14012_v61  ;;  %v14030_v61 = vld [vmem:[%s14781_s24 + $0x48] sm:$0xff]  }
 0x622   : > { %9724 = vmatprep.subr.bf16.mxu0 %v14017_v36  ;;  %v14031_v36 = vld [vmem:[%s14781_s24 + $0x8] sm:$0xff]   ;;  %12593 = vmatprep.subr.bf16.mxu1 %v14030_v61 }
 0x624   : > { %12594 = vmatpush3.bf16.msra.mxu1 %v14031_v36 }
 0x625   : > { %9725 = vmatpush1.bf16.msra.mxu0 %v14015_v13  ;;  %v14032_v13 = vld [vmem:[%s14781_s24 + $0x40] sm:$0xff]  }
 0x626   : > { %12595 = vmatprep.subr.bf16.mxu1 %v14032_v13 }
 0x628   : > { %v8022_v56 = vpop.f32.mrf.mxu0  ;;  %9743 = vmatmul.mubr.bf16.vlgmr.msra.gmra.mxu0 %v9612_v33  ;;  %v8168_v35 = vpop.f32.mrf.mxu1  ;;  %v14033_v33 = vld [vmem:[%s14781_s24] sm:$0xff]  }
 0x629   : > { %v8029_v5 = vadd.f32 %v8022_v56, %v7888_v49  ;;  %12596 = vmatpush3.bf16.msra.mxu1 %v14033_v33 }
 0x62a   : > { %v8024_v18 = vpop.f32.mrf.mxu0  ;;  %v8170_v41 = vpop.f32.mrf.mxu1 }
 0x62b   : > { %v8030_v29 = vadd.f32 %v8024_v18, %v7889_v27  ;;  %v8175_v37 = vadd.f32 %v8168_v35, %v8029_v5 }
 0x62c   : > { %v8026_v44 = vpop.f32.mrf.mxu0  ;;  %v8172_v46 = vpop.f32.mrf.mxu1 }
 0x62d   : > { %v8176_v15 = vadd.f32 %v8170_v41, %v8030_v29 }
 0x62e   : > { %v8027_v31 = vpop.f32.mrf.mxu0  ;;  %v8173_v0 = vpop.f32.mrf.mxu1 }
 0x648   : > { %v8309_v50 = vpop.f32.mrf.mxu0  ;;  %v8455_v43 = vpop.f32.mrf.mxu1 }
 0x649   : > { %v8316_v53 = vadd.f32 %v8309_v50, %v8175_v37 }
 0x64a   : > { %v8311_v7 = vpop.f32.mrf.mxu0  ;;  %v8457_v6 = vpop.f32.mrf.mxu1 }
 0x64b   : > { %v8317_v59 = vadd.f32 %v8311_v7, %v8176_v15  ;;  %v8462_v48 = vadd.f32 %v8455_v43, %v8316_v53 }
 0x64c   : > { %v8313_v39 = vpop.f32.mrf.mxu0  ;;  %v8459_v28 = vpop.f32.mrf.mxu1 }
 0x64d   : > { %v8463_v3 = vadd.f32 %v8457_v6, %v8317_v59  ;;  %v9755_v6 = vlaneseq }
 0x64e   : > { %v8314_v16 = vpop.f32.mrf.mxu0  ;;  %v8460_v8 = vpop.f32.mrf.mxu1 }
 0x64f   : > { %v9756_v39 = vshrl.u32 %v9755_v6, 7 }
 0x651   : > { %v16384_v8 = vsub.s32 0, %v9756_v39 }
 0x668   : > { %v8596_v9 = vpop.f32.mrf.mxu0  ;;  %v8742_v47 = vpop.f32.mrf.mxu1 }
 0x669   : > { %v8603_v17 = vadd.f32 %v8596_v9, %v8462_v48  ;;  %v9753_v9 = vld [vmem:[%s567_s23] sm:$0x3] }
 0x66a   : > { %v8598_v10 = vpop.f32.mrf.mxu0  ;;  %v8744_v58 = vpop.f32.mrf.mxu1 }
 0x66b   : > { %v8604_v14 = vadd.f32 %v8598_v10, %v8463_v3  ;;  %v8749_v40 = vadd.f32 %v8742_v47, %v8603_v17  ;;  %v16388_v17 = vsub.s32 1, %v9756_v39 }
 0x66c   : > { %v8600_v20 = vpop.f32.mrf.mxu0  ;;  %v8746_v12 = vpop.f32.mrf.mxu1 }
 0x66d   : > { %v8750_v21 = vadd.f32 %v8744_v58, %v8604_v14  ;;  %v9758_v58 = vrot.slane %v9753_v9, %v16384_v8  ;;  %v9762_v12 = vrot.slane %v9753_v9, %v16388_v17 }
 0x66e   : > { %v8601_v22 = vpop.f32.mrf.mxu0  ;;  %v8747_v1 = vpop.f32.mrf.mxu1 }
 0x688   : > { %v8883_v52 = vpop.f32.mrf.mxu0  ;;  %v9029_v26 = vpop.f32.mrf.mxu1 }
 0x689   : > { %v8890_v60 = vadd.f32 %v8883_v52, %v8749_v40 }
 0x68a   : > { %v8885_v63 = vpop.f32.mrf.mxu0  ;;  %v9031_v49 = vpop.f32.mrf.mxu1 }
 0x68b   : > { %v8891_v62 = vadd.f32 %v8885_v63, %v8750_v21  ;;  %v9036_v25 = vadd.f32 %v9029_v26, %v8890_v60 }
 0x68c   : > { %v8887_v27 = vpop.f32.mrf.mxu0  ;;  %v9033_v34 = vpop.f32.mrf.mxu1 }
 0x68d   : > { %v9037_v23 = vadd.f32 %v9031_v49, %v8891_v62 }
 0x68e   : > { %v8888_v4 = vpop.f32.mrf.mxu0  ;;  %v9034_v42 = vpop.f32.mrf.mxu1 }
 0x6a8   : > { %v9170_v56 = vpop.f32.mrf.mxu0  ;;  %v9316_v35 = vpop.f32.mrf.mxu1 }
 0x6a9   : > { %v9177_v59 = vadd.f32 %v9170_v56, %v9036_v25 }
 0x6aa   : > { %v9172_v5 = vpop.f32.mrf.mxu0  ;;  %v9318_v18 = vpop.f32.mrf.mxu1 }
 0x6ab   : > { %v9178_v48 = vadd.f32 %v9172_v5, %v9037_v23  ;;  %v9323_v28 = vadd.f32 %v9316_v35, %v9177_v59  ;;  %v9767_v59 = vld [vmem:[%s576_s18] sm:$0x3] }
 0x6ac   : > { %v9174_v41 = vpop.f32.mrf.mxu0  ;;  %v9320_v29 = vpop.f32.mrf.mxu1 }
 0x6ad   : > { %v9324_v3 = vadd.f32 %v9318_v18, %v9178_v48  ;;  %v9768_v48 = vld [vmem:[%s585_s2] sm:$0x3] }
 0x6ae   : > { %v9175_v37 = vpop.f32.mrf.mxu0  ;;  %v9321_v44 = vpop.f32.mrf.mxu1  ;;  %v9836_v9 = vrot.slane %v9768_v48, %v16384_v8 }
 0x6c8   : > { %v9457_v46 = vpop.f32.mrf.mxu0  ;;  %v9603_v15 = vpop.f32.mrf.mxu1 }
 0x6c9   : > { %v9464_v16 = vadd.f32 %v9457_v46, %v9323_v28  ;;  %v9823_v28 = vrot.slane %v9767_v59, %v16384_v8 }
 0x6ca   : > { %v9459_v31 = vpop.f32.mrf.mxu0  ;;  %v9605_v0 = vpop.f32.mrf.mxu1 }
 0x6cb   : > { %v9465_v47 = vadd.f32 %v9459_v31, %v9324_v3  ;;  %v9610_v10 = vadd.f32 %v9603_v15, %v9464_v16 }
 0x6cc   : > { %v9461_v50 = vpop.f32.mrf.mxu0  ;;  %v9607_v43 = vpop.f32.mrf.mxu1 }
 0x6cd   : > { %v9611_v40 = vadd.f32 %v9605_v0, %v9465_v47 }
 0x6ce   : > { %v9462_v53 = vpop.f32.mrf.mxu0  ;;  %v9608_v7 = vpop.f32.mrf.mxu1 }
 0x6e8   : > { %v9744_v14 = vpop.f32.mrf.mxu0 }
 0x6e9   : > { %v9751_v20 = vadd.f32 %v9744_v14, %v9610_v10  ;;  %v9827_v10 = vrot.slane %v9767_v59, %v16388_v17 }
 0x6ea   : > { %v9746_v21 = vpop.f32.mrf.mxu0 }
 0x6eb   : > { %v9765_v22 = vadd.f32 %v9758_v58, %v9751_v20  ;;  %v9752_v1 = vadd.f32 %v9746_v21, %v9611_v40  ;;  %v9840_v20 = vrot.slane %v9768_v48, %v16388_v17 }
 0x6ec   : > { %v9748_v55 = vpop.f32.mrf.mxu0 }
 0x6ed   : > { %v9770_v38 = vsel %vm9769_vm2, %v9765_v22, 0.0  ;;  %v9787_v57 = vmul.f32 %v9765_v22, %v9765_v22  ;;  %v9766_v24 = vadd.f32 %v9762_v12, %v9752_v1 }
 0x6ee   : > { %v9771_v52 = vrot.slane %v9770_v38, 4  ;;  %v9749_v26 = vpop.f32.mrf.mxu0 }
 0x6ef   : > { %v9789_v45 = vsel %vm9769_vm2, %v9787_v57, 0.0  ;;  %v9777_v60 = vsel %vm9769_vm2, %v9766_v24, 0.0  ;;  %v9788_v11 = vmul.f32 %v9766_v24, %v9766_v24 }
 0x6f0   : > { %v9772_v63 = vadd.f32 %v9771_v52, %v9770_v38  ;;  %v9790_v49 = vrot.slane %v9789_v45, 4  ;;  %v9778_v62 = vrot.slane %v9777_v60, 4 }
 0x6f1   : > { %v9796_v25 = vsel %vm9769_vm2, %v9788_v11, 0.0 }
 0x6f2   : > { %v9773_v27 = vrot.slane %v9772_v63, 2  ;;  %v9791_v34 = vadd.f32 %v9790_v49, %v9789_v45  ;;  %v9779_v19 = vadd.f32 %v9778_v62, %v9777_v60  ;;  %v9797_v23 = vrot.slane %v9796_v25, 4 }
 0x6f4   : > { %v9774_v30 = vadd.f32 %v9773_v27, %v9772_v63  ;;  %v9792_v4 = vrot.slane %v9791_v34, 2  ;;  %v9780_v42 = vrot.slane %v9779_v19, 2  ;;  %v9798_v51 = vadd.f32 %v9797_v23, %v9796_v25 }
 0x6f6   : > { %v9775_v54 = vrot.slane %v9774_v30, 1  ;;  %v9793_v32 = vadd.f32 %v9792_v4, %v9791_v34  ;;  %v9781_v2 = vadd.f32 %v9780_v42, %v9779_v19  ;;  %v9799_v61 = vrot.slane %v9798_v51, 2 }
 0x6f8   : > { %v9776_v36 = vadd.f32 %v9775_v54, %v9774_v30  ;;  %v9794_v13 = vrot.slane %v9793_v32, 1  ;;  %v9782_v33 = vrot.slane %v9781_v2, 1  ;;  %v9800_v56 = vadd.f32 %v9799_v61, %v9798_v51 }
 0x6fa   : > { %v9785_v35 = vmul.f32 0.25, %v9776_v36  ;;  %v9795_v5 = vadd.f32 %v9794_v13, %v9793_v32  ;;  %v9783_v18 = vadd.f32 %v9782_v33, %v9781_v2  ;;  %v9801_v41 = vrot.slane %v9800_v56, 1 }
 0x6fc   : > { %v9803_v29 = vmul.f32 0.25, %v9795_v5  ;;  %v9805_v37 = vmul.f32 %v9785_v35, %v9785_v35  ;;  %v9786_v44 = vmul.f32 0.25, %v9783_v18  ;;  %v9802_v46 = vadd.f32 %v9801_v41, %v9800_v56 }
 0x6fd   : > { %v9811_v39 = vsub.f32 %v9765_v22, %v9785_v35 }
 0x6fe   : > { %v9807_v15 = vsub.f32 %v9803_v29, %v9805_v37  ;;  %v9806_v31 = vmul.f32 %v9786_v44, %v9786_v44  ;;  %v9804_v0 = vmul.f32 0.25, %v9802_v46  ;;  %v9812_v47 = vsub.f32 %v9766_v24, %v9786_v44  ;;  %v9849_v24 = vld [vmem:[#allocation3] sm:$0xf] }
 0x700   : > { %v9809_v50 = vmax.f32 %v9807_v15, 0.0  ;;  %v9808_v43 = vsub.f32 %v9804_v0, %v9806_v31 }
 0x702   : > { %v9813_v53 = vadd.f32 1e-05, %v9809_v50  ;;  %v9810_v7 = vmax.f32 %v9808_v43, 0.0 }
 0x704   : > { %14034 = vrsqrt.f32 %v9813_v53  ;;  %v9814_v6 = vadd.f32 1e-05, %v9810_v7 }
 0x706   : > { %14036 = vrsqrt.f32 %v9814_v6 }
 0x711   : > { %v14035_v3 = vpop.eup %14034 }
 0x712   : > { %v9817_v16 = vmul.f32 %v14035_v3, %v9811_v39 }
 0x713   : > { %v14037_v58 = vpop.eup %14036 }
 0x714   : > { %v9830_v14 = vmul.f32 %v9823_v28, %v9817_v16  ;;  %v9818_v40 = vmul.f32 %v14037_v58, %v9812_v47 }
 0x716   : > { %v9843_v12 = vadd.f32 %v9836_v9, %v9830_v14  ;;  %v9831_v21 = vmul.f32 %v9827_v10, %v9818_v40 }
 0x718   : > { %v9845_v1 = vmul.f32 0.1, %v9843_v12  ;;  %v9844_v55 = vadd.f32 %v9840_v20, %v9831_v21 }
 0x71a   : > { %v9846_v38 = vmul.f32 0.1, %v9844_v55  ;;  %v9847_v22 = vmax.f32 %v9843_v12, %v9845_v1 }
 0x71c   : > { %v9848_v57 = vmax.f32 %v9844_v55, %v9846_v38  ;;  %v9850_v26 = vpack.c.bf16 %v9847_v22, %v9847_v22 }
 0x71e   : > { %v9851_v52 = vpack.c.bf16 %v9848_v57, %v9848_v57 }
 0x720   : > { %10012 = vmatprep.mubr.bf16.mxu1 %v9851_v52 }
 0x721   : > { %10013 = vmatmul.mubr.bf16.vlgmr.msra.gmra.mxu1 %v9850_v26 }
 0x7e1   : > { %v12597_v8 = vpop.f32.mrf.mxu1 }
 0x7e3   : > { %v12598_v45 = vpop.f32.mrf.mxu1 }
 0x7e4   : > { %v12599_v60 = vadd.f32 %v12598_v45, %v12597_v8  ;;  %10026 = sbr.rel (%p12097_p13) target bundleno = 2082 (0x822), region = 124 }
 0x7e5   : > { %v12600_v11 = vpop.f32.mrf.mxu1 }
 0x7e6   : > { %v10020_v63 = vadd.f32 %v12599_v60, %v9849_v24 }
 0x7e7   : > { %v12601_v49 = vpop.f32.mrf.mxu1 }
 0x7e8   : > { %10022 = vst.msk [vmem:[#allocation3] sm:$0xf] %vm10021_vm3, %v10020_v63 }
 0x7e9   : > { %v12098_v62 = vld [vmem:[#allocation16] ss:$0 sm:$0xff]  ;;  %v12099_v46 = vld [vmem:[#allocation17] ss:$0 sm:$0xff]  ;;  %v12100_v31 = vld [vmem:[#allocation18] ss:$0 sm:$0xff] }
 0x7ef   : > { %v10027_v17 = vld [vmem:[#allocation3] sm:$0xf] }
 0x7f0   : > { %v10035_v25 = vadd.f32 %v12098_v62, %v10027_v17 }
 0x7f2   : > { %v10038_v27 = vsel %vm10021_vm3, %v10035_v25, 0.0  ;;  %v10046_v34 = vmul.f32 %v10035_v25, %v10035_v25 }
 0x7f3   : > { %v10039_v19 = vrot.slane %v10038_v27, 4 }
 0x7f4   : > { %v10047_v23 = vsel %vm10021_vm3, %v10046_v34, 0.0 }
 0x7f5   : > { %v10040_v30 = vadd.f32 %v10039_v19, %v10038_v27  ;;  %v10048_v4 = vrot.slane %v10047_v23, 4 }
 0x7f7   : > { %v10041_v42 = vrot.slane %v10040_v30, 2  ;;  %v10049_v51 = vadd.f32 %v10048_v4, %v10047_v23 }
 0x7f9   : > { %v10042_v54 = vadd.f32 %v10041_v42, %v10040_v30  ;;  %v10050_v32 = vrot.slane %v10049_v51, 2 }
 0x7fb   : > { %v10043_v2 = vrot.slane %v10042_v54, 1  ;;  %v10051_v61 = vadd.f32 %v10050_v32, %v10049_v51 }
 0x7fd   : > { %v10044_v36 = vadd.f32 %v10043_v2, %v10042_v54  ;;  %v10052_v13 = vrot.slane %v10051_v61, 1 }
 0x7ff   : > { %v10045_v33 = vmul.f32 0.25, %v10044_v36  ;;  %v10053_v56 = vadd.f32 %v10052_v13, %v10051_v61 }
 0x801   : > { %v10054_v35 = vmul.f32 0.25, %v10053_v56  ;;  %v10055_v5 = vmul.f32 %v10045_v33, %v10045_v33  ;;  %v10058_v37 = vsub.f32 %v10035_v25, %v10045_v33 }
 0x803   : > { %v10056_v18 = vsub.f32 %v10054_v35, %v10055_v5 }
 0x805   : > { %v10057_v41 = vmax.f32 %v10056_v18, 0.0 }
 0x807   : > { %v10059_v29 = vadd.f32 1e-05, %v10057_v41 }
 0x809   : > { %14038 = vrsqrt.f32 %v10059_v29 }
 0x816   : > { %v14039_v44 = vpop.eup %14038 }
 0x817   : > { %v10061_v15 = vmul.f32 %v14039_v44, %v10058_v37 }
 0x819   : > { %v10068_v0 = vmul.f32 %v12099_v46, %v10061_v15 }
 0x81b   : > { %v10075_v50 = vadd.f32 %v12100_v31, %v10068_v0 }
 0x81d   : > { %v10076_v43 = vmul.f32 0.1, %v10075_v50 }
 0x81f   : > { %v10077_v53 = vmax.f32 %v10075_v50, %v10076_v43 }
 0x821   : > { %10078 = vst.msk [vmem:[#allocation20] sm:$0xf] %vm10021_vm3, %v10077_v53 }
 0x822 PF: > { %p12695_p3 = scmp.eq.s32.totalorder %s14532_s14, 3  ;;  %s14440_s3 = smov [#allocation20]  }
 0x823   : > { %s10086_s29 = sshll.u32 %s14440_s3, 4  ;;  %s10087_s29 = int_to_ptr.vmem [resolvable:$true] %s10086_s29 }
 0x824   : > { %s14334_s23 = scalar_lea.vmem %s10087_s29, 64  ;;  %p14341_p12 = scmp.lt.s32.totalorder %s10087_s29, %s10087_s29 }
 0x825   : > { %p14335_p11 = scmp.ne.s32.totalorder %s10087_s29, %s14334_s23  ;;  %p14342_p0 = scmp.lt.s32.totalorder %s14334_s23, %s14334_s23 }
 0x827   : > { %p14336_p9 = pnand %p14335_p11, %p12695_p3  ;;  %p14343_p5 = por %p14342_p0, %p14341_p12 }
 0x829   : > { %p14337_p1 = pneg %p14336_p9 }
 0x82b   : > { %p14344_p4 = pnand %p14343_p5, %p14337_p1 }
 0x82d   : > { %14347 = shalt.err (!%p14344_p4)
}
 0x82e   : > { %s16516_s24 = sld [smem:[#allocation38_spill]] }
 0x834   : > { %12642 = dma.vmem_to_hbm [thread:$0]  (%p12695_p3), %s10087_s29, 64, %s16516_s24, [#allocation6]  }
 0x835   : > { %14403 = dma.done.wait (%p12695_p3), [#allocation6], 64  }
 0x836   : > { %14405 = vsyncadd (%p12695_p3), [#allocation6], 4294967232 }
 0x837 PF: > { %s16517_s28 = sld [smem:[#allocation29_spill]]  ;;  %s16519_s25 = smov %s14412_s26 }
 0x838   : > { %s16518_s1 = sld [smem:[#allocation30_spill]]  ;;  %s16520_s26 = smov %s14416_s27 }
 0x83d   : > { %p25_p6 = scmp.ge.s32.totalorder %s16517_s28, 6  }
 0x83e   : > { %s16521_s27 = smov %s16518_s1 }
 0x83f   :  { %27 = sbr.rel (!%p25_p6) target bundleno = 14 (0xe), region = 228 }
 0x844   :  { %10099 = vsyncpa [#allocation5], 1 }
 0x845   :  { %10101 = vsyncpa [#allocation5 + $0x1], 1 }
 0x846   :  { %10102 = vsyncpa [#allocation8], 1 }
 0x847   :  { %10103 = vsyncpa [#allocation11], 1 }
 0x848   :  { %10104 = vsyncpa [#allocation19], 1 }
 0x849   :  { %10105 = vsyncpa [#allocation6], 1 }
 0x84a   :  { %10107 = vsyncpa [#allocation6 + $0x1], 1 }

</bundles_post_ra>
